<compile_context>
chip_gen: v5e
topology: v5e:2x2
jax: 0.10.0
libtpu: 0.0.40
codegen_flags: <defaults>
</compile_context>

<pallas_src>
import numpy as np
import jax
import jax.numpy as jnp
from jax import lax
from jax.experimental import pallas as pl
from jax.experimental.pallas import tpu as pltpu

# Lane-dense (multiple-of-128) padded feature sizes used inside the kernel.
DIN_P = 896     # 784  = 1*28*28 flattened input  -> 7*128
NP1   = 640     # 576  = 4*12*12 conv1 pooled     -> 5*128
NP2   = 256     # 160  = 10*4*4  conv2 pooled     -> 2*128
NP3   = 128     # 100  fc1 hidden                 -> 128
NCLS_P = 128    # 10   classes                    -> 128
NEG_INF = -1e30


def net_fused_kernel(x_ref, m1_ref, b1_ref, m2_ref, b2_ref,
                     wf1_ref, bf1_ref, wf2_ref, bf2_ref, o_ref):
    x = x_ref[...]                                                     # [TB, 896]

    # conv1 as one wide matmul (4 pooling offsets side by side) -> pool -> +b -> relu
    z1 = jnp.dot(x, m1_ref[...], preferred_element_type=jnp.float32)  # [TB, 4*NP1]
    zmax1 = jnp.maximum(jnp.maximum(z1[:, 0 * NP1:1 * NP1], z1[:, 1 * NP1:2 * NP1]),
                        jnp.maximum(z1[:, 2 * NP1:3 * NP1], z1[:, 3 * NP1:4 * NP1]))
    p1 = jnp.maximum(zmax1 + b1_ref[...], 0.0)                         # [TB, NP1]

    # conv2 -> pool -> +b -> relu
    z2 = jnp.dot(p1, m2_ref[...], preferred_element_type=jnp.float32)  # [TB, 4*NP2]
    zmax2 = jnp.maximum(jnp.maximum(z2[:, 0 * NP2:1 * NP2], z2[:, 1 * NP2:2 * NP2]),
                        jnp.maximum(z2[:, 2 * NP2:3 * NP2], z2[:, 3 * NP2:4 * NP2]))
    p2 = jnp.maximum(zmax2 + b2_ref[...], 0.0)                         # [TB, NP2]

    # fc1 + relu
    h = jnp.dot(p2, wf1_ref[...], preferred_element_type=jnp.float32) + bf1_ref[...]
    h = jnp.maximum(h, 0.0)                                            # [TB, NP3]

    # fc2 (padded class columns carry a -1e30 bias) + log_softmax
    logits = jnp.dot(h, wf2_ref[...], preferred_element_type=jnp.float32) + bf2_ref[...]
    m = jnp.max(logits, axis=-1, keepdims=True)
    s = logits - m
    lse = jnp.log(jnp.sum(jnp.exp(s), axis=-1, keepdims=True))
    o_ref[...] = (s - lse).astype(o_ref.dtype)                         # [TB, 128]


def _conv_pool_matrix(w, in_ch, in_hw):
    """Dense matrices for a VALID 5x5 conv feeding a 2x2/2 max-pool.

    Returns [in_ch*in_hw*in_hw, 4, out_ch*oh*oh] (f32) where slab k holds the
    conv outputs at pooling-window position k; max over k == maxpool(conv(x)).
    Row order (ic, h, w), column order (oc, i2, j2) — PyTorch NCHW flatten.
    """
    w = np.asarray(w, np.float32)
    out_ch = w.shape[0]
    conv_hw = in_hw - 4
    oh = conv_hw // 2
    ncols = out_ch * oh * oh
    m = np.zeros((in_ch, in_hw, in_hw, 4, ncols), np.float32)
    for di in range(2):
        for dj in range(2):
            k = di * 2 + dj
            for oc in range(out_ch):
                for i2 in range(oh):
                    for j2 in range(oh):
                        col = (oc * oh + i2) * oh + j2
                        oi, oj = 2 * i2 + di, 2 * j2 + dj
                        for ic in range(in_ch):
                            m[ic, oi:oi + 5, oj:oj + 5, k, col] = w[oc, ic]
    return jnp.asarray(m.reshape(in_ch * in_hw * in_hw, 4, ncols))


def pack_params(w1, b1, w2, b2, wf1, bf1, wf2, bf2):
    """Build the lane-dense, zero-padded dense operands consumed by the kernel."""
    slabs1 = _conv_pool_matrix(w1, 1, 28)            # [784, 4, 576]
    m1 = jnp.zeros((DIN_P, 4 * NP1), jnp.float32)
    for k in range(4):
        m1 = m1.at[:784, k * NP1:k * NP1 + 576].set(slabs1[:, k, :])
    b1v = jnp.zeros((1, NP1), jnp.float32).at[0, :576].set(jnp.repeat(b1, 12 * 12))

    slabs2 = _conv_pool_matrix(w2, 4, 12)            # [576, 4, 160]
    m2 = jnp.zeros((NP1, 4 * NP2), jnp.float32)
    for k in range(4):
        m2 = m2.at[:576, k * NP2:k * NP2 + 160].set(slabs2[:, k, :])
    b2v = jnp.zeros((1, NP2), jnp.float32).at[0, :160].set(jnp.repeat(b2, 4 * 4))

    wf1p = jnp.zeros((NP2, NP3), jnp.float32).at[:160, :100].set(wf1)
    bf1p = jnp.zeros((1, NP3), jnp.float32).at[0, :100].set(bf1)
    wf2p = jnp.zeros((NP3, NCLS_P), jnp.float32).at[:100, :10].set(wf2)
    bf2p = jnp.full((1, NCLS_P), NEG_INF, jnp.float32).at[0, :10].set(bf2)
    return (m1, b1v, m2, b2v, wf1p, bf1p, wf2p, bf2p)


def net_forward(x, packed, *, block_b=128):
    """Full fused forward pass. x: [B, 1, 28, 28] -> log-probs [B, 10]."""
    m1, b1v, m2, b2v, wf1p, bf1p, wf2p, bf2p = packed
    B = x.shape[0]
    xf = x.reshape(B, -1).astype(jnp.float32)                    # [B, 784]

    # Batch tile: multiple of 8 sublanes; pad tiny batches instead of M=2 matmuls.
    tb = min(block_b, max(8, ((B + 7) // 8) * 8))
    bp = ((B + tb - 1) // tb) * tb
    xp = jnp.zeros((bp, DIN_P), jnp.float32).at[:B, :xf.shape[1]].set(xf)

    out = pl.pallas_call(
        net_fused_kernel,
        out_shape=jax.ShapeDtypeStruct((bp, NCLS_P), jnp.float32),
        grid_spec=pl.GridSpec(
            grid=(bp // tb,),
            in_specs=[
                pl.BlockSpec((tb, DIN_P), lambda i: (i, 0)),       # x tile (pipelined)
                pl.BlockSpec((DIN_P, 4 * NP1), lambda i: (0, 0)),  # conv1 matrix (resident)
                pl.BlockSpec((1, NP1), lambda i: (0, 0)),
                pl.BlockSpec((NP1, 4 * NP2), lambda i: (0, 0)),    # conv2 matrix (resident)
                pl.BlockSpec((1, NP2), lambda i: (0, 0)),
                pl.BlockSpec((NP2, NP3), lambda i: (0, 0)),        # fc1
                pl.BlockSpec((1, NP3), lambda i: (0, 0)),
                pl.BlockSpec((NP3, NCLS_P), lambda i: (0, 0)),     # fc2
                pl.BlockSpec((1, NCLS_P), lambda i: (0, 0)),
            ],
            out_specs=pl.BlockSpec((tb, NCLS_P), lambda i: (i, 0)),
        ),
        compiler_params=pltpu.CompilerParams(
            dimension_semantics=("parallel",),
            vmem_limit_bytes=48 * 1024 * 1024,
        ),
    )(xp, m1, b1v, m2, b2v, wf1p, bf1p, wf2p, bf2p)
    return out[:B, :10]


def net_reference(x, w1, b1, w2, b2, wf1, bf1, wf2, bf2):
    """Plain-JAX reference of the PyTorch forward (f32-accurate)."""
    hi = lax.Precision.HIGHEST
    y = lax.conv_general_dilated(x, w1, (1, 1), "VALID",
                                 dimension_numbers=("NCHW", "OIHW", "NCHW"),
                                 precision=hi)
    y = jnp.maximum(y + b1[None, :, None, None], 0.0)
    y = lax.reduce_window(y, -jnp.inf, lax.max, (1, 1, 2, 2), (1, 1, 2, 2), "VALID")
    y = lax.conv_general_dilated(y, w2, (1, 1), "VALID",
                                 dimension_numbers=("NCHW", "OIHW", "NCHW"),
                                 precision=hi)
    y = jnp.maximum(y + b2[None, :, None, None], 0.0)
    y = lax.reduce_window(y, -jnp.inf, lax.max, (1, 1, 2, 2), (1, 1, 2, 2), "VALID")
    y = y.reshape(x.shape[0], -1)                                  # [B, 160] (c,h,w)
    y = jnp.maximum(jnp.dot(y, wf1, precision=hi) + bf1, 0.0)
    y = jnp.dot(y, wf2, precision=hi) + bf2
    return jax.nn.log_softmax(y, axis=-1)


if __name__ == "__main__":
    key = jax.random.PRNGKey(0)
    ks = jax.random.split(key, 9)
    B = 2
    x = jax.random.normal(ks[0], (B, 1, 28, 28), dtype=jnp.float32)

    def uinit(k, shape, fan_in):
        bound = 1.0 / np.sqrt(float(fan_in))
        return jax.random.uniform(k, shape, minval=-bound, maxval=bound,
                                  dtype=jnp.float32)

    # nn.Conv2d / nn.Linear style init (weights stored as [in, out] for the FCs).
    w1 = uinit(ks[1], (4, 1, 5, 5), 1 * 5 * 5)
    b1 = uinit(ks[2], (4,), 1 * 5 * 5)
    w2 = uinit(ks[3], (10, 4, 5, 5), 4 * 5 * 5)
    b2 = uinit(ks[4], (10,), 4 * 5 * 5)
    wf1 = uinit(ks[5], (160, 100), 160)
    bf1 = uinit(ks[6], (100,), 160)
    wf2 = uinit(ks[7], (100, 10), 100)
    bf2 = uinit(ks[8], (10,), 100)

    packed = pack_params(w1, b1, w2, b2, wf1, bf1, wf2, bf2)
    out = net_forward(x, packed)
    jax.block_until_ready(out)

    ref = net_reference(x, w1, b1, w2, b2, wf1, bf1, wf2, bf2)
    assert out.shape == (B, 10)
    assert bool(jnp.allclose(out, ref, atol=1e-3, rtol=1e-3)), (
        "max abs err = %g" % float(jnp.max(jnp.abs(out - ref))))

    print("KERNEL_OK")
</pallas_src>

<mosaic_0001>
module attributes {stable_mosaic.version = 11 : i64} {
  func.func @net_fused_kernel(%arg0: i32, %arg1: memref<8x896xf32, #tpu.memory_space<vmem>>, %arg2: memref<896x2560xf32, #tpu.memory_space<vmem>>, %arg3: memref<1x640xf32, #tpu.memory_space<vmem>>, %arg4: memref<640x1024xf32, #tpu.memory_space<vmem>>, %arg5: memref<1x256xf32, #tpu.memory_space<vmem>>, %arg6: memref<256x128xf32, #tpu.memory_space<vmem>>, %arg7: memref<1x128xf32, #tpu.memory_space<vmem>>, %arg8: memref<128x128xf32, #tpu.memory_space<vmem>>, %arg9: memref<1x128xf32, #tpu.memory_space<vmem>>, %arg10: memref<8x128xf32, #tpu.memory_space<vmem>>) attributes {dimension_semantics = [#tpu.dimension_semantics<parallel>], iteration_bounds = array<i64: 1>, scalar_prefetch = 0 : i64, scratch_operands = 0 : i64, tpu.core_type = #tpu.core_type<tc>, window_params = [{transform_indices = @transform_0, window_bounds = array<i64: 8, 896>}, {pipeline_mode = #tpu.pipeline_mode<synchronous>, transform_indices = @transform_1, window_bounds = array<i64: 896, 2560>}, {pipeline_mode = #tpu.pipeline_mode<synchronous>, transform_indices = @transform_2, window_bounds = array<i64: 1, 640>}, {pipeline_mode = #tpu.pipeline_mode<synchronous>, transform_indices = @transform_3, window_bounds = array<i64: 640, 1024>}, {pipeline_mode = #tpu.pipeline_mode<synchronous>, transform_indices = @transform_4, window_bounds = array<i64: 1, 256>}, {pipeline_mode = #tpu.pipeline_mode<synchronous>, transform_indices = @transform_5, window_bounds = array<i64: 256, 128>}, {pipeline_mode = #tpu.pipeline_mode<synchronous>, transform_indices = @transform_6, window_bounds = array<i64: 1, 128>}, {pipeline_mode = #tpu.pipeline_mode<synchronous>, transform_indices = @transform_7, window_bounds = array<i64: 128, 128>}, {pipeline_mode = #tpu.pipeline_mode<synchronous>, transform_indices = @transform_8, window_bounds = array<i64: 1, 128>}, {transform_indices = @transform_9, window_bounds = array<i64: 8, 128>}]} {
    %c0 = arith.constant 0 : index
    %c0_0 = arith.constant 0 : index
    %0 = vector.load %arg1[%c0, %c0_0] : memref<8x896xf32, #tpu.memory_space<vmem>>, vector<8x896xf32>
    %c0_1 = arith.constant 0 : index
    %c0_2 = arith.constant 0 : index
    %1 = vector.load %arg2[%c0_1, %c0_2] : memref<896x2560xf32, #tpu.memory_space<vmem>>, vector<896x2560xf32>
    %cst = arith.constant dense<0.000000e+00> : vector<8x2560xf32>
    %2 = tpu.matmul %0, %1, %cst {dimension_numbers = #tpu.dot_dimension_numbers<[1], [0], [0], [1], [0, 0, 1, 1], [], []>} : vector<8x896xf32>, vector<896x2560xf32>, vector<8x2560xf32> -> vector<8x2560xf32>
    %3 = vector.extract_strided_slice %2 {offsets = [0, 0], sizes = [8, 640], strides = [1, 1]} : vector<8x2560xf32> to vector<8x640xf32>
    %4 = vector.extract_strided_slice %2 {offsets = [0, 640], sizes = [8, 640], strides = [1, 1]} : vector<8x2560xf32> to vector<8x640xf32>
    %5 = arith.maximumf %3, %4 : vector<8x640xf32>
    %6 = vector.extract_strided_slice %2 {offsets = [0, 1280], sizes = [8, 640], strides = [1, 1]} : vector<8x2560xf32> to vector<8x640xf32>
    %7 = vector.extract_strided_slice %2 {offsets = [0, 1920], sizes = [8, 640], strides = [1, 1]} : vector<8x2560xf32> to vector<8x640xf32>
    %8 = arith.maximumf %6, %7 : vector<8x640xf32>
    %9 = arith.maximumf %5, %8 : vector<8x640xf32>
    %c0_3 = arith.constant 0 : index
    %c0_4 = arith.constant 0 : index
    %10 = vector.load %arg3[%c0_3, %c0_4] : memref<1x640xf32, #tpu.memory_space<vmem>>, vector<1x640xf32>
    %11 = vector.broadcast %10 : vector<1x640xf32> to vector<8x640xf32>
    %12 = arith.addf %9, %11 : vector<8x640xf32>
    %cst_5 = arith.constant 0.000000e+00 : f32
    %13 = vector.broadcast %cst_5 : f32 to vector<8x640xf32>
    %14 = arith.maximumf %12, %13 : vector<8x640xf32>
    %c0_6 = arith.constant 0 : index
    %c0_7 = arith.constant 0 : index
    %15 = vector.load %arg4[%c0_6, %c0_7] : memref<640x1024xf32, #tpu.memory_space<vmem>>, vector<640x1024xf32>
    %cst_8 = arith.constant dense<0.000000e+00> : vector<8x1024xf32>
    %16 = tpu.matmul %14, %15, %cst_8 {dimension_numbers = #tpu.dot_dimension_numbers<[1], [0], [0], [1], [0, 0, 1, 1], [], []>} : vector<8x640xf32>, vector<640x1024xf32>, vector<8x1024xf32> -> vector<8x1024xf32>
    %17 = vector.extract_strided_slice %16 {offsets = [0, 0], sizes = [8, 256], strides = [1, 1]} : vector<8x1024xf32> to vector<8x256xf32>
    %18 = vector.extract_strided_slice %16 {offsets = [0, 256], sizes = [8, 256], strides = [1, 1]} : vector<8x1024xf32> to vector<8x256xf32>
    %19 = arith.maximumf %17, %18 : vector<8x256xf32>
    %20 = vector.extract_strided_slice %16 {offsets = [0, 512], sizes = [8, 256], strides = [1, 1]} : vector<8x1024xf32> to vector<8x256xf32>
    %21 = vector.extract_strided_slice %16 {offsets = [0, 768], sizes = [8, 256], strides = [1, 1]} : vector<8x1024xf32> to vector<8x256xf32>
    %22 = arith.maximumf %20, %21 : vector<8x256xf32>
    %23 = arith.maximumf %19, %22 : vector<8x256xf32>
    %c0_9 = arith.constant 0 : index
    %c0_10 = arith.constant 0 : index
    %24 = vector.load %arg5[%c0_9, %c0_10] : memref<1x256xf32, #tpu.memory_space<vmem>>, vector<1x256xf32>
    %25 = vector.broadcast %24 : vector<1x256xf32> to vector<8x256xf32>
    %26 = arith.addf %23, %25 : vector<8x256xf32>
    %cst_11 = arith.constant 0.000000e+00 : f32
    %27 = vector.broadcast %cst_11 : f32 to vector<8x256xf32>
    %28 = arith.maximumf %26, %27 : vector<8x256xf32>
    %c0_12 = arith.constant 0 : index
    %c0_13 = arith.constant 0 : index
    %29 = vector.load %arg6[%c0_12, %c0_13] : memref<256x128xf32, #tpu.memory_space<vmem>>, vector<256x128xf32>
    %cst_14 = arith.constant dense<0.000000e+00> : vector<8x128xf32>
    %30 = tpu.matmul %28, %29, %cst_14 {dimension_numbers = #tpu.dot_dimension_numbers<[1], [0], [0], [1], [0, 0, 1, 1], [], []>} : vector<8x256xf32>, vector<256x128xf32>, vector<8x128xf32> -> vector<8x128xf32>
    %c0_15 = arith.constant 0 : index
    %c0_16 = arith.constant 0 : index
    %31 = vector.load %arg7[%c0_15, %c0_16] : memref<1x128xf32, #tpu.memory_space<vmem>>, vector<1x128xf32>
    %32 = vector.broadcast %31 : vector<1x128xf32> to vector<8x128xf32>
    %33 = arith.addf %30, %32 : vector<8x128xf32>
    %cst_17 = arith.constant 0.000000e+00 : f32
    %34 = vector.broadcast %cst_17 : f32 to vector<8x128xf32>
    %35 = arith.maximumf %33, %34 : vector<8x128xf32>
    %c0_18 = arith.constant 0 : index
    %c0_19 = arith.constant 0 : index
    %36 = vector.load %arg8[%c0_18, %c0_19] : memref<128x128xf32, #tpu.memory_space<vmem>>, vector<128x128xf32>
    %cst_20 = arith.constant dense<0.000000e+00> : vector<8x128xf32>
    %37 = tpu.matmul %35, %36, %cst_20 {dimension_numbers = #tpu.dot_dimension_numbers<[1], [0], [0], [1], [0, 0, 1, 1], [], []>} : vector<8x128xf32>, vector<128x128xf32>, vector<8x128xf32> -> vector<8x128xf32>
    %c0_21 = arith.constant 0 : index
    %c0_22 = arith.constant 0 : index
    %38 = vector.load %arg9[%c0_21, %c0_22] : memref<1x128xf32, #tpu.memory_space<vmem>>, vector<1x128xf32>
    %39 = vector.broadcast %38 : vector<1x128xf32> to vector<8x128xf32>
    %40 = arith.addf %37, %39 : vector<8x128xf32>
    %cst_23 = arith.constant dense<0xFF800000> : vector<8xf32>
    %41 = vector.multi_reduction <maximumf>, %40, %cst_23 [1] : vector<8x128xf32> to vector<8xf32>
    %42 = vector.shape_cast %41 : vector<8xf32> to vector<8x1xf32>
    %43 = vector.broadcast %42 : vector<8x1xf32> to vector<8x128xf32>
    %44 = arith.subf %40, %43 : vector<8x128xf32>
    %45 = math.exp %44 : vector<8x128xf32>
    %cst_24 = arith.constant dense<0.000000e+00> : vector<8xf32>
    %46 = vector.multi_reduction <add>, %45, %cst_24 [1] : vector<8x128xf32> to vector<8xf32>
    %47 = vector.shape_cast %46 : vector<8xf32> to vector<8x1xf32>
    %48 = math.log %47 : vector<8x1xf32>
    %49 = vector.broadcast %48 : vector<8x1xf32> to vector<8x128xf32>
    %50 = arith.subf %44, %49 : vector<8x128xf32>
    %c0_25 = arith.constant 0 : index
    %c0_26 = arith.constant 0 : index
    %51 = vector.load %arg10[%c0_25, %c0_26] : memref<8x128xf32, #tpu.memory_space<vmem>>, vector<8x128xf32>
    tpu.vector_store %arg10[%c0_25, %c0_26], %50 {strides = array<i32>} : memref<8x128xf32, #tpu.memory_space<vmem>>, vector<8x128xf32>,
    return
  }
  func.func @transform_0(%arg0: i32) -> (i32, i32) {
    %c0_i32 = arith.constant 0 : i32
    %c0_i32_0 = arith.constant 0 : i32
    return %arg0, %c0_i32 : i32, i32
  }
  func.func @transform_1(%arg0: i32) -> (i32, i32) {
    %c0_i32 = arith.constant 0 : i32
    %c0_i32_0 = arith.constant 0 : i32
    %c0_i32_1 = arith.constant 0 : i32
    return %c0_i32, %c0_i32_0 : i32, i32
  }
  func.func @transform_2(%arg0: i32) -> (i32, i32) {
    %c0_i32 = arith.constant 0 : i32
    %c0_i32_0 = arith.constant 0 : i32
    %c0_i32_1 = arith.constant 0 : i32
    return %c0_i32, %c0_i32_0 : i32, i32
  }
  func.func @transform_3(%arg0: i32) -> (i32, i32) {
    %c0_i32 = arith.constant 0 : i32
    %c0_i32_0 = arith.constant 0 : i32
    %c0_i32_1 = arith.constant 0 : i32
    return %c0_i32, %c0_i32_0 : i32, i32
  }
  func.func @transform_4(%arg0: i32) -> (i32, i32) {
    %c0_i32 = arith.constant 0 : i32
    %c0_i32_0 = arith.constant 0 : i32
    %c0_i32_1 = arith.constant 0 : i32
    return %c0_i32, %c0_i32_0 : i32, i32
  }
  func.func @transform_5(%arg0: i32) -> (i32, i32) {
    %c0_i32 = arith.constant 0 : i32
    %c0_i32_0 = arith.constant 0 : i32
    %c0_i32_1 = arith.constant 0 : i32
    return %c0_i32, %c0_i32_0 : i32, i32
  }
  func.func @transform_6(%arg0: i32) -> (i32, i32) {
    %c0_i32 = arith.constant 0 : i32
    %c0_i32_0 = arith.constant 0 : i32
    %c0_i32_1 = arith.constant 0 : i32
    return %c0_i32, %c0_i32_0 : i32, i32
  }
  func.func @transform_7(%arg0: i32) -> (i32, i32) {
    %c0_i32 = arith.constant 0 : i32
    %c0_i32_0 = arith.constant 0 : i32
    %c0_i32_1 = arith.constant 0 : i32
    return %c0_i32, %c0_i32_0 : i32, i32
  }
  func.func @transform_8(%arg0: i32) -> (i32, i32) {
    %c0_i32 = arith.constant 0 : i32
    %c0_i32_0 = arith.constant 0 : i32
    %c0_i32_1 = arith.constant 0 : i32
    return %c0_i32, %c0_i32_0 : i32, i32
  }
  func.func @transform_9(%arg0: i32) -> (i32, i32) {
    %c0_i32 = arith.constant 0 : i32
    %c0_i32_0 = arith.constant 0 : i32
    return %arg0, %c0_i32 : i32, i32
  }
}

</mosaic_0001>

<bundles_post_ra>
// kernel: tpu_custom_call.1
= control target key start
LH: loop header
LB: loop body
LE: loop exit
PB: predicated region body
PF: predicated region fallthrough
CT: control target
= control target key end

     0   :  { %14 = vsyncpa [#allocation3], 0  ;;  %s7895_s0 = inlined_call_operand.hbm [shape: f32[8,896], index: 0, kind: input, shape index: {}]   ;;  %s7896_s1 = inlined_call_operand.hbm [shape: f32[896,2560], index: 1, kind: input, shape index: {}]   ;;  %s7897_s2 = inlined_call_operand.hbm [shape: f32[1,640], index: 2, kind: input, shape index: {}]   ;;  %s7898_s3 = inlined_call_operand.hbm [shape: f32[640,1024], index: 3, kind: input, shape index: {}]   ;;  %s7899_s4 = inlined_call_operand.hbm [shape: f32[1,256], index: 4, kind: input, shape index: {}]   ;;  %s7900_s5 = inlined_call_operand.hbm [shape: f32[256,128], index: 5, kind: input, shape index: {}]   ;;  %s7901_s6 = inlined_call_operand.hbm [shape: f32[1,128], index: 6, kind: input, shape index: {}]   ;;  %s7902_s7 = inlined_call_operand.hbm [shape: f32[128,128], index: 7, kind: input, shape index: {}]   ;;  %s7903_s8 = inlined_call_operand.hbm [shape: f32[1,128], index: 8, kind: input, shape index: {}]   ;;  %s7904_s9 = inlined_call_operand.hbm [shape: f32[8,128], index: 9, kind: output, shape index: {}]  }
   0x1   :  { %15 = vsyncpa [#allocation6], 0 }
   0x2   :  { %16 = vsyncpa [#allocation9], 0 }
   0x3   :  { %17 = vsyncpa [#allocation12], 0 }
   0x4   :  { %18 = vsyncpa [#allocation15], 0  ;;  %s35_s11 = sshll.u32 %s7896_s1, 4  ;;  %s36_s11 = int_to_ptr.hbm [resolvable:$true] %s35_s11 }
   0x5   :  { %19 = vsyncpa [#allocation4], 0  ;;  %s7173_s12 = smov [#allocation5]   ;;  %s59_s16 = sshll.u32 %s7898_s3, 4  ;;  %s60_s16 = int_to_ptr.hbm [resolvable:$true] %s59_s16 }
   0x6   :  { %s37_s13 = sshll.u32 %s7173_s12, 4  ;;  %s7174_s17 = smov 2560   ;;  %s38_s13 = int_to_ptr.vmem [resolvable:$true] %s37_s13 }
   0x7   :  { %s7175_s18 = smov 160   ;;  %s7176_s19 = smov [#allocation8]  }
   0x8   :  { %43 = dma.hbm_to_vmem [thread:$0]  %s36_s11, 286720, %s38_s13, [#allocation6], %s7174_s17, %s7174_s17, %s7175_s18  }
   0x9   :  { %s61_s20 = sshll.u32 %s7176_s19, 4  ;;  %s7177_s21 = smov 1024   ;;  %s62_s20 = int_to_ptr.vmem [resolvable:$true] %s61_s20 }
   0xa   :  { %s7178_s22 = smov 64   ;;  %s83_s24 = sshll.u32 %s7900_s5, 4  ;;  %s84_s24 = int_to_ptr.hbm [resolvable:$true] %s83_s24 }
   0xb   :  { %67 = dma.hbm_to_vmem [thread:$0]  %s60_s16, 81920, %s62_s20, [#allocation9], %s7177_s21, %s7177_s21, %s7178_s22  }
   0xc   :  { %s7179_s25 = smov [#allocation11]   ;;  %s107_s28 = sshll.u32 %s7902_s7, 4  ;;  %s108_s28 = int_to_ptr.hbm [resolvable:$true] %s107_s28 }
   0xd   :  { %s85_s26 = sshll.u32 %s7179_s25, 4  ;;  %s7180_s29 = smov 128   ;;  %s86_s26 = int_to_ptr.vmem [resolvable:$true] %s85_s26 }
   0xe   :  { %s7181_s30 = smov 8   ;;  %s7182_s10 = smov [#allocation14]  }
   0xf   :  { %91 = dma.hbm_to_vmem [thread:$0]  %s84_s24, 4096, %s86_s26, [#allocation12], %s7180_s29, %s7180_s29, %s7181_s30  }
  0x10   :  { %s109_s11 = sshll.u32 %s7182_s10, 4  ;;  %s25_s14 = sshll.u32 %s7895_s0, 4  ;;  %s110_s11 = int_to_ptr.vmem [resolvable:$true] %s109_s11  ;;  %s26_s14 = int_to_ptr.hbm [resolvable:$true] %s25_s14 }
  0x11   :  { %115 = dma.hbm_to_vmem [thread:$0]  %s108_s28, 2048, %s110_s11, [#allocation15], %s7180_s29, %s7180_s29, %s7181_s30  }
  0x12   :  { %s49_s16 = sshll.u32 %s7897_s2, 4  ;;  %s7183_s17 = smov [#allocation2]   ;;  %s50_s16 = int_to_ptr.hbm [resolvable:$true] %s49_s16 }
  0x13   :  { %s27_s18 = sshll.u32 %s7183_s17, 4  ;;  %s7184_s7 = smov [#allocation7]   ;;  %s28_s18 = int_to_ptr.vmem [resolvable:$true] %s27_s18 }
  0x14   :  { %30 = dma.hbm_to_vmem [thread:$0]  %s26_s14, 896, %s28_s18, [#allocation3]  }
  0x15   :  { %s51_s19 = sshll.u32 %s7184_s7, 4  ;;  %s73_s22 = sshll.u32 %s7899_s4, 4  ;;  %s52_s19 = int_to_ptr.vmem [resolvable:$true] %s51_s19  ;;  %s74_s22 = int_to_ptr.hbm [resolvable:$true] %s73_s22 }
  0x16   :  { %54 = dma.hbm_to_vmem [thread:$0]  %s50_s16, 80, %s52_s19, [#allocation6]  }
  0x17   :  { %s97_s23 = sshll.u32 %s7901_s6, 4  ;;  %s7185_s24 = smov [#allocation10]   ;;  %s98_s23 = int_to_ptr.hbm [resolvable:$true] %s97_s23 }
  0x18   :  { %s75_s2 = sshll.u32 %s7185_s24, 4  ;;  %s7186_s25 = smov [#allocation13]   ;;  %s76_s2 = int_to_ptr.vmem [resolvable:$true] %s75_s2 }
  0x19   :  { %78 = dma.hbm_to_vmem [thread:$0]  %s74_s22, 32, %s76_s2, [#allocation9]  }
  0x1a   :  { %s99_s26 = sshll.u32 %s7186_s25, 4  ;;  %s121_s28 = sshll.u32 %s7903_s8, 4  ;;  %s100_s26 = int_to_ptr.vmem [resolvable:$true] %s99_s26  ;;  %s122_s28 = int_to_ptr.hbm [resolvable:$true] %s121_s28 }
  0x1b   :  { %102 = dma.hbm_to_vmem [thread:$0]  %s98_s23, 16, %s100_s26, [#allocation12]  }
  0x1c   :  { %s7187_s4 = smov [#allocation16]  }
  0x1d   :  { %s123_s29 = sshll.u32 %s7187_s4, 4  ;;  %s124_s29 = int_to_ptr.vmem [resolvable:$true] %s123_s29 }
  0x1e   :  { %126 = dma.hbm_to_vmem [thread:$0]  %s122_s28, 16, %s124_s29, [#allocation15]  }
  0x1f   :  { %7161 = dma.done.wait [#allocation3], 896  }
  0x20   :  { %7162 = vsyncadd [#allocation3], 4294966400 }
  0x21   :  { %7163 = dma.done.wait [#allocation6], 286800  }
  0x22   :  { %7164 = vsyncadd [#allocation6], 4294680496 }
  0x23   :  { %7165 = dma.done.wait [#allocation9], 81952  }
  0x24   :  { %7166 = vsyncadd [#allocation9], 4294885344 }
  0x25   :  { %7167 = dma.done.wait [#allocation12], 4112  }
  0x26   :  { %7168 = vsyncadd [#allocation12], 4294963184 }
  0x27   :  { %7169 = dma.done.wait [#allocation15], 2064  }
  0x28   :  { %7170 = vsyncadd [#allocation15], 4294965232  ;;  %v470_v0 = vld [vmem:[#allocation5 + $0x960] sm:$0xff]  ;;  %s7188_s6 = smov [#allocation17]   ;;  %s6838_s11 = sshll.u32 %s7904_s9, 4  ;;  %s6839_s11 = int_to_ptr.hbm [resolvable:$true] %s6838_s11 }
  0x29   :  { %v790_v1 = vld [vmem:[#allocation5 + $0x1360] sm:$0xff]  ;;  %2410 = vmatpush.msra.mxu0 %v470_v0  ;;  %s6836_s8 = sshll.u32 %s7188_s6, 4  ;;  %s6837_s8 = int_to_ptr.vmem [resolvable:$true] %s6836_s8 }
  0x2a   :  { %v1110_v2 = vld [vmem:[#allocation5 + $0x1d60] sm:$0xff]  ;;  %2430 = vmatpush.msra.mxu1 %v790_v1 }
  0x2b   :  { %v450_v3 = vld [vmem:[#allocation5 + $0x8c0] sm:$0xff]  ;;  %2450 = vmatpush.msra.mxu2 %v1110_v2 }
  0x2c   :  { %v770_v4 = vld [vmem:[#allocation5 + $0x12c0] sm:$0xff]  ;;  %2411 = vmatpush.msra.mxu0 %v450_v3 }
  0x2d   :  { %v1090_v5 = vld [vmem:[#allocation5 + $0x1cc0] sm:$0xff]  ;;  %2431 = vmatpush.msra.mxu1 %v770_v4 }
  0x2e   :  { %v1430_v6 = vld [vmem:[#allocation5 + $0x2760] sm:$0xff]  ;;  %2451 = vmatpush.msra.mxu2 %v1090_v5 }
  0x2f   :  { %v430_v7 = vld [vmem:[#allocation5 + $0x820] sm:$0xff]  ;;  %2470 = vmatpush.msra.mxu3 %v1430_v6  ;;  %v471_v6 = vld [vmem:[#allocation5 + $0x968] sm:$0xff] }
  0x30   :  { %v750_v8 = vld [vmem:[#allocation5 + $0x1220] sm:$0xff]  ;;  %2412 = vmatpush.msra.mxu0 %v430_v7 }
  0x31   :  { %v1070_v9 = vld [vmem:[#allocation5 + $0x1c20] sm:$0xff]  ;;  %2432 = vmatpush.msra.mxu1 %v750_v8 }
  0x32   :  { %v1410_v10 = vld [vmem:[#allocation5 + $0x26c0] sm:$0xff]  ;;  %2452 = vmatpush.msra.mxu2 %v1070_v9 }
  0x33   :  { %v410_v11 = vld [vmem:[#allocation5 + $0x780] sm:$0xff]  ;;  %2471 = vmatpush.msra.mxu3 %v1410_v10  ;;  %v451_v10 = vld [vmem:[#allocation5 + $0x8c8] sm:$0xff] }
  0x34   :  { %v730_v12 = vld [vmem:[#allocation5 + $0x1180] sm:$0xff]  ;;  %2413 = vmatpush.msra.mxu0 %v410_v11 }
  0x35   :  { %v1050_v13 = vld [vmem:[#allocation5 + $0x1b80] sm:$0xff]  ;;  %2433 = vmatpush.msra.mxu1 %v730_v12 }
  0x36   :  { %v1390_v14 = vld [vmem:[#allocation5 + $0x2620] sm:$0xff]  ;;  %2453 = vmatpush.msra.mxu2 %v1050_v13 }
  0x37   :  { %v390_v15 = vld [vmem:[#allocation5 + $0x6e0] sm:$0xff]  ;;  %2472 = vmatpush.msra.mxu3 %v1390_v14  ;;  %v431_v14 = vld [vmem:[#allocation5 + $0x828] sm:$0xff] }
  0x38   :  { %v710_v16 = vld [vmem:[#allocation5 + $0x10e0] sm:$0xff]  ;;  %2414 = vmatpush.msra.mxu0 %v390_v15 }
  0x39   :  { %v1030_v17 = vld [vmem:[#allocation5 + $0x1ae0] sm:$0xff]  ;;  %2434 = vmatpush.msra.mxu1 %v710_v16 }
  0x3a   :  { %v1370_v18 = vld [vmem:[#allocation5 + $0x2580] sm:$0xff]  ;;  %2454 = vmatpush.msra.mxu2 %v1030_v17 }
  0x3b   :  { %v370_v19 = vld [vmem:[#allocation5 + $0x640] sm:$0xff]  ;;  %2473 = vmatpush.msra.mxu3 %v1370_v18  ;;  %v411_v18 = vld [vmem:[#allocation5 + $0x788] sm:$0xff] }
  0x3c   :  { %v690_v20 = vld [vmem:[#allocation5 + $0x1040] sm:$0xff]  ;;  %2415 = vmatpush.msra.mxu0 %v370_v19 }
  0x3d   :  { %v1010_v21 = vld [vmem:[#allocation5 + $0x1a40] sm:$0xff]  ;;  %2435 = vmatpush.msra.mxu1 %v690_v20 }
  0x3e   :  { %v1350_v22 = vld [vmem:[#allocation5 + $0x24e0] sm:$0xff]  ;;  %2455 = vmatpush.msra.mxu2 %v1010_v21 }
  0x3f   :  { %v350_v23 = vld [vmem:[#allocation5 + $0x5a0] sm:$0xff]  ;;  %2474 = vmatpush.msra.mxu3 %v1350_v22  ;;  %v391_v22 = vld [vmem:[#allocation5 + $0x6e8] sm:$0xff] }
  0x40   :  { %v670_v24 = vld [vmem:[#allocation5 + $0xfa0] sm:$0xff]  ;;  %2416 = vmatpush.msra.mxu0 %v350_v23 }
  0x41   :  { %v990_v25 = vld [vmem:[#allocation5 + $0x19a0] sm:$0xff]  ;;  %2436 = vmatpush.msra.mxu1 %v670_v24 }
  0x42   :  { %v1330_v26 = vld [vmem:[#allocation5 + $0x2440] sm:$0xff]  ;;  %2456 = vmatpush.msra.mxu2 %v990_v25 }
  0x43   :  { %v330_v27 = vld [vmem:[#allocation5 + $0x500] sm:$0xff]  ;;  %2475 = vmatpush.msra.mxu3 %v1330_v26  ;;  %v371_v26 = vld [vmem:[#allocation5 + $0x648] sm:$0xff] }
  0x44   :  { %v650_v28 = vld [vmem:[#allocation5 + $0xf00] sm:$0xff]  ;;  %2417 = vmatpush.msra.mxu0 %v330_v27 }
  0x45   :  { %v970_v29 = vld [vmem:[#allocation5 + $0x1900] sm:$0xff]  ;;  %2437 = vmatpush.msra.mxu1 %v650_v28 }
  0x46   :  { %v1310_v30 = vld [vmem:[#allocation5 + $0x23a0] sm:$0xff]  ;;  %2457 = vmatpush.msra.mxu2 %v970_v29 }
  0x47   :  { %v310_v31 = vld [vmem:[#allocation5 + $0x460] sm:$0xff]  ;;  %2476 = vmatpush.msra.mxu3 %v1310_v30  ;;  %v351_v30 = vld [vmem:[#allocation5 + $0x5a8] sm:$0xff] }
  0x48   :  { %v630_v32 = vld [vmem:[#allocation5 + $0xe60] sm:$0xff]  ;;  %2418 = vmatpush.msra.mxu0 %v310_v31 }
  0x49   :  { %v950_v33 = vld [vmem:[#allocation5 + $0x1860] sm:$0xff]  ;;  %2438 = vmatpush.msra.mxu1 %v630_v32 }
  0x4a   :  { %v1290_v34 = vld [vmem:[#allocation5 + $0x2300] sm:$0xff]  ;;  %2458 = vmatpush.msra.mxu2 %v950_v33 }
  0x4b   :  { %v290_v35 = vld [vmem:[#allocation5 + $0x3c0] sm:$0xff]  ;;  %2477 = vmatpush.msra.mxu3 %v1290_v34  ;;  %v331_v34 = vld [vmem:[#allocation5 + $0x508] sm:$0xff] }
  0x4c   :  { %v610_v36 = vld [vmem:[#allocation5 + $0xdc0] sm:$0xff]  ;;  %2419 = vmatpush.msra.mxu0 %v290_v35 }
  0x4d   :  { %v930_v37 = vld [vmem:[#allocation5 + $0x17c0] sm:$0xff]  ;;  %2439 = vmatpush.msra.mxu1 %v610_v36 }
  0x4e   :  { %v1270_v38 = vld [vmem:[#allocation5 + $0x2260] sm:$0xff]  ;;  %2459 = vmatpush.msra.mxu2 %v930_v37 }
  0x4f   :  { %v270_v39 = vld [vmem:[#allocation5 + $0x320] sm:$0xff]  ;;  %2478 = vmatpush.msra.mxu3 %v1270_v38  ;;  %v311_v38 = vld [vmem:[#allocation5 + $0x468] sm:$0xff] }
  0x50   :  { %v590_v40 = vld [vmem:[#allocation5 + $0xd20] sm:$0xff]  ;;  %2420 = vmatpush.msra.mxu0 %v270_v39 }
  0x51   :  { %v910_v41 = vld [vmem:[#allocation5 + $0x1720] sm:$0xff]  ;;  %2440 = vmatpush.msra.mxu1 %v590_v40 }
  0x52   :  { %v1250_v42 = vld [vmem:[#allocation5 + $0x21c0] sm:$0xff]  ;;  %2460 = vmatpush.msra.mxu2 %v910_v41 }
  0x53   :  { %v250_v43 = vld [vmem:[#allocation5 + $0x280] sm:$0xff]  ;;  %2479 = vmatpush.msra.mxu3 %v1250_v42  ;;  %v291_v42 = vld [vmem:[#allocation5 + $0x3c8] sm:$0xff] }
  0x54   :  { %v570_v44 = vld [vmem:[#allocation5 + $0xc80] sm:$0xff]  ;;  %2421 = vmatpush.msra.mxu0 %v250_v43 }
  0x55   :  { %v890_v45 = vld [vmem:[#allocation5 + $0x1680] sm:$0xff]  ;;  %2441 = vmatpush.msra.mxu1 %v570_v44 }
  0x56   :  { %v1230_v46 = vld [vmem:[#allocation5 + $0x2120] sm:$0xff]  ;;  %2461 = vmatpush.msra.mxu2 %v890_v45 }
  0x57   :  { %v230_v47 = vld [vmem:[#allocation5 + $0x1e0] sm:$0xff]  ;;  %2480 = vmatpush.msra.mxu3 %v1230_v46  ;;  %v271_v46 = vld [vmem:[#allocation5 + $0x328] sm:$0xff] }
  0x58   :  { %v550_v48 = vld [vmem:[#allocation5 + $0xbe0] sm:$0xff]  ;;  %2422 = vmatpush.msra.mxu0 %v230_v47 }
  0x59   :  { %v870_v49 = vld [vmem:[#allocation5 + $0x15e0] sm:$0xff]  ;;  %2442 = vmatpush.msra.mxu1 %v550_v48 }
  0x5a   :  { %v1210_v50 = vld [vmem:[#allocation5 + $0x2080] sm:$0xff]  ;;  %2462 = vmatpush.msra.mxu2 %v870_v49 }
  0x5b   :  { %v210_v51 = vld [vmem:[#allocation5 + $0x140] sm:$0xff]  ;;  %2481 = vmatpush.msra.mxu3 %v1210_v50  ;;  %v251_v50 = vld [vmem:[#allocation5 + $0x288] sm:$0xff] }
  0x5c   :  { %v530_v52 = vld [vmem:[#allocation5 + $0xb40] sm:$0xff]  ;;  %2423 = vmatpush.msra.mxu0 %v210_v51 }
  0x5d   :  { %v850_v53 = vld [vmem:[#allocation5 + $0x1540] sm:$0xff]  ;;  %2443 = vmatpush.msra.mxu1 %v530_v52 }
  0x5e   :  { %v1190_v54 = vld [vmem:[#allocation5 + $0x1fe0] sm:$0xff]  ;;  %2463 = vmatpush.msra.mxu2 %v850_v53 }
  0x5f   :  { %v190_v55 = vld [vmem:[#allocation5 + $0xa0] sm:$0xff]  ;;  %2482 = vmatpush.msra.mxu3 %v1190_v54  ;;  %v231_v54 = vld [vmem:[#allocation5 + $0x1e8] sm:$0xff] }
  0x60   :  { %v510_v56 = vld [vmem:[#allocation5 + $0xaa0] sm:$0xff]  ;;  %2424 = vmatpush.msra.mxu0 %v190_v55 }
  0x61   :  { %v830_v57 = vld [vmem:[#allocation5 + $0x14a0] sm:$0xff]  ;;  %2444 = vmatpush.msra.mxu1 %v510_v56 }
  0x62   :  { %v1170_v58 = vld [vmem:[#allocation5 + $0x1f40] sm:$0xff]  ;;  %2464 = vmatpush.msra.mxu2 %v830_v57 }
  0x63   :  { %v170_v59 = vld [vmem:[#allocation5] sm:$0xff]  ;;  %2483 = vmatpush.msra.mxu3 %v1170_v58  ;;  %v211_v58 = vld [vmem:[#allocation5 + $0x148] sm:$0xff] }
  0x64   :  { %v490_v60 = vld [vmem:[#allocation5 + $0xa00] sm:$0xff]  ;;  %2425 = vmatpush.msra.mxu0 %v170_v59  ;;  %v7266_v59 = vld [vmem:[#allocation2 + $0x10] sm:$0xff] }
  0x65   :  { %v810_v61 = vld [vmem:[#allocation5 + $0x1400] sm:$0xff]  ;;  %2445 = vmatpush.msra.mxu1 %v490_v60 }
  0x66   :  { %v1150_v62 = vld [vmem:[#allocation5 + $0x1ea0] sm:$0xff]  ;;  %2465 = vmatpush.msra.mxu2 %v810_v61 }
  0x67   :  { %v1750_v63 = vld [vmem:[#allocation5 + $0x3160] sm:$0xff]  ;;  %2484 = vmatpush.msra.mxu3 %v1150_v62  ;;  %2466 = vmatmul.f32.vlgmr.msra.gmra.mxu2 %v7266_v59 }
  0x68   :  { %v2070_v0 = vld [vmem:[#allocation5 + $0x3b60] sm:$0xff]  ;;  %2490 = vmatpush.msrb.mxu0 %v1750_v63  ;;  %v191_v63 = vld [vmem:[#allocation5 + $0xa8] sm:$0xff] }
  0x69   :  { %v2390_v1 = vld [vmem:[#allocation5 + $0x4560] sm:$0xff]  ;;  %2510 = vmatpush.msrb.mxu1 %v2070_v0  ;;  %v7268_v0 = vld [vmem:[#allocation2] sm:$0xff] }
  0x6a   :  { %v1130_v2 = vld [vmem:[#allocation5 + $0x1e00] sm:$0xff]  ;;  %2530 = vmatpush.msrb.mxu2 %v2390_v1  ;;  %v7271_v1 = vld [vmem:[#allocation2 + $0x8] sm:$0xff]  ;;  %2426 = vmatmul.f32.vlgmr.msra.gmra.mxu0 %v7268_v0 }
  0x6b   :  { %v1730_v3 = vld [vmem:[#allocation5 + $0x30c0] sm:$0xff]  ;;  %2485 = vmatpush.msra.mxu3 %v1130_v2  ;;  %2446 = vmatmul.f32.vlgmr.msra.gmra.mxu1 %v7271_v1 }
  0x6c   :  { %v2050_v4 = vld [vmem:[#allocation5 + $0x3ac0] sm:$0xff]  ;;  %2491 = vmatpush.msrb.mxu0 %v1730_v3  ;;  %v791_v3 = vld [vmem:[#allocation5 + $0x1368] sm:$0xff] }
  0x6d   :  { %v2370_v5 = vld [vmem:[#allocation5 + $0x44c0] sm:$0xff]  ;;  %2511 = vmatpush.msrb.mxu1 %v2050_v4  ;;  %2550 = vmatpush.msrb.mxu3 %v471_v6  ;;  %v1111_v4 = vld [vmem:[#allocation5 + $0x1d68] sm:$0xff] }
  0x6e   :  { %v1710_v7 = vld [vmem:[#allocation5 + $0x3020] sm:$0xff]  ;;  %2531 = vmatpush.msrb.mxu2 %v2370_v5  ;;  %v1431_v5 = vld [vmem:[#allocation5 + $0x2768] sm:$0xff] }
  0x6f   :  { %v2030_v8 = vld [vmem:[#allocation5 + $0x3a20] sm:$0xff]  ;;  %2492 = vmatpush.msrb.mxu0 %v1710_v7  ;;  %2551 = vmatpush.msrb.mxu3 %v451_v10  ;;  %v171_v6 = vld [vmem:[#allocation5 + $0x8] sm:$0xff] }
  0x70   :  { %v2350_v9 = vld [vmem:[#allocation5 + $0x4420] sm:$0xff]  ;;  %2512 = vmatpush.msrb.mxu1 %v2030_v8  ;;  %v771_v7 = vld [vmem:[#allocation5 + $0x12c8] sm:$0xff] }
  0x71   :  { %v1690_v11 = vld [vmem:[#allocation5 + $0x2f80] sm:$0xff]  ;;  %2532 = vmatpush.msrb.mxu2 %v2350_v9  ;;  %2552 = vmatpush.msrb.mxu3 %v431_v14  ;;  %v1091_v8 = vld [vmem:[#allocation5 + $0x1cc8] sm:$0xff] }
  0x72   :  { %v2010_v12 = vld [vmem:[#allocation5 + $0x3980] sm:$0xff]  ;;  %2493 = vmatpush.msrb.mxu0 %v1690_v11  ;;  %v1411_v9 = vld [vmem:[#allocation5 + $0x26c8] sm:$0xff] }
  0x73   :  { %v2330_v13 = vld [vmem:[#allocation5 + $0x4380] sm:$0xff]  ;;  %2513 = vmatpush.msrb.mxu1 %v2010_v12  ;;  %2553 = vmatpush.msrb.mxu3 %v411_v18  ;;  %v1751_v10 = vld [vmem:[#allocation5 + $0x3168] sm:$0xff] }
  0x74   :  { %v1670_v15 = vld [vmem:[#allocation5 + $0x2ee0] sm:$0xff]  ;;  %2533 = vmatpush.msrb.mxu2 %v2330_v13  ;;  %v751_v11 = vld [vmem:[#allocation5 + $0x1228] sm:$0xff] }
  0x75   :  { %v1990_v16 = vld [vmem:[#allocation5 + $0x38e0] sm:$0xff]  ;;  %2494 = vmatpush.msrb.mxu0 %v1670_v15  ;;  %2554 = vmatpush.msrb.mxu3 %v391_v22  ;;  %v1071_v12 = vld [vmem:[#allocation5 + $0x1c28] sm:$0xff]  ;;  %v7278_v15 = vld [vmem:[#allocation2 + $0x30] sm:$0xff] }
  0x76   :  { %v2310_v17 = vld [vmem:[#allocation5 + $0x42e0] sm:$0xff]  ;;  %2514 = vmatpush.msrb.mxu1 %v1990_v16  ;;  %v1391_v13 = vld [vmem:[#allocation5 + $0x2628] sm:$0xff] }
  0x77   :  { %v1650_v19 = vld [vmem:[#allocation5 + $0x2e40] sm:$0xff]  ;;  %2534 = vmatpush.msrb.mxu2 %v2310_v17  ;;  %2555 = vmatpush.msrb.mxu3 %v371_v26  ;;  %v1731_v14 = vld [vmem:[#allocation5 + $0x30c8] sm:$0xff] }
  0x78   :  { %v1970_v20 = vld [vmem:[#allocation5 + $0x3840] sm:$0xff]  ;;  %2495 = vmatpush.msrb.mxu0 %v1650_v19  ;;  %v731_v16 = vld [vmem:[#allocation5 + $0x1188] sm:$0xff] }
  0x79   :  { %v2290_v21 = vld [vmem:[#allocation5 + $0x4240] sm:$0xff]  ;;  %2515 = vmatpush.msrb.mxu1 %v1970_v20  ;;  %2556 = vmatpush.msrb.mxu3 %v351_v30  ;;  %v1051_v17 = vld [vmem:[#allocation5 + $0x1b88] sm:$0xff] }
  0x7a   :  { %v1630_v23 = vld [vmem:[#allocation5 + $0x2da0] sm:$0xff]  ;;  %2535 = vmatpush.msrb.mxu2 %v2290_v21  ;;  %v1371_v18 = vld [vmem:[#allocation5 + $0x2588] sm:$0xff] }
  0x7b   :  { %v1950_v24 = vld [vmem:[#allocation5 + $0x37a0] sm:$0xff]  ;;  %2496 = vmatpush.msrb.mxu0 %v1630_v23  ;;  %2557 = vmatpush.msrb.mxu3 %v331_v34  ;;  %v1711_v19 = vld [vmem:[#allocation5 + $0x3028] sm:$0xff] }
  0x7c   :  { %v2270_v25 = vld [vmem:[#allocation5 + $0x41a0] sm:$0xff]  ;;  %2516 = vmatpush.msrb.mxu1 %v1950_v24  ;;  %v7280_v20 = vld [vmem:[#allocation2 + $0x20] sm:$0xff] }
  0x7d   :  { %v1610_v27 = vld [vmem:[#allocation5 + $0x2d00] sm:$0xff]  ;;  %2536 = vmatpush.msrb.mxu2 %v2270_v25  ;;  %2558 = vmatpush.msrb.mxu3 %v311_v38  ;;  %v711_v21 = vld [vmem:[#allocation5 + $0x10e8] sm:$0xff]  ;;  %v7284_v25 = vld [vmem:[#allocation2 + $0x28] sm:$0xff] }
  0x7e   :  { %v1930_v28 = vld [vmem:[#allocation5 + $0x3700] sm:$0xff]  ;;  %2497 = vmatpush.msrb.mxu0 %v1610_v27  ;;  %v1031_v22 = vld [vmem:[#allocation5 + $0x1ae8] sm:$0xff] }
  0x7f   :  { %v2250_v29 = vld [vmem:[#allocation5 + $0x4100] sm:$0xff]  ;;  %2517 = vmatpush.msrb.mxu1 %v1930_v28  ;;  %2559 = vmatpush.msrb.mxu3 %v291_v42  ;;  %v1351_v23 = vld [vmem:[#allocation5 + $0x24e8] sm:$0xff] }
  0x80   :  { %v1590_v31 = vld [vmem:[#allocation5 + $0x2c60] sm:$0xff]  ;;  %2537 = vmatpush.msrb.mxu2 %v2250_v29  ;;  %v1691_v24 = vld [vmem:[#allocation5 + $0x2f88] sm:$0xff] }
  0x81   :  { %v1910_v32 = vld [vmem:[#allocation5 + $0x3660] sm:$0xff]  ;;  %2498 = vmatpush.msrb.mxu0 %v1590_v31  ;;  %2560 = vmatpush.msrb.mxu3 %v271_v46  ;;  %v691_v26 = vld [vmem:[#allocation5 + $0x1048] sm:$0xff] }
  0x82   :  { %v2230_v33 = vld [vmem:[#allocation5 + $0x4060] sm:$0xff]  ;;  %2518 = vmatpush.msrb.mxu1 %v1910_v32  ;;  %v1011_v27 = vld [vmem:[#allocation5 + $0x1a48] sm:$0xff] }
  0x83   :  { %v1570_v35 = vld [vmem:[#allocation5 + $0x2bc0] sm:$0xff]  ;;  %2538 = vmatpush.msrb.mxu2 %v2230_v33  ;;  %2561 = vmatpush.msrb.mxu3 %v251_v50  ;;  %v1331_v28 = vld [vmem:[#allocation5 + $0x2448] sm:$0xff] }
  0x84   :  { %v1890_v36 = vld [vmem:[#allocation5 + $0x35c0] sm:$0xff]  ;;  %2499 = vmatpush.msrb.mxu0 %v1570_v35  ;;  %v1671_v29 = vld [vmem:[#allocation5 + $0x2ee8] sm:$0xff] }
  0x85   :  { %v2210_v37 = vld [vmem:[#allocation5 + $0x3fc0] sm:$0xff]  ;;  %2519 = vmatpush.msrb.mxu1 %v1890_v36  ;;  %2562 = vmatpush.msrb.mxu3 %v231_v54  ;;  %v671_v30 = vld [vmem:[#allocation5 + $0xfa8] sm:$0xff] }
  0x86   :  { %v1550_v39 = vld [vmem:[#allocation5 + $0x2b20] sm:$0xff]  ;;  %2539 = vmatpush.msrb.mxu2 %v2210_v37  ;;  %v991_v31 = vld [vmem:[#allocation5 + $0x19a8] sm:$0xff] }
  0x87   :  { %v1870_v40 = vld [vmem:[#allocation5 + $0x3520] sm:$0xff]  ;;  %2500 = vmatpush.msrb.mxu0 %v1550_v39  ;;  %2563 = vmatpush.msrb.mxu3 %v211_v58  ;;  %v1311_v32 = vld [vmem:[#allocation5 + $0x23a8] sm:$0xff] }
  0x88   :  { %v2190_v41 = vld [vmem:[#allocation5 + $0x3f20] sm:$0xff]  ;;  %2520 = vmatpush.msrb.mxu1 %v1870_v40  ;;  %v1651_v33 = vld [vmem:[#allocation5 + $0x2e48] sm:$0xff] }
  0x89   :  { %v1530_v43 = vld [vmem:[#allocation5 + $0x2a80] sm:$0xff]  ;;  %2540 = vmatpush.msrb.mxu2 %v2190_v41  ;;  %2564 = vmatpush.msrb.mxu3 %v191_v63  ;;  %v651_v34 = vld [vmem:[#allocation5 + $0xf08] sm:$0xff] }
  0x8a   :  { %v1850_v44 = vld [vmem:[#allocation5 + $0x3480] sm:$0xff]  ;;  %2501 = vmatpush.msrb.mxu0 %v1530_v43  ;;  %v971_v35 = vld [vmem:[#allocation5 + $0x1908] sm:$0xff] }
  0x8b   :  { %v2170_v45 = vld [vmem:[#allocation5 + $0x3e80] sm:$0xff]  ;;  %2521 = vmatpush.msrb.mxu1 %v1850_v44  ;;  %2565 = vmatpush.msrb.mxu3 %v171_v6  ;;  %v1291_v36 = vld [vmem:[#allocation5 + $0x2308] sm:$0xff] }
  0x8c   :  { %v1510_v47 = vld [vmem:[#allocation5 + $0x29e0] sm:$0xff]  ;;  %2541 = vmatpush.msrb.mxu2 %v2170_v45  ;;  %v1631_v37 = vld [vmem:[#allocation5 + $0x2da8] sm:$0xff] }
  0x8d   :  { %v1830_v48 = vld [vmem:[#allocation5 + $0x33e0] sm:$0xff]  ;;  %2502 = vmatpush.msrb.mxu0 %v1510_v47  ;;  %v631_v38 = vld [vmem:[#allocation5 + $0xe68] sm:$0xff] }
  0x8e   :  { %v2150_v49 = vld [vmem:[#allocation5 + $0x3de0] sm:$0xff]  ;;  %2522 = vmatpush.msrb.mxu1 %v1830_v48  ;;  %v951_v39 = vld [vmem:[#allocation5 + $0x1868] sm:$0xff] }
  0x8f   :  { %v1490_v51 = vld [vmem:[#allocation5 + $0x2940] sm:$0xff]  ;;  %2542 = vmatpush.msrb.mxu2 %v2150_v49  ;;  %v1271_v40 = vld [vmem:[#allocation5 + $0x2268] sm:$0xff] }
  0x90   :  { %v1810_v52 = vld [vmem:[#allocation5 + $0x3340] sm:$0xff]  ;;  %2503 = vmatpush.msrb.mxu0 %v1490_v51  ;;  %v1611_v41 = vld [vmem:[#allocation5 + $0x2d08] sm:$0xff] }
  0x91   :  { %v2130_v53 = vld [vmem:[#allocation5 + $0x3d40] sm:$0xff]  ;;  %2523 = vmatpush.msrb.mxu1 %v1810_v52  ;;  %v611_v42 = vld [vmem:[#allocation5 + $0xdc8] sm:$0xff] }
  0x92   :  { %v1470_v55 = vld [vmem:[#allocation5 + $0x28a0] sm:$0xff]  ;;  %2543 = vmatpush.msrb.mxu2 %v2130_v53  ;;  %v931_v43 = vld [vmem:[#allocation5 + $0x17c8] sm:$0xff] }
  0x93   :  { %v1790_v56 = vld [vmem:[#allocation5 + $0x32a0] sm:$0xff]  ;;  %2504 = vmatpush.msrb.mxu0 %v1470_v55  ;;  %v1251_v44 = vld [vmem:[#allocation5 + $0x21c8] sm:$0xff] }
  0x94   :  { %v2110_v57 = vld [vmem:[#allocation5 + $0x3ca0] sm:$0xff]  ;;  %2524 = vmatpush.msrb.mxu1 %v1790_v56  ;;  %v1591_v45 = vld [vmem:[#allocation5 + $0x2c68] sm:$0xff] }
  0x95   :  { %v1450_v60 = vld [vmem:[#allocation5 + $0x2800] sm:$0xff]  ;;  %2544 = vmatpush.msrb.mxu2 %v2110_v57  ;;  %v591_v46 = vld [vmem:[#allocation5 + $0xd28] sm:$0xff] }
  0x96   :  { %v1770_v61 = vld [vmem:[#allocation5 + $0x3200] sm:$0xff]  ;;  %2505 = vmatpush.msrb.mxu0 %v1450_v60  ;;  %v911_v47 = vld [vmem:[#allocation5 + $0x1728] sm:$0xff] }
  0x97   :  { %v2090_v62 = vld [vmem:[#allocation5 + $0x3c00] sm:$0xff]  ;;  %2525 = vmatpush.msrb.mxu1 %v1770_v61  ;;  %2506 = vmatmul.f32.vlgmr.msrb.gmra.mxu0 %v7280_v20  ;;  %v1231_v48 = vld [vmem:[#allocation5 + $0x2128] sm:$0xff] }
  0x98   :  { %v7273_v2 = vld [vmem:[#allocation2 + $0x18] sm:$0xff]  ;;  %2545 = vmatpush.msrb.mxu2 %v2090_v62  ;;  %2570 = vmatpush.msra.mxu0 %v791_v3  ;;  %v1571_v49 = vld [vmem:[#allocation5 + $0x2bc8] sm:$0xff] }
  0x99   :  { %2486 = vmatmul.f32.vlgmr.msra.gmra.mxu3 %v7273_v2  ;;  %2590 = vmatpush.msra.mxu1 %v1111_v4  ;;  %v571_v50 = vld [vmem:[#allocation5 + $0xc88] sm:$0xff] }
  0x9a   :  { %2610 = vmatpush.msra.mxu2 %v1431_v5  ;;  %2571 = vmatpush.msra.mxu0 %v771_v7  ;;  %v891_v51 = vld [vmem:[#allocation5 + $0x1688] sm:$0xff] }
  0x9b   :  { %2591 = vmatpush.msra.mxu1 %v1091_v8  ;;  %2630 = vmatpush.msra.mxu3 %v1751_v10  ;;  %v1211_v52 = vld [vmem:[#allocation5 + $0x2088] sm:$0xff] }
  0x9c   :  { %2611 = vmatpush.msra.mxu2 %v1411_v9  ;;  %2572 = vmatpush.msra.mxu0 %v751_v11  ;;  %v1551_v53 = vld [vmem:[#allocation5 + $0x2b28] sm:$0xff] }
  0x9d   :  { %2592 = vmatpush.msra.mxu1 %v1071_v12  ;;  %2631 = vmatpush.msra.mxu3 %v1731_v14  ;;  %v551_v54 = vld [vmem:[#allocation5 + $0xbe8] sm:$0xff]  ;;  %v472_v12 = vld [vmem:[#allocation5 + $0x970] sm:$0xff] }
  0x9e   :  { %2612 = vmatpush.msra.mxu2 %v1391_v13  ;;  %2573 = vmatpush.msra.mxu0 %v731_v16  ;;  %v871_v55 = vld [vmem:[#allocation5 + $0x15e8] sm:$0xff] }
  0x9f   :  { %2546 = vmatmul.f32.vlgmr.msrb.gmra.mxu2 %v7278_v15  ;;  %2593 = vmatpush.msra.mxu1 %v1051_v17  ;;  %v1191_v56 = vld [vmem:[#allocation5 + $0x1fe8] sm:$0xff]  ;;  %v452_v17 = vld [vmem:[#allocation5 + $0x8d0] sm:$0xff] }
  0xa0   :  { %2613 = vmatpush.msra.mxu2 %v1371_v18  ;;  %2632 = vmatpush.msra.mxu3 %v1711_v19  ;;  %v1531_v57 = vld [vmem:[#allocation5 + $0x2a88] sm:$0xff]  ;;  %v792_v18 = vld [vmem:[#allocation5 + $0x1370] sm:$0xff] }
  0xa1   :  { %2574 = vmatpush.msra.mxu0 %v711_v21  ;;  %2594 = vmatpush.msra.mxu1 %v1031_v22  ;;  %v531_v58 = vld [vmem:[#allocation5 + $0xb48] sm:$0xff]  ;;  %v432_v22 = vld [vmem:[#allocation5 + $0x830] sm:$0xff] }
  0xa2   :  { %2614 = vmatpush.msra.mxu2 %v1351_v23  ;;  %2633 = vmatpush.msra.mxu3 %v1691_v24  ;;  %v851_v60 = vld [vmem:[#allocation5 + $0x1548] sm:$0xff]  ;;  %v772_v23 = vld [vmem:[#allocation5 + $0x12d0] sm:$0xff] }
  0xa3   :  { %2526 = vmatmul.f32.vlgmr.msrb.gmra.mxu1 %v7284_v25  ;;  %2575 = vmatpush.msra.mxu0 %v691_v26  ;;  %v1171_v61 = vld [vmem:[#allocation5 + $0x1f48] sm:$0xff] }
  0xa4   :  { %2595 = vmatpush.msra.mxu1 %v1011_v27  ;;  %2615 = vmatpush.msra.mxu2 %v1331_v28  ;;  %v1511_v62 = vld [vmem:[#allocation5 + $0x29e8] sm:$0xff]  ;;  %v412_v27 = vld [vmem:[#allocation5 + $0x790] sm:$0xff] }
  0xa5   :  { %2634 = vmatpush.msra.mxu3 %v1671_v29  ;;  %2576 = vmatpush.msra.mxu0 %v671_v30  ;;  %v511_v63 = vld [vmem:[#allocation5 + $0xaa8] sm:$0xff]  ;;  %v752_v28 = vld [vmem:[#allocation5 + $0x1230] sm:$0xff] }
  0xa6   :  { %2596 = vmatpush.msra.mxu1 %v991_v31  ;;  %2616 = vmatpush.msra.mxu2 %v1311_v32  ;;  %v831_v3 = vld [vmem:[#allocation5 + $0x14a8] sm:$0xff]  ;;  %v392_v31 = vld [vmem:[#allocation5 + $0x6f0] sm:$0xff] }
  0xa7   :  { %2635 = vmatpush.msra.mxu3 %v1651_v33  ;;  %2577 = vmatpush.msra.mxu0 %v651_v34  ;;  %v1151_v4 = vld [vmem:[#allocation5 + $0x1ea8] sm:$0xff]  ;;  %v732_v32 = vld [vmem:[#allocation5 + $0x1190] sm:$0xff] }
  0xa8   :  { %2597 = vmatpush.msra.mxu1 %v971_v35  ;;  %2617 = vmatpush.msra.mxu2 %v1291_v36  ;;  %v1491_v5 = vld [vmem:[#allocation5 + $0x2948] sm:$0xff]  ;;  %v372_v35 = vld [vmem:[#allocation5 + $0x650] sm:$0xff] }
  0xa9   :  { %2636 = vmatpush.msra.mxu3 %v1631_v37  ;;  %2578 = vmatpush.msra.mxu0 %v631_v38  ;;  %v491_v6 = vld [vmem:[#allocation5 + $0xa08] sm:$0xff]  ;;  %v712_v36 = vld [vmem:[#allocation5 + $0x10f0] sm:$0xff] }
  0xaa   :  { %2598 = vmatpush.msra.mxu1 %v951_v39  ;;  %2618 = vmatpush.msra.mxu2 %v1271_v40  ;;  %v811_v7 = vld [vmem:[#allocation5 + $0x1408] sm:$0xff]  ;;  %v352_v39 = vld [vmem:[#allocation5 + $0x5b0] sm:$0xff] }
  0xab   :  { %2637 = vmatpush.msra.mxu3 %v1611_v41  ;;  %2579 = vmatpush.msra.mxu0 %v611_v42  ;;  %v1131_v8 = vld [vmem:[#allocation5 + $0x1e08] sm:$0xff]  ;;  %v692_v40 = vld [vmem:[#allocation5 + $0x1050] sm:$0xff] }
  0xac   :  { %2599 = vmatpush.msra.mxu1 %v931_v43  ;;  %2619 = vmatpush.msra.mxu2 %v1251_v44  ;;  %v1471_v9 = vld [vmem:[#allocation5 + $0x28a8] sm:$0xff]  ;;  %v332_v43 = vld [vmem:[#allocation5 + $0x510] sm:$0xff] }
  0xad   :  { %2638 = vmatpush.msra.mxu3 %v1591_v45  ;;  %2580 = vmatpush.msra.mxu0 %v591_v46  ;;  %v2071_v10 = vld [vmem:[#allocation5 + $0x3b68] sm:$0xff]  ;;  %v672_v44 = vld [vmem:[#allocation5 + $0xfb0] sm:$0xff] }
  0xae   :  { %2600 = vmatpush.msra.mxu1 %v911_v47  ;;  %2620 = vmatpush.msra.mxu2 %v1231_v48  ;;  %v2391_v11 = vld [vmem:[#allocation5 + $0x4568] sm:$0xff]  ;;  %v312_v47 = vld [vmem:[#allocation5 + $0x470] sm:$0xff] }
  0xaf   :  { %2639 = vmatpush.msra.mxu3 %v1571_v49  ;;  %2581 = vmatpush.msra.mxu0 %v571_v50  ;;  %v1451_v13 = vld [vmem:[#allocation5 + $0x2808] sm:$0xff]  ;;  %v652_v48 = vld [vmem:[#allocation5 + $0xf10] sm:$0xff] }
  0xb0   :  { %2601 = vmatpush.msra.mxu1 %v891_v51  ;;  %2621 = vmatpush.msra.mxu2 %v1211_v52  ;;  %v2051_v14 = vld [vmem:[#allocation5 + $0x3ac8] sm:$0xff]  ;;  %v292_v51 = vld [vmem:[#allocation5 + $0x3d0] sm:$0xff] }
  0xb1   :  { %2640 = vmatpush.msra.mxu3 %v1551_v53  ;;  %2582 = vmatpush.msra.mxu0 %v551_v54  ;;  %v2371_v16 = vld [vmem:[#allocation5 + $0x44c8] sm:$0xff]  ;;  %v632_v52 = vld [vmem:[#allocation5 + $0xe70] sm:$0xff] }
  0xb2   :  { %2602 = vmatpush.msra.mxu1 %v871_v55  ;;  %2622 = vmatpush.msra.mxu2 %v1191_v56  ;;  %v2031_v19 = vld [vmem:[#allocation5 + $0x3a28] sm:$0xff]  ;;  %v272_v55 = vld [vmem:[#allocation5 + $0x330] sm:$0xff] }
  0xb3   :  { %2641 = vmatpush.msra.mxu3 %v1531_v57  ;;  %2583 = vmatpush.msra.mxu0 %v531_v58  ;;  %v2351_v21 = vld [vmem:[#allocation5 + $0x4428] sm:$0xff]  ;;  %v612_v56 = vld [vmem:[#allocation5 + $0xdd0] sm:$0xff] }
  0xb4   :  { %2603 = vmatpush.msra.mxu1 %v851_v60  ;;  %2623 = vmatpush.msra.mxu2 %v1171_v61  ;;  %v2011_v24 = vld [vmem:[#allocation5 + $0x3988] sm:$0xff]  ;;  %v252_v60 = vld [vmem:[#allocation5 + $0x290] sm:$0xff] }
  0xb5   :  { %2642 = vmatpush.msra.mxu3 %v1511_v62  ;;  %2584 = vmatpush.msra.mxu0 %v511_v63  ;;  %v2331_v26 = vld [vmem:[#allocation5 + $0x4388] sm:$0xff]  ;;  %v592_v61 = vld [vmem:[#allocation5 + $0xd30] sm:$0xff] }
  0xb6   :  { %2604 = vmatpush.msra.mxu1 %v831_v3  ;;  %2624 = vmatpush.msra.mxu2 %v1151_v4  ;;  %v1991_v29 = vld [vmem:[#allocation5 + $0x38e8] sm:$0xff]  ;;  %v232_v3 = vld [vmem:[#allocation5 + $0x1f0] sm:$0xff] }
  0xb7   :  { %2643 = vmatpush.msra.mxu3 %v1491_v5  ;;  %2585 = vmatpush.msra.mxu0 %v491_v6  ;;  %v2311_v30 = vld [vmem:[#allocation5 + $0x42e8] sm:$0xff]  ;;  %v572_v4 = vld [vmem:[#allocation5 + $0xc90] sm:$0xff] }
  0xb8   :  { %2605 = vmatpush.msra.mxu1 %v811_v7  ;;  %2625 = vmatpush.msra.mxu2 %v1131_v8  ;;  %v1971_v33 = vld [vmem:[#allocation5 + $0x3848] sm:$0xff]  ;;  %v212_v7 = vld [vmem:[#allocation5 + $0x150] sm:$0xff] }
  0xb9   :  { %2644 = vmatpush.msra.mxu3 %v1471_v9  ;;  %2650 = vmatpush.msrb.mxu0 %v2071_v10  ;;  %v2291_v34 = vld [vmem:[#allocation5 + $0x4248] sm:$0xff]  ;;  %v552_v8 = vld [vmem:[#allocation5 + $0xbf0] sm:$0xff] }
  0xba   :  { %2566 = vmatmul.f32.vlgmr.msrb.gmra.mxu3 %v7268_v0  ;;  %2670 = vmatpush.msrb.mxu1 %v2391_v11  ;;  %v1951_v37 = vld [vmem:[#allocation5 + $0x37a8] sm:$0xff]  ;;  %v192_v11 = vld [vmem:[#allocation5 + $0xb0] sm:$0xff] }
  0xbb   :  { %2690 = vmatpush.msrb.mxu2 %v472_v12  ;;  %2645 = vmatpush.msra.mxu3 %v1451_v13  ;;  %v2271_v38 = vld [vmem:[#allocation5 + $0x41a8] sm:$0xff]  ;;  %v532_v12 = vld [vmem:[#allocation5 + $0xb50] sm:$0xff] }
  0xbc   :  { %2651 = vmatpush.msrb.mxu0 %v2051_v14  ;;  %2671 = vmatpush.msrb.mxu1 %v2371_v16  ;;  %v1931_v41 = vld [vmem:[#allocation5 + $0x3708] sm:$0xff]  ;;  %v172_v16 = vld [vmem:[#allocation5 + $0x10] sm:$0xff] }
  0xbd   :  { %2691 = vmatpush.msrb.mxu2 %v452_v17  ;;  %2710 = vmatpush.msrb.mxu3 %v792_v18  ;;  %v2251_v42 = vld [vmem:[#allocation5 + $0x4108] sm:$0xff]  ;;  %v512_v17 = vld [vmem:[#allocation5 + $0xab0] sm:$0xff] }
  0xbe   :  { %2652 = vmatpush.msrb.mxu0 %v2031_v19  ;;  %2672 = vmatpush.msrb.mxu1 %v2351_v21  ;;  %v1911_v45 = vld [vmem:[#allocation5 + $0x3668] sm:$0xff]  ;;  %v1432_v18 = vld [vmem:[#allocation5 + $0x2770] sm:$0xff] }
  0xbf   :  { %2692 = vmatpush.msrb.mxu2 %v432_v22  ;;  %2711 = vmatpush.msrb.mxu3 %v772_v23  ;;  %v2231_v46 = vld [vmem:[#allocation5 + $0x4068] sm:$0xff]  ;;  %v1112_v19 = vld [vmem:[#allocation5 + $0x1d70] sm:$0xff] }
  0xc0   :  { %2626 = vmatmul.f32.vlgmr.msra.gmra.mxu2 %v7273_v2  ;;  %2653 = vmatpush.msrb.mxu0 %v2011_v24  ;;  %v1891_v49 = vld [vmem:[#allocation5 + $0x35c8] sm:$0xff]  ;;  %v1752_v21 = vld [vmem:[#allocation5 + $0x3170] sm:$0xff] }
  0xc1   :  { %2673 = vmatpush.msrb.mxu1 %v2331_v26  ;;  %2693 = vmatpush.msrb.mxu2 %v412_v27  ;;  %v2211_v50 = vld [vmem:[#allocation5 + $0x3fc8] sm:$0xff]  ;;  %v492_v22 = vld [vmem:[#allocation5 + $0xa10] sm:$0xff] }
  0xc2   :  { %2712 = vmatpush.msrb.mxu3 %v752_v28  ;;  %2586 = vmatmul.f32.vlgmr.msra.gmra.mxu0 %v7271_v1  ;;  %v1871_v53 = vld [vmem:[#allocation5 + $0x3528] sm:$0xff]  ;;  %v1092_v23 = vld [vmem:[#allocation5 + $0x1cd0] sm:$0xff] }
  0xc3   :  { %2646 = vmatmul.f32.vlgmr.msra.gmra.mxu3 %v7280_v20  ;;  %2654 = vmatpush.msrb.mxu0 %v1991_v29  ;;  %v2191_v54 = vld [vmem:[#allocation5 + $0x3f28] sm:$0xff]  ;;  %v1412_v24 = vld [vmem:[#allocation5 + $0x26d0] sm:$0xff] }
  0xc4   :  { %2674 = vmatpush.msrb.mxu1 %v2311_v30  ;;  %2694 = vmatpush.msrb.mxu2 %v392_v31  ;;  %v1851_v57 = vld [vmem:[#allocation5 + $0x3488] sm:$0xff]  ;;  %v1732_v26 = vld [vmem:[#allocation5 + $0x30d0] sm:$0xff] }
  0xc5   :  { %2713 = vmatpush.msrb.mxu3 %v732_v32  ;;  %2606 = vmatmul.f32.vlgmr.msra.gmra.mxu1 %v7266_v59  ;;  %v2171_v58 = vld [vmem:[#allocation5 + $0x3e88] sm:$0xff]  ;;  %v2072_v27 = vld [vmem:[#allocation5 + $0x3b70] sm:$0xff] }
  0xc6   :  { %2655 = vmatpush.msrb.mxu0 %v1971_v33  ;;  %2675 = vmatpush.msrb.mxu1 %v2291_v34  ;;  %v1831_v62 = vld [vmem:[#allocation5 + $0x33e8] sm:$0xff]  ;;  %v1072_v28 = vld [vmem:[#allocation5 + $0x1c30] sm:$0xff] }
  0xc7   :  { %2695 = vmatpush.msrb.mxu2 %v372_v35  ;;  %2714 = vmatpush.msrb.mxu3 %v712_v36  ;;  %v2151_v63 = vld [vmem:[#allocation5 + $0x3de8] sm:$0xff]  ;;  %v1392_v29 = vld [vmem:[#allocation5 + $0x2630] sm:$0xff] }
  0xc8   :  { %2656 = vmatpush.msrb.mxu0 %v1951_v37  ;;  %2676 = vmatpush.msrb.mxu1 %v2271_v38  ;;  %v1811_v5 = vld [vmem:[#allocation5 + $0x3348] sm:$0xff]  ;;  %v1712_v30 = vld [vmem:[#allocation5 + $0x3030] sm:$0xff] }
  0xc9   :  { %2696 = vmatpush.msrb.mxu2 %v352_v39  ;;  %2715 = vmatpush.msrb.mxu3 %v692_v40  ;;  %v2131_v6 = vld [vmem:[#allocation5 + $0x3d48] sm:$0xff]  ;;  %v2052_v31 = vld [vmem:[#allocation5 + $0x3ad0] sm:$0xff] }
  0xca   :  { %2657 = vmatpush.msrb.mxu0 %v1931_v41  ;;  %2677 = vmatpush.msrb.mxu1 %v2251_v42  ;;  %v1791_v9 = vld [vmem:[#allocation5 + $0x32a8] sm:$0xff]  ;;  %v1052_v32 = vld [vmem:[#allocation5 + $0x1b90] sm:$0xff] }
  0xcb   :  { %2697 = vmatpush.msrb.mxu2 %v332_v43  ;;  %2716 = vmatpush.msrb.mxu3 %v672_v44  ;;  %v2111_v10 = vld [vmem:[#allocation5 + $0x3ca8] sm:$0xff]  ;;  %v1372_v33 = vld [vmem:[#allocation5 + $0x2590] sm:$0xff] }
  0xcc   :  { %2658 = vmatpush.msrb.mxu0 %v1911_v45  ;;  %2678 = vmatpush.msrb.mxu1 %v2231_v46  ;;  %v1771_v13 = vld [vmem:[#allocation5 + $0x3208] sm:$0xff]  ;;  %v1692_v34 = vld [vmem:[#allocation5 + $0x2f90] sm:$0xff] }
  0xcd   :  { %2698 = vmatpush.msrb.mxu2 %v312_v47  ;;  %2717 = vmatpush.msrb.mxu3 %v652_v48  ;;  %v2091_v14 = vld [vmem:[#allocation5 + $0x3c08] sm:$0xff]  ;;  %v2032_v35 = vld [vmem:[#allocation5 + $0x3a30] sm:$0xff] }
  0xce   :  { %2659 = vmatpush.msrb.mxu0 %v1891_v49  ;;  %2679 = vmatpush.msrb.mxu1 %v2211_v50  ;;  %v1032_v36 = vld [vmem:[#allocation5 + $0x1af0] sm:$0xff] }
  0xcf   :  { %2699 = vmatpush.msrb.mxu2 %v292_v51  ;;  %2718 = vmatpush.msrb.mxu3 %v632_v52  ;;  %v1352_v37 = vld [vmem:[#allocation5 + $0x24f0] sm:$0xff] }
  0xd0   :  { %2660 = vmatpush.msrb.mxu0 %v1871_v53  ;;  %2680 = vmatpush.msrb.mxu1 %v2191_v54  ;;  %v2012_v38 = vld [vmem:[#allocation5 + $0x3990] sm:$0xff] }
  0xd1   :  { %2700 = vmatpush.msrb.mxu2 %v272_v55  ;;  %2719 = vmatpush.msrb.mxu3 %v612_v56  ;;  %v1012_v39 = vld [vmem:[#allocation5 + $0x1a50] sm:$0xff] }
  0xd2   :  { %2661 = vmatpush.msrb.mxu0 %v1851_v57  ;;  %2681 = vmatpush.msrb.mxu1 %v2171_v58  ;;  %v1332_v40 = vld [vmem:[#allocation5 + $0x2450] sm:$0xff] }
  0xd3   :  { %2701 = vmatpush.msrb.mxu2 %v252_v60  ;;  %2720 = vmatpush.msrb.mxu3 %v592_v61  ;;  %v1652_v41 = vld [vmem:[#allocation5 + $0x2e50] sm:$0xff] }
  0xd4   :  { %2662 = vmatpush.msrb.mxu0 %v1831_v62  ;;  %2682 = vmatpush.msrb.mxu1 %v2151_v63  ;;  %v1992_v42 = vld [vmem:[#allocation5 + $0x38f0] sm:$0xff] }
  0xd5   :  { %2702 = vmatpush.msrb.mxu2 %v232_v3  ;;  %2721 = vmatpush.msrb.mxu3 %v572_v4  ;;  %v992_v43 = vld [vmem:[#allocation5 + $0x19b0] sm:$0xff] }
  0xd6   :  { %2663 = vmatpush.msrb.mxu0 %v1811_v5  ;;  %2683 = vmatpush.msrb.mxu1 %v2131_v6  ;;  %v1312_v44 = vld [vmem:[#allocation5 + $0x23b0] sm:$0xff] }
  0xd7   :  { %2703 = vmatpush.msrb.mxu2 %v212_v7  ;;  %2722 = vmatpush.msrb.mxu3 %v552_v8  ;;  %v1632_v45 = vld [vmem:[#allocation5 + $0x2db0] sm:$0xff] }
  0xd8   :  { %2664 = vmatpush.msrb.mxu0 %v1791_v9  ;;  %2684 = vmatpush.msrb.mxu1 %v2111_v10  ;;  %v1972_v46 = vld [vmem:[#allocation5 + $0x3850] sm:$0xff] }
  0xd9   :  { %2704 = vmatpush.msrb.mxu2 %v192_v11  ;;  %2723 = vmatpush.msrb.mxu3 %v532_v12  ;;  %v972_v47 = vld [vmem:[#allocation5 + $0x1910] sm:$0xff] }
  0xda   :  { %2665 = vmatpush.msrb.mxu0 %v1771_v13  ;;  %2685 = vmatpush.msrb.mxu1 %v2091_v14  ;;  %v1292_v48 = vld [vmem:[#allocation5 + $0x2310] sm:$0xff] }
  0xdb   :  { %2705 = vmatpush.msrb.mxu2 %v172_v16  ;;  %2724 = vmatpush.msrb.mxu3 %v512_v17  ;;  %v1612_v49 = vld [vmem:[#allocation5 + $0x2d10] sm:$0xff] }
  0xdc   :  { %2666 = vmatmul.f32.vlgmr.msrb.gmra.mxu0 %v7284_v25  ;;  %2750 = vmatpush.msra.mxu1 %v1432_v18  ;;  %v1952_v50 = vld [vmem:[#allocation5 + $0x37b0] sm:$0xff] }
  0xdd   :  { %2730 = vmatpush.msra.mxu0 %v1112_v19  ;;  %2770 = vmatpush.msra.mxu2 %v1752_v21  ;;  %v952_v51 = vld [vmem:[#allocation5 + $0x1870] sm:$0xff] }
  0xde   :  { %2725 = vmatpush.msrb.mxu3 %v492_v22  ;;  %2686 = vmatmul.f32.vlgmr.msrb.gmra.mxu1 %v7278_v15  ;;  %v1672_v15 = vld [vmem:[#allocation5 + $0x2ef0] sm:$0xff] }
  0xdf   :  { %2731 = vmatpush.msra.mxu0 %v1092_v23  ;;  %2751 = vmatpush.msra.mxu1 %v1412_v24  ;;  %v1272_v52 = vld [vmem:[#allocation5 + $0x2270] sm:$0xff] }
  0xe0   :  { %2771 = vmatpush.msra.mxu2 %v1732_v26  ;;  %2790 = vmatpush.msra.mxu3 %v2072_v27  ;;  %v1592_v53 = vld [vmem:[#allocation5 + $0x2c70] sm:$0xff]  ;;  %v473_v27 = vld [vmem:[#allocation5 + $0x978] sm:$0xff] }
  0xe1   :  { %2732 = vmatpush.msra.mxu0 %v1072_v28  ;;  %2752 = vmatpush.msra.mxu1 %v1392_v29  ;;  %v1932_v54 = vld [vmem:[#allocation5 + $0x3710] sm:$0xff]  ;;  %v793_v28 = vld [vmem:[#allocation5 + $0x1378] sm:$0xff] }
  0xe2   :  { %2772 = vmatpush.msra.mxu2 %v1712_v30  ;;  %2791 = vmatpush.msra.mxu3 %v2052_v31  ;;  %v932_v55 = vld [vmem:[#allocation5 + $0x17d0] sm:$0xff]  ;;  %v453_v31 = vld [vmem:[#allocation5 + $0x8d8] sm:$0xff] }
  0xe3   :  { %2733 = vmatpush.msra.mxu0 %v1052_v32  ;;  %2753 = vmatpush.msra.mxu1 %v1372_v33  ;;  %v1252_v56 = vld [vmem:[#allocation5 + $0x21d0] sm:$0xff]  ;;  %v773_v32 = vld [vmem:[#allocation5 + $0x12d8] sm:$0xff] }
  0xe4   :  { %2773 = vmatpush.msra.mxu2 %v1692_v34  ;;  %2792 = vmatpush.msra.mxu3 %v2032_v35  ;;  %v1572_v57 = vld [vmem:[#allocation5 + $0x2bd0] sm:$0xff]  ;;  %v1113_v33 = vld [vmem:[#allocation5 + $0x1d78] sm:$0xff] }
  0xe5   :  { %2734 = vmatpush.msra.mxu0 %v1032_v36  ;;  %2754 = vmatpush.msra.mxu1 %v1352_v37  ;;  %v1912_v58 = vld [vmem:[#allocation5 + $0x3670] sm:$0xff]  ;;  %v433_v35 = vld [vmem:[#allocation5 + $0x838] sm:$0xff] }
  0xe6   :  { %2774 = vmatpush.msra.mxu2 %v1672_v15  ;;  %2793 = vmatpush.msra.mxu3 %v2012_v38  ;;  %v912_v60 = vld [vmem:[#allocation5 + $0x1730] sm:$0xff]  ;;  %v1093_v36 = vld [vmem:[#allocation5 + $0x1cd8] sm:$0xff] }
  0xe7   :  { %2735 = vmatpush.msra.mxu0 %v1012_v39  ;;  %2755 = vmatpush.msra.mxu1 %v1332_v40  ;;  %v1232_v61 = vld [vmem:[#allocation5 + $0x2130] sm:$0xff]  ;;  %v413_v15 = vld [vmem:[#allocation5 + $0x798] sm:$0xff] }
  0xe8   :  { %2775 = vmatpush.msra.mxu2 %v1652_v41  ;;  %2794 = vmatpush.msra.mxu3 %v1992_v42  ;;  %v1552_v62 = vld [vmem:[#allocation5 + $0x2b30] sm:$0xff]  ;;  %v733_v38 = vld [vmem:[#allocation5 + $0x1198] sm:$0xff] }
  0xe9   :  { %2736 = vmatpush.msra.mxu0 %v992_v43  ;;  %2756 = vmatpush.msra.mxu1 %v1312_v44  ;;  %v1892_v63 = vld [vmem:[#allocation5 + $0x35d0] sm:$0xff]  ;;  %v393_v40 = vld [vmem:[#allocation5 + $0x6f8] sm:$0xff] }
  0xea   :  { %2776 = vmatpush.msra.mxu2 %v1632_v45  ;;  %2795 = vmatpush.msra.mxu3 %v1972_v46  ;;  %v892_v3 = vld [vmem:[#allocation5 + $0x1690] sm:$0xff]  ;;  %v713_v41 = vld [vmem:[#allocation5 + $0x10f8] sm:$0xff] }
  0xeb   :  { %2737 = vmatpush.msra.mxu0 %v972_v47  ;;  %2757 = vmatpush.msra.mxu1 %v1292_v48  ;;  %v1212_v4 = vld [vmem:[#allocation5 + $0x2090] sm:$0xff]  ;;  %v1053_v42 = vld [vmem:[#allocation5 + $0x1b98] sm:$0xff] }
  0xec   :  { %2777 = vmatpush.msra.mxu2 %v1612_v49  ;;  %2796 = vmatpush.msra.mxu3 %v1952_v50  ;;  %v1532_v5 = vld [vmem:[#allocation5 + $0x2a90] sm:$0xff]  ;;  %v373_v44 = vld [vmem:[#allocation5 + $0x658] sm:$0xff] }
  0xed   :  { %2738 = vmatpush.msra.mxu0 %v952_v51  ;;  %2758 = vmatpush.msra.mxu1 %v1272_v52  ;;  %v1872_v6 = vld [vmem:[#allocation5 + $0x3530] sm:$0xff]  ;;  %v693_v45 = vld [vmem:[#allocation5 + $0x1058] sm:$0xff] }
  0xee   :  { %2778 = vmatpush.msra.mxu2 %v1592_v53  ;;  %2797 = vmatpush.msra.mxu3 %v1932_v54  ;;  %v872_v7 = vld [vmem:[#allocation5 + $0x15f0] sm:$0xff]  ;;  %v1033_v46 = vld [vmem:[#allocation5 + $0x1af8] sm:$0xff] }
  0xef   :  { %2739 = vmatpush.msra.mxu0 %v932_v55  ;;  %2759 = vmatpush.msra.mxu1 %v1252_v56  ;;  %v1192_v8 = vld [vmem:[#allocation5 + $0x1ff0] sm:$0xff]  ;;  %v353_v47 = vld [vmem:[#allocation5 + $0x5b8] sm:$0xff] }
  0xf0   :  { %2779 = vmatpush.msra.mxu2 %v1572_v57  ;;  %2798 = vmatpush.msra.mxu3 %v1912_v58  ;;  %v1512_v9 = vld [vmem:[#allocation5 + $0x29f0] sm:$0xff]  ;;  %v673_v48 = vld [vmem:[#allocation5 + $0xfb8] sm:$0xff] }
  0xf1   :  { %2740 = vmatpush.msra.mxu0 %v912_v60  ;;  %2760 = vmatpush.msra.mxu1 %v1232_v61  ;;  %v1852_v10 = vld [vmem:[#allocation5 + $0x3490] sm:$0xff]  ;;  %v1013_v49 = vld [vmem:[#allocation5 + $0x1a58] sm:$0xff] }
  0xf2   :  { %2780 = vmatpush.msra.mxu2 %v1552_v62  ;;  %2799 = vmatpush.msra.mxu3 %v1892_v63  ;;  %v852_v11 = vld [vmem:[#allocation5 + $0x1550] sm:$0xff]  ;;  %v653_v50 = vld [vmem:[#allocation5 + $0xf18] sm:$0xff] }
  0xf3   :  { %2741 = vmatpush.msra.mxu0 %v892_v3  ;;  %2761 = vmatpush.msra.mxu1 %v1212_v4  ;;  %v1172_v12 = vld [vmem:[#allocation5 + $0x1f50] sm:$0xff]  ;;  %v993_v51 = vld [vmem:[#allocation5 + $0x19b8] sm:$0xff] }
  0xf4   :  { %2781 = vmatpush.msra.mxu2 %v1532_v5  ;;  %2800 = vmatpush.msra.mxu3 %v1872_v6  ;;  %v1492_v13 = vld [vmem:[#allocation5 + $0x2950] sm:$0xff]  ;;  %v313_v53 = vld [vmem:[#allocation5 + $0x478] sm:$0xff] }
  0xf5   :  { %2742 = vmatpush.msra.mxu0 %v872_v7  ;;  %2762 = vmatpush.msra.mxu1 %v1192_v8  ;;  %v1832_v14 = vld [vmem:[#allocation5 + $0x33f0] sm:$0xff]  ;;  %v973_v54 = vld [vmem:[#allocation5 + $0x1918] sm:$0xff] }
  0xf6   :  { %2782 = vmatpush.msra.mxu2 %v1512_v9  ;;  %2801 = vmatpush.msra.mxu3 %v1852_v10  ;;  %v832_v16 = vld [vmem:[#allocation5 + $0x14b0] sm:$0xff]  ;;  %v293_v56 = vld [vmem:[#allocation5 + $0x3d8] sm:$0xff] }
  0xf7   :  { %v1152_v17 = vld [vmem:[#allocation5 + $0x1eb0] sm:$0xff]  ;;  %2743 = vmatpush.msra.mxu0 %v852_v11  ;;  %2763 = vmatpush.msra.mxu1 %v1172_v12  ;;  %v613_v57 = vld [vmem:[#allocation5 + $0xdd8] sm:$0xff] }
  0xf8   :  { %v1472_v18 = vld [vmem:[#allocation5 + $0x28b0] sm:$0xff]  ;;  %2783 = vmatpush.msra.mxu2 %v1492_v13  ;;  %2802 = vmatpush.msra.mxu3 %v1832_v14  ;;  %v953_v58 = vld [vmem:[#allocation5 + $0x1878] sm:$0xff] }
  0xf9   :  { %v1812_v19 = vld [vmem:[#allocation5 + $0x3350] sm:$0xff]  ;;  %2744 = vmatpush.msra.mxu0 %v832_v16  ;;  %2764 = vmatpush.msra.mxu1 %v1152_v17  ;;  %v273_v61 = vld [vmem:[#allocation5 + $0x338] sm:$0xff] }
  0xfa   :  { %v812_v21 = vld [vmem:[#allocation5 + $0x1410] sm:$0xff]  ;;  %2784 = vmatpush.msra.mxu2 %v1472_v18  ;;  %2803 = vmatpush.msra.mxu3 %v1812_v19  ;;  %v593_v62 = vld [vmem:[#allocation5 + $0xd38] sm:$0xff] }
  0xfb   :  { %v1132_v22 = vld [vmem:[#allocation5 + $0x1e10] sm:$0xff]  ;;  %2706 = vmatmul.f32.vlgmr.msrb.gmra.mxu2 %v7268_v0  ;;  %2745 = vmatpush.msra.mxu0 %v812_v21  ;;  %v753_v0 = vld [vmem:[#allocation5 + $0x1238] sm:$0xff] }
  0xfc   :  { %v1452_v23 = vld [vmem:[#allocation5 + $0x2810] sm:$0xff]  ;;  %2765 = vmatpush.msra.mxu1 %v1132_v22  ;;  %2726 = vmatmul.f32.vlgmr.msrb.gmra.mxu3 %v7271_v1  ;;  %v1073_v1 = vld [vmem:[#allocation5 + $0x1c38] sm:$0xff] }
  0xfd   :  { %v1792_v24 = vld [vmem:[#allocation5 + $0x32b0] sm:$0xff]  ;;  %2785 = vmatpush.msra.mxu2 %v1452_v23  ;;  %2746 = vmatmul.f32.vlgmr.msra.gmra.mxu0 %v7266_v59  ;;  %v933_v63 = vld [vmem:[#allocation5 + $0x17d8] sm:$0xff] }
  0xfe   :  { %v2392_v26 = vld [vmem:[#allocation5 + $0x4570] sm:$0xff]  ;;  %2804 = vmatpush.msra.mxu3 %v1792_v24  ;;  %2830 = vmatpush.msrb.mxu1 %v473_v27  ;;  %v253_v4 = vld [vmem:[#allocation5 + $0x298] sm:$0xff] }
  0xff   :  { %v1772_v29 = vld [vmem:[#allocation5 + $0x3210] sm:$0xff]  ;;  %2810 = vmatpush.msrb.mxu0 %v2392_v26  ;;  %2850 = vmatpush.msrb.mxu2 %v793_v28  ;;  %v573_v5 = vld [vmem:[#allocation5 + $0xc98] sm:$0xff] }
 0x100   :  { %v2372_v30 = vld [vmem:[#allocation5 + $0x44d0] sm:$0xff]  ;;  %2805 = vmatpush.msra.mxu3 %v1772_v29  ;;  %2831 = vmatpush.msrb.mxu1 %v453_v31  ;;  %v913_v6 = vld [vmem:[#allocation5 + $0x1738] sm:$0xff] }
 0x101   :  { %v2352_v34 = vld [vmem:[#allocation5 + $0x4430] sm:$0xff]  ;;  %2811 = vmatpush.msrb.mxu0 %v2372_v30  ;;  %2851 = vmatpush.msrb.mxu2 %v773_v32  ;;  %v233_v8 = vld [vmem:[#allocation5 + $0x1f8] sm:$0xff] }
 0x102   :  { %2870 = vmatpush.msrb.mxu3 %v1113_v33  ;;  %v2332_v37 = vld [vmem:[#allocation5 + $0x4390] sm:$0xff]  ;;  %2832 = vmatpush.msrb.mxu1 %v433_v35  ;;  %v553_v9 = vld [vmem:[#allocation5 + $0xbf8] sm:$0xff] }
 0x103   :  { %2812 = vmatpush.msrb.mxu0 %v2352_v34  ;;  %2852 = vmatpush.msrb.mxu2 %v753_v0  ;;  %v2312_v39 = vld [vmem:[#allocation5 + $0x42f0] sm:$0xff]  ;;  %v893_v10 = vld [vmem:[#allocation5 + $0x1698] sm:$0xff] }
 0x104   :  { %2871 = vmatpush.msrb.mxu3 %v1093_v36  ;;  %2786 = vmatmul.f32.vlgmr.msra.gmra.mxu2 %v7280_v20  ;;  %v2292_v43 = vld [vmem:[#allocation5 + $0x4250] sm:$0xff]  ;;  %v213_v12 = vld [vmem:[#allocation5 + $0x158] sm:$0xff] }
 0x105   :  { %2813 = vmatpush.msrb.mxu0 %v2332_v37  ;;  %2833 = vmatpush.msrb.mxu1 %v413_v15  ;;  %v2272_v20 = vld [vmem:[#allocation5 + $0x41b0] sm:$0xff]  ;;  %v533_v13 = vld [vmem:[#allocation5 + $0xb58] sm:$0xff] }
 0x106   :  { %2853 = vmatpush.msrb.mxu2 %v733_v38  ;;  %2872 = vmatpush.msrb.mxu3 %v1073_v1  ;;  %v2252_v59 = vld [vmem:[#allocation5 + $0x4110] sm:$0xff]  ;;  %v873_v14 = vld [vmem:[#allocation5 + $0x15f8] sm:$0xff] }
 0x107   :  { %2806 = vmatmul.f32.vlgmr.msra.gmra.mxu3 %v7284_v25  ;;  %2814 = vmatpush.msrb.mxu0 %v2312_v39  ;;  %v333_v25 = vld [vmem:[#allocation5 + $0x518] sm:$0xff]  ;;  %v2232_v52 = vld [vmem:[#allocation5 + $0x4070] sm:$0xff] }
 0x108   :  { %2834 = vmatpush.msrb.mxu1 %v393_v40  ;;  %2854 = vmatpush.msrb.mxu2 %v713_v41  ;;  %v2212_v55 = vld [vmem:[#allocation5 + $0x3fd0] sm:$0xff]  ;;  %v193_v17 = vld [vmem:[#allocation5 + $0xb8] sm:$0xff] }
 0x109   :  { %2873 = vmatpush.msrb.mxu3 %v1053_v42  ;;  %2766 = vmatmul.f32.vlgmr.msra.gmra.mxu1 %v7273_v2  ;;  %v633_v2 = vld [vmem:[#allocation5 + $0xe78] sm:$0xff]  ;;  %v2192_v60 = vld [vmem:[#allocation5 + $0x3f30] sm:$0xff] }
 0x10a   :  { %2815 = vmatpush.msrb.mxu0 %v2292_v43  ;;  %2835 = vmatpush.msrb.mxu1 %v373_v44  ;;  %v2172_v3 = vld [vmem:[#allocation5 + $0x3e90] sm:$0xff]  ;;  %v513_v18 = vld [vmem:[#allocation5 + $0xab8] sm:$0xff] }
 0x10b   :  { %2855 = vmatpush.msrb.mxu2 %v693_v45  ;;  %2874 = vmatpush.msrb.mxu3 %v1033_v46  ;;  %v2152_v7 = vld [vmem:[#allocation5 + $0x3df0] sm:$0xff]  ;;  %v853_v19 = vld [vmem:[#allocation5 + $0x1558] sm:$0xff] }
 0x10c   :  { %2816 = vmatpush.msrb.mxu0 %v2272_v20  ;;  %2836 = vmatpush.msrb.mxu1 %v353_v47  ;;  %v2132_v11 = vld [vmem:[#allocation5 + $0x3d50] sm:$0xff]  ;;  %v173_v22 = vld [vmem:[#allocation5 + $0x18] sm:$0xff] }
 0x10d   :  { %2856 = vmatpush.msrb.mxu2 %v673_v48  ;;  %2875 = vmatpush.msrb.mxu3 %v1013_v49  ;;  %v2112_v16 = vld [vmem:[#allocation5 + $0x3cb0] sm:$0xff]  ;;  %v493_v23 = vld [vmem:[#allocation5 + $0xa18] sm:$0xff] }
 0x10e   :  { %2817 = vmatpush.msrb.mxu0 %v2252_v59  ;;  %2837 = vmatpush.msrb.mxu1 %v333_v25  ;;  %v2092_v21 = vld [vmem:[#allocation5 + $0x3c10] sm:$0xff]  ;;  %v833_v24 = vld [vmem:[#allocation5 + $0x14b8] sm:$0xff] }
 0x10f   :  { %2857 = vmatpush.msrb.mxu2 %v653_v50  ;;  %2876 = vmatpush.msrb.mxu3 %v993_v51  ;;  %v1753_v26 = vld [vmem:[#allocation5 + $0x3178] sm:$0xff] }
 0x110   :  { %2818 = vmatpush.msrb.mxu0 %v2232_v52  ;;  %2838 = vmatpush.msrb.mxu1 %v313_v53  ;;  %v1433_v27 = vld [vmem:[#allocation5 + $0x2778] sm:$0xff] }
 0x111   :  { %2858 = vmatpush.msrb.mxu2 %v633_v2  ;;  %2877 = vmatpush.msrb.mxu3 %v973_v54  ;;  %v2073_v28 = vld [vmem:[#allocation5 + $0x3b78] sm:$0xff] }
 0x112   :  { %2819 = vmatpush.msrb.mxu0 %v2212_v55  ;;  %2839 = vmatpush.msrb.mxu1 %v293_v56  ;;  %v813_v29 = vld [vmem:[#allocation5 + $0x1418] sm:$0xff] }
 0x113   :  { %2859 = vmatpush.msrb.mxu2 %v613_v57  ;;  %2878 = vmatpush.msrb.mxu3 %v953_v58  ;;  %v1733_v30 = vld [vmem:[#allocation5 + $0x30d8] sm:$0xff] }
 0x114   :  { %2820 = vmatpush.msrb.mxu0 %v2192_v60  ;;  %2840 = vmatpush.msrb.mxu1 %v273_v61  ;;  %v7300_v31 = vld [vmem:[#allocation2 + $0x30] sm:$0xff] }
 0x115   :  { %2860 = vmatpush.msrb.mxu2 %v593_v62  ;;  %2879 = vmatpush.msrb.mxu3 %v933_v63  ;;  %v1413_v32 = vld [vmem:[#allocation5 + $0x26d8] sm:$0xff] }
 0x116   :  { %2821 = vmatpush.msrb.mxu0 %v2172_v3  ;;  %2841 = vmatpush.msrb.mxu1 %v253_v4  ;;  %v2053_v33 = vld [vmem:[#allocation5 + $0x3ad8] sm:$0xff] }
 0x117   :  { %2861 = vmatpush.msrb.mxu2 %v573_v5  ;;  %2880 = vmatpush.msrb.mxu3 %v913_v6  ;;  %v2393_v34 = vld [vmem:[#allocation5 + $0x4578] sm:$0xff] }
 0x118   :  { %2822 = vmatpush.msrb.mxu0 %v2152_v7  ;;  %2842 = vmatpush.msrb.mxu1 %v233_v8  ;;  %v1713_v35 = vld [vmem:[#allocation5 + $0x3038] sm:$0xff] }
 0x119   :  { %2862 = vmatpush.msrb.mxu2 %v553_v9  ;;  %2881 = vmatpush.msrb.mxu3 %v893_v10  ;;  %v1393_v0 = vld [vmem:[#allocation5 + $0x2638] sm:$0xff] }
 0x11a   :  { %2823 = vmatpush.msrb.mxu0 %v2132_v11  ;;  %2843 = vmatpush.msrb.mxu1 %v213_v12  ;;  %v2033_v36 = vld [vmem:[#allocation5 + $0x3a38] sm:$0xff] }
 0x11b   :  { %2863 = vmatpush.msrb.mxu2 %v533_v13  ;;  %2882 = vmatpush.msrb.mxu3 %v873_v14  ;;  %v2373_v37 = vld [vmem:[#allocation5 + $0x44d8] sm:$0xff] }
 0x11c   :  { %2824 = vmatpush.msrb.mxu0 %v2112_v16  ;;  %2844 = vmatpush.msrb.mxu1 %v193_v17  ;;  %v1693_v15 = vld [vmem:[#allocation5 + $0x2f98] sm:$0xff] }
 0x11d   :  { %2864 = vmatpush.msrb.mxu2 %v513_v18  ;;  %2883 = vmatpush.msrb.mxu3 %v853_v19  ;;  %v1373_v38 = vld [vmem:[#allocation5 + $0x2598] sm:$0xff] }
 0x11e   :  { %2825 = vmatpush.msrb.mxu0 %v2092_v21  ;;  %2845 = vmatpush.msrb.mxu1 %v173_v22  ;;  %v2013_v1 = vld [vmem:[#allocation5 + $0x3998] sm:$0xff] }
 0x11f   :  { %2865 = vmatpush.msrb.mxu2 %v493_v23  ;;  %2884 = vmatpush.msrb.mxu3 %v833_v24  ;;  %v2353_v39 = vld [vmem:[#allocation5 + $0x4438] sm:$0xff] }
 0x120   :  { %2826 = vmatmul.f32.vlgmr.msrb.gmra.mxu0 %v7300_v31  ;;  %2910 = vmatpush.msra.mxu1 %v1753_v26  ;;  %v1673_v40 = vld [vmem:[#allocation5 + $0x2ef8] sm:$0xff] }
 0x121   :  { %2890 = vmatpush.msra.mxu0 %v1433_v27  ;;  %2930 = vmatpush.msra.mxu2 %v2073_v28  ;;  %v1353_v41 = vld [vmem:[#allocation5 + $0x24f8] sm:$0xff]  ;;  %v7303_v27 = vld [vmem:[#allocation2 + $0x8] sm:$0xff]  ;;  %v474_v28 = vld [vmem:[#allocation5 + $0x980] sm:$0xff] }
 0x122   :  { %2885 = vmatpush.msrb.mxu3 %v813_v29  ;;  %2911 = vmatpush.msra.mxu1 %v1733_v30  ;;  %v1993_v42 = vld [vmem:[#allocation5 + $0x38f8] sm:$0xff]  ;;  %v794_v29 = vld [vmem:[#allocation5 + $0x1380] sm:$0xff] }
 0x123   :  { %2891 = vmatpush.msra.mxu0 %v1413_v32  ;;  %2931 = vmatpush.msra.mxu2 %v2053_v33  ;;  %v2333_v43 = vld [vmem:[#allocation5 + $0x4398] sm:$0xff]  ;;  %v1114_v30 = vld [vmem:[#allocation5 + $0x1d80] sm:$0xff]  ;;  %v7306_v33 = vld [vmem:[#allocation2] sm:$0xff] }
 0x124   :  { %2950 = vmatpush.msra.mxu3 %v2393_v34  ;;  %2912 = vmatpush.msra.mxu1 %v1713_v35  ;;  %v1653_v44 = vld [vmem:[#allocation5 + $0x2e58] sm:$0xff]  ;;  %v454_v35 = vld [vmem:[#allocation5 + $0x8e0] sm:$0xff] }
 0x125   :  { %2892 = vmatpush.msra.mxu0 %v1393_v0  ;;  %2932 = vmatpush.msra.mxu2 %v2033_v36  ;;  %v1333_v45 = vld [vmem:[#allocation5 + $0x2458] sm:$0xff]  ;;  %v774_v0 = vld [vmem:[#allocation5 + $0x12e0] sm:$0xff] }
 0x126   :  { %2951 = vmatpush.msra.mxu3 %v2373_v37  ;;  %2913 = vmatpush.msra.mxu1 %v1693_v15  ;;  %v1973_v46 = vld [vmem:[#allocation5 + $0x3858] sm:$0xff]  ;;  %v1094_v36 = vld [vmem:[#allocation5 + $0x1ce0] sm:$0xff] }
 0x127   :  { %2893 = vmatpush.msra.mxu0 %v1373_v38  ;;  %2933 = vmatpush.msra.mxu2 %v2013_v1  ;;  %v2313_v20 = vld [vmem:[#allocation5 + $0x42f8] sm:$0xff]  ;;  %v1434_v37 = vld [vmem:[#allocation5 + $0x2780] sm:$0xff] }
 0x128   :  { %2952 = vmatpush.msra.mxu3 %v2353_v39  ;;  %2914 = vmatpush.msra.mxu1 %v1673_v40  ;;  %v1633_v47 = vld [vmem:[#allocation5 + $0x2db8] sm:$0xff]  ;;  %v434_v15 = vld [vmem:[#allocation5 + $0x840] sm:$0xff] }
 0x129   :  { %2894 = vmatpush.msra.mxu0 %v1353_v41  ;;  %2934 = vmatpush.msra.mxu2 %v1993_v42  ;;  %v1313_v48 = vld [vmem:[#allocation5 + $0x23b8] sm:$0xff]  ;;  %v754_v38 = vld [vmem:[#allocation5 + $0x1240] sm:$0xff] }
 0x12a   :  { %2953 = vmatpush.msra.mxu3 %v2333_v43  ;;  %2915 = vmatpush.msra.mxu1 %v1653_v44  ;;  %v1953_v49 = vld [vmem:[#allocation5 + $0x37b8] sm:$0xff]  ;;  %v1074_v1 = vld [vmem:[#allocation5 + $0x1c40] sm:$0xff]  ;;  %v7312_v44 = vld [vmem:[#allocation2 + $0x28] sm:$0xff] }
 0x12b   :  { %2895 = vmatpush.msra.mxu0 %v1333_v45  ;;  %2935 = vmatpush.msra.mxu2 %v1973_v46  ;;  %v2293_v59 = vld [vmem:[#allocation5 + $0x4258] sm:$0xff]  ;;  %v1414_v39 = vld [vmem:[#allocation5 + $0x26e0] sm:$0xff] }
 0x12c   :  { %v1613_v25 = vld [vmem:[#allocation5 + $0x2d18] sm:$0xff]  ;;  %2954 = vmatpush.msra.mxu3 %v2313_v20  ;;  %2916 = vmatpush.msra.mxu1 %v1633_v47  ;;  %v414_v40 = vld [vmem:[#allocation5 + $0x7a0] sm:$0xff] }
 0x12d   :  { %v1293_v50 = vld [vmem:[#allocation5 + $0x2318] sm:$0xff]  ;;  %2896 = vmatpush.msra.mxu0 %v1313_v48  ;;  %2936 = vmatpush.msra.mxu2 %v1953_v49  ;;  %v734_v41 = vld [vmem:[#allocation5 + $0x11a0] sm:$0xff] }
 0x12e   :  { %v1933_v51 = vld [vmem:[#allocation5 + $0x3718] sm:$0xff]  ;;  %2955 = vmatpush.msra.mxu3 %v2293_v59  ;;  %2917 = vmatpush.msra.mxu1 %v1613_v25  ;;  %v1054_v42 = vld [vmem:[#allocation5 + $0x1ba0] sm:$0xff] }
 0x12f   :  { %v2273_v52 = vld [vmem:[#allocation5 + $0x41b8] sm:$0xff]  ;;  %2897 = vmatpush.msra.mxu0 %v1293_v50  ;;  %2937 = vmatpush.msra.mxu2 %v1933_v51  ;;  %v1394_v43 = vld [vmem:[#allocation5 + $0x2640] sm:$0xff]  ;;  %v7319_v51 = vld [vmem:[#allocation2 + $0x20] sm:$0xff] }
 0x130   :  { %v1593_v53 = vld [vmem:[#allocation5 + $0x2c78] sm:$0xff]  ;;  %2956 = vmatpush.msra.mxu3 %v2273_v52  ;;  %2866 = vmatmul.f32.vlgmr.msrb.gmra.mxu2 %v7303_v27  ;;  %v394_v45 = vld [vmem:[#allocation5 + $0x700] sm:$0xff] }
 0x131   :  { %v1273_v2 = vld [vmem:[#allocation5 + $0x2278] sm:$0xff]  ;;  %2918 = vmatpush.msra.mxu1 %v1593_v53  ;;  %v714_v46 = vld [vmem:[#allocation5 + $0x1100] sm:$0xff] }
 0x132   :  { %v1913_v54 = vld [vmem:[#allocation5 + $0x3678] sm:$0xff]  ;;  %2898 = vmatpush.msra.mxu0 %v1273_v2  ;;  %2846 = vmatmul.f32.vlgmr.msrb.gmra.mxu1 %v7306_v33  ;;  %v1034_v20 = vld [vmem:[#allocation5 + $0x1b00] sm:$0xff] }
 0x133   :  { %v2253_v55 = vld [vmem:[#allocation5 + $0x4118] sm:$0xff]  ;;  %2938 = vmatpush.msra.mxu2 %v1913_v54  ;;  %v7315_v47 = vld [vmem:[#allocation2 + $0x18] sm:$0xff] }
 0x134   :  { %v1573_v56 = vld [vmem:[#allocation5 + $0x2bd8] sm:$0xff]  ;;  %2957 = vmatpush.msra.mxu3 %v2253_v55  ;;  %v1374_v48 = vld [vmem:[#allocation5 + $0x25a0] sm:$0xff] }
 0x135   :  { %v1253_v57 = vld [vmem:[#allocation5 + $0x21d8] sm:$0xff]  ;;  %2919 = vmatpush.msra.mxu1 %v1573_v56  ;;  %v374_v49 = vld [vmem:[#allocation5 + $0x660] sm:$0xff] }
 0x136   :  { %v1893_v58 = vld [vmem:[#allocation5 + $0x35d8] sm:$0xff]  ;;  %2899 = vmatpush.msra.mxu0 %v1253_v57  ;;  %v694_v59 = vld [vmem:[#allocation5 + $0x1060] sm:$0xff] }
 0x137   :  { %v2233_v60 = vld [vmem:[#allocation5 + $0x4078] sm:$0xff]  ;;  %2939 = vmatpush.msra.mxu2 %v1893_v58  ;;  %v1014_v25 = vld [vmem:[#allocation5 + $0x1a60] sm:$0xff] }
 0x138   :  { %v1553_v61 = vld [vmem:[#allocation5 + $0x2b38] sm:$0xff]  ;;  %2958 = vmatpush.msra.mxu3 %v2233_v60  ;;  %v1354_v50 = vld [vmem:[#allocation5 + $0x2500] sm:$0xff] }
 0x139   :  { %v1233_v62 = vld [vmem:[#allocation5 + $0x2138] sm:$0xff]  ;;  %2920 = vmatpush.msra.mxu1 %v1553_v61  ;;  %v354_v52 = vld [vmem:[#allocation5 + $0x5c0] sm:$0xff] }
 0x13a   :  { %v1873_v63 = vld [vmem:[#allocation5 + $0x3538] sm:$0xff]  ;;  %2900 = vmatpush.msra.mxu0 %v1233_v62  ;;  %v674_v53 = vld [vmem:[#allocation5 + $0xfc0] sm:$0xff] }
 0x13b   :  { %v2213_v3 = vld [vmem:[#allocation5 + $0x3fd8] sm:$0xff]  ;;  %2940 = vmatpush.msra.mxu2 %v1873_v63  ;;  %v994_v2 = vld [vmem:[#allocation5 + $0x19c0] sm:$0xff] }
 0x13c   :  { %v1533_v4 = vld [vmem:[#allocation5 + $0x2a98] sm:$0xff]  ;;  %2959 = vmatpush.msra.mxu3 %v2213_v3  ;;  %v1334_v54 = vld [vmem:[#allocation5 + $0x2460] sm:$0xff] }
 0x13d   :  { %v1213_v5 = vld [vmem:[#allocation5 + $0x2098] sm:$0xff]  ;;  %2921 = vmatpush.msra.mxu1 %v1533_v4  ;;  %v334_v55 = vld [vmem:[#allocation5 + $0x520] sm:$0xff] }
 0x13e   :  { %v1853_v6 = vld [vmem:[#allocation5 + $0x3498] sm:$0xff]  ;;  %2901 = vmatpush.msra.mxu0 %v1213_v5  ;;  %v654_v56 = vld [vmem:[#allocation5 + $0xf20] sm:$0xff] }
 0x13f   :  { %v2193_v7 = vld [vmem:[#allocation5 + $0x3f38] sm:$0xff]  ;;  %2941 = vmatpush.msra.mxu2 %v1853_v6  ;;  %v974_v57 = vld [vmem:[#allocation5 + $0x1920] sm:$0xff] }
 0x140   :  { %v1513_v8 = vld [vmem:[#allocation5 + $0x29f8] sm:$0xff]  ;;  %2960 = vmatpush.msra.mxu3 %v2193_v7  ;;  %v1314_v58 = vld [vmem:[#allocation5 + $0x23c0] sm:$0xff] }
 0x141   :  { %v1193_v9 = vld [vmem:[#allocation5 + $0x1ff8] sm:$0xff]  ;;  %2922 = vmatpush.msra.mxu1 %v1513_v8  ;;  %v314_v60 = vld [vmem:[#allocation5 + $0x480] sm:$0xff] }
 0x142   :  { %v1833_v10 = vld [vmem:[#allocation5 + $0x33f8] sm:$0xff]  ;;  %2902 = vmatpush.msra.mxu0 %v1193_v9  ;;  %v634_v61 = vld [vmem:[#allocation5 + $0xe80] sm:$0xff] }
 0x143   :  { %v2173_v11 = vld [vmem:[#allocation5 + $0x3e98] sm:$0xff]  ;;  %2942 = vmatpush.msra.mxu2 %v1833_v10  ;;  %v954_v62 = vld [vmem:[#allocation5 + $0x1880] sm:$0xff] }
 0x144   :  { %v1493_v12 = vld [vmem:[#allocation5 + $0x2958] sm:$0xff]  ;;  %2961 = vmatpush.msra.mxu3 %v2173_v11  ;;  %v1294_v63 = vld [vmem:[#allocation5 + $0x2320] sm:$0xff] }
 0x145   :  { %v1173_v13 = vld [vmem:[#allocation5 + $0x1f58] sm:$0xff]  ;;  %2923 = vmatpush.msra.mxu1 %v1493_v12  ;;  %v294_v3 = vld [vmem:[#allocation5 + $0x3e0] sm:$0xff] }
 0x146   :  { %v1813_v14 = vld [vmem:[#allocation5 + $0x3358] sm:$0xff]  ;;  %2903 = vmatpush.msra.mxu0 %v1173_v13  ;;  %v614_v4 = vld [vmem:[#allocation5 + $0xde0] sm:$0xff] }
 0x147   :  { %v2153_v16 = vld [vmem:[#allocation5 + $0x3df8] sm:$0xff]  ;;  %2943 = vmatpush.msra.mxu2 %v1813_v14  ;;  %v934_v5 = vld [vmem:[#allocation5 + $0x17e0] sm:$0xff] }
 0x148   :  { %v1473_v17 = vld [vmem:[#allocation5 + $0x28b8] sm:$0xff]  ;;  %2962 = vmatpush.msra.mxu3 %v2153_v16  ;;  %v1274_v6 = vld [vmem:[#allocation5 + $0x2280] sm:$0xff] }
 0x149   :  { %v1153_v18 = vld [vmem:[#allocation5 + $0x1eb8] sm:$0xff]  ;;  %2924 = vmatpush.msra.mxu1 %v1473_v17  ;;  %v274_v7 = vld [vmem:[#allocation5 + $0x340] sm:$0xff] }
 0x14a   :  { %v1793_v19 = vld [vmem:[#allocation5 + $0x32b8] sm:$0xff]  ;;  %2904 = vmatpush.msra.mxu0 %v1153_v18  ;;  %v594_v8 = vld [vmem:[#allocation5 + $0xd40] sm:$0xff] }
 0x14b   :  { %v2133_v21 = vld [vmem:[#allocation5 + $0x3d58] sm:$0xff]  ;;  %2944 = vmatpush.msra.mxu2 %v1793_v19  ;;  %v914_v9 = vld [vmem:[#allocation5 + $0x1740] sm:$0xff] }
 0x14c   :  { %v1133_v22 = vld [vmem:[#allocation5 + $0x1e18] sm:$0xff]  ;;  %2963 = vmatpush.msra.mxu3 %v2133_v21  ;;  %v1254_v10 = vld [vmem:[#allocation5 + $0x21e0] sm:$0xff] }
 0x14d   :  { %v1453_v23 = vld [vmem:[#allocation5 + $0x2818] sm:$0xff]  ;;  %2905 = vmatpush.msra.mxu0 %v1133_v22  ;;  %v254_v11 = vld [vmem:[#allocation5 + $0x2a0] sm:$0xff] }
 0x14e   :  { %v1773_v24 = vld [vmem:[#allocation5 + $0x3218] sm:$0xff]  ;;  %2925 = vmatpush.msra.mxu1 %v1453_v23  ;;  %2906 = vmatmul.f32.vlgmr.msra.gmra.mxu0 %v7315_v47  ;;  %v574_v12 = vld [vmem:[#allocation5 + $0xca0] sm:$0xff] }
 0x14f   :  { %v2113_v26 = vld [vmem:[#allocation5 + $0x3cb8] sm:$0xff]  ;;  %2945 = vmatpush.msra.mxu2 %v1773_v24  ;;  %2970 = vmatpush.msrb.mxu0 %v474_v28  ;;  %v894_v13 = vld [vmem:[#allocation5 + $0x16a0] sm:$0xff] }
 0x150   :  { %2964 = vmatpush.msra.mxu3 %v2113_v26  ;;  %v2093_v32 = vld [vmem:[#allocation5 + $0x3c18] sm:$0xff]  ;;  %2990 = vmatpush.msrb.mxu1 %v794_v29  ;;  %v1234_v14 = vld [vmem:[#allocation5 + $0x2140] sm:$0xff] }
 0x151   :  { %v7309_v34 = vld [vmem:[#allocation2 + $0x10] sm:$0xff]  ;;  %3010 = vmatpush.msrb.mxu2 %v1114_v30  ;;  %2971 = vmatpush.msrb.mxu0 %v454_v35  ;;  %v234_v16 = vld [vmem:[#allocation5 + $0x200] sm:$0xff] }
 0x152   :  { %2886 = vmatmul.f32.vlgmr.msrb.gmra.mxu3 %v7309_v34  ;;  %2991 = vmatpush.msrb.mxu1 %v774_v0  ;;  %v554_v17 = vld [vmem:[#allocation5 + $0xc00] sm:$0xff] }
 0x153   :  { %2965 = vmatpush.msra.mxu3 %v2093_v32  ;;  %3011 = vmatpush.msrb.mxu2 %v1094_v36  ;;  %v874_v18 = vld [vmem:[#allocation5 + $0x1600] sm:$0xff] }
 0x154   :  { %2972 = vmatpush.msrb.mxu0 %v434_v15  ;;  %2992 = vmatpush.msrb.mxu1 %v754_v38  ;;  %v1214_v19 = vld [vmem:[#allocation5 + $0x20a0] sm:$0xff] }
 0x155   :  { %3030 = vmatpush.msrb.mxu3 %v1434_v37  ;;  %3012 = vmatpush.msrb.mxu2 %v1074_v1  ;;  %v214_v21 = vld [vmem:[#allocation5 + $0x160] sm:$0xff] }
 0x156   :  { %2946 = vmatmul.f32.vlgmr.msra.gmra.mxu2 %v7312_v44  ;;  %2973 = vmatpush.msrb.mxu0 %v414_v40  ;;  %v534_v22 = vld [vmem:[#allocation5 + $0xb60] sm:$0xff] }
 0x157   :  { %3031 = vmatpush.msrb.mxu3 %v1414_v39  ;;  %2993 = vmatpush.msrb.mxu1 %v734_v41  ;;  %v854_v23 = vld [vmem:[#allocation5 + $0x1560] sm:$0xff] }
 0x158   :  { %3013 = vmatpush.msrb.mxu2 %v1054_v42  ;;  %2974 = vmatpush.msrb.mxu0 %v394_v45  ;;  %v1194_v24 = vld [vmem:[#allocation5 + $0x2000] sm:$0xff]  ;;  %v475_v42 = vld [vmem:[#allocation5 + $0x988] sm:$0xff] }
 0x159   :  { %3032 = vmatpush.msrb.mxu3 %v1394_v43  ;;  %2994 = vmatpush.msrb.mxu1 %v714_v46  ;;  %v194_v26 = vld [vmem:[#allocation5 + $0xc0] sm:$0xff] }
 0x15a   :  { %2966 = vmatmul.f32.vlgmr.msra.gmra.mxu3 %v7300_v31  ;;  %3014 = vmatpush.msrb.mxu2 %v1034_v20  ;;  %v514_v28 = vld [vmem:[#allocation5 + $0xac0] sm:$0xff]  ;;  %v455_v20 = vld [vmem:[#allocation5 + $0x8e8] sm:$0xff] }
 0x15b   :  { %3033 = vmatpush.msrb.mxu3 %v1374_v48  ;;  %2926 = vmatmul.f32.vlgmr.msra.gmra.mxu1 %v7319_v51  ;;  %v834_v29 = vld [vmem:[#allocation5 + $0x14c0] sm:$0xff] }
 0x15c   :  { %2975 = vmatpush.msrb.mxu0 %v374_v49  ;;  %2995 = vmatpush.msrb.mxu1 %v694_v59  ;;  %v1174_v30 = vld [vmem:[#allocation5 + $0x1f60] sm:$0xff] }
 0x15d   :  { %3015 = vmatpush.msrb.mxu2 %v1014_v25  ;;  %3034 = vmatpush.msrb.mxu3 %v1354_v50  ;;  %v174_v32 = vld [vmem:[#allocation5 + $0x20] sm:$0xff]  ;;  %v435_v25 = vld [vmem:[#allocation5 + $0x848] sm:$0xff] }
 0x15e   :  { %2976 = vmatpush.msrb.mxu0 %v354_v52  ;;  %2996 = vmatpush.msrb.mxu1 %v674_v53  ;;  %v494_v35 = vld [vmem:[#allocation5 + $0xa20] sm:$0xff] }
 0x15f   :  { %3016 = vmatpush.msrb.mxu2 %v994_v2  ;;  %3035 = vmatpush.msrb.mxu3 %v1334_v54  ;;  %v814_v0 = vld [vmem:[#allocation5 + $0x1420] sm:$0xff]  ;;  %v415_v2 = vld [vmem:[#allocation5 + $0x7a8] sm:$0xff] }
 0x160   :  { %2977 = vmatpush.msrb.mxu0 %v334_v55  ;;  %2997 = vmatpush.msrb.mxu1 %v654_v56  ;;  %v1154_v36 = vld [vmem:[#allocation5 + $0x1ec0] sm:$0xff] }
 0x161   :  { %3017 = vmatpush.msrb.mxu2 %v974_v57  ;;  %3036 = vmatpush.msrb.mxu3 %v1314_v58  ;;  %v1754_v37 = vld [vmem:[#allocation5 + $0x3180] sm:$0xff]  ;;  %v395_v57 = vld [vmem:[#allocation5 + $0x708] sm:$0xff] }
 0x162   :  { %2978 = vmatpush.msrb.mxu0 %v314_v60  ;;  %2998 = vmatpush.msrb.mxu1 %v634_v61  ;;  %v2074_v15 = vld [vmem:[#allocation5 + $0x3b80] sm:$0xff] }
 0x163   :  { %3018 = vmatpush.msrb.mxu2 %v954_v62  ;;  %3037 = vmatpush.msrb.mxu3 %v1294_v63  ;;  %v2394_v38 = vld [vmem:[#allocation5 + $0x4580] sm:$0xff]  ;;  %v375_v62 = vld [vmem:[#allocation5 + $0x668] sm:$0xff] }
 0x164   :  { %2979 = vmatpush.msrb.mxu0 %v294_v3  ;;  %2999 = vmatpush.msrb.mxu1 %v614_v4  ;;  %v1134_v1 = vld [vmem:[#allocation5 + $0x1e20] sm:$0xff] }
 0x165   :  { %3019 = vmatpush.msrb.mxu2 %v934_v5  ;;  %3038 = vmatpush.msrb.mxu3 %v1274_v6  ;;  %v1734_v39 = vld [vmem:[#allocation5 + $0x30e0] sm:$0xff]  ;;  %v355_v5 = vld [vmem:[#allocation5 + $0x5c8] sm:$0xff] }
 0x166   :  { %2980 = vmatpush.msrb.mxu0 %v274_v7  ;;  %3000 = vmatpush.msrb.mxu1 %v594_v8  ;;  %v2054_v40 = vld [vmem:[#allocation5 + $0x3ae0] sm:$0xff] }
 0x167   :  { %3020 = vmatpush.msrb.mxu2 %v914_v9  ;;  %3039 = vmatpush.msrb.mxu3 %v1254_v10  ;;  %v2374_v41 = vld [vmem:[#allocation5 + $0x44e0] sm:$0xff]  ;;  %v335_v9 = vld [vmem:[#allocation5 + $0x528] sm:$0xff] }
 0x168   :  { %2981 = vmatpush.msrb.mxu0 %v254_v11  ;;  %3001 = vmatpush.msrb.mxu1 %v574_v12  ;;  %v1714_v43 = vld [vmem:[#allocation5 + $0x3040] sm:$0xff] }
 0x169   :  { %3021 = vmatpush.msrb.mxu2 %v894_v13  ;;  %3040 = vmatpush.msrb.mxu3 %v1234_v14  ;;  %v2034_v45 = vld [vmem:[#allocation5 + $0x3a40] sm:$0xff]  ;;  %v315_v13 = vld [vmem:[#allocation5 + $0x488] sm:$0xff] }
 0x16a   :  { %2982 = vmatpush.msrb.mxu0 %v234_v16  ;;  %3002 = vmatpush.msrb.mxu1 %v554_v17  ;;  %v2354_v46 = vld [vmem:[#allocation5 + $0x4440] sm:$0xff] }
 0x16b   :  { %3022 = vmatpush.msrb.mxu2 %v874_v18  ;;  %3041 = vmatpush.msrb.mxu3 %v1214_v19  ;;  %v1694_v48 = vld [vmem:[#allocation5 + $0x2fa0] sm:$0xff]  ;;  %v295_v18 = vld [vmem:[#allocation5 + $0x3e8] sm:$0xff] }
 0x16c   :  { %2983 = vmatpush.msrb.mxu0 %v214_v21  ;;  %3003 = vmatpush.msrb.mxu1 %v534_v22  ;;  %v2014_v49 = vld [vmem:[#allocation5 + $0x39a0] sm:$0xff] }
 0x16d   :  { %3023 = vmatpush.msrb.mxu2 %v854_v23  ;;  %3042 = vmatpush.msrb.mxu3 %v1194_v24  ;;  %v2334_v59 = vld [vmem:[#allocation5 + $0x43a0] sm:$0xff]  ;;  %v275_v23 = vld [vmem:[#allocation5 + $0x348] sm:$0xff] }
 0x16e   :  { %2984 = vmatpush.msrb.mxu0 %v194_v26  ;;  %3004 = vmatpush.msrb.mxu1 %v514_v28  ;;  %v1674_v50 = vld [vmem:[#allocation5 + $0x2f00] sm:$0xff] }
 0x16f   :  { %3024 = vmatpush.msrb.mxu2 %v834_v29  ;;  %3043 = vmatpush.msrb.mxu3 %v1174_v30  ;;  %v1994_v52 = vld [vmem:[#allocation5 + $0x3900] sm:$0xff]  ;;  %v255_v29 = vld [vmem:[#allocation5 + $0x2a8] sm:$0xff] }
 0x170   :  { %2985 = vmatpush.msrb.mxu0 %v174_v32  ;;  %3005 = vmatpush.msrb.mxu1 %v494_v35  ;;  %v2314_v53 = vld [vmem:[#allocation5 + $0x4300] sm:$0xff] }
 0x171   :  { %3025 = vmatpush.msrb.mxu2 %v814_v0  ;;  %3044 = vmatpush.msrb.mxu3 %v1154_v36  ;;  %v1654_v54 = vld [vmem:[#allocation5 + $0x2e60] sm:$0xff]  ;;  %v235_v0 = vld [vmem:[#allocation5 + $0x208] sm:$0xff] }
 0x172   :  { %3050 = vmatpush.msra.mxu0 %v1754_v37  ;;  %3070 = vmatpush.msra.mxu1 %v2074_v15  ;;  %v1974_v55 = vld [vmem:[#allocation5 + $0x3860] sm:$0xff] }
 0x173   :  { %3090 = vmatpush.msra.mxu2 %v2394_v38  ;;  %3045 = vmatpush.msrb.mxu3 %v1134_v1  ;;  %v2294_v56 = vld [vmem:[#allocation5 + $0x4260] sm:$0xff]  ;;  %v215_v38 = vld [vmem:[#allocation5 + $0x168] sm:$0xff] }
 0x174   :  { %3051 = vmatpush.msra.mxu0 %v1734_v39  ;;  %3071 = vmatpush.msra.mxu1 %v2054_v40  ;;  %v1634_v58 = vld [vmem:[#allocation5 + $0x2dc0] sm:$0xff] }
 0x175   :  { %3091 = vmatpush.msra.mxu2 %v2374_v41  ;;  %3110 = vmatpush.msra.mxu3 %v475_v42  ;;  %v1954_v60 = vld [vmem:[#allocation5 + $0x37c0] sm:$0xff]  ;;  %v195_v41 = vld [vmem:[#allocation5 + $0xc8] sm:$0xff] }
 0x176   :  { %3052 = vmatpush.msra.mxu0 %v1714_v43  ;;  %3072 = vmatpush.msra.mxu1 %v2034_v45  ;;  %v2274_v61 = vld [vmem:[#allocation5 + $0x41c0] sm:$0xff]  ;;  %v795_v42 = vld [vmem:[#allocation5 + $0x1388] sm:$0xff] }
 0x177   :  { %3092 = vmatpush.msra.mxu2 %v2354_v46  ;;  %3111 = vmatpush.msra.mxu3 %v455_v20  ;;  %v1614_v63 = vld [vmem:[#allocation5 + $0x2d20] sm:$0xff]  ;;  %v1115_v43 = vld [vmem:[#allocation5 + $0x1d88] sm:$0xff] }
 0x178   :  { %3053 = vmatpush.msra.mxu0 %v1694_v48  ;;  %3073 = vmatpush.msra.mxu1 %v2014_v49  ;;  %v1934_v3 = vld [vmem:[#allocation5 + $0x3720] sm:$0xff]  ;;  %v1435_v45 = vld [vmem:[#allocation5 + $0x2788] sm:$0xff] }
 0x179   :  { %3093 = vmatpush.msra.mxu2 %v2334_v59  ;;  %3112 = vmatpush.msra.mxu3 %v435_v25  ;;  %v2254_v4 = vld [vmem:[#allocation5 + $0x4120] sm:$0xff]  ;;  %v175_v46 = vld [vmem:[#allocation5 + $0x28] sm:$0xff] }
 0x17a   :  { %3054 = vmatpush.msra.mxu0 %v1674_v50  ;;  %3074 = vmatpush.msra.mxu1 %v1994_v52  ;;  %v1594_v6 = vld [vmem:[#allocation5 + $0x2c80] sm:$0xff]  ;;  %v775_v20 = vld [vmem:[#allocation5 + $0x12e8] sm:$0xff] }
 0x17b   :  { %3094 = vmatpush.msra.mxu2 %v2314_v53  ;;  %3113 = vmatpush.msra.mxu3 %v415_v2  ;;  %v1914_v7 = vld [vmem:[#allocation5 + $0x3680] sm:$0xff]  ;;  %v1095_v48 = vld [vmem:[#allocation5 + $0x1ce8] sm:$0xff] }
 0x17c   :  { %3055 = vmatpush.msra.mxu0 %v1654_v54  ;;  %3075 = vmatpush.msra.mxu1 %v1974_v55  ;;  %v2234_v8 = vld [vmem:[#allocation5 + $0x4080] sm:$0xff]  ;;  %v1415_v49 = vld [vmem:[#allocation5 + $0x26e8] sm:$0xff] }
 0x17d   :  { %3095 = vmatpush.msra.mxu2 %v2294_v56  ;;  %3114 = vmatpush.msra.mxu3 %v395_v57  ;;  %v1574_v10 = vld [vmem:[#allocation5 + $0x2be0] sm:$0xff]  ;;  %v1755_v59 = vld [vmem:[#allocation5 + $0x3188] sm:$0xff] }
 0x17e   :  { %3056 = vmatpush.msra.mxu0 %v1634_v58  ;;  %3076 = vmatpush.msra.mxu1 %v1954_v60  ;;  %v1894_v11 = vld [vmem:[#allocation5 + $0x35e0] sm:$0xff]  ;;  %v755_v25 = vld [vmem:[#allocation5 + $0x1248] sm:$0xff] }
 0x17f   :  { %3096 = vmatpush.msra.mxu2 %v2274_v61  ;;  %3115 = vmatpush.msra.mxu3 %v375_v62  ;;  %v2214_v12 = vld [vmem:[#allocation5 + $0x3fe0] sm:$0xff]  ;;  %v1075_v50 = vld [vmem:[#allocation5 + $0x1c48] sm:$0xff] }
 0x180   :  { %3057 = vmatpush.msra.mxu0 %v1614_v63  ;;  %3077 = vmatpush.msra.mxu1 %v1934_v3  ;;  %v1554_v14 = vld [vmem:[#allocation5 + $0x2b40] sm:$0xff]  ;;  %v1395_v52 = vld [vmem:[#allocation5 + $0x2648] sm:$0xff] }
 0x181   :  { %3097 = vmatpush.msra.mxu2 %v2254_v4  ;;  %3116 = vmatpush.msra.mxu3 %v355_v5  ;;  %v1874_v16 = vld [vmem:[#allocation5 + $0x3540] sm:$0xff]  ;;  %v1735_v53 = vld [vmem:[#allocation5 + $0x30e8] sm:$0xff] }
 0x182   :  { %3058 = vmatpush.msra.mxu0 %v1594_v6  ;;  %3078 = vmatpush.msra.mxu1 %v1914_v7  ;;  %v2194_v17 = vld [vmem:[#allocation5 + $0x3f40] sm:$0xff]  ;;  %v735_v2 = vld [vmem:[#allocation5 + $0x11a8] sm:$0xff] }
 0x183   :  { %3098 = vmatpush.msra.mxu2 %v2234_v8  ;;  %3117 = vmatpush.msra.mxu3 %v335_v9  ;;  %v1534_v19 = vld [vmem:[#allocation5 + $0x2aa0] sm:$0xff]  ;;  %v1055_v54 = vld [vmem:[#allocation5 + $0x1ba8] sm:$0xff] }
 0x184   :  { %3059 = vmatpush.msra.mxu0 %v1574_v10  ;;  %3079 = vmatpush.msra.mxu1 %v1894_v11  ;;  %v1854_v21 = vld [vmem:[#allocation5 + $0x34a0] sm:$0xff]  ;;  %v1375_v55 = vld [vmem:[#allocation5 + $0x25a8] sm:$0xff] }
 0x185   :  { %3099 = vmatpush.msra.mxu2 %v2214_v12  ;;  %3118 = vmatpush.msra.mxu3 %v315_v13  ;;  %v2174_v22 = vld [vmem:[#allocation5 + $0x3ea0] sm:$0xff]  ;;  %v1715_v56 = vld [vmem:[#allocation5 + $0x3048] sm:$0xff] }
 0x186   :  { %3060 = vmatpush.msra.mxu0 %v1554_v14  ;;  %3080 = vmatpush.msra.mxu1 %v1874_v16  ;;  %v1514_v24 = vld [vmem:[#allocation5 + $0x2a00] sm:$0xff]  ;;  %v715_v57 = vld [vmem:[#allocation5 + $0x1108] sm:$0xff] }
 0x187   :  { %3100 = vmatpush.msra.mxu2 %v2194_v17  ;;  %3119 = vmatpush.msra.mxu3 %v295_v18  ;;  %v1834_v26 = vld [vmem:[#allocation5 + $0x3400] sm:$0xff]  ;;  %v1035_v58 = vld [vmem:[#allocation5 + $0x1b08] sm:$0xff] }
 0x188   :  { %3061 = vmatpush.msra.mxu0 %v1534_v19  ;;  %3081 = vmatpush.msra.mxu1 %v1854_v21  ;;  %v2154_v28 = vld [vmem:[#allocation5 + $0x3e00] sm:$0xff]  ;;  %v1355_v60 = vld [vmem:[#allocation5 + $0x2508] sm:$0xff] }
 0x189   :  { %3101 = vmatpush.msra.mxu2 %v2174_v22  ;;  %3120 = vmatpush.msra.mxu3 %v275_v23  ;;  %v1494_v30 = vld [vmem:[#allocation5 + $0x2960] sm:$0xff]  ;;  %v1695_v61 = vld [vmem:[#allocation5 + $0x2fa8] sm:$0xff] }
 0x18a   :  { %v1814_v32 = vld [vmem:[#allocation5 + $0x3360] sm:$0xff]  ;;  %3062 = vmatpush.msra.mxu0 %v1514_v24  ;;  %3082 = vmatpush.msra.mxu1 %v1834_v26  ;;  %v695_v62 = vld [vmem:[#allocation5 + $0x1068] sm:$0xff] }
 0x18b   :  { %v2134_v35 = vld [vmem:[#allocation5 + $0x3d60] sm:$0xff]  ;;  %3102 = vmatpush.msra.mxu2 %v2154_v28  ;;  %3121 = vmatpush.msra.mxu3 %v255_v29  ;;  %v1015_v63 = vld [vmem:[#allocation5 + $0x1a68] sm:$0xff] }
 0x18c   :  { %v1474_v36 = vld [vmem:[#allocation5 + $0x28c0] sm:$0xff]  ;;  %3063 = vmatpush.msra.mxu0 %v1494_v30  ;;  %3083 = vmatpush.msra.mxu1 %v1814_v32  ;;  %v1335_v3 = vld [vmem:[#allocation5 + $0x2468] sm:$0xff] }
 0x18d   :  { %v1794_v37 = vld [vmem:[#allocation5 + $0x32c0] sm:$0xff]  ;;  %3103 = vmatpush.msra.mxu2 %v2134_v35  ;;  %3122 = vmatpush.msra.mxu3 %v235_v0  ;;  %v1675_v4 = vld [vmem:[#allocation5 + $0x2f08] sm:$0xff] }
 0x18e   :  { %v2114_v15 = vld [vmem:[#allocation5 + $0x3cc0] sm:$0xff]  ;;  %3064 = vmatpush.msra.mxu0 %v1474_v36  ;;  %3084 = vmatpush.msra.mxu1 %v1794_v37  ;;  %v675_v5 = vld [vmem:[#allocation5 + $0xfc8] sm:$0xff] }
 0x18f   :  { %v1454_v1 = vld [vmem:[#allocation5 + $0x2820] sm:$0xff]  ;;  %3104 = vmatpush.msra.mxu2 %v2114_v15  ;;  %3123 = vmatpush.msra.mxu3 %v215_v38  ;;  %v1315_v6 = vld [vmem:[#allocation5 + $0x23c8] sm:$0xff] }
 0x190   :  { %v1774_v39 = vld [vmem:[#allocation5 + $0x3220] sm:$0xff]  ;;  %3026 = vmatmul.f32.vlgmr.msrb.gmra.mxu2 %v7309_v34  ;;  %3065 = vmatpush.msra.mxu0 %v1454_v1  ;;  %v1655_v7 = vld [vmem:[#allocation5 + $0x2e68] sm:$0xff] }
 0x191   :  { %v2094_v40 = vld [vmem:[#allocation5 + $0x3c20] sm:$0xff]  ;;  %3085 = vmatpush.msra.mxu1 %v1774_v39  ;;  %3124 = vmatpush.msra.mxu3 %v195_v41  ;;  %v655_v8 = vld [vmem:[#allocation5 + $0xf28] sm:$0xff] }
 0x192   :  { %3105 = vmatpush.msra.mxu2 %v2094_v40  ;;  %2986 = vmatmul.f32.vlgmr.msrb.gmra.mxu0 %v7306_v33  ;;  %v975_v9 = vld [vmem:[#allocation5 + $0x1928] sm:$0xff] }
 0x193   :  { %3006 = vmatmul.f32.vlgmr.msrb.gmra.mxu1 %v7303_v27  ;;  %3046 = vmatmul.f32.vlgmr.msrb.gmra.mxu3 %v7315_v47  ;;  %v1295_v10 = vld [vmem:[#allocation5 + $0x2328] sm:$0xff] }
 0x194   :  { %3130 = vmatpush.msrb.mxu0 %v795_v42  ;;  %3150 = vmatpush.msrb.mxu1 %v1115_v43  ;;  %v1635_v11 = vld [vmem:[#allocation5 + $0x2dc8] sm:$0xff] }
 0x195   :  { %3170 = vmatpush.msrb.mxu2 %v1435_v45  ;;  %3125 = vmatpush.msra.mxu3 %v175_v46  ;;  %v635_v12 = vld [vmem:[#allocation5 + $0xe88] sm:$0xff] }
 0x196   :  { %3131 = vmatpush.msrb.mxu0 %v775_v20  ;;  %3151 = vmatpush.msrb.mxu1 %v1095_v48  ;;  %v955_v13 = vld [vmem:[#allocation5 + $0x1888] sm:$0xff] }
 0x197   :  { %3171 = vmatpush.msrb.mxu2 %v1415_v49  ;;  %3190 = vmatpush.msrb.mxu3 %v1755_v59  ;;  %v1275_v14 = vld [vmem:[#allocation5 + $0x2288] sm:$0xff] }
 0x198   :  { %3132 = vmatpush.msrb.mxu0 %v755_v25  ;;  %3152 = vmatpush.msrb.mxu1 %v1075_v50  ;;  %v1615_v16 = vld [vmem:[#allocation5 + $0x2d28] sm:$0xff]  ;;  %v476_v25 = vld [vmem:[#allocation5 + $0x990] sm:$0xff] }
 0x199   :  { %3172 = vmatpush.msrb.mxu2 %v1395_v52  ;;  %3191 = vmatpush.msrb.mxu3 %v1735_v53  ;;  %v615_v17 = vld [vmem:[#allocation5 + $0xde8] sm:$0xff] }
 0x19a   :  { %3106 = vmatmul.f32.vlgmr.msra.gmra.mxu2 %v7300_v31  ;;  %3133 = vmatpush.msrb.mxu0 %v735_v2  ;;  %v995_v31 = vld [vmem:[#allocation5 + $0x19c8] sm:$0xff]  ;;  %v456_v2 = vld [vmem:[#allocation5 + $0x8f0] sm:$0xff] }
 0x19b   :  { %3153 = vmatpush.msrb.mxu1 %v1055_v54  ;;  %3173 = vmatpush.msrb.mxu2 %v1375_v55  ;;  %v935_v18 = vld [vmem:[#allocation5 + $0x17e8] sm:$0xff]  ;;  %v796_v54 = vld [vmem:[#allocation5 + $0x1390] sm:$0xff] }
 0x19c   :  { %3192 = vmatpush.msrb.mxu3 %v1715_v56  ;;  %3066 = vmatmul.f32.vlgmr.msra.gmra.mxu0 %v7319_v51  ;;  %v1255_v19 = vld [vmem:[#allocation5 + $0x21e8] sm:$0xff] }
 0x19d   :  { %3134 = vmatpush.msrb.mxu0 %v715_v57  ;;  %3154 = vmatpush.msrb.mxu1 %v1035_v58  ;;  %v1595_v21 = vld [vmem:[#allocation5 + $0x2c88] sm:$0xff]  ;;  %v436_v57 = vld [vmem:[#allocation5 + $0x850] sm:$0xff] }
 0x19e   :  { %3174 = vmatpush.msrb.mxu2 %v1355_v60  ;;  %3193 = vmatpush.msrb.mxu3 %v1695_v61  ;;  %v595_v22 = vld [vmem:[#allocation5 + $0xd48] sm:$0xff]  ;;  %v776_v58 = vld [vmem:[#allocation5 + $0x12f0] sm:$0xff] }
 0x19f   :  { %3086 = vmatmul.f32.vlgmr.msra.gmra.mxu1 %v7312_v44  ;;  %3135 = vmatpush.msrb.mxu0 %v695_v62  ;;  %v915_v23 = vld [vmem:[#allocation5 + $0x1748] sm:$0xff]  ;;  %v416_v62 = vld [vmem:[#allocation5 + $0x7b0] sm:$0xff] }
 0x1a0   :  { %3155 = vmatpush.msrb.mxu1 %v1015_v63  ;;  %3175 = vmatpush.msrb.mxu2 %v1335_v3  ;;  %v1235_v24 = vld [vmem:[#allocation5 + $0x2148] sm:$0xff] }
 0x1a1   :  { %3194 = vmatpush.msrb.mxu3 %v1675_v4  ;;  %3136 = vmatpush.msrb.mxu0 %v675_v5  ;;  %v1575_v26 = vld [vmem:[#allocation5 + $0x2be8] sm:$0xff]  ;;  %v396_v4 = vld [vmem:[#allocation5 + $0x710] sm:$0xff] }
 0x1a2   :  { %3156 = vmatpush.msrb.mxu1 %v995_v31  ;;  %3176 = vmatpush.msrb.mxu2 %v1315_v6  ;;  %v575_v28 = vld [vmem:[#allocation5 + $0xca8] sm:$0xff]  ;;  %v736_v5 = vld [vmem:[#allocation5 + $0x11b0] sm:$0xff] }
 0x1a3   :  { %3195 = vmatpush.msrb.mxu3 %v1655_v7  ;;  %3137 = vmatpush.msrb.mxu0 %v655_v8  ;;  %v895_v29 = vld [vmem:[#allocation5 + $0x16a8] sm:$0xff]  ;;  %v376_v7 = vld [vmem:[#allocation5 + $0x670] sm:$0xff] }
 0x1a4   :  { %3157 = vmatpush.msrb.mxu1 %v975_v9  ;;  %3177 = vmatpush.msrb.mxu2 %v1295_v10  ;;  %v1215_v30 = vld [vmem:[#allocation5 + $0x20a8] sm:$0xff]  ;;  %v716_v8 = vld [vmem:[#allocation5 + $0x1110] sm:$0xff] }
 0x1a5   :  { %3196 = vmatpush.msrb.mxu3 %v1635_v11  ;;  %3138 = vmatpush.msrb.mxu0 %v635_v12  ;;  %v1555_v32 = vld [vmem:[#allocation5 + $0x2b48] sm:$0xff]  ;;  %v356_v10 = vld [vmem:[#allocation5 + $0x5d0] sm:$0xff] }
 0x1a6   :  { %3158 = vmatpush.msrb.mxu1 %v955_v13  ;;  %3178 = vmatpush.msrb.mxu2 %v1275_v14  ;;  %v555_v35 = vld [vmem:[#allocation5 + $0xc08] sm:$0xff]  ;;  %v696_v11 = vld [vmem:[#allocation5 + $0x1070] sm:$0xff] }
 0x1a7   :  { %3197 = vmatpush.msrb.mxu3 %v1615_v16  ;;  %3139 = vmatpush.msrb.mxu0 %v615_v17  ;;  %v875_v0 = vld [vmem:[#allocation5 + $0x1608] sm:$0xff]  ;;  %v336_v12 = vld [vmem:[#allocation5 + $0x530] sm:$0xff] }
 0x1a8   :  { %3159 = vmatpush.msrb.mxu1 %v935_v18  ;;  %3179 = vmatpush.msrb.mxu2 %v1255_v19  ;;  %v1195_v36 = vld [vmem:[#allocation5 + $0x2008] sm:$0xff]  ;;  %v676_v13 = vld [vmem:[#allocation5 + $0xfd0] sm:$0xff] }
 0x1a9   :  { %3198 = vmatpush.msrb.mxu3 %v1595_v21  ;;  %3140 = vmatpush.msrb.mxu0 %v595_v22  ;;  %v1535_v37 = vld [vmem:[#allocation5 + $0x2aa8] sm:$0xff]  ;;  %v656_v17 = vld [vmem:[#allocation5 + $0xf30] sm:$0xff] }
 0x1aa   :  { %3160 = vmatpush.msrb.mxu1 %v915_v23  ;;  %3180 = vmatpush.msrb.mxu2 %v1235_v24  ;;  %v535_v15 = vld [vmem:[#allocation5 + $0xb68] sm:$0xff]  ;;  %v296_v21 = vld [vmem:[#allocation5 + $0x3f0] sm:$0xff] }
 0x1ab   :  { %3199 = vmatpush.msrb.mxu3 %v1575_v26  ;;  %3141 = vmatpush.msrb.mxu0 %v575_v28  ;;  %v855_v38 = vld [vmem:[#allocation5 + $0x1568] sm:$0xff]  ;;  %v636_v22 = vld [vmem:[#allocation5 + $0xe90] sm:$0xff] }
 0x1ac   :  { %3161 = vmatpush.msrb.mxu1 %v895_v29  ;;  %3181 = vmatpush.msrb.mxu2 %v1215_v30  ;;  %v1175_v1 = vld [vmem:[#allocation5 + $0x1f68] sm:$0xff]  ;;  %v276_v26 = vld [vmem:[#allocation5 + $0x350] sm:$0xff] }
 0x1ad   :  { %3200 = vmatpush.msrb.mxu3 %v1555_v32  ;;  %3142 = vmatpush.msrb.mxu0 %v555_v35  ;;  %v1515_v39 = vld [vmem:[#allocation5 + $0x2a08] sm:$0xff]  ;;  %v616_v28 = vld [vmem:[#allocation5 + $0xdf0] sm:$0xff] }
 0x1ae   :  { %3162 = vmatpush.msrb.mxu1 %v875_v0  ;;  %3182 = vmatpush.msrb.mxu2 %v1195_v36  ;;  %v515_v40 = vld [vmem:[#allocation5 + $0xac8] sm:$0xff]  ;;  %v256_v32 = vld [vmem:[#allocation5 + $0x2b0] sm:$0xff] }
 0x1af   :  { %3201 = vmatpush.msrb.mxu3 %v1535_v37  ;;  %3143 = vmatpush.msrb.mxu0 %v535_v15  ;;  %v835_v41 = vld [vmem:[#allocation5 + $0x14c8] sm:$0xff]  ;;  %v596_v35 = vld [vmem:[#allocation5 + $0xd50] sm:$0xff] }
 0x1b0   :  { %v1155_v42 = vld [vmem:[#allocation5 + $0x1ec8] sm:$0xff]  ;;  %3163 = vmatpush.msrb.mxu1 %v855_v38  ;;  %3183 = vmatpush.msrb.mxu2 %v1175_v1  ;;  %v236_v37 = vld [vmem:[#allocation5 + $0x210] sm:$0xff] }
 0x1b1   :  { %v1495_v43 = vld [vmem:[#allocation5 + $0x2968] sm:$0xff]  ;;  %3202 = vmatpush.msrb.mxu3 %v1515_v39  ;;  %3144 = vmatpush.msrb.mxu0 %v515_v40  ;;  %v576_v15 = vld [vmem:[#allocation5 + $0xcb0] sm:$0xff] }
 0x1b2   :  { %v495_v45 = vld [vmem:[#allocation5 + $0xa28] sm:$0xff]  ;;  %3164 = vmatpush.msrb.mxu1 %v835_v41  ;;  %3184 = vmatpush.msrb.mxu2 %v1155_v42  ;;  %v216_v39 = vld [vmem:[#allocation5 + $0x170] sm:$0xff] }
 0x1b3   :  { %v815_v46 = vld [vmem:[#allocation5 + $0x1428] sm:$0xff]  ;;  %3203 = vmatpush.msrb.mxu3 %v1495_v43  ;;  %3145 = vmatpush.msrb.mxu0 %v495_v45  ;;  %v556_v40 = vld [vmem:[#allocation5 + $0xc10] sm:$0xff] }
 0x1b4   :  { %v1135_v20 = vld [vmem:[#allocation5 + $0x1e28] sm:$0xff]  ;;  %3165 = vmatpush.msrb.mxu1 %v815_v46  ;;  %3126 = vmatmul.f32.vlgmr.msra.gmra.mxu3 %v7306_v33  ;;  %v756_v33 = vld [vmem:[#allocation5 + $0x1250] sm:$0xff] }
 0x1b5   :  { %v1475_v48 = vld [vmem:[#allocation5 + $0x28c8] sm:$0xff]  ;;  %3185 = vmatpush.msrb.mxu2 %v1135_v20  ;;  %3146 = vmatmul.f32.vlgmr.msrb.gmra.mxu0 %v7303_v27  ;;  %v196_v43 = vld [vmem:[#allocation5 + $0xd0] sm:$0xff] }
 0x1b6   :  { %v2075_v49 = vld [vmem:[#allocation5 + $0x3b88] sm:$0xff]  ;;  %3204 = vmatpush.msrb.mxu3 %v1475_v48  ;;  %3186 = vmatmul.f32.vlgmr.msrb.gmra.mxu2 %v7315_v47  ;;  %v536_v45 = vld [vmem:[#allocation5 + $0xb70] sm:$0xff] }
 0x1b7   :  { %v2395_v59 = vld [vmem:[#allocation5 + $0x4588] sm:$0xff]  ;;  %3210 = vmatpush.msra.mxu0 %v2075_v49  ;;  %3250 = vmatpush.msra.mxu2 %v476_v25  ;;  %v176_v48 = vld [vmem:[#allocation5 + $0x30] sm:$0xff] }
 0x1b8   :  { %v1455_v50 = vld [vmem:[#allocation5 + $0x2828] sm:$0xff]  ;;  %3230 = vmatpush.msra.mxu1 %v2395_v59  ;;  %v516_v49 = vld [vmem:[#allocation5 + $0xad0] sm:$0xff] }
 0x1b9   :  { %v2055_v52 = vld [vmem:[#allocation5 + $0x3ae8] sm:$0xff]  ;;  %3205 = vmatpush.msrb.mxu3 %v1455_v50  ;;  %3251 = vmatpush.msra.mxu2 %v456_v2  ;;  %v1436_v59 = vld [vmem:[#allocation5 + $0x2790] sm:$0xff] }
 0x1ba   :  { %v2375_v53 = vld [vmem:[#allocation5 + $0x44e8] sm:$0xff]  ;;  %3211 = vmatpush.msra.mxu0 %v2055_v52  ;;  %3166 = vmatmul.f32.vlgmr.msrb.gmra.mxu1 %v7309_v34  ;;  %v316_v34 = vld [vmem:[#allocation5 + $0x490] sm:$0xff] }
 0x1bb   :  { %v2035_v55 = vld [vmem:[#allocation5 + $0x3a48] sm:$0xff]  ;;  %3231 = vmatpush.msra.mxu1 %v2375_v53  ;;  %3270 = vmatpush.msra.mxu3 %v796_v54  ;;  %v1116_v25 = vld [vmem:[#allocation5 + $0x1d90] sm:$0xff] }
 0x1bc   :  { %v2355_v56 = vld [vmem:[#allocation5 + $0x4448] sm:$0xff]  ;;  %3212 = vmatpush.msra.mxu0 %v2035_v55  ;;  %3252 = vmatpush.msra.mxu2 %v436_v57  ;;  %v1756_v50 = vld [vmem:[#allocation5 + $0x3190] sm:$0xff] }
 0x1bd   :  { %v2015_v60 = vld [vmem:[#allocation5 + $0x39a8] sm:$0xff]  ;;  %3232 = vmatpush.msra.mxu1 %v2355_v56  ;;  %3271 = vmatpush.msra.mxu3 %v776_v58  ;;  %v496_v52 = vld [vmem:[#allocation5 + $0xa30] sm:$0xff]  ;;  %v7335_v56 = vld [vmem:[#allocation2 + $0x30] sm:$0xff] }
 0x1be   :  { %v2335_v61 = vld [vmem:[#allocation5 + $0x43a8] sm:$0xff]  ;;  %3213 = vmatpush.msra.mxu0 %v2015_v60  ;;  %3253 = vmatpush.msra.mxu2 %v416_v62  ;;  %v1096_v53 = vld [vmem:[#allocation5 + $0x1cf0] sm:$0xff] }
 0x1bf   :  { %v1995_v63 = vld [vmem:[#allocation5 + $0x3908] sm:$0xff]  ;;  %3233 = vmatpush.msra.mxu1 %v2335_v61  ;;  %3272 = vmatpush.msra.mxu3 %v756_v33  ;;  %v1416_v2 = vld [vmem:[#allocation5 + $0x26f0] sm:$0xff] }
 0x1c0   :  { %v2315_v3 = vld [vmem:[#allocation5 + $0x4308] sm:$0xff]  ;;  %3206 = vmatmul.f32.vlgmr.msrb.gmra.mxu3 %v7319_v51  ;;  %3214 = vmatpush.msra.mxu0 %v1995_v63  ;;  %v1736_v54 = vld [vmem:[#allocation5 + $0x30f0] sm:$0xff] }
 0x1c1   :  { %v1975_v31 = vld [vmem:[#allocation5 + $0x3868] sm:$0xff]  ;;  %3234 = vmatpush.msra.mxu1 %v2315_v3  ;;  %3254 = vmatpush.msra.mxu2 %v396_v4  ;;  %v2076_v55 = vld [vmem:[#allocation5 + $0x3b90] sm:$0xff] }
 0x1c2   :  { %v2295_v6 = vld [vmem:[#allocation5 + $0x4268] sm:$0xff]  ;;  %3273 = vmatpush.msra.mxu3 %v736_v5  ;;  %3215 = vmatpush.msra.mxu0 %v1975_v31  ;;  %v1076_v57 = vld [vmem:[#allocation5 + $0x1c50] sm:$0xff] }
 0x1c3   :  { %v1955_v47 = vld [vmem:[#allocation5 + $0x37c8] sm:$0xff]  ;;  %3235 = vmatpush.msra.mxu1 %v2295_v6  ;;  %3255 = vmatpush.msra.mxu2 %v376_v7  ;;  %v1396_v58 = vld [vmem:[#allocation5 + $0x2650] sm:$0xff] }
 0x1c4   :  { %v2275_v9 = vld [vmem:[#allocation5 + $0x41c8] sm:$0xff]  ;;  %3274 = vmatpush.msra.mxu3 %v716_v8  ;;  %3216 = vmatpush.msra.mxu0 %v1955_v47  ;;  %v1716_v60 = vld [vmem:[#allocation5 + $0x3050] sm:$0xff] }
 0x1c5   :  { %v1935_v27 = vld [vmem:[#allocation5 + $0x3728] sm:$0xff]  ;;  %3236 = vmatpush.msra.mxu1 %v2275_v9  ;;  %3256 = vmatpush.msra.mxu2 %v356_v10  ;;  %v2056_v61 = vld [vmem:[#allocation5 + $0x3af0] sm:$0xff] }
 0x1c6   :  { %v2255_v51 = vld [vmem:[#allocation5 + $0x4128] sm:$0xff]  ;;  %3275 = vmatpush.msra.mxu3 %v696_v11  ;;  %3217 = vmatpush.msra.mxu0 %v1935_v27  ;;  %v1376_v62 = vld [vmem:[#allocation5 + $0x25b0] sm:$0xff] }
 0x1c7   :  { %v1915_v14 = vld [vmem:[#allocation5 + $0x3688] sm:$0xff]  ;;  %3237 = vmatpush.msra.mxu1 %v2255_v51  ;;  %3257 = vmatpush.msra.mxu2 %v336_v12  ;;  %v1696_v33 = vld [vmem:[#allocation5 + $0x2fb0] sm:$0xff] }
 0x1c8   :  { %v2235_v16 = vld [vmem:[#allocation5 + $0x4088] sm:$0xff]  ;;  %3276 = vmatpush.msra.mxu3 %v676_v13  ;;  %3218 = vmatpush.msra.mxu0 %v1915_v14  ;;  %v2036_v63 = vld [vmem:[#allocation5 + $0x3a50] sm:$0xff] }
 0x1c9   :  { %v1895_v18 = vld [vmem:[#allocation5 + $0x35e8] sm:$0xff]  ;;  %3238 = vmatpush.msra.mxu1 %v2235_v16  ;;  %3258 = vmatpush.msra.mxu2 %v316_v34  ;;  %v1036_v3 = vld [vmem:[#allocation5 + $0x1b10] sm:$0xff] }
 0x1ca   :  { %v2215_v19 = vld [vmem:[#allocation5 + $0x3fe8] sm:$0xff]  ;;  %3277 = vmatpush.msra.mxu3 %v656_v17  ;;  %3219 = vmatpush.msra.mxu0 %v1895_v18  ;;  %v1356_v4 = vld [vmem:[#allocation5 + $0x2510] sm:$0xff] }
 0x1cb   :  { %v1875_v23 = vld [vmem:[#allocation5 + $0x3548] sm:$0xff]  ;;  %3239 = vmatpush.msra.mxu1 %v2215_v19  ;;  %3259 = vmatpush.msra.mxu2 %v296_v21  ;;  %v1676_v5 = vld [vmem:[#allocation5 + $0x2f10] sm:$0xff] }
 0x1cc   :  { %v2195_v24 = vld [vmem:[#allocation5 + $0x3f48] sm:$0xff]  ;;  %3278 = vmatpush.msra.mxu3 %v636_v22  ;;  %3220 = vmatpush.msra.mxu0 %v1875_v23  ;;  %v2016_v31 = vld [vmem:[#allocation5 + $0x39b0] sm:$0xff] }
 0x1cd   :  { %v1855_v29 = vld [vmem:[#allocation5 + $0x34a8] sm:$0xff]  ;;  %3240 = vmatpush.msra.mxu1 %v2195_v24  ;;  %3260 = vmatpush.msra.mxu2 %v276_v26  ;;  %v1016_v6 = vld [vmem:[#allocation5 + $0x1a70] sm:$0xff] }
 0x1ce   :  { %v2175_v30 = vld [vmem:[#allocation5 + $0x3ea8] sm:$0xff]  ;;  %3279 = vmatpush.msra.mxu3 %v616_v28  ;;  %3221 = vmatpush.msra.mxu0 %v1855_v29  ;;  %v1336_v7 = vld [vmem:[#allocation5 + $0x2470] sm:$0xff] }
 0x1cf   :  { %v1835_v0 = vld [vmem:[#allocation5 + $0x3408] sm:$0xff]  ;;  %3241 = vmatpush.msra.mxu1 %v2175_v30  ;;  %3261 = vmatpush.msra.mxu2 %v256_v32  ;;  %v1656_v8 = vld [vmem:[#allocation5 + $0x2e70] sm:$0xff] }
 0x1d0   :  { %v2155_v36 = vld [vmem:[#allocation5 + $0x3e08] sm:$0xff]  ;;  %3280 = vmatpush.msra.mxu3 %v596_v35  ;;  %3222 = vmatpush.msra.mxu0 %v1835_v0  ;;  %v1996_v47 = vld [vmem:[#allocation5 + $0x3910] sm:$0xff] }
 0x1d1   :  { %v1815_v38 = vld [vmem:[#allocation5 + $0x3368] sm:$0xff]  ;;  %3242 = vmatpush.msra.mxu1 %v2155_v36  ;;  %3262 = vmatpush.msra.mxu2 %v236_v37  ;;  %v996_v9 = vld [vmem:[#allocation5 + $0x19d0] sm:$0xff] }
 0x1d2   :  { %v2135_v1 = vld [vmem:[#allocation5 + $0x3d68] sm:$0xff]  ;;  %3281 = vmatpush.msra.mxu3 %v576_v15  ;;  %3223 = vmatpush.msra.mxu0 %v1815_v38  ;;  %v1316_v10 = vld [vmem:[#allocation5 + $0x23d0] sm:$0xff] }
 0x1d3   :  { %v1795_v41 = vld [vmem:[#allocation5 + $0x32c8] sm:$0xff]  ;;  %3243 = vmatpush.msra.mxu1 %v2135_v1  ;;  %3263 = vmatpush.msra.mxu2 %v216_v39  ;;  %v1636_v11 = vld [vmem:[#allocation5 + $0x2dd0] sm:$0xff] }
 0x1d4   :  { %v2115_v42 = vld [vmem:[#allocation5 + $0x3cc8] sm:$0xff]  ;;  %3282 = vmatpush.msra.mxu3 %v556_v40  ;;  %3224 = vmatpush.msra.mxu0 %v1795_v41  ;;  %v1976_v27 = vld [vmem:[#allocation5 + $0x3870] sm:$0xff] }
 0x1d5   :  { %v1775_v46 = vld [vmem:[#allocation5 + $0x3228] sm:$0xff]  ;;  %3244 = vmatpush.msra.mxu1 %v2115_v42  ;;  %3264 = vmatpush.msra.mxu2 %v196_v43  ;;  %v976_v51 = vld [vmem:[#allocation5 + $0x1930] sm:$0xff] }
 0x1d6   :  { %v2095_v20 = vld [vmem:[#allocation5 + $0x3c28] sm:$0xff]  ;;  %3283 = vmatpush.msra.mxu3 %v536_v45  ;;  %3225 = vmatpush.msra.mxu0 %v1775_v46  ;;  %v1296_v12 = vld [vmem:[#allocation5 + $0x2330] sm:$0xff] }
 0x1d7   :  { %3245 = vmatpush.msra.mxu1 %v2095_v20  ;;  %3265 = vmatpush.msra.mxu2 %v176_v48  ;;  %v1616_v13 = vld [vmem:[#allocation5 + $0x2d30] sm:$0xff] }
 0x1d8   :  { %3284 = vmatpush.msra.mxu3 %v516_v49  ;;  %3226 = vmatmul.f32.vlgmr.msra.gmra.mxu0 %v7312_v44  ;;  %v1056_v44 = vld [vmem:[#allocation5 + $0x1bb0] sm:$0xff] }
 0x1d9   :  { %3310 = vmatpush.msrb.mxu1 %v1436_v59  ;;  %3290 = vmatpush.msrb.mxu0 %v1116_v25  ;;  %v1956_v14 = vld [vmem:[#allocation5 + $0x37d0] sm:$0xff] }
 0x1da   :  { %3330 = vmatpush.msrb.mxu2 %v1756_v50  ;;  %3285 = vmatpush.msra.mxu3 %v496_v52  ;;  %v956_v16 = vld [vmem:[#allocation5 + $0x1890] sm:$0xff]  ;;  %v7338_v50 = vld [vmem:[#allocation2] sm:$0xff]  ;;  %v477_v52 = vld [vmem:[#allocation5 + $0x998] sm:$0xff] }
 0x1db   :  { %3246 = vmatmul.f32.vlgmr.msra.gmra.mxu1 %v7335_v56  ;;  %3291 = vmatpush.msrb.mxu0 %v1096_v53  ;;  %v1276_v34 = vld [vmem:[#allocation5 + $0x2290] sm:$0xff]  ;;  %v797_v53 = vld [vmem:[#allocation5 + $0x1398] sm:$0xff] }
 0x1dc   :  { %3311 = vmatpush.msrb.mxu1 %v1416_v2  ;;  %3331 = vmatpush.msrb.mxu2 %v1736_v54  ;;  %v1596_v17 = vld [vmem:[#allocation5 + $0x2c90] sm:$0xff] }
 0x1dd   :  { %3350 = vmatpush.msrb.mxu3 %v2076_v55  ;;  %3292 = vmatpush.msrb.mxu0 %v1076_v57  ;;  %v1936_v18 = vld [vmem:[#allocation5 + $0x3730] sm:$0xff]  ;;  %v457_v55 = vld [vmem:[#allocation5 + $0x8f8] sm:$0xff] }
 0x1de   :  { %3312 = vmatpush.msrb.mxu1 %v1396_v58  ;;  %3332 = vmatpush.msrb.mxu2 %v1716_v60  ;;  %v936_v19 = vld [vmem:[#allocation5 + $0x17f0] sm:$0xff]  ;;  %v777_v58 = vld [vmem:[#allocation5 + $0x12f8] sm:$0xff] }
 0x1df   :  { %3351 = vmatpush.msrb.mxu3 %v2056_v61  ;;  %3293 = vmatpush.msrb.mxu0 %v1056_v44  ;;  %v1256_v21 = vld [vmem:[#allocation5 + $0x21f0] sm:$0xff]  ;;  %v1117_v60 = vld [vmem:[#allocation5 + $0x1d98] sm:$0xff] }
 0x1e0   :  { %3313 = vmatpush.msrb.mxu1 %v1376_v62  ;;  %3333 = vmatpush.msrb.mxu2 %v1696_v33  ;;  %v1576_v22 = vld [vmem:[#allocation5 + $0x2bf0] sm:$0xff]  ;;  %v437_v44 = vld [vmem:[#allocation5 + $0x858] sm:$0xff] }
 0x1e1   :  { %3352 = vmatpush.msrb.mxu3 %v2036_v63  ;;  %3294 = vmatpush.msrb.mxu0 %v1036_v3  ;;  %v1916_v23 = vld [vmem:[#allocation5 + $0x3690] sm:$0xff]  ;;  %v757_v62 = vld [vmem:[#allocation5 + $0x1258] sm:$0xff] }
 0x1e2   :  { %3314 = vmatpush.msrb.mxu1 %v1356_v4  ;;  %3334 = vmatpush.msrb.mxu2 %v1676_v5  ;;  %v916_v24 = vld [vmem:[#allocation5 + $0x1750] sm:$0xff]  ;;  %v1097_v33 = vld [vmem:[#allocation5 + $0x1cf8] sm:$0xff] }
 0x1e3   :  { %3353 = vmatpush.msrb.mxu3 %v2016_v31  ;;  %3295 = vmatpush.msrb.mxu0 %v1016_v6  ;;  %v1236_v26 = vld [vmem:[#allocation5 + $0x2150] sm:$0xff]  ;;  %v417_v3 = vld [vmem:[#allocation5 + $0x7b8] sm:$0xff]  ;;  %v7344_v31 = vld [vmem:[#allocation2 + $0x20] sm:$0xff] }
 0x1e4   :  { %3315 = vmatpush.msrb.mxu1 %v1336_v7  ;;  %3335 = vmatpush.msrb.mxu2 %v1656_v8  ;;  %v1556_v28 = vld [vmem:[#allocation5 + $0x2b50] sm:$0xff]  ;;  %v737_v4 = vld [vmem:[#allocation5 + $0x11b8] sm:$0xff] }
 0x1e5   :  { %3354 = vmatpush.msrb.mxu3 %v1996_v47  ;;  %3296 = vmatpush.msrb.mxu0 %v996_v9  ;;  %v1896_v29 = vld [vmem:[#allocation5 + $0x35f0] sm:$0xff]  ;;  %v1077_v5 = vld [vmem:[#allocation5 + $0x1c58] sm:$0xff] }
 0x1e6   :  { %3316 = vmatpush.msrb.mxu1 %v1316_v10  ;;  %3336 = vmatpush.msrb.mxu2 %v1636_v11  ;;  %v896_v30 = vld [vmem:[#allocation5 + $0x16b0] sm:$0xff]  ;;  %v397_v7 = vld [vmem:[#allocation5 + $0x718] sm:$0xff] }
 0x1e7   :  { %3355 = vmatpush.msrb.mxu3 %v1976_v27  ;;  %3297 = vmatpush.msrb.mxu0 %v976_v51  ;;  %v1216_v32 = vld [vmem:[#allocation5 + $0x20b0] sm:$0xff]  ;;  %v717_v8 = vld [vmem:[#allocation5 + $0x1118] sm:$0xff] }
 0x1e8   :  { %3317 = vmatpush.msrb.mxu1 %v1296_v12  ;;  %3337 = vmatpush.msrb.mxu2 %v1616_v13  ;;  %v1536_v35 = vld [vmem:[#allocation5 + $0x2ab0] sm:$0xff]  ;;  %v7347_v47 = vld [vmem:[#allocation2 + $0x10] sm:$0xff]  ;;  %v7353_v13 = vld [vmem:[#allocation2 + $0x18] sm:$0xff] }
 0x1e9   :  { %3356 = vmatpush.msrb.mxu3 %v1956_v14  ;;  %3298 = vmatpush.msrb.mxu0 %v956_v16  ;;  %v1876_v0 = vld [vmem:[#allocation5 + $0x3550] sm:$0xff]  ;;  %v1057_v9 = vld [vmem:[#allocation5 + $0x1bb8] sm:$0xff] }
 0x1ea   :  { %3318 = vmatpush.msrb.mxu1 %v1276_v34  ;;  %3338 = vmatpush.msrb.mxu2 %v1596_v17  ;;  %v876_v36 = vld [vmem:[#allocation5 + $0x1610] sm:$0xff]  ;;  %v377_v27 = vld [vmem:[#allocation5 + $0x678] sm:$0xff] }
 0x1eb   :  { %3357 = vmatpush.msrb.mxu3 %v1936_v18  ;;  %3299 = vmatpush.msrb.mxu0 %v936_v19  ;;  %v1196_v37 = vld [vmem:[#allocation5 + $0x2010] sm:$0xff]  ;;  %v697_v51 = vld [vmem:[#allocation5 + $0x1078] sm:$0xff] }
 0x1ec   :  { %3319 = vmatpush.msrb.mxu1 %v1256_v21  ;;  %3339 = vmatpush.msrb.mxu2 %v1576_v22  ;;  %v1516_v15 = vld [vmem:[#allocation5 + $0x2a10] sm:$0xff]  ;;  %v1037_v12 = vld [vmem:[#allocation5 + $0x1b18] sm:$0xff] }
 0x1ed   :  { %3358 = vmatpush.msrb.mxu3 %v1916_v23  ;;  %3300 = vmatpush.msrb.mxu0 %v916_v24  ;;  %v1856_v38 = vld [vmem:[#allocation5 + $0x34b0] sm:$0xff]  ;;  %v357_v16 = vld [vmem:[#allocation5 + $0x5d8] sm:$0xff] }
 0x1ee   :  { %3320 = vmatpush.msrb.mxu1 %v1236_v26  ;;  %3340 = vmatpush.msrb.mxu2 %v1556_v28  ;;  %v856_v1 = vld [vmem:[#allocation5 + $0x1570] sm:$0xff]  ;;  %v677_v34 = vld [vmem:[#allocation5 + $0xfd8] sm:$0xff] }
 0x1ef   :  { %3359 = vmatpush.msrb.mxu3 %v1896_v29  ;;  %3301 = vmatpush.msrb.mxu0 %v896_v30  ;;  %v1176_v39 = vld [vmem:[#allocation5 + $0x1f70] sm:$0xff]  ;;  %v1017_v17 = vld [vmem:[#allocation5 + $0x1a78] sm:$0xff] }
 0x1f0   :  { %3321 = vmatpush.msrb.mxu1 %v1216_v32  ;;  %3341 = vmatpush.msrb.mxu2 %v1536_v35  ;;  %v1496_v40 = vld [vmem:[#allocation5 + $0x2970] sm:$0xff]  ;;  %v337_v19 = vld [vmem:[#allocation5 + $0x538] sm:$0xff] }
 0x1f1   :  { %3360 = vmatpush.msrb.mxu3 %v1876_v0  ;;  %3302 = vmatpush.msrb.mxu0 %v876_v36  ;;  %v1836_v41 = vld [vmem:[#allocation5 + $0x3410] sm:$0xff]  ;;  %v657_v21 = vld [vmem:[#allocation5 + $0xf38] sm:$0xff] }
 0x1f2   :  { %3322 = vmatpush.msrb.mxu1 %v1196_v37  ;;  %3342 = vmatpush.msrb.mxu2 %v1516_v15  ;;  %v836_v42 = vld [vmem:[#allocation5 + $0x14d0] sm:$0xff]  ;;  %v997_v22 = vld [vmem:[#allocation5 + $0x19d8] sm:$0xff] }
 0x1f3   :  { %3361 = vmatpush.msrb.mxu3 %v1856_v38  ;;  %v1156_v43 = vld [vmem:[#allocation5 + $0x1ed0] sm:$0xff]  ;;  %3303 = vmatpush.msrb.mxu0 %v856_v1  ;;  %v317_v24 = vld [vmem:[#allocation5 + $0x498] sm:$0xff] }
 0x1f4   :  { %3323 = vmatpush.msrb.mxu1 %v1176_v39  ;;  %v1476_v45 = vld [vmem:[#allocation5 + $0x28d0] sm:$0xff]  ;;  %3343 = vmatpush.msrb.mxu2 %v1496_v40  ;;  %v637_v26 = vld [vmem:[#allocation5 + $0xe98] sm:$0xff] }
 0x1f5   :  { %v1816_v46 = vld [vmem:[#allocation5 + $0x3370] sm:$0xff]  ;;  %3362 = vmatpush.msrb.mxu3 %v1836_v41  ;;  %3304 = vmatpush.msrb.mxu0 %v836_v42  ;;  %v977_v28 = vld [vmem:[#allocation5 + $0x1938] sm:$0xff] }
 0x1f6   :  { %v816_v20 = vld [vmem:[#allocation5 + $0x1430] sm:$0xff]  ;;  %3324 = vmatpush.msrb.mxu1 %v1156_v43  ;;  %3344 = vmatpush.msrb.mxu2 %v1476_v45  ;;  %v297_v30 = vld [vmem:[#allocation5 + $0x3f8] sm:$0xff] }
 0x1f7   :  { %v1136_v48 = vld [vmem:[#allocation5 + $0x1e30] sm:$0xff]  ;;  %3363 = vmatpush.msrb.mxu3 %v1816_v46  ;;  %3266 = vmatmul.f32.vlgmr.msra.gmra.mxu2 %v7338_v50  ;;  %v617_v32 = vld [vmem:[#allocation5 + $0xdf8] sm:$0xff] }
 0x1f8   :  { %v1456_v49 = vld [vmem:[#allocation5 + $0x2830] sm:$0xff]  ;;  %3305 = vmatpush.msrb.mxu0 %v816_v20  ;;  %3325 = vmatpush.msrb.mxu1 %v1136_v48  ;;  %v957_v35 = vld [vmem:[#allocation5 + $0x1898] sm:$0xff] }
 0x1f9   :  { %v1796_v59 = vld [vmem:[#allocation5 + $0x32d0] sm:$0xff]  ;;  %3345 = vmatpush.msrb.mxu2 %v1456_v49  ;;  %3306 = vmatmul.f32.vlgmr.msrb.gmra.mxu0 %v7347_v47  ;;  %v277_v36 = vld [vmem:[#allocation5 + $0x358] sm:$0xff] }
 0x1fa   :  { %v2396_v25 = vld [vmem:[#allocation5 + $0x4590] sm:$0xff]  ;;  %3364 = vmatpush.msrb.mxu3 %v1796_v59  ;;  %3390 = vmatpush.msra.mxu1 %v477_v52  ;;  %v597_v37 = vld [vmem:[#allocation5 + $0xd58] sm:$0xff] }
 0x1fb   :  { %v1776_v2 = vld [vmem:[#allocation5 + $0x3230] sm:$0xff]  ;;  %3370 = vmatpush.msra.mxu0 %v2396_v25  ;;  %3410 = vmatpush.msra.mxu2 %v797_v53  ;;  %v937_v15 = vld [vmem:[#allocation5 + $0x17f8] sm:$0xff] }
 0x1fc   :  { %v2376_v54 = vld [vmem:[#allocation5 + $0x44f0] sm:$0xff]  ;;  %3365 = vmatpush.msrb.mxu3 %v1776_v2  ;;  %3391 = vmatpush.msra.mxu1 %v457_v55  ;;  %v257_v1 = vld [vmem:[#allocation5 + $0x2b8] sm:$0xff] }
 0x1fd   :  { %v7341_v57 = vld [vmem:[#allocation2 + $0x8] sm:$0xff]  ;;  %3371 = vmatpush.msra.mxu0 %v2376_v54  ;;  %3411 = vmatpush.msra.mxu2 %v777_v58  ;;  %v577_v39 = vld [vmem:[#allocation5 + $0xcb8] sm:$0xff] }
 0x1fe   :  { %3286 = vmatmul.f32.vlgmr.msra.gmra.mxu3 %v7341_v57  ;;  %v2356_v61 = vld [vmem:[#allocation5 + $0x4450] sm:$0xff]  ;;  %3392 = vmatpush.msra.mxu1 %v437_v44  ;;  %v917_v40 = vld [vmem:[#allocation5 + $0x1758] sm:$0xff] }
 0x1ff   :  { %3430 = vmatpush.msra.mxu3 %v1117_v60  ;;  %v2336_v63 = vld [vmem:[#allocation5 + $0x43b0] sm:$0xff]  ;;  %3372 = vmatpush.msra.mxu0 %v2356_v61  ;;  %v237_v42 = vld [vmem:[#allocation5 + $0x218] sm:$0xff] }
 0x200   :  { %3412 = vmatpush.msra.mxu2 %v757_v62  ;;  %v2316_v6 = vld [vmem:[#allocation5 + $0x4310] sm:$0xff]  ;;  %3393 = vmatpush.msra.mxu1 %v417_v3  ;;  %v557_v43 = vld [vmem:[#allocation5 + $0xc18] sm:$0xff] }
 0x201   :  { %3431 = vmatpush.msra.mxu3 %v1097_v33  ;;  %3346 = vmatmul.f32.vlgmr.msrb.gmra.mxu2 %v7344_v31  ;;  %v7350_v10 = vld [vmem:[#allocation2 + $0x28] sm:$0xff]  ;;  %v897_v45 = vld [vmem:[#allocation5 + $0x16b8] sm:$0xff] }
 0x202   :  { %3373 = vmatpush.msra.mxu0 %v2336_v63  ;;  %3413 = vmatpush.msra.mxu2 %v737_v4  ;;  %v2296_v11 = vld [vmem:[#allocation5 + $0x4270] sm:$0xff]  ;;  %v217_v20 = vld [vmem:[#allocation5 + $0x178] sm:$0xff] }
 0x203   :  { %3432 = vmatpush.msra.mxu3 %v1077_v5  ;;  %3394 = vmatpush.msra.mxu1 %v397_v7  ;;  %v2276_v14 = vld [vmem:[#allocation5 + $0x41d0] sm:$0xff]  ;;  %v537_v48 = vld [vmem:[#allocation5 + $0xb78] sm:$0xff] }
 0x204   :  { %3374 = vmatpush.msra.mxu0 %v2316_v6  ;;  %3414 = vmatpush.msra.mxu2 %v717_v8  ;;  %v2256_v18 = vld [vmem:[#allocation5 + $0x4130] sm:$0xff]  ;;  %v877_v49 = vld [vmem:[#allocation5 + $0x1618] sm:$0xff] }
 0x205   :  { %3433 = vmatpush.msra.mxu3 %v1057_v9  ;;  %3326 = vmatmul.f32.vlgmr.msrb.gmra.mxu1 %v7353_v13  ;;  %v2236_v23 = vld [vmem:[#allocation5 + $0x4090] sm:$0xff]  ;;  %v197_v25 = vld [vmem:[#allocation5 + $0xd8] sm:$0xff] }
 0x206   :  { %3366 = vmatmul.f32.vlgmr.msrb.gmra.mxu3 %v7350_v10  ;;  %3375 = vmatpush.msra.mxu0 %v2296_v11  ;;  %v2216_v29 = vld [vmem:[#allocation5 + $0x3ff0] sm:$0xff]  ;;  %v517_v52 = vld [vmem:[#allocation5 + $0xad8] sm:$0xff] }
 0x207   :  { %3395 = vmatpush.msra.mxu1 %v377_v27  ;;  %3415 = vmatpush.msra.mxu2 %v697_v51  ;;  %v2196_v0 = vld [vmem:[#allocation5 + $0x3f50] sm:$0xff]  ;;  %v857_v53 = vld [vmem:[#allocation5 + $0x1578] sm:$0xff] }
 0x208   :  { %3434 = vmatpush.msra.mxu3 %v1037_v12  ;;  %3376 = vmatpush.msra.mxu0 %v2276_v14  ;;  %v2176_v38 = vld [vmem:[#allocation5 + $0x3eb0] sm:$0xff]  ;;  %v177_v54 = vld [vmem:[#allocation5 + $0x38] sm:$0xff] }
 0x209   :  { %3396 = vmatpush.msra.mxu1 %v357_v16  ;;  %3416 = vmatpush.msra.mxu2 %v677_v34  ;;  %v2156_v41 = vld [vmem:[#allocation5 + $0x3e10] sm:$0xff]  ;;  %v497_v55 = vld [vmem:[#allocation5 + $0xa38] sm:$0xff] }
 0x20a   :  { %3435 = vmatpush.msra.mxu3 %v1017_v17  ;;  %3377 = vmatpush.msra.mxu0 %v2256_v18  ;;  %v2136_v46 = vld [vmem:[#allocation5 + $0x3d70] sm:$0xff]  ;;  %v837_v58 = vld [vmem:[#allocation5 + $0x14d8] sm:$0xff] }
 0x20b   :  { %3397 = vmatpush.msra.mxu1 %v337_v19  ;;  %3417 = vmatpush.msra.mxu2 %v657_v21  ;;  %v2116_v59 = vld [vmem:[#allocation5 + $0x3cd0] sm:$0xff]  ;;  %v1757_v60 = vld [vmem:[#allocation5 + $0x3198] sm:$0xff] }
 0x20c   :  { %3436 = vmatpush.msra.mxu3 %v997_v22  ;;  %3378 = vmatpush.msra.mxu0 %v2236_v23  ;;  %v2096_v2 = vld [vmem:[#allocation5 + $0x3c30] sm:$0xff]  ;;  %v1437_v61 = vld [vmem:[#allocation5 + $0x2798] sm:$0xff] }
 0x20d   :  { %3398 = vmatpush.msra.mxu1 %v317_v24  ;;  %3418 = vmatpush.msra.mxu2 %v637_v26  ;;  %v2077_v44 = vld [vmem:[#allocation5 + $0x3b98] sm:$0xff] }
 0x20e   :  { %3437 = vmatpush.msra.mxu3 %v977_v28  ;;  %3379 = vmatpush.msra.mxu0 %v2216_v29  ;;  %v817_v62 = vld [vmem:[#allocation5 + $0x1438] sm:$0xff] }
 0x20f   :  { %3399 = vmatpush.msra.mxu1 %v297_v30  ;;  %3419 = vmatpush.msra.mxu2 %v617_v32  ;;  %v1737_v33 = vld [vmem:[#allocation5 + $0x30f8] sm:$0xff] }
 0x210   :  { %3438 = vmatpush.msra.mxu3 %v957_v35  ;;  %3380 = vmatpush.msra.mxu0 %v2196_v0  ;;  %v1417_v63 = vld [vmem:[#allocation5 + $0x26f8] sm:$0xff] }
 0x211   :  { %3400 = vmatpush.msra.mxu1 %v277_v36  ;;  %3420 = vmatpush.msra.mxu2 %v597_v37  ;;  %v2057_v3 = vld [vmem:[#allocation5 + $0x3af8] sm:$0xff] }
 0x212   :  { %3439 = vmatpush.msra.mxu3 %v937_v15  ;;  %3381 = vmatpush.msra.mxu0 %v2176_v38  ;;  %v2397_v4 = vld [vmem:[#allocation5 + $0x4598] sm:$0xff] }
 0x213   :  { %3401 = vmatpush.msra.mxu1 %v257_v1  ;;  %3421 = vmatpush.msra.mxu2 %v577_v39  ;;  %v1717_v5 = vld [vmem:[#allocation5 + $0x3058] sm:$0xff] }
 0x214   :  { %3440 = vmatpush.msra.mxu3 %v917_v40  ;;  %3382 = vmatpush.msra.mxu0 %v2156_v41  ;;  %v1397_v6 = vld [vmem:[#allocation5 + $0x2658] sm:$0xff] }
 0x215   :  { %3402 = vmatpush.msra.mxu1 %v237_v42  ;;  %3422 = vmatpush.msra.mxu2 %v557_v43  ;;  %v2037_v7 = vld [vmem:[#allocation5 + $0x3a58] sm:$0xff] }
 0x216   :  { %3441 = vmatpush.msra.mxu3 %v897_v45  ;;  %3383 = vmatpush.msra.mxu0 %v2136_v46  ;;  %v2377_v8 = vld [vmem:[#allocation5 + $0x44f8] sm:$0xff] }
 0x217   :  { %3403 = vmatpush.msra.mxu1 %v217_v20  ;;  %3423 = vmatpush.msra.mxu2 %v537_v48  ;;  %v1697_v9 = vld [vmem:[#allocation5 + $0x2fb8] sm:$0xff] }
 0x218   :  { %3442 = vmatpush.msra.mxu3 %v877_v49  ;;  %3384 = vmatpush.msra.mxu0 %v2116_v59  ;;  %v1377_v11 = vld [vmem:[#allocation5 + $0x25b8] sm:$0xff] }
 0x219   :  { %3404 = vmatpush.msra.mxu1 %v197_v25  ;;  %3424 = vmatpush.msra.mxu2 %v517_v52  ;;  %v2017_v27 = vld [vmem:[#allocation5 + $0x39b8] sm:$0xff] }
 0x21a   :  { %3443 = vmatpush.msra.mxu3 %v857_v53  ;;  %3385 = vmatpush.msra.mxu0 %v2096_v2  ;;  %v2357_v51 = vld [vmem:[#allocation5 + $0x4458] sm:$0xff] }
 0x21b   :  { %3405 = vmatpush.msra.mxu1 %v177_v54  ;;  %3425 = vmatpush.msra.mxu2 %v497_v55  ;;  %v1677_v12 = vld [vmem:[#allocation5 + $0x2f18] sm:$0xff] }
 0x21c   :  { %3444 = vmatpush.msra.mxu3 %v837_v58  ;;  %3386 = vmatmul.f32.vlgmr.msra.gmra.mxu0 %v7335_v56  ;;  %v1357_v14 = vld [vmem:[#allocation5 + $0x2518] sm:$0xff] }
 0x21d   :  { %3470 = vmatpush.msrb.mxu1 %v1757_v60  ;;  %3450 = vmatpush.msrb.mxu0 %v1437_v61  ;;  %v1997_v16 = vld [vmem:[#allocation5 + $0x3918] sm:$0xff] }
 0x21e   :  { %3490 = vmatpush.msrb.mxu2 %v2077_v44  ;;  %3445 = vmatpush.msra.mxu3 %v817_v62  ;;  %v2337_v34 = vld [vmem:[#allocation5 + $0x43b8] sm:$0xff] }
 0x21f   :  { %3471 = vmatpush.msrb.mxu1 %v1737_v33  ;;  %3451 = vmatpush.msrb.mxu0 %v1417_v63  ;;  %v1657_v17 = vld [vmem:[#allocation5 + $0x2e78] sm:$0xff] }
 0x220   :  { %3491 = vmatpush.msrb.mxu2 %v2057_v3  ;;  %3510 = vmatpush.msrb.mxu3 %v2397_v4  ;;  %v1337_v18 = vld [vmem:[#allocation5 + $0x2478] sm:$0xff]  ;;  %v478_v4 = vld [vmem:[#allocation5 + $0x9a0] sm:$0xff] }
 0x221   :  { %3472 = vmatpush.msrb.mxu1 %v1717_v5  ;;  %3452 = vmatpush.msrb.mxu0 %v1397_v6  ;;  %v1977_v19 = vld [vmem:[#allocation5 + $0x3878] sm:$0xff]  ;;  %v798_v5 = vld [vmem:[#allocation5 + $0x13a0] sm:$0xff] }
 0x222   :  { %3492 = vmatpush.msrb.mxu2 %v2037_v7  ;;  %3511 = vmatpush.msrb.mxu3 %v2377_v8  ;;  %v2317_v21 = vld [vmem:[#allocation5 + $0x4318] sm:$0xff]  ;;  %v1118_v6 = vld [vmem:[#allocation5 + $0x1da0] sm:$0xff] }
 0x223   :  { %3473 = vmatpush.msrb.mxu1 %v1697_v9  ;;  %3453 = vmatpush.msrb.mxu0 %v1377_v11  ;;  %v1637_v22 = vld [vmem:[#allocation5 + $0x2dd8] sm:$0xff]  ;;  %v458_v8 = vld [vmem:[#allocation5 + $0x900] sm:$0xff] }
 0x224   :  { %3493 = vmatpush.msrb.mxu2 %v2017_v27  ;;  %3512 = vmatpush.msrb.mxu3 %v2357_v51  ;;  %v1317_v23 = vld [vmem:[#allocation5 + $0x23d8] sm:$0xff]  ;;  %v778_v9 = vld [vmem:[#allocation5 + $0x1300] sm:$0xff] }
 0x225   :  { %3474 = vmatpush.msrb.mxu1 %v1677_v12  ;;  %3454 = vmatpush.msrb.mxu0 %v1357_v14  ;;  %v1957_v24 = vld [vmem:[#allocation5 + $0x37d8] sm:$0xff]  ;;  %v1098_v11 = vld [vmem:[#allocation5 + $0x1d00] sm:$0xff] }
 0x226   :  { %3494 = vmatpush.msrb.mxu2 %v1997_v16  ;;  %3513 = vmatpush.msrb.mxu3 %v2337_v34  ;;  %v2297_v26 = vld [vmem:[#allocation5 + $0x4278] sm:$0xff]  ;;  %v1438_v27 = vld [vmem:[#allocation5 + $0x27a0] sm:$0xff] }
 0x227   :  { %3475 = vmatpush.msrb.mxu1 %v1657_v17  ;;  %3455 = vmatpush.msrb.mxu0 %v1337_v18  ;;  %v1617_v28 = vld [vmem:[#allocation5 + $0x2d38] sm:$0xff]  ;;  %v438_v51 = vld [vmem:[#allocation5 + $0x860] sm:$0xff] }
 0x228   :  { %3495 = vmatpush.msrb.mxu2 %v1977_v19  ;;  %3514 = vmatpush.msrb.mxu3 %v2317_v21  ;;  %v1297_v29 = vld [vmem:[#allocation5 + $0x2338] sm:$0xff]  ;;  %v758_v12 = vld [vmem:[#allocation5 + $0x1260] sm:$0xff] }
 0x229   :  { %3476 = vmatpush.msrb.mxu1 %v1637_v22  ;;  %v1937_v30 = vld [vmem:[#allocation5 + $0x3738] sm:$0xff]  ;;  %3456 = vmatpush.msrb.mxu0 %v1317_v23  ;;  %v1078_v14 = vld [vmem:[#allocation5 + $0x1c60] sm:$0xff] }
 0x22a   :  { %3496 = vmatpush.msrb.mxu2 %v1957_v24  ;;  %v2277_v32 = vld [vmem:[#allocation5 + $0x41d8] sm:$0xff]  ;;  %3515 = vmatpush.msrb.mxu3 %v2297_v26  ;;  %v1418_v16 = vld [vmem:[#allocation5 + $0x2700] sm:$0xff] }
 0x22b   :  { %v1597_v35 = vld [vmem:[#allocation5 + $0x2c98] sm:$0xff]  ;;  %3477 = vmatpush.msrb.mxu1 %v1617_v28  ;;  %3457 = vmatpush.msrb.mxu0 %v1297_v29  ;;  %v738_v34 = vld [vmem:[#allocation5 + $0x11c0] sm:$0xff] }
 0x22c   :  { %v1277_v0 = vld [vmem:[#allocation5 + $0x2298] sm:$0xff]  ;;  %3497 = vmatpush.msrb.mxu2 %v1937_v30  ;;  %3516 = vmatpush.msrb.mxu3 %v2277_v32  ;;  %v1058_v17 = vld [vmem:[#allocation5 + $0x1bc0] sm:$0xff] }
 0x22d   :  { %v1917_v36 = vld [vmem:[#allocation5 + $0x3698] sm:$0xff]  ;;  %3478 = vmatpush.msrb.mxu1 %v1597_v35  ;;  %3458 = vmatpush.msrb.mxu0 %v1277_v0  ;;  %v1398_v18 = vld [vmem:[#allocation5 + $0x2660] sm:$0xff] }
 0x22e   :  { %v2257_v37 = vld [vmem:[#allocation5 + $0x4138] sm:$0xff]  ;;  %3498 = vmatpush.msrb.mxu2 %v1917_v36  ;;  %3446 = vmatmul.f32.vlgmr.msra.gmra.mxu3 %v7347_v47  ;;  %v398_v19 = vld [vmem:[#allocation5 + $0x720] sm:$0xff] }
 0x22f   :  { %v1577_v15 = vld [vmem:[#allocation5 + $0x2bf8] sm:$0xff]  ;;  %3517 = vmatpush.msrb.mxu3 %v2257_v37  ;;  %3426 = vmatmul.f32.vlgmr.msra.gmra.mxu2 %v7341_v57  ;;  %v1038_v21 = vld [vmem:[#allocation5 + $0x1b20] sm:$0xff] }
 0x230   :  { %v1257_v38 = vld [vmem:[#allocation5 + $0x21f8] sm:$0xff]  ;;  %3479 = vmatpush.msrb.mxu1 %v1577_v15  ;;  %v1378_v22 = vld [vmem:[#allocation5 + $0x25c0] sm:$0xff] }
 0x231   :  { %v1897_v1 = vld [vmem:[#allocation5 + $0x35f8] sm:$0xff]  ;;  %3459 = vmatpush.msrb.mxu0 %v1257_v38  ;;  %3406 = vmatmul.f32.vlgmr.msra.gmra.mxu1 %v7338_v50  ;;  %v378_v23 = vld [vmem:[#allocation5 + $0x680] sm:$0xff] }
 0x232   :  { %v2237_v39 = vld [vmem:[#allocation5 + $0x4098] sm:$0xff]  ;;  %3499 = vmatpush.msrb.mxu2 %v1897_v1  ;;  %v698_v24 = vld [vmem:[#allocation5 + $0x1080] sm:$0xff] }
 0x233   :  { %v1557_v40 = vld [vmem:[#allocation5 + $0x2b58] sm:$0xff]  ;;  %3518 = vmatpush.msrb.mxu3 %v2237_v39  ;;  %v1358_v26 = vld [vmem:[#allocation5 + $0x2520] sm:$0xff] }
 0x234   :  { %v1237_v41 = vld [vmem:[#allocation5 + $0x2158] sm:$0xff]  ;;  %3480 = vmatpush.msrb.mxu1 %v1557_v40  ;;  %v358_v28 = vld [vmem:[#allocation5 + $0x5e0] sm:$0xff] }
 0x235   :  { %v1877_v42 = vld [vmem:[#allocation5 + $0x3558] sm:$0xff]  ;;  %3460 = vmatpush.msrb.mxu0 %v1237_v41  ;;  %v678_v29 = vld [vmem:[#allocation5 + $0xfe0] sm:$0xff] }
 0x236   :  { %v2217_v43 = vld [vmem:[#allocation5 + $0x3ff8] sm:$0xff]  ;;  %3500 = vmatpush.msrb.mxu2 %v1877_v42  ;;  %v998_v30 = vld [vmem:[#allocation5 + $0x19e0] sm:$0xff] }
 0x237   :  { %v1537_v45 = vld [vmem:[#allocation5 + $0x2ab8] sm:$0xff]  ;;  %3519 = vmatpush.msrb.mxu3 %v2217_v43  ;;  %v1338_v32 = vld [vmem:[#allocation5 + $0x2480] sm:$0xff] }
 0x238   :  { %v1217_v46 = vld [vmem:[#allocation5 + $0x20b8] sm:$0xff]  ;;  %3481 = vmatpush.msrb.mxu1 %v1537_v45  ;;  %v338_v35 = vld [vmem:[#allocation5 + $0x540] sm:$0xff] }
 0x239   :  { %v1857_v20 = vld [vmem:[#allocation5 + $0x34b8] sm:$0xff]  ;;  %3461 = vmatpush.msrb.mxu0 %v1217_v46  ;;  %v658_v0 = vld [vmem:[#allocation5 + $0xf40] sm:$0xff] }
 0x23a   :  { %v2197_v48 = vld [vmem:[#allocation5 + $0x3f58] sm:$0xff]  ;;  %3501 = vmatpush.msrb.mxu2 %v1857_v20  ;;  %v978_v36 = vld [vmem:[#allocation5 + $0x1940] sm:$0xff] }
 0x23b   :  { %v1197_v49 = vld [vmem:[#allocation5 + $0x2018] sm:$0xff]  ;;  %3520 = vmatpush.msrb.mxu3 %v2197_v48  ;;  %v1318_v37 = vld [vmem:[#allocation5 + $0x23e0] sm:$0xff] }
 0x23c   :  { %v1517_v59 = vld [vmem:[#allocation5 + $0x2a18] sm:$0xff]  ;;  %3462 = vmatpush.msrb.mxu0 %v1197_v49  ;;  %v318_v15 = vld [vmem:[#allocation5 + $0x4a0] sm:$0xff] }
 0x23d   :  { %v1837_v25 = vld [vmem:[#allocation5 + $0x3418] sm:$0xff]  ;;  %3482 = vmatpush.msrb.mxu1 %v1517_v59  ;;  %v638_v38 = vld [vmem:[#allocation5 + $0xea0] sm:$0xff] }
 0x23e   :  { %v2177_v52 = vld [vmem:[#allocation5 + $0x3eb8] sm:$0xff]  ;;  %3502 = vmatpush.msrb.mxu2 %v1837_v25  ;;  %v958_v1 = vld [vmem:[#allocation5 + $0x18a0] sm:$0xff] }
 0x23f   :  { %v1177_v53 = vld [vmem:[#allocation5 + $0x1f78] sm:$0xff]  ;;  %3521 = vmatpush.msrb.mxu3 %v2177_v52  ;;  %v1298_v39 = vld [vmem:[#allocation5 + $0x2340] sm:$0xff] }
 0x240   :  { %v1497_v2 = vld [vmem:[#allocation5 + $0x2978] sm:$0xff]  ;;  %3463 = vmatpush.msrb.mxu0 %v1177_v53  ;;  %v298_v40 = vld [vmem:[#allocation5 + $0x400] sm:$0xff] }
 0x241   :  { %v1817_v54 = vld [vmem:[#allocation5 + $0x3378] sm:$0xff]  ;;  %3483 = vmatpush.msrb.mxu1 %v1497_v2  ;;  %v618_v41 = vld [vmem:[#allocation5 + $0xe00] sm:$0xff] }
 0x242   :  { %v2157_v55 = vld [vmem:[#allocation5 + $0x3e18] sm:$0xff]  ;;  %3503 = vmatpush.msrb.mxu2 %v1817_v54  ;;  %v938_v42 = vld [vmem:[#allocation5 + $0x1800] sm:$0xff] }
 0x243   :  { %v1157_v58 = vld [vmem:[#allocation5 + $0x1ed8] sm:$0xff]  ;;  %3522 = vmatpush.msrb.mxu3 %v2157_v55  ;;  %v1278_v43 = vld [vmem:[#allocation5 + $0x22a0] sm:$0xff] }
 0x244   :  { %v1477_v60 = vld [vmem:[#allocation5 + $0x28d8] sm:$0xff]  ;;  %3464 = vmatpush.msrb.mxu0 %v1157_v58  ;;  %v278_v45 = vld [vmem:[#allocation5 + $0x360] sm:$0xff] }
 0x245   :  { %v1797_v61 = vld [vmem:[#allocation5 + $0x32d8] sm:$0xff]  ;;  %3484 = vmatpush.msrb.mxu1 %v1477_v60  ;;  %v598_v46 = vld [vmem:[#allocation5 + $0xd60] sm:$0xff] }
 0x246   :  { %v2137_v44 = vld [vmem:[#allocation5 + $0x3d78] sm:$0xff]  ;;  %3504 = vmatpush.msrb.mxu2 %v1797_v61  ;;  %v918_v20 = vld [vmem:[#allocation5 + $0x1760] sm:$0xff] }
 0x247   :  { %v1137_v62 = vld [vmem:[#allocation5 + $0x1e38] sm:$0xff]  ;;  %3523 = vmatpush.msrb.mxu3 %v2137_v44  ;;  %v1258_v48 = vld [vmem:[#allocation5 + $0x2200] sm:$0xff] }
 0x248   :  { %v1457_v33 = vld [vmem:[#allocation5 + $0x2838] sm:$0xff]  ;;  %3465 = vmatpush.msrb.mxu0 %v1137_v62  ;;  %v258_v49 = vld [vmem:[#allocation5 + $0x2c0] sm:$0xff] }
 0x249   :  { %v1777_v63 = vld [vmem:[#allocation5 + $0x3238] sm:$0xff]  ;;  %3485 = vmatpush.msrb.mxu1 %v1457_v33  ;;  %3466 = vmatmul.f32.vlgmr.msrb.gmra.mxu0 %v7353_v13  ;;  %v578_v59 = vld [vmem:[#allocation5 + $0xcc0] sm:$0xff] }
 0x24a   :  { %v2117_v3 = vld [vmem:[#allocation5 + $0x3cd8] sm:$0xff]  ;;  %3505 = vmatpush.msrb.mxu2 %v1777_v63  ;;  %3530 = vmatpush.msra.mxu0 %v478_v4  ;;  %v898_v25 = vld [vmem:[#allocation5 + $0x16c0] sm:$0xff] }
 0x24b   :  { %3524 = vmatpush.msrb.mxu3 %v2117_v3  ;;  %v2097_v7 = vld [vmem:[#allocation5 + $0x3c38] sm:$0xff]  ;;  %3506 = vmatmul.f32.vlgmr.msrb.gmra.mxu2 %v7350_v10  ;;  %v418_v10 = vld [vmem:[#allocation5 + $0x7c0] sm:$0xff] }
 0x24c   :  { %3550 = vmatpush.msra.mxu1 %v798_v5  ;;  %3570 = vmatpush.msra.mxu2 %v1118_v6  ;;  %v1238_v52 = vld [vmem:[#allocation5 + $0x2160] sm:$0xff] }
 0x24d   :  { %3525 = vmatpush.msrb.mxu3 %v2097_v7  ;;  %3531 = vmatpush.msra.mxu0 %v458_v8  ;;  %v238_v53 = vld [vmem:[#allocation5 + $0x220] sm:$0xff] }
 0x24e   :  { %3526 = vmatmul.f32.vlgmr.msrb.gmra.mxu3 %v7335_v56  ;;  %3551 = vmatpush.msra.mxu1 %v778_v9  ;;  %v718_v56 = vld [vmem:[#allocation5 + $0x1120] sm:$0xff] }
 0x24f   :  { %3571 = vmatpush.msra.mxu2 %v1098_v11  ;;  %3590 = vmatpush.msra.mxu3 %v1438_v27  ;;  %v558_v2 = vld [vmem:[#allocation5 + $0xc20] sm:$0xff] }
 0x250   :  { %3486 = vmatmul.f32.vlgmr.msrb.gmra.mxu1 %v7344_v31  ;;  %3532 = vmatpush.msra.mxu0 %v438_v51  ;;  %v1018_v31 = vld [vmem:[#allocation5 + $0x1a80] sm:$0xff] }
 0x251   :  { %3552 = vmatpush.msra.mxu1 %v758_v12  ;;  %3572 = vmatpush.msra.mxu2 %v1078_v14  ;;  %v878_v54 = vld [vmem:[#allocation5 + $0x1620] sm:$0xff] }
 0x252   :  { %3591 = vmatpush.msra.mxu3 %v1418_v16  ;;  %3533 = vmatpush.msra.mxu0 %v418_v10  ;;  %v1218_v55 = vld [vmem:[#allocation5 + $0x20c0] sm:$0xff]  ;;  %v479_v16 = vld [vmem:[#allocation5 + $0x9a8] sm:$0xff] }
 0x253   :  { %3553 = vmatpush.msra.mxu1 %v738_v34  ;;  %3573 = vmatpush.msra.mxu2 %v1058_v17  ;;  %v218_v58 = vld [vmem:[#allocation5 + $0x180] sm:$0xff] }
 0x254   :  { %3592 = vmatpush.msra.mxu3 %v1398_v18  ;;  %3534 = vmatpush.msra.mxu0 %v398_v19  ;;  %v538_v60 = vld [vmem:[#allocation5 + $0xb80] sm:$0xff]  ;;  %v459_v18 = vld [vmem:[#allocation5 + $0x908] sm:$0xff] }
 0x255   :  { %3554 = vmatpush.msra.mxu1 %v718_v56  ;;  %3574 = vmatpush.msra.mxu2 %v1038_v21  ;;  %v858_v61 = vld [vmem:[#allocation5 + $0x1580] sm:$0xff] }
 0x256   :  { %3593 = vmatpush.msra.mxu3 %v1378_v22  ;;  %3535 = vmatpush.msra.mxu0 %v378_v23  ;;  %v1198_v44 = vld [vmem:[#allocation5 + $0x2020] sm:$0xff]  ;;  %v439_v22 = vld [vmem:[#allocation5 + $0x868] sm:$0xff] }
 0x257   :  { %3555 = vmatpush.msra.mxu1 %v698_v24  ;;  %3575 = vmatpush.msra.mxu2 %v1018_v31  ;;  %v198_v62 = vld [vmem:[#allocation5 + $0xe0] sm:$0xff] }
 0x258   :  { %3594 = vmatpush.msra.mxu3 %v1358_v26  ;;  %3536 = vmatpush.msra.mxu0 %v358_v28  ;;  %v518_v33 = vld [vmem:[#allocation5 + $0xae0] sm:$0xff]  ;;  %v419_v26 = vld [vmem:[#allocation5 + $0x7c8] sm:$0xff] }
 0x259   :  { %3556 = vmatpush.msra.mxu1 %v678_v29  ;;  %3576 = vmatpush.msra.mxu2 %v998_v30  ;;  %v838_v63 = vld [vmem:[#allocation5 + $0x14e0] sm:$0xff] }
 0x25a   :  { %3595 = vmatpush.msra.mxu3 %v1338_v32  ;;  %3537 = vmatpush.msra.mxu0 %v338_v35  ;;  %v1178_v3 = vld [vmem:[#allocation5 + $0x1f80] sm:$0xff]  ;;  %v399_v32 = vld [vmem:[#allocation5 + $0x728] sm:$0xff] }
 0x25b   :  { %3557 = vmatpush.msra.mxu1 %v658_v0  ;;  %3577 = vmatpush.msra.mxu2 %v978_v36  ;;  %v178_v4 = vld [vmem:[#allocation5 + $0x40] sm:$0xff] }
 0x25c   :  { %3596 = vmatpush.msra.mxu3 %v1318_v37  ;;  %3538 = vmatpush.msra.mxu0 %v318_v15  ;;  %v498_v5 = vld [vmem:[#allocation5 + $0xa40] sm:$0xff]  ;;  %v379_v37 = vld [vmem:[#allocation5 + $0x688] sm:$0xff] }
 0x25d   :  { %3558 = vmatpush.msra.mxu1 %v638_v38  ;;  %3578 = vmatpush.msra.mxu2 %v958_v1  ;;  %v818_v6 = vld [vmem:[#allocation5 + $0x1440] sm:$0xff] }
 0x25e   :  { %3597 = vmatpush.msra.mxu3 %v1298_v39  ;;  %3539 = vmatpush.msra.mxu0 %v298_v40  ;;  %v1158_v7 = vld [vmem:[#allocation5 + $0x1ee0] sm:$0xff]  ;;  %v359_v39 = vld [vmem:[#allocation5 + $0x5e8] sm:$0xff] }
 0x25f   :  { %3559 = vmatpush.msra.mxu1 %v618_v41  ;;  %3579 = vmatpush.msra.mxu2 %v938_v42  ;;  %v1758_v8 = vld [vmem:[#allocation5 + $0x31a0] sm:$0xff] }
 0x260   :  { %3598 = vmatpush.msra.mxu3 %v1278_v43  ;;  %3540 = vmatpush.msra.mxu0 %v278_v45  ;;  %v2078_v9 = vld [vmem:[#allocation5 + $0x3ba0] sm:$0xff]  ;;  %v339_v43 = vld [vmem:[#allocation5 + $0x548] sm:$0xff] }
 0x261   :  { %3560 = vmatpush.msra.mxu1 %v598_v46  ;;  %3580 = vmatpush.msra.mxu2 %v918_v20  ;;  %v2398_v11 = vld [vmem:[#allocation5 + $0x45a0] sm:$0xff] }
 0x262   :  { %3599 = vmatpush.msra.mxu3 %v1258_v48  ;;  %3541 = vmatpush.msra.mxu0 %v258_v49  ;;  %v1138_v27 = vld [vmem:[#allocation5 + $0x1e40] sm:$0xff]  ;;  %v319_v48 = vld [vmem:[#allocation5 + $0x4a8] sm:$0xff] }
 0x263   :  { %3561 = vmatpush.msra.mxu1 %v578_v59  ;;  %3581 = vmatpush.msra.mxu2 %v898_v25  ;;  %v1738_v51 = vld [vmem:[#allocation5 + $0x3100] sm:$0xff] }
 0x264   :  { %3600 = vmatpush.msra.mxu3 %v1238_v52  ;;  %3542 = vmatpush.msra.mxu0 %v238_v53  ;;  %v2058_v12 = vld [vmem:[#allocation5 + $0x3b00] sm:$0xff]  ;;  %v299_v52 = vld [vmem:[#allocation5 + $0x408] sm:$0xff] }
 0x265   :  { %3562 = vmatpush.msra.mxu1 %v558_v2  ;;  %3582 = vmatpush.msra.mxu2 %v878_v54  ;;  %v2378_v14 = vld [vmem:[#allocation5 + $0x4500] sm:$0xff] }
 0x266   :  { %3601 = vmatpush.msra.mxu3 %v1218_v55  ;;  %3543 = vmatpush.msra.mxu0 %v218_v58  ;;  %v1718_v10 = vld [vmem:[#allocation5 + $0x3060] sm:$0xff]  ;;  %v279_v55 = vld [vmem:[#allocation5 + $0x368] sm:$0xff] }
 0x267   :  { %3563 = vmatpush.msra.mxu1 %v538_v60  ;;  %3583 = vmatpush.msra.mxu2 %v858_v61  ;;  %v2038_v34 = vld [vmem:[#allocation5 + $0x3a60] sm:$0xff] }
 0x268   :  { %3602 = vmatpush.msra.mxu3 %v1198_v44  ;;  %3544 = vmatpush.msra.mxu0 %v198_v62  ;;  %v2358_v17 = vld [vmem:[#allocation5 + $0x4460] sm:$0xff]  ;;  %v259_v44 = vld [vmem:[#allocation5 + $0x2c8] sm:$0xff] }
 0x269   :  { %3564 = vmatpush.msra.mxu1 %v518_v33  ;;  %3584 = vmatpush.msra.mxu2 %v838_v63  ;;  %v1698_v19 = vld [vmem:[#allocation5 + $0x2fc0] sm:$0xff] }
 0x26a   :  { %3603 = vmatpush.msra.mxu3 %v1178_v3  ;;  %3545 = vmatpush.msra.mxu0 %v178_v4  ;;  %v2018_v56 = vld [vmem:[#allocation5 + $0x39c0] sm:$0xff]  ;;  %v239_v3 = vld [vmem:[#allocation5 + $0x228] sm:$0xff] }
 0x26b   :  { %3565 = vmatpush.msra.mxu1 %v498_v5  ;;  %3585 = vmatpush.msra.mxu2 %v818_v6  ;;  %v2338_v21 = vld [vmem:[#allocation5 + $0x43c0] sm:$0xff] }
 0x26c   :  { %3604 = vmatpush.msra.mxu3 %v1158_v7  ;;  %3610 = vmatpush.msrb.mxu0 %v1758_v8  ;;  %v1678_v23 = vld [vmem:[#allocation5 + $0x2f20] sm:$0xff]  ;;  %v219_v7 = vld [vmem:[#allocation5 + $0x188] sm:$0xff] }
 0x26d   :  { %3630 = vmatpush.msrb.mxu1 %v2078_v9  ;;  %3650 = vmatpush.msrb.mxu2 %v2398_v11  ;;  %v1998_v24 = vld [vmem:[#allocation5 + $0x3920] sm:$0xff]  ;;  %v199_v11 = vld [vmem:[#allocation5 + $0xe8] sm:$0xff] }
 0x26e   :  { %3605 = vmatpush.msra.mxu3 %v1138_v27  ;;  %3611 = vmatpush.msrb.mxu0 %v1738_v51  ;;  %v2318_v31 = vld [vmem:[#allocation5 + $0x4320] sm:$0xff]  ;;  %v1439_v27 = vld [vmem:[#allocation5 + $0x27a8] sm:$0xff] }
 0x26f   :  { %3631 = vmatpush.msrb.mxu1 %v2058_v12  ;;  %3651 = vmatpush.msrb.mxu2 %v2378_v14  ;;  %v1658_v28 = vld [vmem:[#allocation5 + $0x2e80] sm:$0xff]  ;;  %v179_v51 = vld [vmem:[#allocation5 + $0x48] sm:$0xff]  ;;  %v7368_v12 = vld [vmem:[#allocation2 + $0x30] sm:$0xff] }
 0x270   :  { %3670 = vmatpush.msrb.mxu3 %v479_v16  ;;  %3612 = vmatpush.msrb.mxu0 %v1718_v10  ;;  %v1978_v29 = vld [vmem:[#allocation5 + $0x3880] sm:$0xff]  ;;  %v1099_v14 = vld [vmem:[#allocation5 + $0x1d08] sm:$0xff] }
 0x271   :  { %3632 = vmatpush.msrb.mxu1 %v2038_v34  ;;  %3652 = vmatpush.msrb.mxu2 %v2358_v17  ;;  %v2298_v30 = vld [vmem:[#allocation5 + $0x4280] sm:$0xff]  ;;  %v1419_v16 = vld [vmem:[#allocation5 + $0x2708] sm:$0xff] }
 0x272   :  { %3671 = vmatpush.msrb.mxu3 %v459_v18  ;;  %3613 = vmatpush.msrb.mxu0 %v1698_v19  ;;  %v1638_v35 = vld [vmem:[#allocation5 + $0x2de0] sm:$0xff]  ;;  %v1759_v10 = vld [vmem:[#allocation5 + $0x31a8] sm:$0xff] }
 0x273   :  { %3633 = vmatpush.msrb.mxu1 %v2018_v56  ;;  %3653 = vmatpush.msrb.mxu2 %v2338_v21  ;;  %v1958_v0 = vld [vmem:[#allocation5 + $0x37e0] sm:$0xff]  ;;  %v7371_v34 = vld [vmem:[#allocation2 + $0x20] sm:$0xff] }
 0x274   :  { %3672 = vmatpush.msrb.mxu3 %v439_v22  ;;  %3614 = vmatpush.msrb.mxu0 %v1678_v23  ;;  %v2278_v36 = vld [vmem:[#allocation5 + $0x41e0] sm:$0xff]  ;;  %v759_v17 = vld [vmem:[#allocation5 + $0x1268] sm:$0xff]  ;;  %v7374_v22 = vld [vmem:[#allocation2 + $0x28] sm:$0xff] }
 0x275   :  { %3634 = vmatpush.msrb.mxu1 %v1998_v24  ;;  %3654 = vmatpush.msrb.mxu2 %v2318_v31  ;;  %v1618_v15 = vld [vmem:[#allocation5 + $0x2d40] sm:$0xff]  ;;  %v1079_v18 = vld [vmem:[#allocation5 + $0x1c68] sm:$0xff] }
 0x276   :  { %3673 = vmatpush.msrb.mxu3 %v419_v26  ;;  %3615 = vmatpush.msrb.mxu0 %v1658_v28  ;;  %v1938_v38 = vld [vmem:[#allocation5 + $0x3740] sm:$0xff]  ;;  %v1399_v19 = vld [vmem:[#allocation5 + $0x2668] sm:$0xff] }
 0x277   :  { %3635 = vmatpush.msrb.mxu1 %v1978_v29  ;;  %3655 = vmatpush.msrb.mxu2 %v2298_v30  ;;  %v2258_v1 = vld [vmem:[#allocation5 + $0x4140] sm:$0xff]  ;;  %v1739_v56 = vld [vmem:[#allocation5 + $0x3108] sm:$0xff] }
 0x278   :  { %3674 = vmatpush.msrb.mxu3 %v399_v32  ;;  %3616 = vmatpush.msrb.mxu0 %v1638_v35  ;;  %v1598_v40 = vld [vmem:[#allocation5 + $0x2ca0] sm:$0xff]  ;;  %v739_v21 = vld [vmem:[#allocation5 + $0x11c8] sm:$0xff] }
 0x279   :  { %3636 = vmatpush.msrb.mxu1 %v1958_v0  ;;  %3656 = vmatpush.msrb.mxu2 %v2278_v36  ;;  %v1918_v41 = vld [vmem:[#allocation5 + $0x36a0] sm:$0xff]  ;;  %v1059_v23 = vld [vmem:[#allocation5 + $0x1bc8] sm:$0xff] }
 0x27a   :  { %3675 = vmatpush.msrb.mxu3 %v379_v37  ;;  %3617 = vmatpush.msrb.mxu0 %v1618_v15  ;;  %v2238_v42 = vld [vmem:[#allocation5 + $0x40a0] sm:$0xff]  ;;  %v1379_v24 = vld [vmem:[#allocation5 + $0x25c8] sm:$0xff] }
 0x27b   :  { %3637 = vmatpush.msrb.mxu1 %v1938_v38  ;;  %3657 = vmatpush.msrb.mxu2 %v2258_v1  ;;  %v1578_v45 = vld [vmem:[#allocation5 + $0x2c00] sm:$0xff]  ;;  %v1719_v31 = vld [vmem:[#allocation5 + $0x3068] sm:$0xff] }
 0x27c   :  { %3676 = vmatpush.msrb.mxu3 %v359_v39  ;;  %v1898_v46 = vld [vmem:[#allocation5 + $0x3600] sm:$0xff]  ;;  %3618 = vmatpush.msrb.mxu0 %v1598_v40  ;;  %v719_v26 = vld [vmem:[#allocation5 + $0x1128] sm:$0xff] }
 0x27d   :  { %3638 = vmatpush.msrb.mxu1 %v1918_v41  ;;  %v2218_v20 = vld [vmem:[#allocation5 + $0x4000] sm:$0xff]  ;;  %3658 = vmatpush.msrb.mxu2 %v2238_v42  ;;  %v1039_v28 = vld [vmem:[#allocation5 + $0x1b28] sm:$0xff] }
 0x27e   :  { %3677 = vmatpush.msrb.mxu3 %v339_v43  ;;  %v1558_v49 = vld [vmem:[#allocation5 + $0x2b60] sm:$0xff]  ;;  %3619 = vmatpush.msrb.mxu0 %v1578_v45  ;;  %v1359_v29 = vld [vmem:[#allocation5 + $0x2528] sm:$0xff] }
 0x27f   :  { %v1878_v59 = vld [vmem:[#allocation5 + $0x3560] sm:$0xff]  ;;  %3639 = vmatpush.msrb.mxu1 %v1898_v46  ;;  %3659 = vmatpush.msrb.mxu2 %v2218_v20  ;;  %v1699_v30 = vld [vmem:[#allocation5 + $0x2fc8] sm:$0xff] }
 0x280   :  { %v2198_v25 = vld [vmem:[#allocation5 + $0x3f60] sm:$0xff]  ;;  %3678 = vmatpush.msrb.mxu3 %v319_v48  ;;  %3620 = vmatpush.msrb.mxu0 %v1558_v49  ;;  %v699_v32 = vld [vmem:[#allocation5 + $0x1088] sm:$0xff] }
 0x281   :  { %v1538_v53 = vld [vmem:[#allocation5 + $0x2ac0] sm:$0xff]  ;;  %3640 = vmatpush.msrb.mxu1 %v1878_v59  ;;  %3660 = vmatpush.msrb.mxu2 %v2198_v25  ;;  %v1019_v35 = vld [vmem:[#allocation5 + $0x1a88] sm:$0xff] }
 0x282   :  { %v1858_v2 = vld [vmem:[#allocation5 + $0x34c0] sm:$0xff]  ;;  %3679 = vmatpush.msrb.mxu3 %v299_v52  ;;  %3621 = vmatpush.msrb.mxu0 %v1538_v53  ;;  %v1339_v0 = vld [vmem:[#allocation5 + $0x2488] sm:$0xff] }
 0x283   :  { %v2178_v54 = vld [vmem:[#allocation5 + $0x3ec0] sm:$0xff]  ;;  %3641 = vmatpush.msrb.mxu1 %v1858_v2  ;;  %3586 = vmatmul.f32.vlgmr.msra.gmra.mxu2 %v7347_v47  ;;  %v1679_v36 = vld [vmem:[#allocation5 + $0x2f28] sm:$0xff] }
 0x284   :  { %v1518_v58 = vld [vmem:[#allocation5 + $0x2a20] sm:$0xff]  ;;  %3661 = vmatpush.msrb.mxu2 %v2178_v54  ;;  %3680 = vmatpush.msrb.mxu3 %v279_v55  ;;  %v679_v37 = vld [vmem:[#allocation5 + $0xfe8] sm:$0xff] }
 0x285   :  { %v1838_v60 = vld [vmem:[#allocation5 + $0x3420] sm:$0xff]  ;;  %3622 = vmatpush.msrb.mxu0 %v1518_v58  ;;  %3606 = vmatmul.f32.vlgmr.msra.gmra.mxu3 %v7353_v13  ;;  %v1119_v13 = vld [vmem:[#allocation5 + $0x1da8] sm:$0xff] }
 0x286   :  { %v2158_v61 = vld [vmem:[#allocation5 + $0x3e20] sm:$0xff]  ;;  %3642 = vmatpush.msrb.mxu1 %v1838_v60  ;;  %3681 = vmatpush.msrb.mxu3 %v259_v44  ;;  %v999_v15 = vld [vmem:[#allocation5 + $0x19e8] sm:$0xff] }
 0x287   :  { %v1498_v62 = vld [vmem:[#allocation5 + $0x2980] sm:$0xff]  ;;  %3662 = vmatpush.msrb.mxu2 %v2158_v61  ;;  %3546 = vmatmul.f32.vlgmr.msra.gmra.mxu0 %v7338_v50  ;;  %v799_v50 = vld [vmem:[#allocation5 + $0x13a8] sm:$0xff] }
 0x288   :  { %v1818_v33 = vld [vmem:[#allocation5 + $0x3380] sm:$0xff]  ;;  %3623 = vmatpush.msrb.mxu0 %v1498_v62  ;;  %3682 = vmatpush.msrb.mxu3 %v239_v3  ;;  %v1319_v38 = vld [vmem:[#allocation5 + $0x23e8] sm:$0xff] }
 0x289   :  { %v2138_v63 = vld [vmem:[#allocation5 + $0x3d80] sm:$0xff]  ;;  %3643 = vmatpush.msrb.mxu1 %v1818_v33  ;;  %v1659_v1 = vld [vmem:[#allocation5 + $0x2e88] sm:$0xff] }
 0x28a   :  { %v1478_v4 = vld [vmem:[#allocation5 + $0x28e0] sm:$0xff]  ;;  %3663 = vmatpush.msrb.mxu2 %v2138_v63  ;;  %3566 = vmatmul.f32.vlgmr.msra.gmra.mxu1 %v7341_v57  ;;  %v779_v57 = vld [vmem:[#allocation5 + $0x1308] sm:$0xff] }
 0x28b   :  { %v1798_v5 = vld [vmem:[#allocation5 + $0x32e0] sm:$0xff]  ;;  %3624 = vmatpush.msrb.mxu0 %v1478_v4  ;;  %3683 = vmatpush.msrb.mxu3 %v219_v7  ;;  %v659_v39 = vld [vmem:[#allocation5 + $0xf48] sm:$0xff] }
 0x28c   :  { %v2118_v6 = vld [vmem:[#allocation5 + $0x3ce0] sm:$0xff]  ;;  %3644 = vmatpush.msrb.mxu1 %v1798_v5  ;;  %v979_v40 = vld [vmem:[#allocation5 + $0x1948] sm:$0xff] }
 0x28d   :  { %v1458_v47 = vld [vmem:[#allocation5 + $0x2840] sm:$0xff]  ;;  %3664 = vmatpush.msrb.mxu2 %v2118_v6  ;;  %3684 = vmatpush.msrb.mxu3 %v199_v11  ;;  %v1299_v41 = vld [vmem:[#allocation5 + $0x2348] sm:$0xff] }
 0x28e   :  { %v1778_v8 = vld [vmem:[#allocation5 + $0x3240] sm:$0xff]  ;;  %3625 = vmatpush.msrb.mxu0 %v1458_v47  ;;  %v1639_v42 = vld [vmem:[#allocation5 + $0x2de8] sm:$0xff] }
 0x28f   :  { %v2098_v9 = vld [vmem:[#allocation5 + $0x3c40] sm:$0xff]  ;;  %3645 = vmatpush.msrb.mxu1 %v1778_v8  ;;  %3685 = vmatpush.msrb.mxu3 %v179_v51  ;;  %v639_v43 = vld [vmem:[#allocation5 + $0xea8] sm:$0xff] }
 0x290   :  { %3665 = vmatpush.msrb.mxu2 %v2098_v9  ;;  %3690 = vmatpush.msra.mxu0 %v799_v50  ;;  %v959_v45 = vld [vmem:[#allocation5 + $0x18a8] sm:$0xff] }
 0x291   :  { %3666 = vmatmul.f32.vlgmr.msrb.gmra.mxu2 %v7368_v12  ;;  %3710 = vmatpush.msra.mxu1 %v1119_v13  ;;  %v1279_v46 = vld [vmem:[#allocation5 + $0x22a8] sm:$0xff] }
 0x292   :  { %3730 = vmatpush.msra.mxu2 %v1439_v27  ;;  %3626 = vmatmul.f32.vlgmr.msrb.gmra.mxu0 %v7371_v34  ;;  %v1619_v20 = vld [vmem:[#allocation5 + $0x2d48] sm:$0xff] }
 0x293   :  { %3691 = vmatpush.msra.mxu0 %v779_v57  ;;  %3711 = vmatpush.msra.mxu1 %v1099_v14  ;;  %v619_v48 = vld [vmem:[#allocation5 + $0xe08] sm:$0xff]  ;;  %v480_v14 = vld [vmem:[#allocation5 + $0x9b0] sm:$0xff] }
 0x294   :  { %3731 = vmatpush.msra.mxu2 %v1419_v16  ;;  %3750 = vmatpush.msra.mxu3 %v1759_v10  ;;  %v939_v49 = vld [vmem:[#allocation5 + $0x1808] sm:$0xff] }
 0x295   :  { %3646 = vmatmul.f32.vlgmr.msrb.gmra.mxu1 %v7374_v22  ;;  %3692 = vmatpush.msra.mxu0 %v759_v17  ;;  %v1259_v59 = vld [vmem:[#allocation5 + $0x2208] sm:$0xff] }
 0x296   :  { %3712 = vmatpush.msra.mxu1 %v1079_v18  ;;  %3732 = vmatpush.msra.mxu2 %v1399_v19  ;;  %v1599_v25 = vld [vmem:[#allocation5 + $0x2ca8] sm:$0xff]  ;;  %v460_v19 = vld [vmem:[#allocation5 + $0x910] sm:$0xff] }
 0x297   :  { %3751 = vmatpush.msra.mxu3 %v1739_v56  ;;  %3693 = vmatpush.msra.mxu0 %v739_v21  ;;  %v599_v52 = vld [vmem:[#allocation5 + $0xd68] sm:$0xff]  ;;  %v800_v56 = vld [vmem:[#allocation5 + $0x13b0] sm:$0xff] }
 0x298   :  { %3713 = vmatpush.msra.mxu1 %v1059_v23  ;;  %3733 = vmatpush.msra.mxu2 %v1379_v24  ;;  %v919_v53 = vld [vmem:[#allocation5 + $0x1768] sm:$0xff]  ;;  %v440_v24 = vld [vmem:[#allocation5 + $0x870] sm:$0xff] }
 0x299   :  { %3752 = vmatpush.msra.mxu3 %v1719_v31  ;;  %3694 = vmatpush.msra.mxu0 %v719_v26  ;;  %v1239_v2 = vld [vmem:[#allocation5 + $0x2168] sm:$0xff]  ;;  %v780_v31 = vld [vmem:[#allocation5 + $0x1310] sm:$0xff] }
 0x29a   :  { %3714 = vmatpush.msra.mxu1 %v1039_v28  ;;  %3734 = vmatpush.msra.mxu2 %v1359_v29  ;;  %v1579_v54 = vld [vmem:[#allocation5 + $0x2c08] sm:$0xff]  ;;  %v420_v29 = vld [vmem:[#allocation5 + $0x7d0] sm:$0xff] }
 0x29b   :  { %3753 = vmatpush.msra.mxu3 %v1699_v30  ;;  %3695 = vmatpush.msra.mxu0 %v699_v32  ;;  %v579_v55 = vld [vmem:[#allocation5 + $0xcc8] sm:$0xff]  ;;  %v760_v30 = vld [vmem:[#allocation5 + $0x1270] sm:$0xff]  ;;  %v7380_v32 = vld [vmem:[#allocation2 + $0x18] sm:$0xff] }
 0x29c   :  { %3715 = vmatpush.msra.mxu1 %v1019_v35  ;;  %3735 = vmatpush.msra.mxu2 %v1339_v0  ;;  %v899_v58 = vld [vmem:[#allocation5 + $0x16c8] sm:$0xff] }
 0x29d   :  { %3754 = vmatpush.msra.mxu3 %v1679_v36  ;;  %3696 = vmatpush.msra.mxu0 %v679_v37  ;;  %v1219_v60 = vld [vmem:[#allocation5 + $0x20c8] sm:$0xff]  ;;  %v400_v36 = vld [vmem:[#allocation5 + $0x730] sm:$0xff] }
 0x29e   :  { %3716 = vmatpush.msra.mxu1 %v999_v15  ;;  %3736 = vmatpush.msra.mxu2 %v1319_v38  ;;  %v1559_v61 = vld [vmem:[#allocation5 + $0x2b68] sm:$0xff]  ;;  %v7383_v37 = vld [vmem:[#allocation2 + $0x8] sm:$0xff] }
 0x29f   :  { %3755 = vmatpush.msra.mxu3 %v1659_v1  ;;  %3697 = vmatpush.msra.mxu0 %v659_v39  ;;  %v559_v44 = vld [vmem:[#allocation5 + $0xc28] sm:$0xff]  ;;  %v740_v15 = vld [vmem:[#allocation5 + $0x11d0] sm:$0xff] }
 0x2a0   :  { %3717 = vmatpush.msra.mxu1 %v979_v40  ;;  %3737 = vmatpush.msra.mxu2 %v1299_v41  ;;  %v879_v62 = vld [vmem:[#allocation5 + $0x1628] sm:$0xff]  ;;  %v380_v39 = vld [vmem:[#allocation5 + $0x690] sm:$0xff]  ;;  %v7387_v41 = vld [vmem:[#allocation2 + $0x10] sm:$0xff] }
 0x2a1   :  { %3756 = vmatpush.msra.mxu3 %v1639_v42  ;;  %3698 = vmatpush.msra.mxu0 %v639_v43  ;;  %v1199_v33 = vld [vmem:[#allocation5 + $0x2028] sm:$0xff]  ;;  %v720_v40 = vld [vmem:[#allocation5 + $0x1130] sm:$0xff] }
 0x2a2   :  { %3718 = vmatpush.msra.mxu1 %v959_v45  ;;  %3738 = vmatpush.msra.mxu2 %v1279_v46  ;;  %v1539_v63 = vld [vmem:[#allocation5 + $0x2ac8] sm:$0xff]  ;;  %v360_v45 = vld [vmem:[#allocation5 + $0x5f0] sm:$0xff] }
 0x2a3   :  { %3757 = vmatpush.msra.mxu3 %v1619_v20  ;;  %3699 = vmatpush.msra.mxu0 %v619_v48  ;;  %v539_v3 = vld [vmem:[#allocation5 + $0xb88] sm:$0xff]  ;;  %v700_v46 = vld [vmem:[#allocation5 + $0x1090] sm:$0xff] }
 0x2a4   :  { %3719 = vmatpush.msra.mxu1 %v939_v49  ;;  %3739 = vmatpush.msra.mxu2 %v1259_v59  ;;  %v859_v4 = vld [vmem:[#allocation5 + $0x1588] sm:$0xff]  ;;  %v340_v49 = vld [vmem:[#allocation5 + $0x550] sm:$0xff] }
 0x2a5   :  { %3758 = vmatpush.msra.mxu3 %v1599_v25  ;;  %3700 = vmatpush.msra.mxu0 %v599_v52  ;;  %v1179_v5 = vld [vmem:[#allocation5 + $0x1f88] sm:$0xff]  ;;  %v680_v59 = vld [vmem:[#allocation5 + $0xff0] sm:$0xff] }
 0x2a6   :  { %3720 = vmatpush.msra.mxu1 %v919_v53  ;;  %3740 = vmatpush.msra.mxu2 %v1239_v2  ;;  %v1519_v6 = vld [vmem:[#allocation5 + $0x2a28] sm:$0xff]  ;;  %v320_v53 = vld [vmem:[#allocation5 + $0x4b0] sm:$0xff] }
 0x2a7   :  { %3759 = vmatpush.msra.mxu3 %v1579_v54  ;;  %3701 = vmatpush.msra.mxu0 %v579_v55  ;;  %v519_v7 = vld [vmem:[#allocation5 + $0xae8] sm:$0xff]  ;;  %v660_v2 = vld [vmem:[#allocation5 + $0xf50] sm:$0xff] }
 0x2a8   :  { %3721 = vmatpush.msra.mxu1 %v899_v58  ;;  %3741 = vmatpush.msra.mxu2 %v1219_v60  ;;  %v839_v47 = vld [vmem:[#allocation5 + $0x14e8] sm:$0xff]  ;;  %v300_v58 = vld [vmem:[#allocation5 + $0x410] sm:$0xff] }
 0x2a9   :  { %3760 = vmatpush.msra.mxu3 %v1559_v61  ;;  %3702 = vmatpush.msra.mxu0 %v559_v44  ;;  %v1159_v8 = vld [vmem:[#allocation5 + $0x1ee8] sm:$0xff]  ;;  %v640_v60 = vld [vmem:[#allocation5 + $0xeb0] sm:$0xff] }
 0x2aa   :  { %3722 = vmatpush.msra.mxu1 %v879_v62  ;;  %3742 = vmatpush.msra.mxu2 %v1199_v33  ;;  %v1499_v9 = vld [vmem:[#allocation5 + $0x2988] sm:$0xff]  ;;  %v280_v62 = vld [vmem:[#allocation5 + $0x370] sm:$0xff] }
 0x2ab   :  { %3761 = vmatpush.msra.mxu3 %v1539_v63  ;;  %3703 = vmatpush.msra.mxu0 %v539_v3  ;;  %v499_v11 = vld [vmem:[#allocation5 + $0xa48] sm:$0xff]  ;;  %v620_v33 = vld [vmem:[#allocation5 + $0xe10] sm:$0xff] }
 0x2ac   :  { %3723 = vmatpush.msra.mxu1 %v859_v4  ;;  %3743 = vmatpush.msra.mxu2 %v1179_v5  ;;  %v819_v50 = vld [vmem:[#allocation5 + $0x1448] sm:$0xff]  ;;  %v260_v4 = vld [vmem:[#allocation5 + $0x2d0] sm:$0xff] }
 0x2ad   :  { %3762 = vmatpush.msra.mxu3 %v1519_v6  ;;  %3704 = vmatpush.msra.mxu0 %v519_v7  ;;  %v1139_v13 = vld [vmem:[#allocation5 + $0x1e48] sm:$0xff]  ;;  %v600_v5 = vld [vmem:[#allocation5 + $0xd70] sm:$0xff] }
 0x2ae   :  { %3724 = vmatpush.msra.mxu1 %v839_v47  ;;  %3744 = vmatpush.msra.mxu2 %v1159_v8  ;;  %v1479_v27 = vld [vmem:[#allocation5 + $0x28e8] sm:$0xff]  ;;  %v240_v47 = vld [vmem:[#allocation5 + $0x230] sm:$0xff] }
 0x2af   :  { %v2079_v51 = vld [vmem:[#allocation5 + $0x3ba8] sm:$0xff]  ;;  %3763 = vmatpush.msra.mxu3 %v1499_v9  ;;  %3705 = vmatpush.msra.mxu0 %v499_v11  ;;  %v580_v8 = vld [vmem:[#allocation5 + $0xcd0] sm:$0xff] }
 0x2b0   :  { %v2399_v57 = vld [vmem:[#allocation5 + $0x45a8] sm:$0xff]  ;;  %3725 = vmatpush.msra.mxu1 %v819_v50  ;;  %3745 = vmatpush.msra.mxu2 %v1139_v13  ;;  %v220_v50 = vld [vmem:[#allocation5 + $0x190] sm:$0xff] }
 0x2b1   :  { %v1459_v16 = vld [vmem:[#allocation5 + $0x2848] sm:$0xff]  ;;  %3764 = vmatpush.msra.mxu3 %v1479_v27  ;;  %3770 = vmatpush.msrb.mxu0 %v2079_v51  ;;  %v560_v13 = vld [vmem:[#allocation5 + $0xc30] sm:$0xff] }
 0x2b2   :  { %v2059_v10 = vld [vmem:[#allocation5 + $0x3b08] sm:$0xff]  ;;  %3790 = vmatpush.msrb.mxu1 %v2399_v57  ;;  %3810 = vmatpush.msrb.mxu2 %v480_v14  ;;  %v200_v57 = vld [vmem:[#allocation5 + $0xf0] sm:$0xff] }
 0x2b3   :  { %v2379_v17 = vld [vmem:[#allocation5 + $0x4508] sm:$0xff]  ;;  %3765 = vmatpush.msra.mxu3 %v1459_v16  ;;  %3771 = vmatpush.msrb.mxu0 %v2059_v10  ;;  %v540_v14 = vld [vmem:[#allocation5 + $0xb90] sm:$0xff] }
 0x2b4   :  { %v7377_v18 = vld [vmem:[#allocation2] sm:$0xff]  ;;  %3791 = vmatpush.msrb.mxu1 %v2379_v17  ;;  %3811 = vmatpush.msrb.mxu2 %v460_v19  ;;  %v180_v17 = vld [vmem:[#allocation5 + $0x50] sm:$0xff] }
 0x2b5   :  { %3686 = vmatmul.f32.vlgmr.msrb.gmra.mxu3 %v7377_v18  ;;  %v2039_v21 = vld [vmem:[#allocation5 + $0x3a68] sm:$0xff]  ;;  %3746 = vmatmul.f32.vlgmr.msra.gmra.mxu2 %v7380_v32  ;;  %v520_v19 = vld [vmem:[#allocation5 + $0xaf0] sm:$0xff] }
 0x2b6   :  { %v2359_v23 = vld [vmem:[#allocation5 + $0x4468] sm:$0xff]  ;;  %3830 = vmatpush.msrb.mxu3 %v800_v56  ;;  %3772 = vmatpush.msrb.mxu0 %v2039_v21  ;;  %v1440_v56 = vld [vmem:[#allocation5 + $0x27b0] sm:$0xff] }
 0x2b7   :  { %v2019_v26 = vld [vmem:[#allocation5 + $0x39c8] sm:$0xff]  ;;  %3792 = vmatpush.msrb.mxu1 %v2359_v23  ;;  %3812 = vmatpush.msrb.mxu2 %v440_v24  ;;  %v1120_v21 = vld [vmem:[#allocation5 + $0x1db0] sm:$0xff] }
 0x2b8   :  { %v2339_v28 = vld [vmem:[#allocation5 + $0x43c8] sm:$0xff]  ;;  %3831 = vmatpush.msrb.mxu3 %v780_v31  ;;  %3773 = vmatpush.msrb.mxu0 %v2019_v26  ;;  %v1760_v23 = vld [vmem:[#allocation5 + $0x31b0] sm:$0xff] }
 0x2b9   :  { %v1999_v35 = vld [vmem:[#allocation5 + $0x3928] sm:$0xff]  ;;  %3793 = vmatpush.msrb.mxu1 %v2339_v28  ;;  %3813 = vmatpush.msrb.mxu2 %v420_v29  ;;  %v500_v24 = vld [vmem:[#allocation5 + $0xa50] sm:$0xff] }
 0x2ba   :  { %v2319_v0 = vld [vmem:[#allocation5 + $0x4328] sm:$0xff]  ;;  %3832 = vmatpush.msrb.mxu3 %v760_v30  ;;  %3706 = vmatmul.f32.vlgmr.msra.gmra.mxu0 %v7383_v37  ;;  %v1100_v31 = vld [vmem:[#allocation5 + $0x1d10] sm:$0xff] }
 0x2bb   :  { %3774 = vmatpush.msrb.mxu0 %v1999_v35  ;;  %v1979_v38 = vld [vmem:[#allocation5 + $0x3888] sm:$0xff]  ;;  %3794 = vmatpush.msrb.mxu1 %v2319_v0  ;;  %v1420_v26 = vld [vmem:[#allocation5 + $0x2710] sm:$0xff] }
 0x2bc   :  { %v2299_v1 = vld [vmem:[#allocation5 + $0x4288] sm:$0xff]  ;;  %3814 = vmatpush.msrb.mxu2 %v400_v36  ;;  %3833 = vmatpush.msrb.mxu3 %v740_v15  ;;  %v1740_v28 = vld [vmem:[#allocation5 + $0x3110] sm:$0xff] }
 0x2bd   :  { %3766 = vmatmul.f32.vlgmr.msra.gmra.mxu3 %v7371_v34  ;;  %3726 = vmatmul.f32.vlgmr.msra.gmra.mxu1 %v7387_v41  ;;  %v1959_v42 = vld [vmem:[#allocation5 + $0x37e8] sm:$0xff]  ;;  %v2080_v29 = vld [vmem:[#allocation5 + $0x3bb0] sm:$0xff] }
 0x2be   :  { %v2279_v43 = vld [vmem:[#allocation5 + $0x41e8] sm:$0xff]  ;;  %3775 = vmatpush.msrb.mxu0 %v1979_v38  ;;  %3795 = vmatpush.msrb.mxu1 %v2299_v1  ;;  %v1080_v30 = vld [vmem:[#allocation5 + $0x1c70] sm:$0xff] }
 0x2bf   :  { %3815 = vmatpush.msrb.mxu2 %v380_v39  ;;  %3834 = vmatpush.msrb.mxu3 %v720_v40  ;;  %v1939_v20 = vld [vmem:[#allocation5 + $0x3748] sm:$0xff]  ;;  %v1400_v35 = vld [vmem:[#allocation5 + $0x2670] sm:$0xff] }
 0x2c0   :  { %v2259_v48 = vld [vmem:[#allocation5 + $0x4148] sm:$0xff]  ;;  %3776 = vmatpush.msrb.mxu0 %v1959_v42  ;;  %3796 = vmatpush.msrb.mxu1 %v2279_v43  ;;  %v1720_v0 = vld [vmem:[#allocation5 + $0x3070] sm:$0xff] }
 0x2c1   :  { %3816 = vmatpush.msrb.mxu2 %v360_v45  ;;  %3835 = vmatpush.msrb.mxu3 %v700_v46  ;;  %v1919_v25 = vld [vmem:[#allocation5 + $0x36a8] sm:$0xff]  ;;  %v2060_v36 = vld [vmem:[#allocation5 + $0x3b10] sm:$0xff] }
 0x2c2   :  { %v2239_v52 = vld [vmem:[#allocation5 + $0x40a8] sm:$0xff]  ;;  %3777 = vmatpush.msrb.mxu0 %v1939_v20  ;;  %3797 = vmatpush.msrb.mxu1 %v2259_v48  ;;  %v1060_v15 = vld [vmem:[#allocation5 + $0x1bd0] sm:$0xff] }
 0x2c3   :  { %3817 = vmatpush.msrb.mxu2 %v340_v49  ;;  %3836 = vmatpush.msrb.mxu3 %v680_v59  ;;  %v1899_v54 = vld [vmem:[#allocation5 + $0x3608] sm:$0xff]  ;;  %v1380_v38 = vld [vmem:[#allocation5 + $0x25d0] sm:$0xff] }
 0x2c4   :  { %v2219_v55 = vld [vmem:[#allocation5 + $0x4008] sm:$0xff]  ;;  %3778 = vmatpush.msrb.mxu0 %v1919_v25  ;;  %3798 = vmatpush.msrb.mxu1 %v2239_v52  ;;  %v1700_v1 = vld [vmem:[#allocation5 + $0x2fd0] sm:$0xff] }
 0x2c5   :  { %3818 = vmatpush.msrb.mxu2 %v320_v53  ;;  %3837 = vmatpush.msrb.mxu3 %v660_v2  ;;  %v1879_v61 = vld [vmem:[#allocation5 + $0x3568] sm:$0xff]  ;;  %v2040_v39 = vld [vmem:[#allocation5 + $0x3a70] sm:$0xff] }
 0x2c6   :  { %v2199_v44 = vld [vmem:[#allocation5 + $0x3f68] sm:$0xff]  ;;  %3779 = vmatpush.msrb.mxu0 %v1899_v54  ;;  %3799 = vmatpush.msrb.mxu1 %v2219_v55  ;;  %v1040_v40 = vld [vmem:[#allocation5 + $0x1b30] sm:$0xff] }
 0x2c7   :  { %3819 = vmatpush.msrb.mxu2 %v300_v58  ;;  %3838 = vmatpush.msrb.mxu3 %v640_v60  ;;  %v1859_v63 = vld [vmem:[#allocation5 + $0x34c8] sm:$0xff]  ;;  %v1360_v42 = vld [vmem:[#allocation5 + $0x2530] sm:$0xff] }
 0x2c8   :  { %v2179_v3 = vld [vmem:[#allocation5 + $0x3ec8] sm:$0xff]  ;;  %3780 = vmatpush.msrb.mxu0 %v1879_v61  ;;  %3800 = vmatpush.msrb.mxu1 %v2199_v44  ;;  %v2020_v43 = vld [vmem:[#allocation5 + $0x39d0] sm:$0xff] }
 0x2c9   :  { %3820 = vmatpush.msrb.mxu2 %v280_v62  ;;  %3839 = vmatpush.msrb.mxu3 %v620_v33  ;;  %v1839_v6 = vld [vmem:[#allocation5 + $0x3428] sm:$0xff]  ;;  %v1020_v45 = vld [vmem:[#allocation5 + $0x1a90] sm:$0xff] }
 0x2ca   :  { %v2159_v7 = vld [vmem:[#allocation5 + $0x3e28] sm:$0xff]  ;;  %3781 = vmatpush.msrb.mxu0 %v1859_v63  ;;  %3801 = vmatpush.msrb.mxu1 %v2179_v3  ;;  %v1340_v46 = vld [vmem:[#allocation5 + $0x2490] sm:$0xff] }
 0x2cb   :  { %3821 = vmatpush.msrb.mxu2 %v260_v4  ;;  %3840 = vmatpush.msrb.mxu3 %v600_v5  ;;  %v1819_v9 = vld [vmem:[#allocation5 + $0x3388] sm:$0xff]  ;;  %v1660_v20 = vld [vmem:[#allocation5 + $0x2e90] sm:$0xff] }
 0x2cc   :  { %v2139_v11 = vld [vmem:[#allocation5 + $0x3d88] sm:$0xff]  ;;  %3782 = vmatpush.msrb.mxu0 %v1839_v6  ;;  %3802 = vmatpush.msrb.mxu1 %v2159_v7  ;;  %v2000_v48 = vld [vmem:[#allocation5 + $0x3930] sm:$0xff] }
 0x2cd   :  { %3822 = vmatpush.msrb.mxu2 %v240_v47  ;;  %3841 = vmatpush.msrb.mxu3 %v580_v8  ;;  %v1799_v27 = vld [vmem:[#allocation5 + $0x32e8] sm:$0xff]  ;;  %v1000_v49 = vld [vmem:[#allocation5 + $0x19f0] sm:$0xff] }
 0x2ce   :  { %v2119_v51 = vld [vmem:[#allocation5 + $0x3ce8] sm:$0xff]  ;;  %3783 = vmatpush.msrb.mxu0 %v1819_v9  ;;  %3803 = vmatpush.msrb.mxu1 %v2139_v11  ;;  %v1320_v59 = vld [vmem:[#allocation5 + $0x23f0] sm:$0xff] }
 0x2cf   :  { %3823 = vmatpush.msrb.mxu2 %v220_v50  ;;  %3842 = vmatpush.msrb.mxu3 %v560_v13  ;;  %v1779_v16 = vld [vmem:[#allocation5 + $0x3248] sm:$0xff]  ;;  %v1640_v25 = vld [vmem:[#allocation5 + $0x2df0] sm:$0xff] }
 0x2d0   :  { %v2099_v10 = vld [vmem:[#allocation5 + $0x3c48] sm:$0xff]  ;;  %3784 = vmatpush.msrb.mxu0 %v1799_v27  ;;  %3804 = vmatpush.msrb.mxu1 %v2119_v51  ;;  %v1980_v52 = vld [vmem:[#allocation5 + $0x3890] sm:$0xff] }
 0x2d1   :  { %3824 = vmatpush.msrb.mxu2 %v200_v57  ;;  %3843 = vmatpush.msrb.mxu3 %v540_v14  ;;  %v980_v53 = vld [vmem:[#allocation5 + $0x1950] sm:$0xff] }
 0x2d2   :  { %3785 = vmatpush.msrb.mxu0 %v1779_v16  ;;  %3805 = vmatpush.msrb.mxu1 %v2099_v10  ;;  %v1300_v2 = vld [vmem:[#allocation5 + $0x2350] sm:$0xff] }
 0x2d3   :  { %3825 = vmatpush.msrb.mxu2 %v180_v17  ;;  %3844 = vmatpush.msrb.mxu3 %v520_v19  ;;  %v1620_v54 = vld [vmem:[#allocation5 + $0x2d50] sm:$0xff] }
 0x2d4   :  { %3786 = vmatmul.f32.vlgmr.msrb.gmra.mxu0 %v7374_v22  ;;  %3870 = vmatpush.msra.mxu1 %v1440_v56  ;;  %v1960_v55 = vld [vmem:[#allocation5 + $0x37f0] sm:$0xff] }
 0x2d5   :  { %3850 = vmatpush.msra.mxu0 %v1120_v21  ;;  %3890 = vmatpush.msra.mxu2 %v1760_v23  ;;  %v960_v58 = vld [vmem:[#allocation5 + $0x18b0] sm:$0xff] }
 0x2d6   :  { %3845 = vmatpush.msrb.mxu3 %v500_v24  ;;  %3806 = vmatmul.f32.vlgmr.msrb.gmra.mxu1 %v7368_v12  ;;  %v1680_v12 = vld [vmem:[#allocation5 + $0x2f30] sm:$0xff] }
 0x2d7   :  { %3851 = vmatpush.msra.mxu0 %v1100_v31  ;;  %3871 = vmatpush.msra.mxu1 %v1420_v26  ;;  %v1280_v60 = vld [vmem:[#allocation5 + $0x22b0] sm:$0xff] }
 0x2d8   :  { %3891 = vmatpush.msra.mxu2 %v1740_v28  ;;  %3910 = vmatpush.msra.mxu3 %v2080_v29  ;;  %v1600_v61 = vld [vmem:[#allocation5 + $0x2cb0] sm:$0xff]  ;;  %v481_v29 = vld [vmem:[#allocation5 + $0x9b8] sm:$0xff] }
 0x2d9   :  { %3852 = vmatpush.msra.mxu0 %v1080_v30  ;;  %3872 = vmatpush.msra.mxu1 %v1400_v35  ;;  %v1940_v44 = vld [vmem:[#allocation5 + $0x3750] sm:$0xff]  ;;  %v801_v30 = vld [vmem:[#allocation5 + $0x13b8] sm:$0xff] }
 0x2da   :  { %3892 = vmatpush.msra.mxu2 %v1720_v0  ;;  %3911 = vmatpush.msra.mxu3 %v2060_v36  ;;  %v940_v62 = vld [vmem:[#allocation5 + $0x1810] sm:$0xff]  ;;  %v461_v36 = vld [vmem:[#allocation5 + $0x918] sm:$0xff] }
 0x2db   :  { %3853 = vmatpush.msra.mxu0 %v1060_v15  ;;  %3873 = vmatpush.msra.mxu1 %v1380_v38  ;;  %v1260_v33 = vld [vmem:[#allocation5 + $0x2210] sm:$0xff]  ;;  %v781_v15 = vld [vmem:[#allocation5 + $0x1318] sm:$0xff] }
 0x2dc   :  { %3893 = vmatpush.msra.mxu2 %v1700_v1  ;;  %3912 = vmatpush.msra.mxu3 %v2040_v39  ;;  %v1580_v63 = vld [vmem:[#allocation5 + $0x2c10] sm:$0xff]  ;;  %v1121_v38 = vld [vmem:[#allocation5 + $0x1db8] sm:$0xff] }
 0x2dd   :  { %3854 = vmatpush.msra.mxu0 %v1040_v40  ;;  %3874 = vmatpush.msra.mxu1 %v1360_v42  ;;  %v1920_v3 = vld [vmem:[#allocation5 + $0x36b0] sm:$0xff]  ;;  %v441_v39 = vld [vmem:[#allocation5 + $0x878] sm:$0xff] }
 0x2de   :  { %3894 = vmatpush.msra.mxu2 %v1680_v12  ;;  %3913 = vmatpush.msra.mxu3 %v2020_v43  ;;  %v920_v4 = vld [vmem:[#allocation5 + $0x1770] sm:$0xff]  ;;  %v1101_v40 = vld [vmem:[#allocation5 + $0x1d18] sm:$0xff] }
 0x2df   :  { %3855 = vmatpush.msra.mxu0 %v1020_v45  ;;  %3875 = vmatpush.msra.mxu1 %v1340_v46  ;;  %v1240_v5 = vld [vmem:[#allocation5 + $0x2170] sm:$0xff]  ;;  %v421_v12 = vld [vmem:[#allocation5 + $0x7d8] sm:$0xff] }
 0x2e0   :  { %3895 = vmatpush.msra.mxu2 %v1660_v20  ;;  %3914 = vmatpush.msra.mxu3 %v2000_v48  ;;  %v1560_v6 = vld [vmem:[#allocation5 + $0x2b70] sm:$0xff]  ;;  %v741_v43 = vld [vmem:[#allocation5 + $0x11d8] sm:$0xff] }
 0x2e1   :  { %3856 = vmatpush.msra.mxu0 %v1000_v49  ;;  %3876 = vmatpush.msra.mxu1 %v1320_v59  ;;  %v1900_v7 = vld [vmem:[#allocation5 + $0x3610] sm:$0xff]  ;;  %v1081_v45 = vld [vmem:[#allocation5 + $0x1c78] sm:$0xff] }
 0x2e2   :  { %3896 = vmatpush.msra.mxu2 %v1640_v25  ;;  %3915 = vmatpush.msra.mxu3 %v1980_v52  ;;  %v900_v47 = vld [vmem:[#allocation5 + $0x16d0] sm:$0xff]  ;;  %v401_v20 = vld [vmem:[#allocation5 + $0x738] sm:$0xff] }
 0x2e3   :  { %3857 = vmatpush.msra.mxu0 %v980_v53  ;;  %3877 = vmatpush.msra.mxu1 %v1300_v2  ;;  %v1220_v8 = vld [vmem:[#allocation5 + $0x20d0] sm:$0xff]  ;;  %v721_v48 = vld [vmem:[#allocation5 + $0x1138] sm:$0xff] }
 0x2e4   :  { %3897 = vmatpush.msra.mxu2 %v1620_v54  ;;  %3916 = vmatpush.msra.mxu3 %v1960_v55  ;;  %v1540_v9 = vld [vmem:[#allocation5 + $0x2ad0] sm:$0xff]  ;;  %v1061_v49 = vld [vmem:[#allocation5 + $0x1bd8] sm:$0xff] }
 0x2e5   :  { %3858 = vmatpush.msra.mxu0 %v960_v58  ;;  %3878 = vmatpush.msra.mxu1 %v1280_v60  ;;  %v1880_v11 = vld [vmem:[#allocation5 + $0x3570] sm:$0xff]  ;;  %v381_v25 = vld [vmem:[#allocation5 + $0x698] sm:$0xff] }
 0x2e6   :  { %3898 = vmatpush.msra.mxu2 %v1600_v61  ;;  %3917 = vmatpush.msra.mxu3 %v1940_v44  ;;  %v880_v50 = vld [vmem:[#allocation5 + $0x1630] sm:$0xff]  ;;  %v701_v52 = vld [vmem:[#allocation5 + $0x1098] sm:$0xff] }
 0x2e7   :  { %3859 = vmatpush.msra.mxu0 %v940_v62  ;;  %3879 = vmatpush.msra.mxu1 %v1260_v33  ;;  %v1200_v13 = vld [vmem:[#allocation5 + $0x2030] sm:$0xff]  ;;  %v1041_v53 = vld [vmem:[#allocation5 + $0x1b38] sm:$0xff] }
 0x2e8   :  { %3899 = vmatpush.msra.mxu2 %v1580_v63  ;;  %3918 = vmatpush.msra.mxu3 %v1920_v3  ;;  %v1520_v27 = vld [vmem:[#allocation5 + $0x2a30] sm:$0xff]  ;;  %v361_v2 = vld [vmem:[#allocation5 + $0x5f8] sm:$0xff] }
 0x2e9   :  { %3860 = vmatpush.msra.mxu0 %v920_v4  ;;  %3880 = vmatpush.msra.mxu1 %v1240_v5  ;;  %v1860_v51 = vld [vmem:[#allocation5 + $0x34d0] sm:$0xff]  ;;  %v681_v54 = vld [vmem:[#allocation5 + $0xff8] sm:$0xff] }
 0x2ea   :  { %3900 = vmatpush.msra.mxu2 %v1560_v6  ;;  %3919 = vmatpush.msra.mxu3 %v1900_v7  ;;  %v860_v57 = vld [vmem:[#allocation5 + $0x1590] sm:$0xff]  ;;  %v1021_v55 = vld [vmem:[#allocation5 + $0x1a98] sm:$0xff] }
 0x2eb   :  { %3861 = vmatpush.msra.mxu0 %v900_v47  ;;  %3881 = vmatpush.msra.mxu1 %v1220_v8  ;;  %v1180_v14 = vld [vmem:[#allocation5 + $0x1f90] sm:$0xff]  ;;  %v661_v60 = vld [vmem:[#allocation5 + $0xf58] sm:$0xff] }
 0x2ec   :  { %3901 = vmatpush.msra.mxu2 %v1540_v9  ;;  %3920 = vmatpush.msra.mxu3 %v1880_v11  ;;  %v1500_v16 = vld [vmem:[#allocation5 + $0x2990] sm:$0xff]  ;;  %v1001_v61 = vld [vmem:[#allocation5 + $0x19f8] sm:$0xff] }
 0x2ed   :  { %3862 = vmatpush.msra.mxu0 %v880_v50  ;;  %3882 = vmatpush.msra.mxu1 %v1200_v13  ;;  %v1840_v10 = vld [vmem:[#allocation5 + $0x3430] sm:$0xff]  ;;  %v321_v62 = vld [vmem:[#allocation5 + $0x4b8] sm:$0xff] }
 0x2ee   :  { %3902 = vmatpush.msra.mxu2 %v1520_v27  ;;  %3921 = vmatpush.msra.mxu3 %v1860_v51  ;;  %v840_v17 = vld [vmem:[#allocation5 + $0x14f0] sm:$0xff]  ;;  %v981_v33 = vld [vmem:[#allocation5 + $0x1958] sm:$0xff] }
 0x2ef   :  { %v1160_v19 = vld [vmem:[#allocation5 + $0x1ef0] sm:$0xff]  ;;  %3863 = vmatpush.msra.mxu0 %v860_v57  ;;  %3883 = vmatpush.msra.mxu1 %v1180_v14  ;;  %v301_v3 = vld [vmem:[#allocation5 + $0x418] sm:$0xff] }
 0x2f0   :  { %v1480_v56 = vld [vmem:[#allocation5 + $0x28f0] sm:$0xff]  ;;  %3903 = vmatpush.msra.mxu2 %v1500_v16  ;;  %3922 = vmatpush.msra.mxu3 %v1840_v10  ;;  %v621_v4 = vld [vmem:[#allocation5 + $0xe18] sm:$0xff] }
 0x2f1   :  { %v1820_v21 = vld [vmem:[#allocation5 + $0x3390] sm:$0xff]  ;;  %3864 = vmatpush.msra.mxu0 %v840_v17  ;;  %3884 = vmatpush.msra.mxu1 %v1160_v19  ;;  %v961_v5 = vld [vmem:[#allocation5 + $0x18b8] sm:$0xff] }
 0x2f2   :  { %v820_v23 = vld [vmem:[#allocation5 + $0x1450] sm:$0xff]  ;;  %3904 = vmatpush.msra.mxu2 %v1480_v56  ;;  %3923 = vmatpush.msra.mxu3 %v1820_v21  ;;  %v281_v7 = vld [vmem:[#allocation5 + $0x378] sm:$0xff] }
 0x2f3   :  { %v1140_v24 = vld [vmem:[#allocation5 + $0x1e50] sm:$0xff]  ;;  %3826 = vmatmul.f32.vlgmr.msrb.gmra.mxu2 %v7377_v18  ;;  %3865 = vmatpush.msra.mxu0 %v820_v23  ;;  %v761_v18 = vld [vmem:[#allocation5 + $0x1278] sm:$0xff] }
 0x2f4   :  { %v1460_v31 = vld [vmem:[#allocation5 + $0x2850] sm:$0xff]  ;;  %3885 = vmatpush.msra.mxu1 %v1140_v24  ;;  %3846 = vmatmul.f32.vlgmr.msrb.gmra.mxu3 %v7383_v37  ;;  %v601_v47 = vld [vmem:[#allocation5 + $0xd78] sm:$0xff] }
 0x2f5   :  { %v1800_v26 = vld [vmem:[#allocation5 + $0x32f0] sm:$0xff]  ;;  %3905 = vmatpush.msra.mxu2 %v1460_v31  ;;  %3866 = vmatmul.f32.vlgmr.msra.gmra.mxu0 %v7387_v41  ;;  %v941_v8 = vld [vmem:[#allocation5 + $0x1818] sm:$0xff] }
 0x2f6   :  { %v2400_v28 = vld [vmem:[#allocation5 + $0x45b0] sm:$0xff]  ;;  %3924 = vmatpush.msra.mxu3 %v1800_v26  ;;  %3950 = vmatpush.msrb.mxu1 %v481_v29  ;;  %v261_v11 = vld [vmem:[#allocation5 + $0x2d8] sm:$0xff] }
 0x2f7   :  { %v1780_v35 = vld [vmem:[#allocation5 + $0x3250] sm:$0xff]  ;;  %3930 = vmatpush.msrb.mxu0 %v2400_v28  ;;  %3970 = vmatpush.msrb.mxu2 %v801_v30  ;;  %v581_v50 = vld [vmem:[#allocation5 + $0xcd8] sm:$0xff] }
 0x2f8   :  { %v2380_v0 = vld [vmem:[#allocation5 + $0x4510] sm:$0xff]  ;;  %3925 = vmatpush.msra.mxu3 %v1780_v35  ;;  %3951 = vmatpush.msrb.mxu1 %v461_v36  ;;  %v921_v13 = vld [vmem:[#allocation5 + $0x1778] sm:$0xff] }
 0x2f9   :  { %v2360_v1 = vld [vmem:[#allocation5 + $0x4470] sm:$0xff]  ;;  %3931 = vmatpush.msrb.mxu0 %v2380_v0  ;;  %3971 = vmatpush.msrb.mxu2 %v781_v15  ;;  %v241_v51 = vld [vmem:[#allocation5 + $0x238] sm:$0xff] }
 0x2fa   :  { %3990 = vmatpush.msrb.mxu3 %v1121_v38  ;;  %v2340_v42 = vld [vmem:[#allocation5 + $0x43d0] sm:$0xff]  ;;  %3952 = vmatpush.msrb.mxu1 %v441_v39  ;;  %v561_v57 = vld [vmem:[#allocation5 + $0xc38] sm:$0xff] }
 0x2fb   :  { %3932 = vmatpush.msrb.mxu0 %v2360_v1  ;;  %3972 = vmatpush.msrb.mxu2 %v761_v18  ;;  %v2320_v46 = vld [vmem:[#allocation5 + $0x4330] sm:$0xff]  ;;  %v901_v14 = vld [vmem:[#allocation5 + $0x16d8] sm:$0xff] }
 0x2fc   :  { %3991 = vmatpush.msrb.mxu3 %v1101_v40  ;;  %3906 = vmatmul.f32.vlgmr.msra.gmra.mxu2 %v7371_v34  ;;  %v2300_v59 = vld [vmem:[#allocation5 + $0x4290] sm:$0xff]  ;;  %v221_v10 = vld [vmem:[#allocation5 + $0x198] sm:$0xff] }
 0x2fd   :  { %3933 = vmatpush.msrb.mxu0 %v2340_v42  ;;  %3953 = vmatpush.msrb.mxu1 %v421_v12  ;;  %v2280_v34 = vld [vmem:[#allocation5 + $0x41f0] sm:$0xff]  ;;  %v541_v17 = vld [vmem:[#allocation5 + $0xb98] sm:$0xff] }
 0x2fe   :  { %3973 = vmatpush.msrb.mxu2 %v741_v43  ;;  %3992 = vmatpush.msrb.mxu3 %v1081_v45  ;;  %v2260_v58 = vld [vmem:[#allocation5 + $0x4150] sm:$0xff]  ;;  %v881_v19 = vld [vmem:[#allocation5 + $0x1638] sm:$0xff] }
 0x2ff   :  { %3926 = vmatmul.f32.vlgmr.msra.gmra.mxu3 %v7374_v22  ;;  %3934 = vmatpush.msrb.mxu0 %v2320_v46  ;;  %v341_v22 = vld [vmem:[#allocation5 + $0x558] sm:$0xff]  ;;  %v2240_v44 = vld [vmem:[#allocation5 + $0x40b0] sm:$0xff] }
 0x300   :  { %3954 = vmatpush.msrb.mxu1 %v401_v20  ;;  %3974 = vmatpush.msrb.mxu2 %v721_v48  ;;  %v2220_v63 = vld [vmem:[#allocation5 + $0x4010] sm:$0xff]  ;;  %v201_v21 = vld [vmem:[#allocation5 + $0xf8] sm:$0xff] }
 0x301   :  { %3993 = vmatpush.msrb.mxu3 %v1061_v49  ;;  %3886 = vmatmul.f32.vlgmr.msra.gmra.mxu1 %v7380_v32  ;;  %v641_v32 = vld [vmem:[#allocation5 + $0xeb8] sm:$0xff]  ;;  %v2200_v6 = vld [vmem:[#allocation5 + $0x3f70] sm:$0xff] }
 0x302   :  { %3935 = vmatpush.msrb.mxu0 %v2300_v59  ;;  %3955 = vmatpush.msrb.mxu1 %v381_v25  ;;  %v2180_v9 = vld [vmem:[#allocation5 + $0x3ed0] sm:$0xff]  ;;  %v521_v23 = vld [vmem:[#allocation5 + $0xaf8] sm:$0xff] }
 0x303   :  { %3975 = vmatpush.msrb.mxu2 %v701_v52  ;;  %3994 = vmatpush.msrb.mxu3 %v1041_v53  ;;  %v2160_v27 = vld [vmem:[#allocation5 + $0x3e30] sm:$0xff]  ;;  %v861_v24 = vld [vmem:[#allocation5 + $0x1598] sm:$0xff] }
 0x304   :  { %3936 = vmatpush.msrb.mxu0 %v2280_v34  ;;  %3956 = vmatpush.msrb.mxu1 %v361_v2  ;;  %v2140_v16 = vld [vmem:[#allocation5 + $0x3d90] sm:$0xff]  ;;  %v181_v26 = vld [vmem:[#allocation5 + $0x58] sm:$0xff] }
 0x305   :  { %3976 = vmatpush.msrb.mxu2 %v681_v54  ;;  %3995 = vmatpush.msrb.mxu3 %v1021_v55  ;;  %v2120_v56 = vld [vmem:[#allocation5 + $0x3cf0] sm:$0xff]  ;;  %v501_v28 = vld [vmem:[#allocation5 + $0xa58] sm:$0xff] }
 0x306   :  { %3937 = vmatpush.msrb.mxu0 %v2260_v58  ;;  %3957 = vmatpush.msrb.mxu1 %v341_v22  ;;  %v2100_v31 = vld [vmem:[#allocation5 + $0x3c50] sm:$0xff]  ;;  %v841_v29 = vld [vmem:[#allocation5 + $0x14f8] sm:$0xff] }
 0x307   :  { %3977 = vmatpush.msrb.mxu2 %v661_v60  ;;  %3996 = vmatpush.msrb.mxu3 %v1001_v61  ;;  %v1761_v30 = vld [vmem:[#allocation5 + $0x31b8] sm:$0xff] }
 0x308   :  { %3938 = vmatpush.msrb.mxu0 %v2240_v44  ;;  %3958 = vmatpush.msrb.mxu1 %v321_v62  ;;  %v1441_v35 = vld [vmem:[#allocation5 + $0x27b8] sm:$0xff] }
 0x309   :  { %3978 = vmatpush.msrb.mxu2 %v641_v32  ;;  %3997 = vmatpush.msrb.mxu3 %v981_v33  ;;  %v2081_v0 = vld [vmem:[#allocation5 + $0x3bb8] sm:$0xff] }
 0x30a   :  { %3939 = vmatpush.msrb.mxu0 %v2220_v63  ;;  %3959 = vmatpush.msrb.mxu1 %v301_v3  ;;  %v821_v36 = vld [vmem:[#allocation5 + $0x1458] sm:$0xff] }
 0x30b   :  { %3979 = vmatpush.msrb.mxu2 %v621_v4  ;;  %3998 = vmatpush.msrb.mxu3 %v961_v5  ;;  %v1741_v15 = vld [vmem:[#allocation5 + $0x3118] sm:$0xff] }
 0x30c   :  { %3940 = vmatpush.msrb.mxu0 %v2200_v6  ;;  %3960 = vmatpush.msrb.mxu1 %v281_v7  ;;  %v7398_v38 = vld [vmem:[#allocation2 + $0x30] sm:$0xff] }
 0x30d   :  { %3980 = vmatpush.msrb.mxu2 %v601_v47  ;;  %3999 = vmatpush.msrb.mxu3 %v941_v8  ;;  %v1421_v1 = vld [vmem:[#allocation5 + $0x2718] sm:$0xff] }
 0x30e   :  { %3941 = vmatpush.msrb.mxu0 %v2180_v9  ;;  %3961 = vmatpush.msrb.mxu1 %v261_v11  ;;  %v2061_v39 = vld [vmem:[#allocation5 + $0x3b18] sm:$0xff] }
 0x30f   :  { %3981 = vmatpush.msrb.mxu2 %v581_v50  ;;  %4000 = vmatpush.msrb.mxu3 %v921_v13  ;;  %v2401_v18 = vld [vmem:[#allocation5 + $0x45b8] sm:$0xff] }
 0x310   :  { %3942 = vmatpush.msrb.mxu0 %v2160_v27  ;;  %3962 = vmatpush.msrb.mxu1 %v241_v51  ;;  %v1721_v40 = vld [vmem:[#allocation5 + $0x3078] sm:$0xff] }
 0x311   :  { %3982 = vmatpush.msrb.mxu2 %v561_v57  ;;  %4001 = vmatpush.msrb.mxu3 %v901_v14  ;;  %v1401_v42 = vld [vmem:[#allocation5 + $0x2678] sm:$0xff] }
 0x312   :  { %3943 = vmatpush.msrb.mxu0 %v2140_v16  ;;  %3963 = vmatpush.msrb.mxu1 %v221_v10  ;;  %v2041_v12 = vld [vmem:[#allocation5 + $0x3a78] sm:$0xff] }
 0x313   :  { %3983 = vmatpush.msrb.mxu2 %v541_v17  ;;  %4002 = vmatpush.msrb.mxu3 %v881_v19  ;;  %v2381_v43 = vld [vmem:[#allocation5 + $0x4518] sm:$0xff] }
 0x314   :  { %3944 = vmatpush.msrb.mxu0 %v2120_v56  ;;  %3964 = vmatpush.msrb.mxu1 %v201_v21  ;;  %v1701_v45 = vld [vmem:[#allocation5 + $0x2fd8] sm:$0xff] }
 0x315   :  { %3984 = vmatpush.msrb.mxu2 %v521_v23  ;;  %4003 = vmatpush.msrb.mxu3 %v861_v24  ;;  %v1381_v46 = vld [vmem:[#allocation5 + $0x25d8] sm:$0xff] }
 0x316   :  { %3945 = vmatpush.msrb.mxu0 %v2100_v31  ;;  %3965 = vmatpush.msrb.mxu1 %v181_v26  ;;  %v2021_v20 = vld [vmem:[#allocation5 + $0x39d8] sm:$0xff] }
 0x317   :  { %3985 = vmatpush.msrb.mxu2 %v501_v28  ;;  %4004 = vmatpush.msrb.mxu3 %v841_v29  ;;  %v2361_v48 = vld [vmem:[#allocation5 + $0x4478] sm:$0xff] }
 0x318   :  { %3946 = vmatmul.f32.vlgmr.msrb.gmra.mxu0 %v7398_v38  ;;  %4030 = vmatpush.msra.mxu1 %v1761_v30  ;;  %v1681_v49 = vld [vmem:[#allocation5 + $0x2f38] sm:$0xff] }
 0x319   :  { %4010 = vmatpush.msra.mxu0 %v1441_v35  ;;  %4050 = vmatpush.msra.mxu2 %v2081_v0  ;;  %v1361_v59 = vld [vmem:[#allocation5 + $0x2538] sm:$0xff] }
 0x31a   :  { %4005 = vmatpush.msrb.mxu3 %v821_v36  ;;  %4031 = vmatpush.msra.mxu1 %v1741_v15  ;;  %v2001_v25 = vld [vmem:[#allocation5 + $0x3938] sm:$0xff]  ;;  %v482_v36 = vld [vmem:[#allocation5 + $0x9c0] sm:$0xff] }
 0x31b   :  { %4011 = vmatpush.msra.mxu0 %v1421_v1  ;;  %4051 = vmatpush.msra.mxu2 %v2061_v39  ;;  %v2341_v52 = vld [vmem:[#allocation5 + $0x43d8] sm:$0xff]  ;;  %v802_v15 = vld [vmem:[#allocation5 + $0x13c0] sm:$0xff] }
 0x31c   :  { %4070 = vmatpush.msra.mxu3 %v2401_v18  ;;  %4032 = vmatpush.msra.mxu1 %v1721_v40  ;;  %v1661_v53 = vld [vmem:[#allocation5 + $0x2e98] sm:$0xff]  ;;  %v1122_v1 = vld [vmem:[#allocation5 + $0x1dc0] sm:$0xff]  ;;  %v7402_v18 = vld [vmem:[#allocation2] sm:$0xff] }
 0x31d   :  { %4012 = vmatpush.msra.mxu0 %v1401_v42  ;;  %4052 = vmatpush.msra.mxu2 %v2041_v12  ;;  %v1341_v34 = vld [vmem:[#allocation5 + $0x2498] sm:$0xff]  ;;  %v462_v40 = vld [vmem:[#allocation5 + $0x920] sm:$0xff] }
 0x31e   :  { %4071 = vmatpush.msra.mxu3 %v2381_v43  ;;  %4033 = vmatpush.msra.mxu1 %v1701_v45  ;;  %v1981_v2 = vld [vmem:[#allocation5 + $0x3898] sm:$0xff]  ;;  %v782_v42 = vld [vmem:[#allocation5 + $0x1320] sm:$0xff] }
 0x31f   :  { %4013 = vmatpush.msra.mxu0 %v1381_v46  ;;  %4053 = vmatpush.msra.mxu2 %v2021_v20  ;;  %v2321_v54 = vld [vmem:[#allocation5 + $0x4338] sm:$0xff]  ;;  %v1102_v12 = vld [vmem:[#allocation5 + $0x1d20] sm:$0xff] }
 0x320   :  { %4072 = vmatpush.msra.mxu3 %v2361_v48  ;;  %4034 = vmatpush.msra.mxu1 %v1681_v49  ;;  %v1641_v55 = vld [vmem:[#allocation5 + $0x2df8] sm:$0xff]  ;;  %v442_v43 = vld [vmem:[#allocation5 + $0x880] sm:$0xff] }
 0x321   :  { %4014 = vmatpush.msra.mxu0 %v1361_v59  ;;  %4054 = vmatpush.msra.mxu2 %v2001_v25  ;;  %v1321_v58 = vld [vmem:[#allocation5 + $0x23f8] sm:$0xff]  ;;  %v762_v45 = vld [vmem:[#allocation5 + $0x1280] sm:$0xff]  ;;  %v7406_v25 = vld [vmem:[#allocation2 + $0x28] sm:$0xff] }
 0x322   :  { %4073 = vmatpush.msra.mxu3 %v2341_v52  ;;  %4035 = vmatpush.msra.mxu1 %v1661_v53  ;;  %v1961_v22 = vld [vmem:[#allocation5 + $0x37f8] sm:$0xff]  ;;  %v1082_v46 = vld [vmem:[#allocation5 + $0x1c80] sm:$0xff] }
 0x323   :  { %4015 = vmatpush.msra.mxu0 %v1341_v34  ;;  %4055 = vmatpush.msra.mxu2 %v1981_v2  ;;  %v2301_v60 = vld [vmem:[#allocation5 + $0x4298] sm:$0xff]  ;;  %v1422_v20 = vld [vmem:[#allocation5 + $0x2720] sm:$0xff] }
 0x324   :  { %v1621_v61 = vld [vmem:[#allocation5 + $0x2d58] sm:$0xff]  ;;  %4074 = vmatpush.msra.mxu3 %v2321_v54  ;;  %4036 = vmatpush.msra.mxu1 %v1641_v55  ;;  %v422_v48 = vld [vmem:[#allocation5 + $0x7e0] sm:$0xff]  ;;  %v7412_v55 = vpop.f32.mrf.mxu2 }
 0x325   :  { %v1301_v44 = vld [vmem:[#allocation5 + $0x2358] sm:$0xff]  ;;  %4016 = vmatpush.msra.mxu0 %v1321_v58  ;;  %4056 = vmatpush.msra.mxu2 %v1961_v22  ;;  %v1062_v49 = vld [vmem:[#allocation5 + $0x1be0] sm:$0xff] }
 0x326   :  { %v1941_v62 = vld [vmem:[#allocation5 + $0x3758] sm:$0xff]  ;;  %4075 = vmatpush.msra.mxu3 %v2301_v60  ;;  %4037 = vmatpush.msra.mxu1 %v1621_v61  ;;  %v1402_v59 = vld [vmem:[#allocation5 + $0x2680] sm:$0xff] }
 0x327   :  { %v2281_v32 = vld [vmem:[#allocation5 + $0x41f8] sm:$0xff]  ;;  %4017 = vmatpush.msra.mxu0 %v1301_v44  ;;  %4057 = vmatpush.msra.mxu2 %v1941_v62  ;;  %v402_v52 = vld [vmem:[#allocation5 + $0x740] sm:$0xff]  ;;  %v7415_v44 = vld [vmem:[#allocation2 + $0x20] sm:$0xff] }
 0x328   :  { %v1601_v33 = vld [vmem:[#allocation5 + $0x2cb8] sm:$0xff]  ;;  %4076 = vmatpush.msra.mxu3 %v2281_v32  ;;  %3986 = vmatmul.f32.vlgmr.msrb.gmra.mxu2 %v7383_v37  ;;  %v1442_v37 = vld [vmem:[#allocation5 + $0x27c0] sm:$0xff] }
 0x329   :  { %v1281_v63 = vld [vmem:[#allocation5 + $0x22b8] sm:$0xff]  ;;  %4038 = vmatpush.msra.mxu1 %v1601_v33  ;;  %4006 = vmatmul.f32.vlgmr.msrb.gmra.mxu3 %v7387_v41  ;;  %v742_v41 = vld [vmem:[#allocation5 + $0x11e0] sm:$0xff]  ;;  %v7418_v33 = vpop.f32.mrf.mxu1 }
 0x32a   :  { %v1921_v3 = vld [vmem:[#allocation5 + $0x36b8] sm:$0xff]  ;;  %4018 = vmatpush.msra.mxu0 %v1281_v63  ;;  %3966 = vmatmul.f32.vlgmr.msrb.gmra.mxu1 %v7402_v18  ;;  %v722_v53 = vld [vmem:[#allocation5 + $0x1140] sm:$0xff]  ;;  %v7420_v63 = vpop.f32.mrf.mxu3 }
 0x32b   :  { %v2261_v4 = vld [vmem:[#allocation5 + $0x4158] sm:$0xff]  ;;  %4058 = vmatpush.msra.mxu2 %v1921_v3  ;;  %v1042_v34 = vld [vmem:[#allocation5 + $0x1b40] sm:$0xff] }
 0x32c   :  { %v1581_v5 = vld [vmem:[#allocation5 + $0x2c18] sm:$0xff]  ;;  %4077 = vmatpush.msra.mxu3 %v2261_v4  ;;  %v7409_v2 = vld [vmem:[#allocation2 + $0x18] sm:$0xff] }
 0x32d   :  { %v1261_v6 = vld [vmem:[#allocation5 + $0x2218] sm:$0xff]  ;;  %4039 = vmatpush.msra.mxu1 %v1581_v5  ;;  %v1382_v54 = vld [vmem:[#allocation5 + $0x25e0] sm:$0xff] }
 0x32e   :  { %v1901_v7 = vld [vmem:[#allocation5 + $0x3618] sm:$0xff]  ;;  %4019 = vmatpush.msra.mxu0 %v1261_v6  ;;  %v382_v58 = vld [vmem:[#allocation5 + $0x6a0] sm:$0xff] }
 0x32f   :  { %v2241_v47 = vld [vmem:[#allocation5 + $0x40b8] sm:$0xff]  ;;  %4059 = vmatpush.msra.mxu2 %v1901_v7  ;;  %v702_v22 = vld [vmem:[#allocation5 + $0x10a0] sm:$0xff] }
 0x330   :  { %v1561_v8 = vld [vmem:[#allocation5 + $0x2b78] sm:$0xff]  ;;  %4078 = vmatpush.msra.mxu3 %v2241_v47  ;;  %v1022_v60 = vld [vmem:[#allocation5 + $0x1aa0] sm:$0xff] }
 0x331   :  { %v1241_v9 = vld [vmem:[#allocation5 + $0x2178] sm:$0xff]  ;;  %4040 = vmatpush.msra.mxu1 %v1561_v8  ;;  %v1362_v61 = vld [vmem:[#allocation5 + $0x2540] sm:$0xff] }
 0x332   :  { %v1881_v11 = vld [vmem:[#allocation5 + $0x3578] sm:$0xff]  ;;  %4020 = vmatpush.msra.mxu0 %v1241_v9  ;;  %v362_v62 = vld [vmem:[#allocation5 + $0x600] sm:$0xff] }
 0x333   :  { %v2221_v50 = vld [vmem:[#allocation5 + $0x4018] sm:$0xff]  ;;  %4060 = vmatpush.msra.mxu2 %v1881_v11  ;;  %v682_v32 = vld [vmem:[#allocation5 + $0x1000] sm:$0xff] }
 0x334   :  { %v1541_v13 = vld [vmem:[#allocation5 + $0x2ad8] sm:$0xff]  ;;  %4079 = vmatpush.msra.mxu3 %v2221_v50  ;;  %v1002_v3 = vld [vmem:[#allocation5 + $0x1a00] sm:$0xff] }
 0x335   :  { %v1221_v27 = vld [vmem:[#allocation5 + $0x20d8] sm:$0xff]  ;;  %4041 = vmatpush.msra.mxu1 %v1541_v13  ;;  %v1342_v4 = vld [vmem:[#allocation5 + $0x24a0] sm:$0xff]  ;;  %v7422_v13 = vpop.f32.mrf.mxu0 }
 0x336   :  { %v1861_v51 = vld [vmem:[#allocation5 + $0x34d8] sm:$0xff]  ;;  %4021 = vmatpush.msra.mxu0 %v1221_v27  ;;  %v342_v5 = vld [vmem:[#allocation5 + $0x560] sm:$0xff] }
 0x337   :  { %v2201_v57 = vld [vmem:[#allocation5 + $0x3f78] sm:$0xff]  ;;  %4061 = vmatpush.msra.mxu2 %v1861_v51  ;;  %v662_v6 = vld [vmem:[#allocation5 + $0xf60] sm:$0xff] }
 0x338   :  { %v1521_v14 = vld [vmem:[#allocation5 + $0x2a38] sm:$0xff]  ;;  %4080 = vmatpush.msra.mxu3 %v2201_v57  ;;  %v982_v7 = vld [vmem:[#allocation5 + $0x1960] sm:$0xff] }
 0x339   :  { %v1201_v16 = vld [vmem:[#allocation5 + $0x2038] sm:$0xff]  ;;  %4042 = vmatpush.msra.mxu1 %v1521_v14  ;;  %v1322_v47 = vld [vmem:[#allocation5 + $0x2400] sm:$0xff] }
 0x33a   :  { %v1841_v10 = vld [vmem:[#allocation5 + $0x3438] sm:$0xff]  ;;  %4022 = vmatpush.msra.mxu0 %v1201_v16  ;;  %v322_v8 = vld [vmem:[#allocation5 + $0x4c0] sm:$0xff]  ;;  %v7424_v16 = vpop.f32.mrf.mxu2 }
 0x33b   :  { %v2181_v17 = vld [vmem:[#allocation5 + $0x3ed8] sm:$0xff]  ;;  %4062 = vmatpush.msra.mxu2 %v1841_v10  ;;  %v642_v9 = vld [vmem:[#allocation5 + $0xec0] sm:$0xff]  ;;  %7905 = vst [vmem:[#allocation24_spill] sm:$0xff] %v7424_v16 }
 0x33c   :  { %v1501_v19 = vld [vmem:[#allocation5 + $0x2998] sm:$0xff]  ;;  %4081 = vmatpush.msra.mxu3 %v2181_v17  ;;  %v962_v11 = vld [vmem:[#allocation5 + $0x18c0] sm:$0xff] }
 0x33d   :  { %v1181_v56 = vld [vmem:[#allocation5 + $0x1f98] sm:$0xff]  ;;  %4043 = vmatpush.msra.mxu1 %v1501_v19  ;;  %v1302_v50 = vld [vmem:[#allocation5 + $0x2360] sm:$0xff]  ;;  %v7426_v19 = vpop.f32.mrf.mxu3 }
 0x33e   :  { %v1821_v21 = vld [vmem:[#allocation5 + $0x3398] sm:$0xff]  ;;  %4023 = vmatpush.msra.mxu0 %v1181_v56  ;;  %v302_v27 = vld [vmem:[#allocation5 + $0x420] sm:$0xff] }
 0x33f   :  { %v2161_v23 = vld [vmem:[#allocation5 + $0x3e38] sm:$0xff]  ;;  %4063 = vmatpush.msra.mxu2 %v1821_v21  ;;  %v622_v51 = vld [vmem:[#allocation5 + $0xe20] sm:$0xff] }
 0x340   :  { %v1481_v24 = vld [vmem:[#allocation5 + $0x28f8] sm:$0xff]  ;;  %4082 = vmatpush.msra.mxu3 %v2161_v23  ;;  %v942_v57 = vld [vmem:[#allocation5 + $0x1820] sm:$0xff] }
 0x341   :  { %v1161_v31 = vld [vmem:[#allocation5 + $0x1ef8] sm:$0xff]  ;;  %4044 = vmatpush.msra.mxu1 %v1481_v24  ;;  %v1282_v14 = vld [vmem:[#allocation5 + $0x22c0] sm:$0xff] }
 0x342   :  { %v1801_v26 = vld [vmem:[#allocation5 + $0x32f8] sm:$0xff]  ;;  %4024 = vmatpush.msra.mxu0 %v1161_v31  ;;  %v282_v10 = vld [vmem:[#allocation5 + $0x380] sm:$0xff]  ;;  %v7428_v31 = vpop.f32.mrf.mxu1 }
 0x343   :  { %v2141_v28 = vld [vmem:[#allocation5 + $0x3d98] sm:$0xff]  ;;  %4064 = vmatpush.msra.mxu2 %v1801_v26  ;;  %v602_v17 = vld [vmem:[#allocation5 + $0xd80] sm:$0xff] }
 0x344   :  { %v1141_v29 = vld [vmem:[#allocation5 + $0x1e58] sm:$0xff]  ;;  %4083 = vmatpush.msra.mxu3 %v2141_v28  ;;  %v922_v56 = vld [vmem:[#allocation5 + $0x1780] sm:$0xff] }
 0x345   :  { %v1461_v30 = vld [vmem:[#allocation5 + $0x2858] sm:$0xff]  ;;  %4025 = vmatpush.msra.mxu0 %v1141_v29  ;;  %v1262_v21 = vld [vmem:[#allocation5 + $0x2220] sm:$0xff] }
 0x346   :  { %v1781_v35 = vld [vmem:[#allocation5 + $0x3258] sm:$0xff]  ;;  %4045 = vmatpush.msra.mxu1 %v1461_v30  ;;  %4026 = vmatmul.f32.vlgmr.msra.gmra.mxu0 %v7409_v2  ;;  %v262_v23 = vld [vmem:[#allocation5 + $0x2e0] sm:$0xff] }
 0x347   :  { %v2121_v0 = vld [vmem:[#allocation5 + $0x3cf8] sm:$0xff]  ;;  %4065 = vmatpush.msra.mxu2 %v1781_v35  ;;  %4090 = vmatpush.msrb.mxu0 %v482_v36  ;;  %v582_v24 = vld [vmem:[#allocation5 + $0xce0] sm:$0xff] }
 0x348   :  { %4084 = vmatpush.msra.mxu3 %v2121_v0  ;;  %v2101_v39 = vld [vmem:[#allocation5 + $0x3c58] sm:$0xff]  ;;  %4110 = vmatpush.msrb.mxu1 %v802_v15  ;;  %v902_v26 = vld [vmem:[#allocation5 + $0x16e0] sm:$0xff] }
 0x349   :  { %4130 = vmatpush.msrb.mxu2 %v1122_v1  ;;  %4091 = vmatpush.msrb.mxu0 %v462_v40  ;;  %v1242_v28 = vld [vmem:[#allocation5 + $0x2180] sm:$0xff]  ;;  %v7430_v40 = vpop.f32.mrf.mxu0  ;;  %v1005_v16 = vld [vmem:[#allocation5 + $0x1a18] sm:$0xff] }
 0x34a   :  { %4085 = vmatpush.msra.mxu3 %v2101_v39  ;;  %4111 = vmatpush.msrb.mxu1 %v782_v42  ;;  %v242_v29 = vld [vmem:[#allocation5 + $0x240] sm:$0xff]  ;;  %v7432_v42 = vpop.f32.mrf.mxu2 }
 0x34b   :  { %4131 = vmatpush.msrb.mxu2 %v1102_v12  ;;  %4092 = vmatpush.msrb.mxu0 %v442_v43  ;;  %v562_v30 = vld [vmem:[#allocation5 + $0xc40] sm:$0xff] }
 0x34c   :  { %4150 = vmatpush.msrb.mxu3 %v1442_v37  ;;  %4112 = vmatpush.msrb.mxu1 %v762_v45  ;;  %v882_v35 = vld [vmem:[#allocation5 + $0x1640] sm:$0xff] }
 0x34d   :  { %4132 = vmatpush.msrb.mxu2 %v1082_v46  ;;  %4093 = vmatpush.msrb.mxu0 %v422_v48  ;;  %v1222_v0 = vld [vmem:[#allocation5 + $0x20e0] sm:$0xff]  ;;  %v7434_v48 = vpop.f32.mrf.mxu1 }
 0x34e   :  { %4151 = vmatpush.msrb.mxu3 %v1422_v20  ;;  %4066 = vmatmul.f32.vlgmr.msra.gmra.mxu2 %v7406_v25  ;;  %v222_v36 = vld [vmem:[#allocation5 + $0x1a0] sm:$0xff] }
 0x34f   :  { %4113 = vmatpush.msrb.mxu1 %v742_v41  ;;  %4133 = vmatpush.msrb.mxu2 %v1062_v49  ;;  %v542_v15 = vld [vmem:[#allocation5 + $0xba0] sm:$0xff]  ;;  %v7436_v41 = vpop.f32.mrf.mxu3 }
 0x350   :  { %4152 = vmatpush.msrb.mxu3 %v1402_v59  ;;  %4094 = vmatpush.msrb.mxu0 %v402_v52  ;;  %v862_v1 = vld [vmem:[#allocation5 + $0x15a0] sm:$0xff] }
 0x351   :  { %4086 = vmatmul.f32.vlgmr.msra.gmra.mxu3 %v7398_v38  ;;  %4114 = vmatpush.msrb.mxu1 %v722_v53  ;;  %v1202_v39 = vld [vmem:[#allocation5 + $0x2040] sm:$0xff] }
 0x352   :  { %4134 = vmatpush.msrb.mxu2 %v1042_v34  ;;  %4153 = vmatpush.msrb.mxu3 %v1382_v54  ;;  %v202_v12 = vld [vmem:[#allocation5 + $0x100] sm:$0xff] }
 0x353   :  { %4046 = vmatmul.f32.vlgmr.msra.gmra.mxu1 %v7415_v44  ;;  %4095 = vmatpush.msrb.mxu0 %v382_v58  ;;  %v522_v37 = vld [vmem:[#allocation5 + $0xb00] sm:$0xff] }
 0x354   :  { %4115 = vmatpush.msrb.mxu1 %v702_v22  ;;  %4135 = vmatpush.msrb.mxu2 %v1022_v60  ;;  %v842_v43 = vld [vmem:[#allocation5 + $0x1500] sm:$0xff] }
 0x355   :  { %4154 = vmatpush.msrb.mxu3 %v1362_v61  ;;  %4096 = vmatpush.msrb.mxu0 %v362_v62  ;;  %v1182_v45 = vld [vmem:[#allocation5 + $0x1fa0] sm:$0xff]  ;;  %v483_v61 = vld [vmem:[#allocation5 + $0x9c8] sm:$0xff]  ;;  %v7438_v62 = vpop.f32.mrf.mxu0 }
 0x356   :  { %4116 = vmatpush.msrb.mxu1 %v682_v32  ;;  %4136 = vmatpush.msrb.mxu2 %v1002_v3  ;;  %v182_v46 = vld [vmem:[#allocation5 + $0x60] sm:$0xff]  ;;  %v7440_v32 = vpop.f32.mrf.mxu2 }
 0x357   :  { %4155 = vmatpush.msrb.mxu3 %v1342_v4  ;;  %4097 = vmatpush.msrb.mxu0 %v342_v5  ;;  %v502_v20 = vld [vmem:[#allocation5 + $0xa60] sm:$0xff] }
 0x358   :  { %4117 = vmatpush.msrb.mxu1 %v662_v6  ;;  %4137 = vmatpush.msrb.mxu2 %v982_v7  ;;  %v822_v49 = vld [vmem:[#allocation5 + $0x1460] sm:$0xff]  ;;  %v463_v6 = vld [vmem:[#allocation5 + $0x928] sm:$0xff] }
 0x359   :  { %4156 = vmatpush.msrb.mxu3 %v1322_v47  ;;  %4098 = vmatpush.msrb.mxu0 %v322_v8  ;;  %v1162_v59 = vld [vmem:[#allocation5 + $0x1f00] sm:$0xff]  ;;  %v7442_v8 = vpop.f32.mrf.mxu1 }
 0x35a   :  { %4118 = vmatpush.msrb.mxu1 %v642_v9  ;;  %4138 = vmatpush.msrb.mxu2 %v962_v11  ;;  %v1762_v52 = vld [vmem:[#allocation5 + $0x31c0] sm:$0xff]  ;;  %7906 = vst [vmem:[#allocation25_spill] sm:$0xff] %v7442_v8  ;;  %v7444_v9 = vpop.f32.mrf.mxu3  ;;  %v1025_v8 = vld [vmem:[#allocation5 + $0x1ab8] sm:$0xff] }
 0x35b   :  { %4157 = vmatpush.msrb.mxu3 %v1302_v50  ;;  %4099 = vmatpush.msrb.mxu0 %v302_v27  ;;  %v2082_v53 = vld [vmem:[#allocation5 + $0x3bc0] sm:$0xff]  ;;  %v443_v50 = vld [vmem:[#allocation5 + $0x888] sm:$0xff] }
 0x35c   :  { %4119 = vmatpush.msrb.mxu1 %v622_v51  ;;  %4139 = vmatpush.msrb.mxu2 %v942_v57  ;;  %v2402_v34 = vld [vmem:[#allocation5 + $0x45c0] sm:$0xff] }
 0x35d   :  { %4158 = vmatpush.msrb.mxu3 %v1282_v14  ;;  %4100 = vmatpush.msrb.mxu0 %v282_v10  ;;  %v1142_v54 = vld [vmem:[#allocation5 + $0x1e60] sm:$0xff]  ;;  %v423_v14 = vld [vmem:[#allocation5 + $0x7e8] sm:$0xff] }
 0x35e   :  { %4120 = vmatpush.msrb.mxu1 %v602_v17  ;;  %4140 = vmatpush.msrb.mxu2 %v922_v56  ;;  %v1742_v58 = vld [vmem:[#allocation5 + $0x3120] sm:$0xff] }
 0x35f   :  { %4159 = vmatpush.msrb.mxu3 %v1262_v21  ;;  %4101 = vmatpush.msrb.mxu0 %v262_v23  ;;  %v2062_v22 = vld [vmem:[#allocation5 + $0x3b20] sm:$0xff]  ;;  %v403_v21 = vld [vmem:[#allocation5 + $0x748] sm:$0xff]  ;;  %v7446_v23 = vpop.f32.mrf.mxu0 }
 0x360   :  { %4121 = vmatpush.msrb.mxu1 %v582_v24  ;;  %4141 = vmatpush.msrb.mxu2 %v902_v26  ;;  %v2382_v60 = vld [vmem:[#allocation5 + $0x4520] sm:$0xff]  ;;  %7907 = vst [vmem:[#allocation26_spill] sm:$0xff] %v7446_v23 }
 0x361   :  { %4160 = vmatpush.msrb.mxu3 %v1242_v28  ;;  %4102 = vmatpush.msrb.mxu0 %v242_v29  ;;  %v1722_v3 = vld [vmem:[#allocation5 + $0x3080] sm:$0xff]  ;;  %v383_v29 = vld [vmem:[#allocation5 + $0x6a8] sm:$0xff] }
 0x362   :  { %4122 = vmatpush.msrb.mxu1 %v562_v30  ;;  %4142 = vmatpush.msrb.mxu2 %v882_v35  ;;  %v2042_v4 = vld [vmem:[#allocation5 + $0x3a80] sm:$0xff]  ;;  %v7448_v30 = vpop.f32.mrf.mxu2 }
 0x363   :  { %4161 = vmatpush.msrb.mxu3 %v1222_v0  ;;  %4103 = vmatpush.msrb.mxu0 %v222_v36  ;;  %v2362_v5 = vld [vmem:[#allocation5 + $0x4480] sm:$0xff]  ;;  %7908 = vst [vmem:[#allocation27_spill] sm:$0xff] %v7448_v30  ;;  %v7450_v36 = vpop.f32.mrf.mxu1  ;;  %v2264_v30 = vld [vmem:[#allocation5 + $0x4170] sm:$0xff] }
 0x364   :  { %4123 = vmatpush.msrb.mxu1 %v542_v15  ;;  %4143 = vmatpush.msrb.mxu2 %v862_v1  ;;  %v1702_v7 = vld [vmem:[#allocation5 + $0x2fe0] sm:$0xff]  ;;  %7909 = vst [vmem:[#allocation28_spill] sm:$0xff] %v7450_v36  ;;  %v363_v1 = vld [vmem:[#allocation5 + $0x608] sm:$0xff] }
 0x365   :  { %4162 = vmatpush.msrb.mxu3 %v1202_v39  ;;  %4104 = vmatpush.msrb.mxu0 %v202_v12  ;;  %v2022_v47 = vld [vmem:[#allocation5 + $0x39e0] sm:$0xff] }
 0x366   :  { %4124 = vmatpush.msrb.mxu1 %v522_v37  ;;  %4144 = vmatpush.msrb.mxu2 %v842_v43  ;;  %v2342_v11 = vld [vmem:[#allocation5 + $0x43e0] sm:$0xff]  ;;  %v7452_v37 = vpop.f32.mrf.mxu3 }
 0x367   :  { %4163 = vmatpush.msrb.mxu3 %v1182_v45  ;;  %4105 = vmatpush.msrb.mxu0 %v182_v46  ;;  %v1682_v27 = vld [vmem:[#allocation5 + $0x2f40] sm:$0xff]  ;;  %7910 = vst [vmem:[#allocation29_spill] sm:$0xff] %v7452_v37  ;;  %v343_v45 = vld [vmem:[#allocation5 + $0x568] sm:$0xff] }
 0x368   :  { %4125 = vmatpush.msrb.mxu1 %v502_v20  ;;  %4145 = vmatpush.msrb.mxu2 %v822_v49  ;;  %v2002_v51 = vld [vmem:[#allocation5 + $0x3940] sm:$0xff] }
 0x369   :  { %4164 = vmatpush.msrb.mxu3 %v1162_v59  ;;  %4170 = vmatpush.msra.mxu0 %v1762_v52  ;;  %v2322_v57 = vld [vmem:[#allocation5 + $0x4340] sm:$0xff]  ;;  %v323_v59 = vld [vmem:[#allocation5 + $0x4c8] sm:$0xff]  ;;  %v7454_v52 = vpop.f32.mrf.mxu0 }
 0x36a   :  { %4190 = vmatpush.msra.mxu1 %v2082_v53  ;;  %4210 = vmatpush.msra.mxu2 %v2402_v34  ;;  %v1662_v10 = vld [vmem:[#allocation5 + $0x2ea0] sm:$0xff] }
 0x36b   :  { %4165 = vmatpush.msrb.mxu3 %v1142_v54  ;;  %4171 = vmatpush.msra.mxu0 %v1742_v58  ;;  %v1982_v17 = vld [vmem:[#allocation5 + $0x38a0] sm:$0xff]  ;;  %v303_v58 = vld [vmem:[#allocation5 + $0x428] sm:$0xff] }
 0x36c   :  { %4191 = vmatpush.msra.mxu1 %v2062_v22  ;;  %4211 = vmatpush.msra.mxu2 %v2382_v60  ;;  %v2302_v56 = vld [vmem:[#allocation5 + $0x42a0] sm:$0xff]  ;;  %v7456_v22 = vpop.f32.mrf.mxu2 }
 0x36d   :  { %4230 = vmatpush.msra.mxu3 %v483_v61  ;;  %4172 = vmatpush.msra.mxu0 %v1722_v3  ;;  %v1642_v24 = vld [vmem:[#allocation5 + $0x2e00] sm:$0xff]  ;;  %7911 = vst [vmem:[#allocation30_spill] sm:$0xff] %v7456_v22  ;;  %v7458_v3 = vpop.f32.mrf.mxu1  ;;  %v1364_v22 = vld [vmem:[#allocation5 + $0x2550] sm:$0xff] }
 0x36e   :  { %4192 = vmatpush.msra.mxu1 %v2042_v4  ;;  %4212 = vmatpush.msra.mxu2 %v2362_v5  ;;  %v1962_v26 = vld [vmem:[#allocation5 + $0x3800] sm:$0xff]  ;;  %7912 = vst [vmem:[#allocation31_spill] sm:$0xff] %v7458_v3  ;;  %v283_v5 = vld [vmem:[#allocation5 + $0x388] sm:$0xff] }
 0x36f   :  { %4231 = vmatpush.msra.mxu3 %v463_v6  ;;  %4173 = vmatpush.msra.mxu0 %v1702_v7  ;;  %v2282_v28 = vld [vmem:[#allocation5 + $0x4200] sm:$0xff] }
 0x370   :  { %4193 = vmatpush.msra.mxu1 %v2022_v47  ;;  %4213 = vmatpush.msra.mxu2 %v2342_v11  ;;  %v1622_v35 = vld [vmem:[#allocation5 + $0x2d60] sm:$0xff]  ;;  %v7460_v47 = vpop.f32.mrf.mxu3 }
 0x371   :  { %4232 = vmatpush.msra.mxu3 %v443_v50  ;;  %4174 = vmatpush.msra.mxu0 %v1682_v27  ;;  %v1942_v0 = vld [vmem:[#allocation5 + $0x3760] sm:$0xff]  ;;  %7913 = vst [vmem:[#allocation32_spill] sm:$0xff] %v7460_v47  ;;  %v263_v50 = vld [vmem:[#allocation5 + $0x2e8] sm:$0xff]  ;;  %v1384_v47 = vld [vmem:[#allocation5 + $0x25f0] sm:$0xff] }
 0x372   :  { %4194 = vmatpush.msra.mxu1 %v2002_v51  ;;  %4214 = vmatpush.msra.mxu2 %v2322_v57  ;;  %v2262_v15 = vld [vmem:[#allocation5 + $0x4160] sm:$0xff] }
 0x373   :  { %4233 = vmatpush.msra.mxu3 %v423_v14  ;;  %4175 = vmatpush.msra.mxu0 %v1662_v10  ;;  %v1602_v39 = vld [vmem:[#allocation5 + $0x2cc0] sm:$0xff]  ;;  %v243_v14 = vld [vmem:[#allocation5 + $0x248] sm:$0xff]  ;;  %v7462_v10 = vpop.f32.mrf.mxu0 }
 0x374   :  { %4195 = vmatpush.msra.mxu1 %v1982_v17  ;;  %4215 = vmatpush.msra.mxu2 %v2302_v56  ;;  %v1922_v12 = vld [vmem:[#allocation5 + $0x36c0] sm:$0xff]  ;;  %7914 = vst [vmem:[#allocation33_spill] sm:$0xff] %v7462_v10  ;;  %v2364_v10 = vld [vmem:[#allocation5 + $0x4490] sm:$0xff] }
 0x375   :  { %4234 = vmatpush.msra.mxu3 %v403_v21  ;;  %4176 = vmatpush.msra.mxu0 %v1642_v24  ;;  %v2242_v43 = vld [vmem:[#allocation5 + $0x40c0] sm:$0xff]  ;;  %v223_v24 = vld [vmem:[#allocation5 + $0x1a8] sm:$0xff] }
 0x376   :  { %4196 = vmatpush.msra.mxu1 %v1962_v26  ;;  %4216 = vmatpush.msra.mxu2 %v2282_v28  ;;  %v1582_v46 = vld [vmem:[#allocation5 + $0x2c20] sm:$0xff] }
 0x377   :  { %4235 = vmatpush.msra.mxu3 %v383_v29  ;;  %4177 = vmatpush.msra.mxu0 %v1622_v35  ;;  %v1902_v20 = vld [vmem:[#allocation5 + $0x3620] sm:$0xff]  ;;  %v7464_v35 = vpop.f32.mrf.mxu2 }
 0x378   :  { %4197 = vmatpush.msra.mxu1 %v1942_v0  ;;  %4217 = vmatpush.msra.mxu2 %v2262_v15  ;;  %v2222_v49 = vld [vmem:[#allocation5 + $0x4020] sm:$0xff]  ;;  %7915 = vst [vmem:[#allocation34_spill] sm:$0xff] %v7464_v35  ;;  %v203_v0 = vld [vmem:[#allocation5 + $0x108] sm:$0xff]  ;;  %v7466_v15 = vpop.f32.mrf.mxu1 }
 0x379   :  { %4236 = vmatpush.msra.mxu3 %v363_v1  ;;  %4178 = vmatpush.msra.mxu0 %v1602_v39  ;;  %v1562_v53 = vld [vmem:[#allocation5 + $0x2b80] sm:$0xff]  ;;  %7916 = vst [vmem:[#allocation35_spill] sm:$0xff] %v7466_v15  ;;  %v7468_v1 = vld [vmem:[#allocation2 + $0x10] sm:$0xff]  ;;  %v803_v39 = vld [vmem:[#allocation5 + $0x13c8] sm:$0xff] }
 0x37a   :  { %4198 = vmatpush.msra.mxu1 %v1922_v12  ;;  %4218 = vmatpush.msra.mxu2 %v2242_v43  ;;  %v1882_v34 = vld [vmem:[#allocation5 + $0x3580] sm:$0xff]  ;;  %v1123_v12 = vld [vmem:[#allocation5 + $0x1dc8] sm:$0xff]  ;;  %v7471_v43 = vpop.f32.mrf.mxu3 }
 0x37b   :  { %4237 = vmatpush.msra.mxu3 %v343_v45  ;;  %4179 = vmatpush.msra.mxu0 %v1582_v46  ;;  %v2202_v54 = vld [vmem:[#allocation5 + $0x3f80] sm:$0xff]  ;;  %7917 = vst [vmem:[#allocation36_spill] sm:$0xff] %v7471_v43  ;;  %v1443_v45 = vld [vmem:[#allocation5 + $0x27c8] sm:$0xff]  ;;  %v564_v43 = vld [vmem:[#allocation5 + $0xc50] sm:$0xff] }
 0x37c   :  { %4199 = vmatpush.msra.mxu1 %v1902_v20  ;;  %4219 = vmatpush.msra.mxu2 %v2222_v49  ;;  %v1542_v60 = vld [vmem:[#allocation5 + $0x2ae0] sm:$0xff]  ;;  %v183_v46 = vld [vmem:[#allocation5 + $0x68] sm:$0xff]  ;;  %v7474_v20 = vpop.f32.mrf.mxu0  ;;  %v7476_v49 = vld [vmem:[#allocation2 + $0x8] sm:$0xff] }
 0x37d   :  { %4238 = vmatpush.msra.mxu3 %v323_v59  ;;  %v1862_v61 = vld [vmem:[#allocation5 + $0x34e0] sm:$0xff]  ;;  %4180 = vmatpush.msra.mxu0 %v1562_v53  ;;  %7918 = vst [vmem:[#allocation37_spill] sm:$0xff] %v7474_v20  ;;  %v783_v59 = vld [vmem:[#allocation5 + $0x1328] sm:$0xff]  ;;  %v1424_v20 = vld [vmem:[#allocation5 + $0x2730] sm:$0xff] }
 0x37e   :  { %4200 = vmatpush.msra.mxu1 %v1882_v34  ;;  %v2182_v4 = vld [vmem:[#allocation5 + $0x3ee0] sm:$0xff]  ;;  %4220 = vmatpush.msra.mxu2 %v2202_v54  ;;  %v1103_v53 = vld [vmem:[#allocation5 + $0x1d28] sm:$0xff] }
 0x37f   :  { %4239 = vmatpush.msra.mxu3 %v303_v58  ;;  %v1522_v6 = vld [vmem:[#allocation5 + $0x2a40] sm:$0xff]  ;;  %4181 = vmatpush.msra.mxu0 %v1542_v60  ;;  %v1423_v34 = vld [vmem:[#allocation5 + $0x2728] sm:$0xff] }
 0x380   :  { %v1842_v7 = vld [vmem:[#allocation5 + $0x3440] sm:$0xff]  ;;  %4201 = vmatpush.msra.mxu1 %v1862_v61  ;;  %4221 = vmatpush.msra.mxu2 %v2182_v4  ;;  %v1763_v54 = vld [vmem:[#allocation5 + $0x31c8] sm:$0xff] }
 0x381   :  { %v2162_v11 = vld [vmem:[#allocation5 + $0x3e40] sm:$0xff]  ;;  %4240 = vmatpush.msra.mxu3 %v283_v5  ;;  %4182 = vmatpush.msra.mxu0 %v1522_v6  ;;  %v763_v58 = vld [vmem:[#allocation5 + $0x1288] sm:$0xff]  ;;  %v7480_v5 = vpop.f32.mrf.mxu2 }
 0x382   :  { %v1502_v27 = vld [vmem:[#allocation5 + $0x29a0] sm:$0xff]  ;;  %4202 = vmatpush.msra.mxu1 %v1842_v7  ;;  %4222 = vmatpush.msra.mxu2 %v2162_v11  ;;  %v1083_v60 = vld [vmem:[#allocation5 + $0x1c88] sm:$0xff]  ;;  %7919 = vst [vmem:[#allocation38_spill] sm:$0xff] %v7480_v5  ;;  %v7482_v7 = vpop.f32.mrf.mxu1  ;;  %v284_v5 = vld [vmem:[#allocation5 + $0x390] sm:$0xff] }
 0x383   :  { %v1822_v51 = vld [vmem:[#allocation5 + $0x33a0] sm:$0xff]  ;;  %4241 = vmatpush.msra.mxu3 %v263_v50  ;;  %4183 = vmatpush.msra.mxu0 %v1502_v27  ;;  %v1403_v61 = vld [vmem:[#allocation5 + $0x2688] sm:$0xff]  ;;  %7920 = vst [vmem:[#allocation39_spill] sm:$0xff] %v7482_v7  ;;  %v624_v7 = vld [vmem:[#allocation5 + $0xe30] sm:$0xff] }
 0x384   :  { %v2142_v57 = vld [vmem:[#allocation5 + $0x3da0] sm:$0xff]  ;;  %4203 = vmatpush.msra.mxu1 %v1822_v51  ;;  %4146 = vmatmul.f32.vlgmr.msrb.gmra.mxu2 %v7468_v1  ;;  %v1743_v4 = vld [vmem:[#allocation5 + $0x3128] sm:$0xff]  ;;  %v7484_v51 = vpop.f32.mrf.mxu3 }
 0x385   :  { %v1482_v17 = vld [vmem:[#allocation5 + $0x2900] sm:$0xff]  ;;  %4223 = vmatpush.msra.mxu2 %v2142_v57  ;;  %4242 = vmatpush.msra.mxu3 %v243_v14  ;;  %v743_v6 = vld [vmem:[#allocation5 + $0x11e8] sm:$0xff]  ;;  %7921 = vst [vmem:[#allocation40_spill] sm:$0xff] %v7484_v51  ;;  %v664_v51 = vld [vmem:[#allocation5 + $0xf70] sm:$0xff] }
 0x386   :  { %v1802_v56 = vld [vmem:[#allocation5 + $0x3300] sm:$0xff]  ;;  %4184 = vmatpush.msra.mxu0 %v1482_v17  ;;  %4126 = vmatmul.f32.vlgmr.msrb.gmra.mxu1 %v7476_v49  ;;  %v1063_v11 = vld [vmem:[#allocation5 + $0x1be8] sm:$0xff]  ;;  %v7487_v17 = vpop.f32.mrf.mxu0 }
 0x387   :  { %v2122_v21 = vld [vmem:[#allocation5 + $0x3d00] sm:$0xff]  ;;  %4204 = vmatpush.msra.mxu1 %v1802_v56  ;;  %4243 = vmatpush.msra.mxu3 %v223_v24  ;;  %v1383_v50 = vld [vmem:[#allocation5 + $0x25e8] sm:$0xff]  ;;  %7922 = vst [vmem:[#allocation41_spill] sm:$0xff] %v7487_v17 }
 0x388   :  { %v1462_v26 = vld [vmem:[#allocation5 + $0x2860] sm:$0xff]  ;;  %4224 = vmatpush.msra.mxu2 %v2122_v21  ;;  %4106 = vmatmul.f32.vlgmr.msrb.gmra.mxu0 %v7402_v18  ;;  %v1723_v27 = vld [vmem:[#allocation5 + $0x3088] sm:$0xff] }
 0x389   :  { %v1782_v28 = vld [vmem:[#allocation5 + $0x3260] sm:$0xff]  ;;  %4185 = vmatpush.msra.mxu0 %v1462_v26  ;;  %4244 = vmatpush.msra.mxu3 %v203_v0  ;;  %v723_v57 = vld [vmem:[#allocation5 + $0x1148] sm:$0xff] }
 0x38a   :  { %v2102_v29 = vld [vmem:[#allocation5 + $0x3c60] sm:$0xff]  ;;  %4205 = vmatpush.msra.mxu1 %v1782_v28  ;;  %4166 = vmatmul.f32.vlgmr.msrb.gmra.mxu3 %v7409_v2  ;;  %v1043_v14 = vld [vmem:[#allocation5 + $0x1b48] sm:$0xff] }
 0x38b   :  { %4225 = vmatpush.msra.mxu2 %v2102_v29  ;;  %4250 = vmatpush.msrb.mxu0 %v803_v39  ;;  %v1363_v56 = vld [vmem:[#allocation5 + $0x2548] sm:$0xff] }
 0x38c   :  { %4270 = vmatpush.msrb.mxu1 %v1123_v12  ;;  %4245 = vmatpush.msra.mxu3 %v183_v46  ;;  %v1703_v21 = vld [vmem:[#allocation5 + $0x2fe8] sm:$0xff]  ;;  %v7491_v46 = vpop.f32.mrf.mxu2 }
 0x38d   :  { %4290 = vmatpush.msrb.mxu2 %v1443_v45  ;;  %4251 = vmatpush.msrb.mxu0 %v783_v59  ;;  %v703_v24 = vld [vmem:[#allocation5 + $0x10a8] sm:$0xff]  ;;  %7923 = vst [vmem:[#allocation42_spill] sm:$0xff] %v7491_v46 }
 0x38e   :  { %4271 = vmatpush.msrb.mxu1 %v1103_v53  ;;  %4310 = vmatpush.msrb.mxu3 %v1763_v54  ;;  %v1023_v26 = vld [vmem:[#allocation5 + $0x1aa8] sm:$0xff]  ;;  %v7495_v54 = vpop.f32.mrf.mxu3 }
 0x38f   :  { %4291 = vmatpush.msrb.mxu2 %v1423_v34  ;;  %4252 = vmatpush.msrb.mxu0 %v763_v58  ;;  %v1343_v28 = vld [vmem:[#allocation5 + $0x24a8] sm:$0xff]  ;;  %v7493_v34 = vpop.f32.mrf.mxu1 }
 0x390   :  { %4272 = vmatpush.msrb.mxu1 %v1083_v60  ;;  %4311 = vmatpush.msrb.mxu3 %v1743_v4  ;;  %v683_v29 = vld [vmem:[#allocation5 + $0x1008] sm:$0xff]  ;;  %7924 = vst [vmem:[#allocation43_spill] sm:$0xff] %v7493_v34 }
 0x391   :  { %4292 = vmatpush.msrb.mxu2 %v1403_v61  ;;  %4253 = vmatpush.msrb.mxu0 %v743_v6  ;;  %v1003_v0 = vld [vmem:[#allocation5 + $0x1a08] sm:$0xff] }
 0x392   :  { %4226 = vmatmul.f32.vlgmr.msra.gmra.mxu2 %v7398_v38  ;;  %4273 = vmatpush.msrb.mxu1 %v1063_v11  ;;  %v1683_v38 = vld [vmem:[#allocation5 + $0x2f48] sm:$0xff]  ;;  %v7497_v11 = vpop.f32.mrf.mxu0 }
 0x393   :  { %4293 = vmatpush.msrb.mxu2 %v1383_v50  ;;  %4312 = vmatpush.msrb.mxu3 %v1723_v27  ;;  %v1323_v39 = vld [vmem:[#allocation5 + $0x2408] sm:$0xff]  ;;  %7925 = vst [vmem:[#allocation44_spill] sm:$0xff] %v7497_v11 }
 0x394   :  { %4186 = vmatmul.f32.vlgmr.msra.gmra.mxu0 %v7415_v44  ;;  %4274 = vmatpush.msrb.mxu1 %v1043_v14  ;;  %v1663_v12 = vld [vmem:[#allocation5 + $0x2ea8] sm:$0xff] }
 0x395   :  { %4254 = vmatpush.msrb.mxu0 %v723_v57  ;;  %4294 = vmatpush.msrb.mxu2 %v1363_v56  ;;  %v663_v45 = vld [vmem:[#allocation5 + $0xf68] sm:$0xff] }
 0x396   :  { %4313 = vmatpush.msrb.mxu3 %v1703_v21  ;;  %4206 = vmatmul.f32.vlgmr.msra.gmra.mxu1 %v7406_v25  ;;  %v983_v59 = vld [vmem:[#allocation5 + $0x1968] sm:$0xff] }
 0x397   :  { %4255 = vmatpush.msrb.mxu0 %v703_v24  ;;  %4275 = vmatpush.msrb.mxu1 %v1023_v26  ;;  %v1303_v53 = vld [vmem:[#allocation5 + $0x2368] sm:$0xff] }
 0x398   :  { %4295 = vmatpush.msrb.mxu2 %v1343_v28  ;;  %4314 = vmatpush.msrb.mxu3 %v1683_v38  ;;  %v1643_v25 = vld [vmem:[#allocation5 + $0x2e08] sm:$0xff]  ;;  %v7499_v28 = vpop.f32.mrf.mxu2 }
 0x399   :  { %4256 = vmatpush.msrb.mxu0 %v683_v29  ;;  %4276 = vmatpush.msrb.mxu1 %v1003_v0  ;;  %v643_v58 = vld [vmem:[#allocation5 + $0xec8] sm:$0xff]  ;;  %v7501_v0 = vpop.f32.mrf.mxu1 }
 0x39a   :  { %4296 = vmatpush.msrb.mxu2 %v1323_v39  ;;  %4315 = vmatpush.msrb.mxu3 %v1663_v12  ;;  %v963_v60 = vld [vmem:[#allocation5 + $0x18c8] sm:$0xff] }
 0x39b   :  { %4257 = vmatpush.msrb.mxu0 %v663_v45  ;;  %v1283_v61 = vld [vmem:[#allocation5 + $0x22c8] sm:$0xff]  ;;  %4277 = vmatpush.msrb.mxu1 %v983_v59 }
 0x39c   :  { %4297 = vmatpush.msrb.mxu2 %v1303_v53  ;;  %v1623_v4 = vld [vmem:[#allocation5 + $0x2d68] sm:$0xff]  ;;  %4316 = vmatpush.msrb.mxu3 %v1643_v25  ;;  %v7503_v53 = vpop.f32.mrf.mxu3 }
 0x39d   :  { %v623_v6 = vld [vmem:[#allocation5 + $0xe28] sm:$0xff]  ;;  %4258 = vmatpush.msrb.mxu0 %v643_v58  ;;  %4278 = vmatpush.msrb.mxu1 %v963_v60  ;;  %v7505_v60 = vpop.f32.mrf.mxu0 }
 0x39e   :  { %v943_v50 = vld [vmem:[#allocation5 + $0x1828] sm:$0xff]  ;;  %4298 = vmatpush.msrb.mxu2 %v1283_v61  ;;  %4317 = vmatpush.msrb.mxu3 %v1623_v4 }
 0x39f   :  { %v1263_v27 = vld [vmem:[#allocation5 + $0x2228] sm:$0xff]  ;;  %4259 = vmatpush.msrb.mxu0 %v623_v6  ;;  %4279 = vmatpush.msrb.mxu1 %v943_v50 }
 0x3a0   :  { %v1603_v57 = vld [vmem:[#allocation5 + $0x2cc8] sm:$0xff]  ;;  %4299 = vmatpush.msrb.mxu2 %v1263_v27  ;;  %4246 = vmatmul.f32.vlgmr.msra.gmra.mxu3 %v7402_v18  ;;  %v424_v18 = vld [vmem:[#allocation5 + $0x7f0] sm:$0xff] }
 0x3a1   :  { %v603_v14 = vld [vmem:[#allocation5 + $0xd88] sm:$0xff]  ;;  %4318 = vmatpush.msrb.mxu3 %v1603_v57 }
 0x3a2   :  { %v923_v56 = vld [vmem:[#allocation5 + $0x1788] sm:$0xff]  ;;  %4260 = vmatpush.msrb.mxu0 %v603_v14 }
 0x3a3   :  { %v1243_v21 = vld [vmem:[#allocation5 + $0x2188] sm:$0xff]  ;;  %4280 = vmatpush.msrb.mxu1 %v923_v56 }
 0x3a4   :  { %v1583_v24 = vld [vmem:[#allocation5 + $0x2c28] sm:$0xff]  ;;  %4300 = vmatpush.msrb.mxu2 %v1243_v21  ;;  %v7507_v21 = vpop.f32.mrf.mxu2 }
 0x3a5   :  { %v583_v26 = vld [vmem:[#allocation5 + $0xce8] sm:$0xff]  ;;  %4319 = vmatpush.msrb.mxu3 %v1583_v24 }
 0x3a6   :  { %v903_v38 = vld [vmem:[#allocation5 + $0x16e8] sm:$0xff]  ;;  %4261 = vmatpush.msrb.mxu0 %v583_v26 }
 0x3a7   :  { %v1223_v29 = vld [vmem:[#allocation5 + $0x20e8] sm:$0xff]  ;;  %4281 = vmatpush.msrb.mxu1 %v903_v38  ;;  %v7509_v38 = vpop.f32.mrf.mxu1 }
 0x3a8   :  { %v1563_v39 = vld [vmem:[#allocation5 + $0x2b88] sm:$0xff]  ;;  %4301 = vmatpush.msrb.mxu2 %v1223_v29  ;;  %7926 = vst [vmem:[#allocation45_spill] sm:$0xff] %v7509_v38 }
 0x3a9   :  { %v563_v12 = vld [vmem:[#allocation5 + $0xc48] sm:$0xff]  ;;  %4320 = vmatpush.msrb.mxu3 %v1563_v39 }
 0x3aa   :  { %v883_v45 = vld [vmem:[#allocation5 + $0x1648] sm:$0xff]  ;;  %4262 = vmatpush.msrb.mxu0 %v563_v12 }
 0x3ab   :  { %v1203_v59 = vld [vmem:[#allocation5 + $0x2048] sm:$0xff]  ;;  %4282 = vmatpush.msrb.mxu1 %v883_v45  ;;  %v7511_v45 = vpop.f32.mrf.mxu3 }
 0x3ac   :  { %v1543_v25 = vld [vmem:[#allocation5 + $0x2ae8] sm:$0xff]  ;;  %4302 = vmatpush.msrb.mxu2 %v1203_v59  ;;  %v484_v59 = vld [vmem:[#allocation5 + $0x9d0] sm:$0xff] }
 0x3ad   :  { %v543_v58 = vld [vmem:[#allocation5 + $0xba8] sm:$0xff]  ;;  %4321 = vmatpush.msrb.mxu3 %v1543_v25 }
 0x3ae   :  { %v863_v61 = vld [vmem:[#allocation5 + $0x15a8] sm:$0xff]  ;;  %4263 = vmatpush.msrb.mxu0 %v543_v58  ;;  %v7513_v58 = vpop.f32.mrf.mxu0 }
 0x3af   :  { %v1183_v4 = vld [vmem:[#allocation5 + $0x1fa8] sm:$0xff]  ;;  %4283 = vmatpush.msrb.mxu1 %v863_v61 }
 0x3b0   :  { %v1523_v6 = vld [vmem:[#allocation5 + $0x2a48] sm:$0xff]  ;;  %4303 = vmatpush.msrb.mxu2 %v1183_v4 }
 0x3b1   :  { %v523_v50 = vld [vmem:[#allocation5 + $0xb08] sm:$0xff]  ;;  %4322 = vmatpush.msrb.mxu3 %v1523_v6  ;;  %v464_v6 = vld [vmem:[#allocation5 + $0x930] sm:$0xff] }
 0x3b2   :  { %v843_v27 = vld [vmem:[#allocation5 + $0x1508] sm:$0xff]  ;;  %4264 = vmatpush.msrb.mxu0 %v523_v50  ;;  %v804_v50 = vld [vmem:[#allocation5 + $0x13d0] sm:$0xff] }
 0x3b3   :  { %v1163_v57 = vld [vmem:[#allocation5 + $0x1f08] sm:$0xff]  ;;  %4284 = vmatpush.msrb.mxu1 %v843_v27 }
 0x3b4   :  { %v1503_v14 = vld [vmem:[#allocation5 + $0x29a8] sm:$0xff]  ;;  %4304 = vmatpush.msrb.mxu2 %v1163_v57 }
 0x3b5   :  { %v503_v56 = vld [vmem:[#allocation5 + $0xa68] sm:$0xff]  ;;  %4323 = vmatpush.msrb.mxu3 %v1503_v14  ;;  %v444_v14 = vld [vmem:[#allocation5 + $0x890] sm:$0xff] }
 0x3b6   :  { %v823_v24 = vld [vmem:[#allocation5 + $0x1468] sm:$0xff]  ;;  %4265 = vmatpush.msrb.mxu0 %v503_v56  ;;  %v784_v56 = vld [vmem:[#allocation5 + $0x1330] sm:$0xff] }
 0x3b7   :  { %v1143_v26 = vld [vmem:[#allocation5 + $0x1e68] sm:$0xff]  ;;  %4285 = vmatpush.msrb.mxu1 %v823_v24  ;;  %4266 = vmatmul.f32.vlgmr.msrb.gmra.mxu0 %v7476_v49 }
 0x3b8   :  { %v1483_v29 = vld [vmem:[#allocation5 + $0x2908] sm:$0xff]  ;;  %4305 = vmatpush.msrb.mxu2 %v1143_v26  ;;  %v7516_v26 = vpop.f32.mrf.mxu1  ;;  %4286 = vmatmul.f32.vlgmr.msrb.gmra.mxu1 %v7468_v1 }
 0x3b9   :  { %v2083_v39 = vld [vmem:[#allocation5 + $0x3bc8] sm:$0xff]  ;;  %4324 = vmatpush.msrb.mxu3 %v1483_v29  ;;  %4306 = vmatmul.f32.vlgmr.msrb.gmra.mxu2 %v7409_v2  ;;  %v384_v2 = vld [vmem:[#allocation5 + $0x6b0] sm:$0xff] }
 0x3ba   :  { %v2403_v12 = vld [vmem:[#allocation5 + $0x45c8] sm:$0xff]  ;;  %4330 = vmatpush.msra.mxu0 %v2083_v39  ;;  %4370 = vmatpush.msra.mxu2 %v484_v59  ;;  %v7518_v39 = vpop.f32.mrf.mxu2 }
 0x3bb   :  { %v1463_v25 = vld [vmem:[#allocation5 + $0x2868] sm:$0xff]  ;;  %4350 = vmatpush.msra.mxu1 %v2403_v12  ;;  %v764_v12 = vld [vmem:[#allocation5 + $0x1290] sm:$0xff] }
 0x3bc   :  { %v2063_v61 = vld [vmem:[#allocation5 + $0x3b28] sm:$0xff]  ;;  %4325 = vmatpush.msrb.mxu3 %v1463_v25  ;;  %4371 = vmatpush.msra.mxu2 %v464_v6  ;;  %v7521_v25 = vpop.f32.mrf.mxu0  ;;  %v7523_v6 = vpop.f32.mrf.mxu3 }
 0x3bd   :  { %v2383_v4 = vld [vmem:[#allocation5 + $0x4528] sm:$0xff]  ;;  %4331 = vmatpush.msra.mxu0 %v2063_v61  ;;  %7927 = vst [vmem:[#allocation46_spill] sm:$0xff] %v7523_v6  ;;  %4326 = vmatmul.f32.vlgmr.msrb.gmra.mxu3 %v7415_v44 }
 0x3be   :  { %v2043_v27 = vld [vmem:[#allocation5 + $0x3a88] sm:$0xff]  ;;  %4351 = vmatpush.msra.mxu1 %v2383_v4  ;;  %4390 = vmatpush.msra.mxu3 %v804_v50  ;;  %v404_v4 = vld [vmem:[#allocation5 + $0x750] sm:$0xff] }
 0x3bf   :  { %v2363_v57 = vld [vmem:[#allocation5 + $0x4488] sm:$0xff]  ;;  %4332 = vmatpush.msra.mxu0 %v2043_v27  ;;  %4372 = vmatpush.msra.mxu2 %v444_v14  ;;  %v744_v50 = vld [vmem:[#allocation5 + $0x11f0] sm:$0xff] }
 0x3c0   :  { %v2023_v24 = vld [vmem:[#allocation5 + $0x39e8] sm:$0xff]  ;;  %4352 = vmatpush.msra.mxu1 %v2363_v57  ;;  %4391 = vmatpush.msra.mxu3 %v784_v56  ;;  %v724_v14 = vld [vmem:[#allocation5 + $0x1150] sm:$0xff] }
 0x3c1   :  { %v2343_v29 = vld [vmem:[#allocation5 + $0x43e8] sm:$0xff]  ;;  %4333 = vmatpush.msra.mxu0 %v2023_v24  ;;  %4373 = vmatpush.msra.mxu2 %v424_v18  ;;  %v364_v18 = vld [vmem:[#allocation5 + $0x610] sm:$0xff] }
 0x3c2   :  { %v2003_v59 = vld [vmem:[#allocation5 + $0x3948] sm:$0xff]  ;;  %4353 = vmatpush.msra.mxu1 %v2343_v29  ;;  %4392 = vmatpush.msra.mxu3 %v764_v12  ;;  %v7528_v29 = vpop.f32.mrf.mxu1  ;;  %v704_v12 = vld [vmem:[#allocation5 + $0x10b0] sm:$0xff]  ;;  %v7530_v46 = vpop.f32.mrf.mxu2 }
 0x3c3   :  { %v2323_v61 = vld [vmem:[#allocation5 + $0x4348] sm:$0xff]  ;;  %4334 = vmatpush.msra.mxu0 %v2003_v59  ;;  %4374 = vmatpush.msra.mxu2 %v404_v4  ;;  %v684_v4 = vld [vmem:[#allocation5 + $0x1010] sm:$0xff] }
 0x3c4   :  { %v1983_v27 = vld [vmem:[#allocation5 + $0x38a8] sm:$0xff]  ;;  %4354 = vmatpush.msra.mxu1 %v2323_v61  ;;  %4393 = vmatpush.msra.mxu3 %v744_v50  ;;  %v344_v61 = vld [vmem:[#allocation5 + $0x570] sm:$0xff]  ;;  %v7532_v50 = vpop.f32.mrf.mxu0 }
 0x3c5   :  { %v2303_v57 = vld [vmem:[#allocation5 + $0x42a8] sm:$0xff]  ;;  %4335 = vmatpush.msra.mxu0 %v1983_v27  ;;  %4375 = vmatpush.msra.mxu2 %v384_v2  ;;  %7928 = vst [vmem:[#allocation47_spill] sm:$0xff] %v7532_v50  ;;  %v7534_v27 = vpop.f32.mrf.mxu3  ;;  %v2244_v50 = vld [vmem:[#allocation5 + $0x40d0] sm:$0xff] }
 0x3c6   :  { %v1963_v56 = vld [vmem:[#allocation5 + $0x3808] sm:$0xff]  ;;  %4355 = vmatpush.msra.mxu1 %v2303_v57  ;;  %4394 = vmatpush.msra.mxu3 %v724_v14  ;;  %v324_v57 = vld [vmem:[#allocation5 + $0x4d0] sm:$0xff] }
 0x3c7   :  { %v2283_v24 = vld [vmem:[#allocation5 + $0x4208] sm:$0xff]  ;;  %4336 = vmatpush.msra.mxu0 %v1963_v56  ;;  %4376 = vmatpush.msra.mxu2 %v364_v18  ;;  %v304_v56 = vld [vmem:[#allocation5 + $0x430] sm:$0xff] }
 0x3c8   :  { %v1943_v44 = vld [vmem:[#allocation5 + $0x3768] sm:$0xff]  ;;  %4356 = vmatpush.msra.mxu1 %v2283_v24  ;;  %4395 = vmatpush.msra.mxu3 %v704_v12  ;;  %v644_v24 = vld [vmem:[#allocation5 + $0xed0] sm:$0xff] }
 0x3c9   :  { %v2263_v59 = vld [vmem:[#allocation5 + $0x4168] sm:$0xff]  ;;  %4337 = vmatpush.msra.mxu0 %v1943_v44  ;;  %4377 = vmatpush.msra.mxu2 %v344_v61 }
 0x3ca   :  { %v1923_v34 = vld [vmem:[#allocation5 + $0x36c8] sm:$0xff]  ;;  %4357 = vmatpush.msra.mxu1 %v2263_v59  ;;  %4396 = vmatpush.msra.mxu3 %v684_v4  ;;  %v7536_v61 = vpop.f32.mrf.mxu1 }
 0x3cb   :  { %v2243_v11 = vld [vmem:[#allocation5 + $0x40c8] sm:$0xff]  ;;  %4338 = vmatpush.msra.mxu0 %v1923_v34  ;;  %4378 = vmatpush.msra.mxu2 %v324_v57  ;;  %7929 = vst [vmem:[#allocation48_spill] sm:$0xff] %v7536_v61  ;;  %v264_v34 = vld [vmem:[#allocation5 + $0x2f0] sm:$0xff]  ;;  %v7540_v57 = vpop.f32.mrf.mxu2 }
 0x3cc   :  { %v1903_v2 = vld [vmem:[#allocation5 + $0x3628] sm:$0xff]  ;;  %4358 = vmatpush.msra.mxu1 %v2243_v11  ;;  %4397 = vmatpush.msra.mxu3 %v664_v51  ;;  %v604_v11 = vld [vmem:[#allocation5 + $0xd90] sm:$0xff]  ;;  %v7538_v4 = vpop.f32.mrf.mxu0  ;;  %7930 = vst [vmem:[#allocation49_spill] sm:$0xff] %v7540_v57  ;;  %v1045_v57 = vld [vmem:[#allocation5 + $0x1b58] sm:$0xff] }
 0x3cd   :  { %v2223_v14 = vld [vmem:[#allocation5 + $0x4028] sm:$0xff]  ;;  %4339 = vmatpush.msra.mxu0 %v1903_v2  ;;  %4379 = vmatpush.msra.mxu2 %v304_v56  ;;  %v584_v56 = vld [vmem:[#allocation5 + $0xcf0] sm:$0xff] }
 0x3ce   :  { %v1883_v18 = vld [vmem:[#allocation5 + $0x3588] sm:$0xff]  ;;  %4359 = vmatpush.msra.mxu1 %v2223_v14  ;;  %4398 = vmatpush.msra.mxu3 %v644_v24  ;;  %v244_v14 = vld [vmem:[#allocation5 + $0x250] sm:$0xff] }
 0x3cf   :  { %v2203_v12 = vld [vmem:[#allocation5 + $0x3f88] sm:$0xff]  ;;  %4340 = vmatpush.msra.mxu0 %v1883_v18  ;;  %4380 = vmatpush.msra.mxu2 %v284_v5  ;;  %v7542_v18 = vpop.f32.mrf.mxu3 }
 0x3d0   :  { %v1863_v44 = vld [vmem:[#allocation5 + $0x34e8] sm:$0xff]  ;;  %4360 = vmatpush.msra.mxu1 %v2203_v12  ;;  %4399 = vmatpush.msra.mxu3 %v624_v7  ;;  %7931 = vst [vmem:[#allocation50_spill] sm:$0xff] %v7542_v18  ;;  %v224_v12 = vld [vmem:[#allocation5 + $0x1b0] sm:$0xff] }
 0x3d1   :  { %v2183_v59 = vld [vmem:[#allocation5 + $0x3ee8] sm:$0xff]  ;;  %4341 = vmatpush.msra.mxu0 %v1863_v44  ;;  %4381 = vmatpush.msra.mxu2 %v264_v34  ;;  %v204_v44 = vld [vmem:[#allocation5 + $0x110] sm:$0xff] }
 0x3d2   :  { %v1843_v51 = vld [vmem:[#allocation5 + $0x3448] sm:$0xff]  ;;  %4361 = vmatpush.msra.mxu1 %v2183_v59  ;;  %4400 = vmatpush.msra.mxu3 %v604_v11  ;;  %v544_v59 = vld [vmem:[#allocation5 + $0xbb0] sm:$0xff]  ;;  %v7544_v35 = vpop.f32.mrf.mxu1 }
 0x3d3   :  { %v2163_v2 = vld [vmem:[#allocation5 + $0x3e48] sm:$0xff]  ;;  %4342 = vmatpush.msra.mxu0 %v1843_v51  ;;  %4382 = vmatpush.msra.mxu2 %v244_v14  ;;  %7932 = vst [vmem:[#allocation51_spill] sm:$0xff] %v7544_v35  ;;  %v184_v51 = vld [vmem:[#allocation5 + $0x70] sm:$0xff]  ;;  %v7548_v14 = vpop.f32.mrf.mxu2 }
 0x3d4   :  { %v1823_v24 = vld [vmem:[#allocation5 + $0x33a8] sm:$0xff]  ;;  %4362 = vmatpush.msra.mxu1 %v2163_v2  ;;  %4401 = vmatpush.msra.mxu3 %v584_v56  ;;  %v524_v2 = vld [vmem:[#allocation5 + $0xb10] sm:$0xff]  ;;  %v7546_v15 = vpop.f32.mrf.mxu0  ;;  %7934 = vst [vmem:[#allocation53_spill] sm:$0xff] %v7548_v14 }
 0x3d5   :  { %v2143_v17 = vld [vmem:[#allocation5 + $0x3da8] sm:$0xff]  ;;  %4343 = vmatpush.msra.mxu0 %v1823_v24  ;;  %4383 = vmatpush.msra.mxu2 %v224_v12  ;;  %7933 = vst [vmem:[#allocation52_spill] sm:$0xff] %v7546_v15  ;;  %v1444_v56 = vld [vmem:[#allocation5 + $0x27d0] sm:$0xff] }
 0x3d6   :  { %v1803_v5 = vld [vmem:[#allocation5 + $0x3308] sm:$0xff]  ;;  %4363 = vmatpush.msra.mxu1 %v2143_v17  ;;  %4402 = vmatpush.msra.mxu3 %v564_v43  ;;  %v1124_v17 = vld [vmem:[#allocation5 + $0x1dd0] sm:$0xff] }
 0x3d7   :  { %v2123_v7 = vld [vmem:[#allocation5 + $0x3d08] sm:$0xff]  ;;  %4344 = vmatpush.msra.mxu0 %v1803_v5  ;;  %4384 = vmatpush.msra.mxu2 %v204_v44  ;;  %v1764_v24 = vld [vmem:[#allocation5 + $0x31d0] sm:$0xff]  ;;  %v7550_v12 = vpop.f32.mrf.mxu3 }
 0x3d8   :  { %v1783_v34 = vld [vmem:[#allocation5 + $0x3268] sm:$0xff]  ;;  %4364 = vmatpush.msra.mxu1 %v2123_v7  ;;  %4403 = vmatpush.msra.mxu3 %v544_v59  ;;  %v504_v43 = vld [vmem:[#allocation5 + $0xa70] sm:$0xff]  ;;  %7935 = vst [vmem:[#allocation54_spill] sm:$0xff] %v7550_v12 }
 0x3d9   :  { %v2103_v11 = vld [vmem:[#allocation5 + $0x3c68] sm:$0xff]  ;;  %4345 = vmatpush.msra.mxu0 %v1783_v34  ;;  %4385 = vmatpush.msra.mxu2 %v184_v51  ;;  %v7552_v5 = vld [vmem:[#allocation2 + $0x28] sm:$0xff]  ;;  %v7555_v34 = vld [vmem:[#allocation2 + $0x30] sm:$0xff] }
 0x3da   :  { %4365 = vmatpush.msra.mxu1 %v2103_v11  ;;  %4404 = vmatpush.msra.mxu3 %v524_v2  ;;  %v1104_v7 = vld [vmem:[#allocation5 + $0x1d30] sm:$0xff]  ;;  %v7558_v14 = vpop.f32.mrf.mxu1  ;;  %v7586_v15 = vld [vmem:[#allocation2] sm:$0xff] }
 0x3db   :  { %4346 = vmatmul.f32.vlgmr.msra.gmra.mxu0 %v7552_v5  ;;  %4450 = vmatpush.msrb.mxu2 %v1764_v24  ;;  %v1744_v44 = vld [vmem:[#allocation5 + $0x3130] sm:$0xff]  ;;  %7936 = vst [vmem:[#allocation55_spill] sm:$0xff] %v7558_v14 }
 0x3dc   :  { %4430 = vmatpush.msrb.mxu1 %v1444_v56  ;;  %4410 = vmatpush.msrb.mxu0 %v1124_v17  ;;  %v2084_v59 = vld [vmem:[#allocation5 + $0x3bd0] sm:$0xff]  ;;  %v7560_v3 = vpop.f32.mrf.mxu0 }
 0x3dd   :  { %4405 = vmatpush.msra.mxu3 %v504_v43  ;;  %4366 = vmatmul.f32.vlgmr.msra.gmra.mxu1 %v7555_v34  ;;  %v1084_v11 = vld [vmem:[#allocation5 + $0x1c90] sm:$0xff]  ;;  %7937 = vst [vmem:[#allocation56_spill] sm:$0xff] %v7560_v3 }
 0x3de   :  { %v1404_v51 = vld [vmem:[#allocation5 + $0x2690] sm:$0xff]  ;;  %4411 = vmatpush.msrb.mxu0 %v1104_v7  ;;  %4431 = vmatpush.msrb.mxu1 %v1424_v20  ;;  %v7562_v7 = vpop.f32.mrf.mxu2 }
 0x3df   :  { %v1724_v2 = vld [vmem:[#allocation5 + $0x3090] sm:$0xff]  ;;  %4451 = vmatpush.msrb.mxu2 %v1744_v44  ;;  %4470 = vmatpush.msrb.mxu3 %v2084_v59  ;;  %7938 = vst [vmem:[#allocation57_spill] sm:$0xff] %v7562_v7  ;;  %v7564_v59 = vpop.f32.mrf.mxu3 }
 0x3e0   :  { %v2064_v12 = vld [vmem:[#allocation5 + $0x3b30] sm:$0xff]  ;;  %4412 = vmatpush.msrb.mxu0 %v1084_v11  ;;  %4432 = vmatpush.msrb.mxu1 %v1404_v51  ;;  %7939 = vst [vmem:[#allocation58_spill] sm:$0xff] %v7564_v59 }
 0x3e1   :  { %v1064_v56 = vld [vmem:[#allocation5 + $0x1bf0] sm:$0xff]  ;;  %4452 = vmatpush.msrb.mxu2 %v1724_v2  ;;  %4471 = vmatpush.msrb.mxu3 %v2064_v12 }
 0x3e2   :  { %v1704_v17 = vld [vmem:[#allocation5 + $0x2ff0] sm:$0xff]  ;;  %4413 = vmatpush.msrb.mxu0 %v1064_v56  ;;  %4433 = vmatpush.msrb.mxu1 %v1384_v47 }
 0x3e3   :  { %v2044_v24 = vld [vmem:[#allocation5 + $0x3a90] sm:$0xff]  ;;  %4453 = vmatpush.msrb.mxu2 %v1704_v17  ;;  %4406 = vmatmul.f32.vlgmr.msra.gmra.mxu3 %v7476_v49  ;;  %v425_v49 = vld [vmem:[#allocation5 + $0x7f8] sm:$0xff] }
 0x3e4   :  { %v1044_v43 = vld [vmem:[#allocation5 + $0x1b50] sm:$0xff]  ;;  %4472 = vmatpush.msrb.mxu3 %v2044_v24  ;;  %4434 = vmatpush.msrb.mxu1 %v1364_v22 }
 0x3e5   :  { %v1684_v20 = vld [vmem:[#allocation5 + $0x2f50] sm:$0xff]  ;;  %4414 = vmatpush.msrb.mxu0 %v1044_v43  ;;  %v7566_v43 = vpop.f32.mrf.mxu1  ;;  %4386 = vmatmul.f32.vlgmr.msra.gmra.mxu2 %v7586_v15 }
 0x3e6   :  { %v2024_v44 = vld [vmem:[#allocation5 + $0x39f0] sm:$0xff]  ;;  %4454 = vmatpush.msrb.mxu2 %v1684_v20  ;;  %7940 = vst [vmem:[#allocation59_spill] sm:$0xff] %v7566_v43 }
 0x3e7   :  { %v1024_v11 = vld [vmem:[#allocation5 + $0x1ab0] sm:$0xff]  ;;  %4473 = vmatpush.msrb.mxu3 %v2024_v44  ;;  %v7568_v44 = vpop.f32.mrf.mxu0 }
 0x3e8   :  { %v1344_v51 = vld [vmem:[#allocation5 + $0x24b0] sm:$0xff]  ;;  %4415 = vmatpush.msrb.mxu0 %v1024_v11  ;;  %7941 = vst [vmem:[#allocation60_spill] sm:$0xff] %v7568_v44  ;;  %v7570_v11 = vpop.f32.mrf.mxu2 }
 0x3e9   :  { %v1664_v2 = vld [vmem:[#allocation5 + $0x2eb0] sm:$0xff]  ;;  %4435 = vmatpush.msrb.mxu1 %v1344_v51  ;;  %7942 = vst [vmem:[#allocation61_spill] sm:$0xff] %v7570_v11 }
 0x3ea   :  { %v2004_v12 = vld [vmem:[#allocation5 + $0x3950] sm:$0xff]  ;;  %4455 = vmatpush.msrb.mxu2 %v1664_v2 }
 0x3eb   :  { %v1004_v14 = vld [vmem:[#allocation5 + $0x1a10] sm:$0xff]  ;;  %4474 = vmatpush.msrb.mxu3 %v2004_v12 }
 0x3ec   :  { %v1324_v3 = vld [vmem:[#allocation5 + $0x2410] sm:$0xff]  ;;  %4416 = vmatpush.msrb.mxu0 %v1004_v14 }
 0x3ed   :  { %v1644_v56 = vld [vmem:[#allocation5 + $0x2e10] sm:$0xff]  ;;  %4436 = vmatpush.msrb.mxu1 %v1324_v3  ;;  %v7574_v11 = vpop.f32.mrf.mxu1 }
 0x3ee   :  { %v1984_v47 = vld [vmem:[#allocation5 + $0x38b0] sm:$0xff]  ;;  %4456 = vmatpush.msrb.mxu2 %v1644_v56  ;;  %v7572_v56 = vpop.f32.mrf.mxu3  ;;  %7944 = vst [vmem:[#allocation63_spill] sm:$0xff] %v7574_v11 }
 0x3ef   :  { %v984_v7 = vld [vmem:[#allocation5 + $0x1970] sm:$0xff]  ;;  %4475 = vmatpush.msrb.mxu3 %v1984_v47  ;;  %7943 = vst [vmem:[#allocation62_spill] sm:$0xff] %v7572_v56  ;;  %v7576_v56 = vpop.f32.mrf.mxu0 }
 0x3f0   :  { %v1304_v59 = vld [vmem:[#allocation5 + $0x2370] sm:$0xff]  ;;  %4417 = vmatpush.msrb.mxu0 %v984_v7  ;;  %7945 = vst [vmem:[#allocation64_spill] sm:$0xff] %v7576_v56 }
 0x3f1   :  { %v1624_v17 = vld [vmem:[#allocation5 + $0x2d70] sm:$0xff]  ;;  %4437 = vmatpush.msrb.mxu1 %v1304_v59 }
 0x3f2   :  { %v1964_v24 = vld [vmem:[#allocation5 + $0x3810] sm:$0xff]  ;;  %4457 = vmatpush.msrb.mxu2 %v1624_v17 }
 0x3f3   :  { %v964_v22 = vld [vmem:[#allocation5 + $0x18d0] sm:$0xff]  ;;  %4476 = vmatpush.msrb.mxu3 %v1964_v24 }
 0x3f4   :  { %v1284_v20 = vld [vmem:[#allocation5 + $0x22d0] sm:$0xff]  ;;  %4418 = vmatpush.msrb.mxu0 %v964_v22 }
 0x3f5   :  { %v1604_v51 = vld [vmem:[#allocation5 + $0x2cd0] sm:$0xff]  ;;  %4438 = vmatpush.msrb.mxu1 %v1284_v20 }
 0x3f6   :  { %v1944_v2 = vld [vmem:[#allocation5 + $0x3770] sm:$0xff]  ;;  %4458 = vmatpush.msrb.mxu2 %v1604_v51 }
 0x3f7   :  { %v944_v14 = vld [vmem:[#allocation5 + $0x1830] sm:$0xff]  ;;  %4477 = vmatpush.msrb.mxu3 %v1944_v2 }
 0x3f8   :  { %v1264_v3 = vld [vmem:[#allocation5 + $0x2230] sm:$0xff]  ;;  %4419 = vmatpush.msrb.mxu0 %v944_v14  ;;  %v7578_v14 = vpop.f32.mrf.mxu2 }
 0x3f9   :  { %v1584_v12 = vld [vmem:[#allocation5 + $0x2c30] sm:$0xff]  ;;  %4439 = vmatpush.msrb.mxu1 %v1264_v3 }
 0x3fa   :  { %v1924_v43 = vld [vmem:[#allocation5 + $0x36d0] sm:$0xff]  ;;  %4459 = vmatpush.msrb.mxu2 %v1584_v12 }
 0x3fb   :  { %v924_v47 = vld [vmem:[#allocation5 + $0x1790] sm:$0xff]  ;;  %4478 = vmatpush.msrb.mxu3 %v1924_v43 }
 0x3fc   :  { %v1244_v44 = vld [vmem:[#allocation5 + $0x2190] sm:$0xff]  ;;  %4420 = vmatpush.msrb.mxu0 %v924_v47 }
 0x3fd   :  { %v1564_v7 = vld [vmem:[#allocation5 + $0x2b90] sm:$0xff]  ;;  %4440 = vmatpush.msrb.mxu1 %v1244_v44 }
 0x3fe   :  { %v1904_v59 = vld [vmem:[#allocation5 + $0x3630] sm:$0xff]  ;;  %4460 = vmatpush.msrb.mxu2 %v1564_v7  ;;  %v7580_v7 = vpop.f32.mrf.mxu3 }
 0x3ff   :  { %v904_v17 = vld [vmem:[#allocation5 + $0x16f0] sm:$0xff]  ;;  %4479 = vmatpush.msrb.mxu3 %v1904_v59 }
 0x400   :  { %v1224_v24 = vld [vmem:[#allocation5 + $0x20f0] sm:$0xff]  ;;  %4421 = vmatpush.msrb.mxu0 %v904_v17 }
 0x401   :  { %v1544_v22 = vld [vmem:[#allocation5 + $0x2af0] sm:$0xff]  ;;  %4441 = vmatpush.msrb.mxu1 %v1224_v24 }
 0x402   :  { %v1884_v20 = vld [vmem:[#allocation5 + $0x3590] sm:$0xff]  ;;  %4461 = vmatpush.msrb.mxu2 %v1544_v22 }
 0x403   :  { %v884_v51 = vld [vmem:[#allocation5 + $0x1650] sm:$0xff]  ;;  %4480 = vmatpush.msrb.mxu3 %v1884_v20 }
 0x404   :  { %v1204_v2 = vld [vmem:[#allocation5 + $0x2050] sm:$0xff]  ;;  %4422 = vmatpush.msrb.mxu0 %v884_v51 }
 0x405   :  { %v1524_v3 = vld [vmem:[#allocation5 + $0x2a50] sm:$0xff]  ;;  %4442 = vmatpush.msrb.mxu1 %v1204_v2  ;;  %v7582_v2 = vpop.f32.mrf.mxu1 }
 0x406   :  { %v1864_v43 = vld [vmem:[#allocation5 + $0x34f0] sm:$0xff]  ;;  %4462 = vmatpush.msrb.mxu2 %v1524_v3  ;;  %v7592_v18 = vpop.f32.mrf.mxu3 }
 0x407   :  { %v864_v12 = vld [vmem:[#allocation5 + $0x15b0] sm:$0xff]  ;;  %4481 = vmatpush.msrb.mxu3 %v1864_v43  ;;  %v7584_v43 = vpop.f32.mrf.mxu0  ;;  %7946 = vst [vmem:[#allocation65_spill] sm:$0xff] %v7592_v18 }
 0x408   :  { %v1184_v44 = vld [vmem:[#allocation5 + $0x1fb0] sm:$0xff]  ;;  %4423 = vmatpush.msrb.mxu0 %v864_v12  ;;  %v485_v12 = vld [vmem:[#allocation5 + $0x9d8] sm:$0xff] }
 0x409   :  { %v1504_v47 = vld [vmem:[#allocation5 + $0x29b0] sm:$0xff]  ;;  %4443 = vmatpush.msrb.mxu1 %v1184_v44  ;;  %v7589_v44 = vpop.f32.mrf.mxu2 }
 0x40a   :  { %v1844_v11 = vld [vmem:[#allocation5 + $0x3450] sm:$0xff]  ;;  %4463 = vmatpush.msrb.mxu2 %v1504_v47 }
 0x40b   :  { %v844_v59 = vld [vmem:[#allocation5 + $0x1510] sm:$0xff]  ;;  %4482 = vmatpush.msrb.mxu3 %v1844_v11  ;;  %v805_v11 = vld [vmem:[#allocation5 + $0x13d8] sm:$0xff] }
 0x40c   :  { %v1164_v56 = vld [vmem:[#allocation5 + $0x1f10] sm:$0xff]  ;;  %4424 = vmatpush.msrb.mxu0 %v844_v59  ;;  %v465_v59 = vld [vmem:[#allocation5 + $0x938] sm:$0xff] }
 0x40d   :  { %v1484_v17 = vld [vmem:[#allocation5 + $0x2910] sm:$0xff]  ;;  %4444 = vmatpush.msrb.mxu1 %v1164_v56 }
 0x40e   :  { %v1824_v24 = vld [vmem:[#allocation5 + $0x33b0] sm:$0xff]  ;;  %4464 = vmatpush.msrb.mxu2 %v1484_v17  ;;  %v785_v17 = vld [vmem:[#allocation5 + $0x1338] sm:$0xff] }
 0x40f   :  { %v824_v22 = vld [vmem:[#allocation5 + $0x1470] sm:$0xff]  ;;  %4483 = vmatpush.msrb.mxu3 %v1824_v24  ;;  %v1125_v24 = vld [vmem:[#allocation5 + $0x1dd8] sm:$0xff]  ;;  %v7596_v37 = vpop.f32.mrf.mxu0 }
 0x410   :  { %v1144_v20 = vld [vmem:[#allocation5 + $0x1e70] sm:$0xff]  ;;  %4425 = vmatpush.msrb.mxu0 %v824_v22  ;;  %v445_v22 = vld [vmem:[#allocation5 + $0x898] sm:$0xff]  ;;  %7947 = vst [vmem:[#allocation66_spill] sm:$0xff] %v7596_v37 }
 0x411   :  { %v1464_v51 = vld [vmem:[#allocation5 + $0x2870] sm:$0xff]  ;;  %4445 = vmatpush.msrb.mxu1 %v1144_v20  ;;  %v765_v20 = vld [vmem:[#allocation5 + $0x1298] sm:$0xff]  ;;  %4426 = vmatmul.f32.vlgmr.msrb.gmra.mxu0 %v7468_v1 }
 0x412   :  { %v1804_v35 = vld [vmem:[#allocation5 + $0x3310] sm:$0xff]  ;;  %4465 = vmatpush.msrb.mxu2 %v1464_v51  ;;  %v1105_v51 = vld [vmem:[#allocation5 + $0x1d38] sm:$0xff] }
 0x413   :  { %v2404_v3 = vld [vmem:[#allocation5 + $0x45d0] sm:$0xff]  ;;  %4484 = vmatpush.msrb.mxu3 %v1804_v35  ;;  %4510 = vmatpush.msra.mxu1 %v485_v12  ;;  %v745_v12 = vld [vmem:[#allocation5 + $0x11f8] sm:$0xff] }
 0x414   :  { %v1784_v56 = vld [vmem:[#allocation5 + $0x3270] sm:$0xff]  ;;  %4490 = vmatpush.msra.mxu0 %v2404_v3  ;;  %4530 = vmatpush.msra.mxu2 %v805_v11  ;;  %v7594_v3 = vpop.f32.mrf.mxu1  ;;  %v1085_v11 = vld [vmem:[#allocation5 + $0x1c98] sm:$0xff] }
 0x415   :  { %v2384_v47 = vld [vmem:[#allocation5 + $0x4530] sm:$0xff]  ;;  %4485 = vmatpush.msrb.mxu3 %v1784_v56  ;;  %4511 = vmatpush.msra.mxu1 %v465_v59  ;;  %v7598_v56 = vld [vmem:[#allocation2 + $0x20] sm:$0xff]  ;;  %v7601_v59 = vpop.f32.mrf.mxu2  ;;  %v685_v1 = vld [vmem:[#allocation5 + $0x1018] sm:$0xff] }
 0x416   :  { %4491 = vmatpush.msra.mxu0 %v2384_v47  ;;  %4531 = vmatpush.msra.mxu2 %v785_v17  ;;  %v2344_v35 = vld [vmem:[#allocation5 + $0x43f0] sm:$0xff]  ;;  %v405_v17 = vld [vmem:[#allocation5 + $0x758] sm:$0xff] }
 0x417   :  { %4550 = vmatpush.msra.mxu3 %v1125_v24  ;;  %4512 = vmatpush.msra.mxu1 %v445_v22  ;;  %v2324_v47 = vld [vmem:[#allocation5 + $0x4350] sm:$0xff]  ;;  %v1065_v24 = vld [vmem:[#allocation5 + $0x1bf8] sm:$0xff] }
 0x418   :  { %4492 = vmatpush.msra.mxu0 %v2364_v10  ;;  %4532 = vmatpush.msra.mxu2 %v765_v20  ;;  %v725_v10 = vld [vmem:[#allocation5 + $0x1158] sm:$0xff]  ;;  %v2304_v22 = vld [vmem:[#allocation5 + $0x42b0] sm:$0xff] }
 0x419   :  { %4551 = vmatpush.msra.mxu3 %v1105_v51  ;;  %4466 = vmatmul.f32.vlgmr.msrb.gmra.mxu2 %v7598_v56  ;;  %v385_v20 = vld [vmem:[#allocation5 + $0x6b8] sm:$0xff]  ;;  %v7605_v51 = vpop.f32.mrf.mxu3 }
 0x41a   :  { %4493 = vmatpush.msra.mxu0 %v2344_v35  ;;  %4513 = vmatpush.msra.mxu1 %v425_v49  ;;  %v705_v35 = vld [vmem:[#allocation5 + $0x10b8] sm:$0xff]  ;;  %v7607_v49 = vld [vmem:[#allocation2 + $0x18] sm:$0xff] }
 0x41b   :  { %4533 = vmatpush.msra.mxu2 %v745_v12  ;;  %4552 = vmatpush.msra.mxu3 %v1085_v11  ;;  %v2284_v12 = vld [vmem:[#allocation5 + $0x4210] sm:$0xff]  ;;  %v365_v11 = vld [vmem:[#allocation5 + $0x618] sm:$0xff] }
 0x41c   :  { %4486 = vmatmul.f32.vlgmr.msrb.gmra.mxu3 %v7552_v5  ;;  %4494 = vmatpush.msra.mxu0 %v2324_v47  ;;  %v7610_v47 = vpop.f32.mrf.mxu0  ;;  %v325_v37 = vld [vmem:[#allocation5 + $0x4d8] sm:$0xff] }
 0x41d   :  { %4514 = vmatpush.msra.mxu1 %v405_v17  ;;  %4534 = vmatpush.msra.mxu2 %v725_v10  ;;  %v345_v17 = vld [vmem:[#allocation5 + $0x578] sm:$0xff]  ;;  %v7612_v10 = vpop.f32.mrf.mxu1  ;;  %v7614_v38 = vpop.f32.mrf.mxu2 }
 0x41e   :  { %4553 = vmatpush.msra.mxu3 %v1065_v24  ;;  %4446 = vmatmul.f32.vlgmr.msrb.gmra.mxu1 %v7607_v49  ;;  %v665_v24 = vld [vmem:[#allocation5 + $0xf78] sm:$0xff]  ;;  %7948 = vst [vmem:[#allocation67_spill] sm:$0xff] %v7614_v38 }
 0x41f   :  { %4495 = vmatpush.msra.mxu0 %v2304_v22  ;;  %4515 = vmatpush.msra.mxu1 %v385_v20  ;;  %v645_v22 = vld [vmem:[#allocation5 + $0xed8] sm:$0xff] }
 0x420   :  { %4535 = vmatpush.msra.mxu2 %v705_v35  ;;  %4554 = vmatpush.msra.mxu3 %v1045_v57  ;;  %v985_v20 = vld [vmem:[#allocation5 + $0x1978] sm:$0xff]  ;;  %v2224_v57 = vld [vmem:[#allocation5 + $0x4030] sm:$0xff] }
 0x421   :  { %4496 = vmatpush.msra.mxu0 %v2284_v12  ;;  %4516 = vmatpush.msra.mxu1 %v365_v11  ;;  %v305_v35 = vld [vmem:[#allocation5 + $0x438] sm:$0xff]  ;;  %v7616_v61 = vpop.f32.mrf.mxu3 }
 0x422   :  { %4536 = vmatpush.msra.mxu2 %v685_v1  ;;  %4555 = vmatpush.msra.mxu3 %v1025_v8  ;;  %v625_v12 = vld [vmem:[#allocation5 + $0xe38] sm:$0xff]  ;;  %v2204_v1 = vld [vmem:[#allocation5 + $0x3f90] sm:$0xff]  ;;  %7949 = vst [vmem:[#allocation68_spill] sm:$0xff] %v7616_v61 }
 0x423   :  { %4497 = vmatpush.msra.mxu0 %v2264_v30  ;;  %4517 = vmatpush.msra.mxu1 %v345_v17  ;;  %v965_v11 = vld [vmem:[#allocation5 + $0x18d8] sm:$0xff] }
 0x424   :  { %4537 = vmatpush.msra.mxu2 %v665_v24  ;;  %4556 = vmatpush.msra.mxu3 %v1005_v16  ;;  %v285_v8 = vld [vmem:[#allocation5 + $0x398] sm:$0xff]  ;;  %v2184_v24 = vld [vmem:[#allocation5 + $0x3ef0] sm:$0xff]  ;;  %v4107_v6 = vpop.f32.mrf.mxu0 }
 0x425   :  { %4498 = vmatpush.msra.mxu0 %v2244_v50  ;;  %4518 = vmatpush.msra.mxu1 %v325_v37  ;;  %v605_v30 = vld [vmem:[#allocation5 + $0xd98] sm:$0xff]  ;;  %v4127_v18 = vpop.f32.mrf.mxu1  ;;  %v4147_v61 = vpop.f32.mrf.mxu2 }
 0x426   :  { %4538 = vmatpush.msra.mxu2 %v645_v22  ;;  %4557 = vmatpush.msra.mxu3 %v985_v20  ;;  %v945_v17 = vld [vmem:[#allocation5 + $0x1838] sm:$0xff]  ;;  %v2164_v22 = vld [vmem:[#allocation5 + $0x3e50] sm:$0xff]  ;;  %v4128_v36 = vadd.f32 %v4127_v18, %v4107_v6 }
 0x427   :  { %4499 = vmatpush.msra.mxu0 %v2224_v57  ;;  %4519 = vmatpush.msra.mxu1 %v305_v35  ;;  %v265_v16 = vld [vmem:[#allocation5 + $0x2f8] sm:$0xff] }
 0x428   :  { %4539 = vmatpush.msra.mxu2 %v625_v12  ;;  %4558 = vmatpush.msra.mxu3 %v965_v11  ;;  %v585_v37 = vld [vmem:[#allocation5 + $0xcf8] sm:$0xff]  ;;  %v2144_v12 = vld [vmem:[#allocation5 + $0x3db0] sm:$0xff]  ;;  %v4148_v38 = vadd.f32 %v4147_v61, %v4128_v36 }
 0x429   :  { %4500 = vmatpush.msra.mxu0 %v2204_v1  ;;  %4520 = vmatpush.msra.mxu1 %v285_v8  ;;  %v925_v50 = vld [vmem:[#allocation5 + $0x1798] sm:$0xff] }
 0x42a   :  { %4540 = vmatpush.msra.mxu2 %v605_v30  ;;  %4559 = vmatpush.msra.mxu3 %v945_v17  ;;  %v245_v20 = vld [vmem:[#allocation5 + $0x258] sm:$0xff]  ;;  %v2124_v30 = vld [vmem:[#allocation5 + $0x3d10] sm:$0xff] }
 0x42b   :  { %4501 = vmatpush.msra.mxu0 %v2184_v24  ;;  %4521 = vmatpush.msra.mxu1 %v265_v16  ;;  %v565_v57 = vld [vmem:[#allocation5 + $0xc58] sm:$0xff]  ;;  %v4167_v24 = vpop.f32.mrf.mxu3  ;;  %v2104_v16 = vld [vmem:[#allocation5 + $0x3c70] sm:$0xff] }
 0x42c   :  { %v905_v35 = vld [vmem:[#allocation5 + $0x16f8] sm:$0xff]  ;;  %4541 = vmatpush.msra.mxu2 %v585_v37  ;;  %4560 = vmatpush.msra.mxu3 %v925_v50  ;;  %v4168_v50 = vadd.f32 %v4167_v24, %v4148_v38  ;;  %v4187_v61 = vpop.f32.mrf.mxu0 }
 0x42d   :  { %v225_v11 = vld [vmem:[#allocation5 + $0x1b8] sm:$0xff]  ;;  %4502 = vmatpush.msra.mxu0 %v2164_v22  ;;  %4522 = vmatpush.msra.mxu1 %v245_v20  ;;  %v4227_v24 = vpop.f32.mrf.mxu2 }
 0x42e   :  { %v545_v1 = vld [vmem:[#allocation5 + $0xbb8] sm:$0xff]  ;;  %4542 = vmatpush.msra.mxu2 %v565_v57  ;;  %4561 = vmatpush.msra.mxu3 %v905_v35 }
 0x42f   :  { %v885_v8 = vld [vmem:[#allocation5 + $0x1658] sm:$0xff]  ;;  %4503 = vmatpush.msra.mxu0 %v2144_v12  ;;  %4523 = vmatpush.msra.mxu1 %v225_v11  ;;  %v4188_v12 = vadd.f32 %v4187_v61, %v4168_v50 }
 0x430   :  { %v205_v17 = vld [vmem:[#allocation5 + $0x118] sm:$0xff]  ;;  %4543 = vmatpush.msra.mxu2 %v545_v1  ;;  %4562 = vmatpush.msra.mxu3 %v885_v8 }
 0x431   :  { %v525_v6 = vld [vmem:[#allocation5 + $0xb18] sm:$0xff]  ;;  %4504 = vmatpush.msra.mxu0 %v2124_v30  ;;  %4524 = vmatpush.msra.mxu1 %v205_v17  ;;  %v4207_v30 = vpop.f32.mrf.mxu1 }
 0x432   :  { %v865_v18 = vld [vmem:[#allocation5 + $0x15b8] sm:$0xff]  ;;  %4544 = vmatpush.msra.mxu2 %v525_v6 }
 0x433   :  { %v185_v37 = vld [vmem:[#allocation5 + $0x78] sm:$0xff]  ;;  %4563 = vmatpush.msra.mxu3 %v865_v18  ;;  %4505 = vmatpush.msra.mxu0 %v2104_v16  ;;  %v4208_v18 = vadd.f32 %v4207_v30, %v4188_v12 }
 0x434   :  { %v505_v22 = vld [vmem:[#allocation5 + $0xa78] sm:$0xff]  ;;  %4525 = vmatpush.msra.mxu1 %v185_v37  ;;  %4506 = vmatmul.f32.vlgmr.msra.gmra.mxu0 %v7555_v34 }
 0x435   :  { %v845_v20 = vld [vmem:[#allocation5 + $0x1518] sm:$0xff]  ;;  %4545 = vmatpush.msra.mxu2 %v505_v22  ;;  %4526 = vmatmul.f32.vlgmr.msra.gmra.mxu1 %v7586_v15  ;;  %v466_v15 = vld [vmem:[#allocation5 + $0x940] sm:$0xff] }
 0x436   :  { %v1765_v36 = vld [vmem:[#allocation5 + $0x31d8] sm:$0xff]  ;;  %4564 = vmatpush.msra.mxu3 %v845_v20  ;;  %v7619_v20 = vadd.f32 %v4227_v24, %v4208_v18 }
 0x437   :  { %v1445_v57 = vld [vmem:[#allocation5 + $0x27d8] sm:$0xff]  ;;  %4590 = vmatpush.msrb.mxu1 %v1765_v36 }
 0x438   :  { %v2085_v35 = vld [vmem:[#allocation5 + $0x3bd8] sm:$0xff]  ;;  %4570 = vmatpush.msrb.mxu0 %v1445_v57  ;;  %7950 = vst [vmem:[#allocation69_spill] sm:$0xff] %v7619_v20 }
 0x439   :  { %v825_v11 = vld [vmem:[#allocation5 + $0x1478] sm:$0xff]  ;;  %4610 = vmatpush.msrb.mxu2 %v2085_v35 }
 0x43a   :  { %v1745_v1 = vld [vmem:[#allocation5 + $0x3138] sm:$0xff]  ;;  %4565 = vmatpush.msra.mxu3 %v825_v11 }
 0x43b   :  { %v1425_v38 = vld [vmem:[#allocation5 + $0x2738] sm:$0xff]  ;;  %4591 = vmatpush.msrb.mxu1 %v1745_v1 }
 0x43c   :  { %v2065_v8 = vld [vmem:[#allocation5 + $0x3b38] sm:$0xff]  ;;  %4571 = vmatpush.msrb.mxu0 %v1425_v38 }
 0x43d   :  { %v2405_v17 = vld [vmem:[#allocation5 + $0x45d8] sm:$0xff]  ;;  %4611 = vmatpush.msrb.mxu2 %v2065_v8 }
 0x43e   :  { %v1725_v6 = vld [vmem:[#allocation5 + $0x3098] sm:$0xff]  ;;  %4630 = vmatpush.msrb.mxu3 %v2405_v17 }
 0x43f   :  { %v1405_v16 = vld [vmem:[#allocation5 + $0x2698] sm:$0xff]  ;;  %4592 = vmatpush.msrb.mxu1 %v1725_v6 }
 0x440   :  { %v2045_v37 = vld [vmem:[#allocation5 + $0x3a98] sm:$0xff]  ;;  %4572 = vmatpush.msrb.mxu0 %v1405_v16 }
 0x441   :  { %v2385_v50 = vld [vmem:[#allocation5 + $0x4538] sm:$0xff]  ;;  %4612 = vmatpush.msrb.mxu2 %v2045_v37 }
 0x442   :  { %v1705_v22 = vld [vmem:[#allocation5 + $0x2ff8] sm:$0xff]  ;;  %4631 = vmatpush.msrb.mxu3 %v2385_v50 }
 0x443   :  { %v1385_v36 = vld [vmem:[#allocation5 + $0x25f8] sm:$0xff]  ;;  %4593 = vmatpush.msrb.mxu1 %v1705_v22 }
 0x444   :  { %v2025_v61 = vld [vmem:[#allocation5 + $0x39f8] sm:$0xff]  ;;  %4573 = vmatpush.msrb.mxu0 %v1385_v36 }
 0x445   :  { %v2365_v57 = vld [vmem:[#allocation5 + $0x4498] sm:$0xff]  ;;  %4613 = vmatpush.msrb.mxu2 %v2025_v61 }
 0x446   :  { %v1685_v35 = vld [vmem:[#allocation5 + $0x2f58] sm:$0xff]  ;;  %4632 = vmatpush.msrb.mxu3 %v2365_v57 }
 0x447   :  { %v1365_v12 = vld [vmem:[#allocation5 + $0x2558] sm:$0xff]  ;;  %4594 = vmatpush.msrb.mxu1 %v1685_v35 }
 0x448   :  { %v2005_v11 = vld [vmem:[#allocation5 + $0x3958] sm:$0xff]  ;;  %4574 = vmatpush.msrb.mxu0 %v1365_v12 }
 0x449   :  { %v2345_v1 = vld [vmem:[#allocation5 + $0x43f8] sm:$0xff]  ;;  %4614 = vmatpush.msrb.mxu2 %v2005_v11 }
 0x44a   :  { %v1665_v38 = vld [vmem:[#allocation5 + $0x2eb8] sm:$0xff]  ;;  %4633 = vmatpush.msrb.mxu3 %v2345_v1 }
 0x44b   :  { %v1345_v8 = vld [vmem:[#allocation5 + $0x24b8] sm:$0xff]  ;;  %4595 = vmatpush.msrb.mxu1 %v1665_v38 }
 0x44c   :  { %v1985_v30 = vld [vmem:[#allocation5 + $0x38b8] sm:$0xff]  ;;  %4575 = vmatpush.msrb.mxu0 %v1345_v8 }
 0x44d   :  { %v2325_v17 = vld [vmem:[#allocation5 + $0x4358] sm:$0xff]  ;;  %4615 = vmatpush.msrb.mxu2 %v1985_v30 }
 0x44e   :  { %v1645_v6 = vld [vmem:[#allocation5 + $0x2e18] sm:$0xff]  ;;  %4634 = vmatpush.msrb.mxu3 %v2325_v17 }
 0x44f   :  { %v1325_v18 = vld [vmem:[#allocation5 + $0x2418] sm:$0xff]  ;;  %4596 = vmatpush.msrb.mxu1 %v1645_v6 }
 0x450   :  { %v1965_v24 = vld [vmem:[#allocation5 + $0x3818] sm:$0xff]  ;;  %4576 = vmatpush.msrb.mxu0 %v1325_v18 }
 0x451   :  { %v2305_v16 = vld [vmem:[#allocation5 + $0x42b8] sm:$0xff]  ;;  %4616 = vmatpush.msrb.mxu2 %v1965_v24 }
 0x452   :  { %v1625_v37 = vld [vmem:[#allocation5 + $0x2d78] sm:$0xff]  ;;  %4635 = vmatpush.msrb.mxu3 %v2305_v16 }
 0x453   :  { %v1305_v50 = vld [vmem:[#allocation5 + $0x2378] sm:$0xff]  ;;  %4597 = vmatpush.msrb.mxu1 %v1625_v37 }
 0x454   :  { %v1945_v22 = vld [vmem:[#allocation5 + $0x3778] sm:$0xff]  ;;  %4577 = vmatpush.msrb.mxu0 %v1305_v50 }
 0x455   :  { %v2285_v36 = vld [vmem:[#allocation5 + $0x4218] sm:$0xff]  ;;  %4617 = vmatpush.msrb.mxu2 %v1945_v22 }
 0x456   :  { %v1605_v61 = vld [vmem:[#allocation5 + $0x2cd8] sm:$0xff]  ;;  %4636 = vmatpush.msrb.mxu3 %v2285_v36 }
 0x457   :  { %v1285_v57 = vld [vmem:[#allocation5 + $0x22d8] sm:$0xff]  ;;  %4598 = vmatpush.msrb.mxu1 %v1605_v61 }
 0x458   :  { %v1925_v35 = vld [vmem:[#allocation5 + $0x36d8] sm:$0xff]  ;;  %4578 = vmatpush.msrb.mxu0 %v1285_v57 }
 0x459   :  { %v2265_v12 = vld [vmem:[#allocation5 + $0x4178] sm:$0xff]  ;;  %4618 = vmatpush.msrb.mxu2 %v1925_v35  ;;  %v7621_v35 = vld [vmem:[#allocation2 + $0x8] sm:$0xff] }
 0x45a   :  { %v1585_v11 = vld [vmem:[#allocation5 + $0x2c38] sm:$0xff]  ;;  %4637 = vmatpush.msrb.mxu3 %v2265_v12  ;;  %4546 = vmatmul.f32.vlgmr.msra.gmra.mxu2 %v7621_v35 }
 0x45b   :  { %v1265_v1 = vld [vmem:[#allocation5 + $0x2238] sm:$0xff]  ;;  %4599 = vmatpush.msrb.mxu1 %v1585_v11 }
 0x45c   :  { %v1905_v38 = vld [vmem:[#allocation5 + $0x3638] sm:$0xff]  ;;  %4579 = vmatpush.msrb.mxu0 %v1265_v1 }
 0x45d   :  { %v2245_v8 = vld [vmem:[#allocation5 + $0x40d8] sm:$0xff]  ;;  %4619 = vmatpush.msrb.mxu2 %v1905_v38 }
 0x45e   :  { %v1565_v30 = vld [vmem:[#allocation5 + $0x2b98] sm:$0xff]  ;;  %4638 = vmatpush.msrb.mxu3 %v2245_v8 }
 0x45f   :  { %v1245_v17 = vld [vmem:[#allocation5 + $0x2198] sm:$0xff]  ;;  %4600 = vmatpush.msrb.mxu1 %v1565_v30 }
 0x460   :  { %v1885_v6 = vld [vmem:[#allocation5 + $0x3598] sm:$0xff]  ;;  %4580 = vmatpush.msrb.mxu0 %v1245_v17 }
 0x461   :  { %v2225_v18 = vld [vmem:[#allocation5 + $0x4038] sm:$0xff]  ;;  %4620 = vmatpush.msrb.mxu2 %v1885_v6 }
 0x462   :  { %v1545_v24 = vld [vmem:[#allocation5 + $0x2af8] sm:$0xff]  ;;  %4639 = vmatpush.msrb.mxu3 %v2225_v18 }
 0x463   :  { %v1225_v16 = vld [vmem:[#allocation5 + $0x20f8] sm:$0xff]  ;;  %4601 = vmatpush.msrb.mxu1 %v1545_v24 }
 0x464   :  { %v1865_v37 = vld [vmem:[#allocation5 + $0x34f8] sm:$0xff]  ;;  %4581 = vmatpush.msrb.mxu0 %v1225_v16 }
 0x465   :  { %v2205_v50 = vld [vmem:[#allocation5 + $0x3f98] sm:$0xff]  ;;  %4621 = vmatpush.msrb.mxu2 %v1865_v37  ;;  %v4247_v37 = vpop.f32.mrf.mxu3 }
 0x466   :  { %v1205_v22 = vld [vmem:[#allocation5 + $0x2058] sm:$0xff]  ;;  %4640 = vmatpush.msrb.mxu3 %v2205_v50 }
 0x467   :  { %v1525_v36 = vld [vmem:[#allocation5 + $0x2a58] sm:$0xff]  ;;  %4582 = vmatpush.msrb.mxu0 %v1205_v22 }
 0x468   :  { %v1845_v61 = vld [vmem:[#allocation5 + $0x3458] sm:$0xff]  ;;  %4602 = vmatpush.msrb.mxu1 %v1525_v36  ;;  %v486_v36 = vld [vmem:[#allocation5 + $0x9e0] sm:$0xff] }
 0x469   :  { %v2185_v57 = vld [vmem:[#allocation5 + $0x3ef8] sm:$0xff]  ;;  %4622 = vmatpush.msrb.mxu2 %v1845_v61  ;;  %v4267_v61 = vpop.f32.mrf.mxu0 }
 0x46a   :  { %v1185_v12 = vld [vmem:[#allocation5 + $0x1fb8] sm:$0xff]  ;;  %4641 = vmatpush.msrb.mxu3 %v2185_v57  ;;  %v806_v57 = vld [vmem:[#allocation5 + $0x13e0] sm:$0xff] }
 0x46b   :  { %v1505_v11 = vld [vmem:[#allocation5 + $0x29b8] sm:$0xff]  ;;  %4583 = vmatpush.msrb.mxu0 %v1185_v12  ;;  %v1126_v12 = vld [vmem:[#allocation5 + $0x1de0] sm:$0xff] }
 0x46c   :  { %v1825_v1 = vld [vmem:[#allocation5 + $0x33b8] sm:$0xff]  ;;  %4603 = vmatpush.msrb.mxu1 %v1505_v11  ;;  %v4268_v11 = vadd.f32 %v4267_v61, %v4247_v37  ;;  %v766_v37 = vld [vmem:[#allocation5 + $0x12a0] sm:$0xff] }
 0x46d   :  { %v2165_v38 = vld [vmem:[#allocation5 + $0x3e58] sm:$0xff]  ;;  %4623 = vmatpush.msrb.mxu2 %v1825_v1  ;;  %v426_v61 = vld [vmem:[#allocation5 + $0x800] sm:$0xff] }
 0x46e   :  { %v7624_v8 = vld [vmem:[#allocation2 + $0x10] sm:$0xff]  ;;  %4642 = vmatpush.msrb.mxu3 %v2165_v38  ;;  %v4287_v38 = vpop.f32.mrf.mxu1 }
 0x46f   :  { %4566 = vmatmul.f32.vlgmr.msra.gmra.mxu3 %v7624_v8  ;;  %v1165_v30 = vld [vmem:[#allocation5 + $0x1f18] sm:$0xff] }
 0x470   :  { %v1485_v17 = vld [vmem:[#allocation5 + $0x2918] sm:$0xff]  ;;  %4584 = vmatpush.msrb.mxu0 %v1165_v30  ;;  %v786_v30 = vld [vmem:[#allocation5 + $0x1340] sm:$0xff] }
 0x471   :  { %v1805_v6 = vld [vmem:[#allocation5 + $0x3318] sm:$0xff]  ;;  %4604 = vmatpush.msrb.mxu1 %v1485_v17  ;;  %v1106_v17 = vld [vmem:[#allocation5 + $0x1d40] sm:$0xff] }
 0x472   :  { %v2145_v18 = vld [vmem:[#allocation5 + $0x3db8] sm:$0xff]  ;;  %4624 = vmatpush.msrb.mxu2 %v1805_v6  ;;  %v4288_v6 = vadd.f32 %v4287_v38, %v4268_v11  ;;  %v1066_v11 = vld [vmem:[#allocation5 + $0x1c00] sm:$0xff] }
 0x473   :  { %v1145_v24 = vld [vmem:[#allocation5 + $0x1e78] sm:$0xff]  ;;  %4643 = vmatpush.msrb.mxu3 %v2145_v18  ;;  %v4307_v18 = vpop.f32.mrf.mxu2  ;;  %v1046_v38 = vld [vmem:[#allocation5 + $0x1b60] sm:$0xff] }
 0x474   :  { %v1465_v16 = vld [vmem:[#allocation5 + $0x2878] sm:$0xff]  ;;  %4585 = vmatpush.msrb.mxu0 %v1145_v24  ;;  %v1446_v24 = vld [vmem:[#allocation5 + $0x27e0] sm:$0xff] }
 0x475   :  { %v1785_v50 = vld [vmem:[#allocation5 + $0x3278] sm:$0xff]  ;;  %4605 = vmatpush.msrb.mxu1 %v1465_v16  ;;  %4586 = vmatmul.f32.vlgmr.msrb.gmra.mxu0 %v7607_v49  ;;  %v446_v16 = vld [vmem:[#allocation5 + $0x8a0] sm:$0xff] }
 0x476   :  { %v2125_v22 = vld [vmem:[#allocation5 + $0x3d18] sm:$0xff]  ;;  %4625 = vmatpush.msrb.mxu2 %v1785_v50  ;;  %4650 = vmatpush.msra.mxu0 %v486_v36  ;;  %v4308_v50 = vadd.f32 %v4307_v18, %v4288_v6  ;;  %v4327_v36 = vpop.f32.mrf.mxu3  ;;  %v1026_v6 = vld [vmem:[#allocation5 + $0x1ac0] sm:$0xff] }
 0x477   :  { %4644 = vmatpush.msrb.mxu3 %v2125_v22  ;;  %v2105_v1 = vld [vmem:[#allocation5 + $0x3c78] sm:$0xff]  ;;  %4626 = vmatmul.f32.vlgmr.msrb.gmra.mxu2 %v7552_v5  ;;  %v1086_v5 = vld [vmem:[#allocation5 + $0x1ca0] sm:$0xff] }
 0x478   :  { %4670 = vmatpush.msra.mxu1 %v806_v57  ;;  %4690 = vmatpush.msra.mxu2 %v1126_v12  ;;  %v1426_v22 = vld [vmem:[#allocation5 + $0x2740] sm:$0xff]  ;;  %v7632_v12 = vadd.f32 %v4327_v36, %v4308_v50  ;;  %v1489_v20 = vld [vmem:[#allocation5 + $0x2938] sm:$0xff] }
 0x479   :  { %4645 = vmatpush.msrb.mxu3 %v2105_v1  ;;  %4651 = vmatpush.msra.mxu0 %v466_v15  ;;  %v746_v57 = vld [vmem:[#allocation5 + $0x1200] sm:$0xff] }
 0x47a   :  { %4646 = vmatmul.f32.vlgmr.msrb.gmra.mxu3 %v7555_v34  ;;  %4671 = vmatpush.msra.mxu1 %v786_v30  ;;  %v1406_v34 = vld [vmem:[#allocation5 + $0x26a0] sm:$0xff] }
 0x47b   :  { %4691 = vmatpush.msra.mxu2 %v1106_v17  ;;  %4710 = vmatpush.msra.mxu3 %v1446_v24  ;;  %v406_v1 = vld [vmem:[#allocation5 + $0x760] sm:$0xff] }
 0x47c   :  { %4606 = vmatmul.f32.vlgmr.msrb.gmra.mxu1 %v7598_v56  ;;  %4652 = vmatpush.msra.mxu0 %v446_v16  ;;  %v726_v15 = vld [vmem:[#allocation5 + $0x1160] sm:$0xff] }
 0x47d   :  { %4672 = vmatpush.msra.mxu1 %v766_v37  ;;  %4692 = vmatpush.msra.mxu2 %v1086_v5  ;;  %v1386_v30 = vld [vmem:[#allocation5 + $0x2600] sm:$0xff] }
 0x47e   :  { %4711 = vmatpush.msra.mxu3 %v1426_v22  ;;  %4653 = vmatpush.msra.mxu0 %v426_v61  ;;  %v386_v17 = vld [vmem:[#allocation5 + $0x6c0] sm:$0xff] }
 0x47f   :  { %4673 = vmatpush.msra.mxu1 %v746_v57  ;;  %4693 = vmatpush.msra.mxu2 %v1066_v11  ;;  %v706_v56 = vld [vmem:[#allocation5 + $0x10c0] sm:$0xff] }
 0x480   :  { %4712 = vmatpush.msra.mxu3 %v1406_v34  ;;  %4654 = vmatpush.msra.mxu0 %v406_v1  ;;  %v1366_v18 = vld [vmem:[#allocation5 + $0x2560] sm:$0xff] }
 0x481   :  { %4674 = vmatpush.msra.mxu1 %v726_v15  ;;  %4694 = vmatpush.msra.mxu2 %v1046_v38  ;;  %v366_v24 = vld [vmem:[#allocation5 + $0x620] sm:$0xff] }
 0x482   :  { %4713 = vmatpush.msra.mxu3 %v1386_v30  ;;  %v686_v16 = vld [vmem:[#allocation5 + $0x1020] sm:$0xff]  ;;  %4655 = vmatpush.msra.mxu0 %v386_v17 }
 0x483   :  { %4675 = vmatpush.msra.mxu1 %v706_v56  ;;  %v1006_v37 = vld [vmem:[#allocation5 + $0x1a20] sm:$0xff]  ;;  %4695 = vmatpush.msra.mxu2 %v1026_v6 }
 0x484   :  { %v1346_v50 = vld [vmem:[#allocation5 + $0x24c0] sm:$0xff]  ;;  %4714 = vmatpush.msra.mxu3 %v1366_v18  ;;  %4656 = vmatpush.msra.mxu0 %v366_v24 }
 0x485   :  { %v346_v5 = vld [vmem:[#allocation5 + $0x580] sm:$0xff]  ;;  %4676 = vmatpush.msra.mxu1 %v686_v16  ;;  %4696 = vmatpush.msra.mxu2 %v1006_v37 }
 0x486   :  { %v666_v22 = vld [vmem:[#allocation5 + $0xf80] sm:$0xff]  ;;  %4715 = vmatpush.msra.mxu3 %v1346_v50  ;;  %4657 = vmatpush.msra.mxu0 %v346_v5 }
 0x487   :  { %v986_v36 = vld [vmem:[#allocation5 + $0x1980] sm:$0xff]  ;;  %4677 = vmatpush.msra.mxu1 %v666_v22 }
 0x488   :  { %v1326_v61 = vld [vmem:[#allocation5 + $0x2420] sm:$0xff]  ;;  %4697 = vmatpush.msra.mxu2 %v986_v36 }
 0x489   :  { %v326_v57 = vld [vmem:[#allocation5 + $0x4e0] sm:$0xff]  ;;  %4716 = vmatpush.msra.mxu3 %v1326_v61  ;;  %v4347_v61 = vpop.f32.mrf.mxu0 }
 0x48a   :  { %v646_v11 = vld [vmem:[#allocation5 + $0xee0] sm:$0xff]  ;;  %4658 = vmatpush.msra.mxu0 %v326_v57 }
 0x48b   :  { %v966_v34 = vld [vmem:[#allocation5 + $0x18e0] sm:$0xff]  ;;  %4678 = vmatpush.msra.mxu1 %v646_v11 }
 0x48c   :  { %v1306_v1 = vld [vmem:[#allocation5 + $0x2380] sm:$0xff]  ;;  %4698 = vmatpush.msra.mxu2 %v966_v34  ;;  %v4348_v34 = vadd.f32 %v4347_v61, %v7632_v12 }
 0x48d   :  { %v306_v15 = vld [vmem:[#allocation5 + $0x440] sm:$0xff]  ;;  %4717 = vmatpush.msra.mxu3 %v1306_v1 }
 0x48e   :  { %v626_v38 = vld [vmem:[#allocation5 + $0xe40] sm:$0xff]  ;;  %4659 = vmatpush.msra.mxu0 %v306_v15 }
 0x48f   :  { %v946_v30 = vld [vmem:[#allocation5 + $0x1840] sm:$0xff]  ;;  %4679 = vmatpush.msra.mxu1 %v626_v38  ;;  %v4367_v38 = vpop.f32.mrf.mxu1 }
 0x490   :  { %v1286_v17 = vld [vmem:[#allocation5 + $0x22e0] sm:$0xff]  ;;  %4699 = vmatpush.msra.mxu2 %v946_v30 }
 0x491   :  { %v286_v56 = vld [vmem:[#allocation5 + $0x3a0] sm:$0xff]  ;;  %4718 = vmatpush.msra.mxu3 %v1286_v17 }
 0x492   :  { %v606_v6 = vld [vmem:[#allocation5 + $0xda0] sm:$0xff]  ;;  %4660 = vmatpush.msra.mxu0 %v286_v56  ;;  %v7635_v56 = vadd.f32 %v4367_v38, %v4348_v34 }
 0x493   :  { %v926_v18 = vld [vmem:[#allocation5 + $0x17a0] sm:$0xff]  ;;  %4680 = vmatpush.msra.mxu1 %v606_v6 }
 0x494   :  { %v1266_v24 = vld [vmem:[#allocation5 + $0x2240] sm:$0xff]  ;;  %4700 = vmatpush.msra.mxu2 %v926_v18  ;;  %7951 = vst [vmem:[#allocation70_spill] sm:$0xff] %v7635_v56  ;;  %v1027_v56 = vld [vmem:[#allocation5 + $0x1ac8] sm:$0xff] }
 0x495   :  { %v266_v16 = vld [vmem:[#allocation5 + $0x300] sm:$0xff]  ;;  %4719 = vmatpush.msra.mxu3 %v1266_v24 }
 0x496   :  { %v586_v37 = vld [vmem:[#allocation5 + $0xd00] sm:$0xff]  ;;  %4661 = vmatpush.msra.mxu0 %v266_v16 }
 0x497   :  { %v906_v50 = vld [vmem:[#allocation5 + $0x1700] sm:$0xff]  ;;  %4681 = vmatpush.msra.mxu1 %v586_v37 }
 0x498   :  { %v1246_v5 = vld [vmem:[#allocation5 + $0x21a0] sm:$0xff]  ;;  %4701 = vmatpush.msra.mxu2 %v906_v50 }
 0x499   :  { %v246_v22 = vld [vmem:[#allocation5 + $0x260] sm:$0xff]  ;;  %4720 = vmatpush.msra.mxu3 %v1246_v5 }
 0x49a   :  { %v566_v36 = vld [vmem:[#allocation5 + $0xc60] sm:$0xff]  ;;  %4662 = vmatpush.msra.mxu0 %v246_v22 }
 0x49b   :  { %v886_v57 = vld [vmem:[#allocation5 + $0x1660] sm:$0xff]  ;;  %4682 = vmatpush.msra.mxu1 %v566_v36 }
 0x49c   :  { %v1226_v11 = vld [vmem:[#allocation5 + $0x2100] sm:$0xff]  ;;  %4702 = vmatpush.msra.mxu2 %v886_v57 }
 0x49d   :  { %v226_v1 = vld [vmem:[#allocation5 + $0x1c0] sm:$0xff]  ;;  %4721 = vmatpush.msra.mxu3 %v1226_v11 }
 0x49e   :  { %v546_v15 = vld [vmem:[#allocation5 + $0xbc0] sm:$0xff]  ;;  %4663 = vmatpush.msra.mxu0 %v226_v1 }
 0x49f   :  { %v866_v30 = vld [vmem:[#allocation5 + $0x15c0] sm:$0xff]  ;;  %4683 = vmatpush.msra.mxu1 %v546_v15  ;;  %v487_v15 = vld [vmem:[#allocation5 + $0x9e8] sm:$0xff] }
 0x4a0   :  { %v1206_v17 = vld [vmem:[#allocation5 + $0x2060] sm:$0xff]  ;;  %4703 = vmatpush.msra.mxu2 %v866_v30 }
 0x4a1   :  { %v206_v6 = vld [vmem:[#allocation5 + $0x120] sm:$0xff]  ;;  %4722 = vmatpush.msra.mxu3 %v1206_v17 }
 0x4a2   :  { %v526_v18 = vld [vmem:[#allocation5 + $0xb20] sm:$0xff]  ;;  %4664 = vmatpush.msra.mxu0 %v206_v6  ;;  %v467_v6 = vld [vmem:[#allocation5 + $0x948] sm:$0xff] }
 0x4a3   :  { %v846_v24 = vld [vmem:[#allocation5 + $0x1520] sm:$0xff]  ;;  %4684 = vmatpush.msra.mxu1 %v526_v18 }
 0x4a4   :  { %v1186_v16 = vld [vmem:[#allocation5 + $0x1fc0] sm:$0xff]  ;;  %4704 = vmatpush.msra.mxu2 %v846_v24 }
 0x4a5   :  { %v186_v12 = vld [vmem:[#allocation5 + $0x80] sm:$0xff]  ;;  %4723 = vmatpush.msra.mxu3 %v1186_v16 }
 0x4a6   :  { %v506_v37 = vld [vmem:[#allocation5 + $0xa80] sm:$0xff]  ;;  %4665 = vmatpush.msra.mxu0 %v186_v12  ;;  %v447_v12 = vld [vmem:[#allocation5 + $0x8a8] sm:$0xff] }
 0x4a7   :  { %v826_v50 = vld [vmem:[#allocation5 + $0x1480] sm:$0xff]  ;;  %4685 = vmatpush.msra.mxu1 %v506_v37 }
 0x4a8   :  { %v1166_v5 = vld [vmem:[#allocation5 + $0x1f20] sm:$0xff]  ;;  %4705 = vmatpush.msra.mxu2 %v826_v50  ;;  %4686 = vmatmul.f32.vlgmr.msra.gmra.mxu1 %v7621_v35 }
 0x4a9   :  { %v1766_v22 = vld [vmem:[#allocation5 + $0x31e0] sm:$0xff]  ;;  %4724 = vmatpush.msra.mxu3 %v1166_v5  ;;  %4706 = vmatmul.f32.vlgmr.msra.gmra.mxu2 %v7624_v8 }
 0x4aa   :  { %v2086_v36 = vld [vmem:[#allocation5 + $0x3be0] sm:$0xff]  ;;  %4730 = vmatpush.msrb.mxu0 %v1766_v22  ;;  %v427_v22 = vld [vmem:[#allocation5 + $0x808] sm:$0xff] }
 0x4ab   :  { %v2406_v61 = vld [vmem:[#allocation5 + $0x45e0] sm:$0xff]  ;;  %4750 = vmatpush.msrb.mxu1 %v2086_v36 }
 0x4ac   :  { %v1146_v57 = vld [vmem:[#allocation5 + $0x1e80] sm:$0xff]  ;;  %4770 = vmatpush.msrb.mxu2 %v2406_v61 }
 0x4ad   :  { %v1746_v11 = vld [vmem:[#allocation5 + $0x3140] sm:$0xff]  ;;  %4725 = vmatpush.msra.mxu3 %v1146_v57 }
 0x4ae   :  { %v2066_v34 = vld [vmem:[#allocation5 + $0x3b40] sm:$0xff]  ;;  %4731 = vmatpush.msrb.mxu0 %v1746_v11  ;;  %v407_v11 = vld [vmem:[#allocation5 + $0x768] sm:$0xff]  ;;  %4726 = vmatmul.f32.vlgmr.msra.gmra.mxu3 %v7607_v49 }
 0x4af   :  { %v2386_v1 = vld [vmem:[#allocation5 + $0x4540] sm:$0xff]  ;;  %4751 = vmatpush.msrb.mxu1 %v2066_v34  ;;  %4790 = vmatpush.msrb.mxu3 %v487_v15  ;;  %v807_v49 = vld [vmem:[#allocation5 + $0x13e8] sm:$0xff] }
 0x4b0   :  { %v1726_v38 = vld [vmem:[#allocation5 + $0x30a0] sm:$0xff]  ;;  %4771 = vmatpush.msrb.mxu2 %v2386_v1 }
 0x4b1   :  { %v2046_v30 = vld [vmem:[#allocation5 + $0x3aa0] sm:$0xff]  ;;  %4732 = vmatpush.msrb.mxu0 %v1726_v38  ;;  %4791 = vmatpush.msrb.mxu3 %v467_v6  ;;  %v387_v38 = vld [vmem:[#allocation5 + $0x6c8] sm:$0xff] }
 0x4b2   :  { %v2366_v17 = vld [vmem:[#allocation5 + $0x44a0] sm:$0xff]  ;;  %4752 = vmatpush.msrb.mxu1 %v2046_v30 }
 0x4b3   :  { %v1706_v18 = vld [vmem:[#allocation5 + $0x3000] sm:$0xff]  ;;  %4772 = vmatpush.msrb.mxu2 %v2366_v17  ;;  %4792 = vmatpush.msrb.mxu3 %v447_v12 }
 0x4b4   :  { %v2026_v24 = vld [vmem:[#allocation5 + $0x3a00] sm:$0xff]  ;;  %4733 = vmatpush.msrb.mxu0 %v1706_v18  ;;  %v367_v18 = vld [vmem:[#allocation5 + $0x628] sm:$0xff] }
 0x4b5   :  { %v2346_v16 = vld [vmem:[#allocation5 + $0x4400] sm:$0xff]  ;;  %4753 = vmatpush.msrb.mxu1 %v2026_v24  ;;  %4793 = vmatpush.msrb.mxu3 %v427_v22 }
 0x4b6   :  { %v1686_v37 = vld [vmem:[#allocation5 + $0x2f60] sm:$0xff]  ;;  %4773 = vmatpush.msrb.mxu2 %v2346_v16 }
 0x4b7   :  { %v2006_v50 = vld [vmem:[#allocation5 + $0x3960] sm:$0xff]  ;;  %4734 = vmatpush.msrb.mxu0 %v1686_v37  ;;  %4794 = vmatpush.msrb.mxu3 %v407_v11  ;;  %v347_v37 = vld [vmem:[#allocation5 + $0x588] sm:$0xff] }
 0x4b8   :  { %v2326_v5 = vld [vmem:[#allocation5 + $0x4360] sm:$0xff]  ;;  %4754 = vmatpush.msrb.mxu1 %v2006_v50 }
 0x4b9   :  { %v1666_v36 = vld [vmem:[#allocation5 + $0x2ec0] sm:$0xff]  ;;  %4774 = vmatpush.msrb.mxu2 %v2326_v5  ;;  %4795 = vmatpush.msrb.mxu3 %v387_v38 }
 0x4ba   :  { %v1986_v61 = vld [vmem:[#allocation5 + $0x38c0] sm:$0xff]  ;;  %4735 = vmatpush.msrb.mxu0 %v1666_v36  ;;  %v327_v36 = vld [vmem:[#allocation5 + $0x4e8] sm:$0xff] }
 0x4bb   :  { %v2306_v57 = vld [vmem:[#allocation5 + $0x42c0] sm:$0xff]  ;;  %4755 = vmatpush.msrb.mxu1 %v1986_v61  ;;  %4796 = vmatpush.msrb.mxu3 %v367_v18 }
 0x4bc   :  { %v1646_v34 = vld [vmem:[#allocation5 + $0x2e20] sm:$0xff]  ;;  %4775 = vmatpush.msrb.mxu2 %v2306_v57 }
 0x4bd   :  { %v1966_v1 = vld [vmem:[#allocation5 + $0x3820] sm:$0xff]  ;;  %4736 = vmatpush.msrb.mxu0 %v1646_v34  ;;  %4797 = vmatpush.msrb.mxu3 %v347_v37  ;;  %v307_v34 = vld [vmem:[#allocation5 + $0x448] sm:$0xff] }
 0x4be   :  { %v2286_v15 = vld [vmem:[#allocation5 + $0x4220] sm:$0xff]  ;;  %4756 = vmatpush.msrb.mxu1 %v1966_v1 }
 0x4bf   :  { %v1626_v30 = vld [vmem:[#allocation5 + $0x2d80] sm:$0xff]  ;;  %4776 = vmatpush.msrb.mxu2 %v2286_v15  ;;  %4798 = vmatpush.msrb.mxu3 %v327_v36 }
 0x4c0   :  { %v1946_v17 = vld [vmem:[#allocation5 + $0x3780] sm:$0xff]  ;;  %4737 = vmatpush.msrb.mxu0 %v1626_v30  ;;  %v287_v30 = vld [vmem:[#allocation5 + $0x3a8] sm:$0xff] }
 0x4c1   :  { %v2266_v6 = vld [vmem:[#allocation5 + $0x4180] sm:$0xff]  ;;  %4757 = vmatpush.msrb.mxu1 %v1946_v17  ;;  %4799 = vmatpush.msrb.mxu3 %v307_v34 }
 0x4c2   :  { %v1606_v24 = vld [vmem:[#allocation5 + $0x2ce0] sm:$0xff]  ;;  %4777 = vmatpush.msrb.mxu2 %v2266_v6 }
 0x4c3   :  { %v1926_v16 = vld [vmem:[#allocation5 + $0x36e0] sm:$0xff]  ;;  %4738 = vmatpush.msrb.mxu0 %v1606_v24  ;;  %4800 = vmatpush.msrb.mxu3 %v287_v30  ;;  %v267_v24 = vld [vmem:[#allocation5 + $0x308] sm:$0xff] }
 0x4c4   :  { %v2246_v12 = vld [vmem:[#allocation5 + $0x40e0] sm:$0xff]  ;;  %4758 = vmatpush.msrb.mxu1 %v1926_v16  ;;  %v207_v30 = vld [vmem:[#allocation5 + $0x128] sm:$0xff] }
 0x4c5   :  { %v1586_v50 = vld [vmem:[#allocation5 + $0x2c40] sm:$0xff]  ;;  %4778 = vmatpush.msrb.mxu2 %v2246_v12  ;;  %4801 = vmatpush.msrb.mxu3 %v267_v24  ;;  %v1447_v24 = vld [vmem:[#allocation5 + $0x27e8] sm:$0xff] }
 0x4c6   :  { %v1906_v5 = vld [vmem:[#allocation5 + $0x3640] sm:$0xff]  ;;  %4739 = vmatpush.msrb.mxu0 %v1586_v50  ;;  %v7638_v50 = vld [vmem:[#allocation2] sm:$0xff] }
 0x4c7   :  { %v2226_v22 = vld [vmem:[#allocation5 + $0x4040] sm:$0xff]  ;;  %4759 = vmatpush.msrb.mxu1 %v1906_v5  ;;  %4666 = vmatmul.f32.vlgmr.msra.gmra.mxu0 %v7638_v50  ;;  %v247_v5 = vld [vmem:[#allocation5 + $0x268] sm:$0xff] }
 0x4c8   :  { %v1566_v61 = vld [vmem:[#allocation5 + $0x2ba0] sm:$0xff]  ;;  %4779 = vmatpush.msrb.mxu2 %v2226_v22  ;;  %v4387_v22 = vpop.f32.mrf.mxu2  ;;  %4802 = vmatpush.msrb.mxu3 %v247_v5  ;;  %v787_v5 = vld [vmem:[#allocation5 + $0x1348] sm:$0xff] }
 0x4c9   :  { %v1886_v57 = vld [vmem:[#allocation5 + $0x35a0] sm:$0xff]  ;;  %4740 = vmatpush.msrb.mxu0 %v1566_v61 }
 0x4ca   :  { %v2206_v11 = vld [vmem:[#allocation5 + $0x3fa0] sm:$0xff]  ;;  %4760 = vmatpush.msrb.mxu1 %v1886_v57 }
 0x4cb   :  { %v1546_v1 = vld [vmem:[#allocation5 + $0x2b00] sm:$0xff]  ;;  %4780 = vmatpush.msrb.mxu2 %v2206_v11  ;;  %v227_v11 = vld [vmem:[#allocation5 + $0x1c8] sm:$0xff] }
 0x4cc   :  { %v1866_v15 = vld [vmem:[#allocation5 + $0x3500] sm:$0xff]  ;;  %4741 = vmatpush.msrb.mxu0 %v1546_v1  ;;  %4803 = vmatpush.msrb.mxu3 %v227_v11 }
 0x4cd   :  { %v2186_v38 = vld [vmem:[#allocation5 + $0x3f00] sm:$0xff]  ;;  %4761 = vmatpush.msrb.mxu1 %v1866_v15  ;;  %v4407_v15 = vpop.f32.mrf.mxu3 }
 0x4ce   :  { %v1526_v17 = vld [vmem:[#allocation5 + $0x2a60] sm:$0xff]  ;;  %4781 = vmatpush.msrb.mxu2 %v2186_v38  ;;  %4804 = vmatpush.msrb.mxu3 %v207_v30  ;;  %v1407_v30 = vld [vmem:[#allocation5 + $0x26a8] sm:$0xff] }
 0x4cf   :  { %v1846_v6 = vld [vmem:[#allocation5 + $0x3460] sm:$0xff]  ;;  %4742 = vmatpush.msrb.mxu0 %v1526_v17  ;;  %v4408_v17 = vadd.f32 %v4407_v15, %v4387_v22  ;;  %v4447_v22 = vpop.f32.mrf.mxu1  ;;  %v767_v15 = vld [vmem:[#allocation5 + $0x12a8] sm:$0xff] }
 0x4d0   :  { %v2166_v18 = vld [vmem:[#allocation5 + $0x3e60] sm:$0xff]  ;;  %4762 = vmatpush.msrb.mxu1 %v1846_v6  ;;  %v4427_v6 = vpop.f32.mrf.mxu0 }
 0x4d1   :  { %v1506_v16 = vld [vmem:[#allocation5 + $0x29c0] sm:$0xff]  ;;  %4782 = vmatpush.msrb.mxu2 %v2166_v18  ;;  %v1127_v18 = vld [vmem:[#allocation5 + $0x1de8] sm:$0xff] }
 0x4d2   :  { %v1826_v12 = vld [vmem:[#allocation5 + $0x33c0] sm:$0xff]  ;;  %4743 = vmatpush.msrb.mxu0 %v1506_v16  ;;  %v4428_v16 = vadd.f32 %v4427_v6, %v4408_v17  ;;  %v747_v6 = vld [vmem:[#allocation5 + $0x1208] sm:$0xff] }
 0x4d3   :  { %v2146_v37 = vld [vmem:[#allocation5 + $0x3dc0] sm:$0xff]  ;;  %4763 = vmatpush.msrb.mxu1 %v1826_v12  ;;  %v187_v12 = vld [vmem:[#allocation5 + $0x88] sm:$0xff] }
 0x4d4   :  { %v1486_v36 = vld [vmem:[#allocation5 + $0x2920] sm:$0xff]  ;;  %4783 = vmatpush.msrb.mxu2 %v2146_v37  ;;  %v7643_v37 = vld [vmem:[#allocation2 + $0x30] sm:$0xff]  ;;  %v4448_v11 = vadd.f32 %v4447_v22, %v4428_v16  ;;  %4805 = vmatpush.msrb.mxu3 %v187_v12  ;;  %v1067_v16 = vld [vmem:[#allocation5 + $0x1c08] sm:$0xff] }
 0x4d5   :  { %v1806_v61 = vld [vmem:[#allocation5 + $0x3320] sm:$0xff]  ;;  %4744 = vmatpush.msrb.mxu0 %v1486_v36  ;;  %v1107_v36 = vld [vmem:[#allocation5 + $0x1d48] sm:$0xff]  ;;  %4806 = vmatmul.f32.vlgmr.msrb.gmra.mxu3 %v7638_v50 }
 0x4d6   :  { %v2126_v57 = vld [vmem:[#allocation5 + $0x3d20] sm:$0xff]  ;;  %4764 = vmatpush.msrb.mxu1 %v1806_v61  ;;  %v1427_v61 = vld [vmem:[#allocation5 + $0x2748] sm:$0xff] }
 0x4d7   :  { %v1466_v34 = vld [vmem:[#allocation5 + $0x2880] sm:$0xff]  ;;  %4784 = vmatpush.msrb.mxu2 %v2126_v57  ;;  %v1767_v57 = vld [vmem:[#allocation5 + $0x31e8] sm:$0xff] }
 0x4d8   :  { %v1786_v1 = vld [vmem:[#allocation5 + $0x3280] sm:$0xff]  ;;  %4745 = vmatpush.msrb.mxu0 %v1466_v34  ;;  %v4467_v34 = vpop.f32.mrf.mxu2  ;;  %4870 = vmatpush.msra.mxu3 %v1767_v57  ;;  %v1387_v12 = vld [vmem:[#allocation5 + $0x2608] sm:$0xff] }
 0x4d9   :  { %v2106_v38 = vld [vmem:[#allocation5 + $0x3c80] sm:$0xff]  ;;  %4765 = vmatpush.msrb.mxu1 %v1786_v1  ;;  %v7646_v1 = vld [vmem:[#allocation2 + $0x20] sm:$0xff]  ;;  %v4468_v17 = vadd.f32 %v4467_v34, %v4448_v11 }
 0x4da   :  { %4785 = vmatpush.msrb.mxu2 %v2106_v38  ;;  %4810 = vmatpush.msra.mxu0 %v807_v49  ;;  %v1087_v38 = vld [vmem:[#allocation5 + $0x1ca8] sm:$0xff] }
 0x4db   :  { %4786 = vmatmul.f32.vlgmr.msrb.gmra.mxu2 %v7643_v37  ;;  %4830 = vmatpush.msra.mxu1 %v1127_v18  ;;  %v1747_v49 = vld [vmem:[#allocation5 + $0x3148] sm:$0xff]  ;;  %v4487_v18 = vpop.f32.mrf.mxu3 }
 0x4dc   :  { %4850 = vmatpush.msra.mxu2 %v1447_v24  ;;  %4746 = vmatmul.f32.vlgmr.msrb.gmra.mxu0 %v7646_v1  ;;  %v7649_v24 = vld [vmem:[#allocation2 + $0x28] sm:$0xff]  ;;  %v7652_v22 = vadd.f32 %v4487_v18, %v4468_v17  ;;  %v1367_v57 = vld [vmem:[#allocation5 + $0x2568] sm:$0xff] }
 0x4dd   :  { %4811 = vmatpush.msra.mxu0 %v787_v5  ;;  %4831 = vmatpush.msra.mxu1 %v1107_v36  ;;  %v1727_v5 = vld [vmem:[#allocation5 + $0x30a8] sm:$0xff] }
 0x4de   :  { %4851 = vmatpush.msra.mxu2 %v1427_v61  ;;  %4766 = vmatmul.f32.vlgmr.msrb.gmra.mxu1 %v7649_v24  ;;  %v727_v36 = vld [vmem:[#allocation5 + $0x1168] sm:$0xff] }
 0x4df   :  { %4812 = vmatpush.msra.mxu0 %v767_v15  ;;  %4832 = vmatpush.msra.mxu1 %v1087_v38  ;;  %v1047_v61 = vld [vmem:[#allocation5 + $0x1b68] sm:$0xff] }
 0x4e0   :  { %4852 = vmatpush.msra.mxu2 %v1407_v30  ;;  %4871 = vmatpush.msra.mxu3 %v1747_v49  ;;  %v1707_v11 = vld [vmem:[#allocation5 + $0x3008] sm:$0xff] }
 0x4e1   :  { %4813 = vmatpush.msra.mxu0 %v747_v6  ;;  %4833 = vmatpush.msra.mxu1 %v1067_v16  ;;  %v707_v34 = vld [vmem:[#allocation5 + $0x10c8] sm:$0xff] }
 0x4e2   :  { %4853 = vmatpush.msra.mxu2 %v1387_v12  ;;  %4872 = vmatpush.msra.mxu3 %v1727_v5  ;;  %v1347_v15 = vld [vmem:[#allocation5 + $0x24c8] sm:$0xff] }
 0x4e3   :  { %4814 = vmatpush.msra.mxu0 %v727_v36  ;;  %4834 = vmatpush.msra.mxu1 %v1047_v61  ;;  %v1687_v17 = vld [vmem:[#allocation5 + $0x2f68] sm:$0xff] }
 0x4e4   :  { %4854 = vmatpush.msra.mxu2 %v1367_v57  ;;  %v687_v18 = vld [vmem:[#allocation5 + $0x1028] sm:$0xff]  ;;  %4873 = vmatpush.msra.mxu3 %v1707_v11 }
 0x4e5   :  { %4815 = vmatpush.msra.mxu0 %v707_v34  ;;  %v1007_v38 = vld [vmem:[#allocation5 + $0x1a28] sm:$0xff]  ;;  %4835 = vmatpush.msra.mxu1 %v1027_v56 }
 0x4e6   :  { %v1327_v30 = vld [vmem:[#allocation5 + $0x2428] sm:$0xff]  ;;  %4855 = vmatpush.msra.mxu2 %v1347_v15  ;;  %4874 = vmatpush.msra.mxu3 %v1687_v17 }
 0x4e7   :  { %v1667_v49 = vld [vmem:[#allocation5 + $0x2ec8] sm:$0xff]  ;;  %4816 = vmatpush.msra.mxu0 %v687_v18  ;;  %4836 = vmatpush.msra.mxu1 %v1007_v38 }
 0x4e8   :  { %v667_v6 = vld [vmem:[#allocation5 + $0xf88] sm:$0xff]  ;;  %4856 = vmatpush.msra.mxu2 %v1327_v30  ;;  %4875 = vmatpush.msra.mxu3 %v1667_v49 }
 0x4e9   :  { %v987_v16 = vld [vmem:[#allocation5 + $0x1988] sm:$0xff]  ;;  %4817 = vmatpush.msra.mxu0 %v667_v6 }
 0x4ea   :  { %v1307_v12 = vld [vmem:[#allocation5 + $0x2388] sm:$0xff]  ;;  %4837 = vmatpush.msra.mxu1 %v987_v16 }
 0x4eb   :  { %v1647_v5 = vld [vmem:[#allocation5 + $0x2e28] sm:$0xff]  ;;  %4857 = vmatpush.msra.mxu2 %v1307_v12 }
 0x4ec   :  { %v647_v36 = vld [vmem:[#allocation5 + $0xee8] sm:$0xff]  ;;  %4876 = vmatpush.msra.mxu3 %v1647_v5 }
 0x4ed   :  { %v967_v61 = vld [vmem:[#allocation5 + $0x18e8] sm:$0xff]  ;;  %4818 = vmatpush.msra.mxu0 %v647_v36 }
 0x4ee   :  { %v1287_v57 = vld [vmem:[#allocation5 + $0x22e8] sm:$0xff]  ;;  %4838 = vmatpush.msra.mxu1 %v967_v61 }
 0x4ef   :  { %v1627_v11 = vld [vmem:[#allocation5 + $0x2d88] sm:$0xff]  ;;  %4858 = vmatpush.msra.mxu2 %v1287_v57 }
 0x4f0   :  { %v627_v34 = vld [vmem:[#allocation5 + $0xe48] sm:$0xff]  ;;  %4877 = vmatpush.msra.mxu3 %v1627_v11  ;;  %v4507_v11 = vpop.f32.mrf.mxu0 }
 0x4f1   :  { %v947_v56 = vld [vmem:[#allocation5 + $0x1848] sm:$0xff]  ;;  %4819 = vmatpush.msra.mxu0 %v627_v34 }
 0x4f2   :  { %v1267_v15 = vld [vmem:[#allocation5 + $0x2248] sm:$0xff]  ;;  %4839 = vmatpush.msra.mxu1 %v947_v56 }
 0x4f3   :  { %v1607_v17 = vld [vmem:[#allocation5 + $0x2ce8] sm:$0xff]  ;;  %4859 = vmatpush.msra.mxu2 %v1267_v15  ;;  %v7655_v15 = vadd.f32 %v4507_v11, %v7652_v22 }
 0x4f4   :  { %v607_v18 = vld [vmem:[#allocation5 + $0xda8] sm:$0xff]  ;;  %4878 = vmatpush.msra.mxu3 %v1607_v17 }
 0x4f5   :  { %v927_v38 = vld [vmem:[#allocation5 + $0x17a8] sm:$0xff]  ;;  %4820 = vmatpush.msra.mxu0 %v607_v18  ;;  %7952 = vst [vmem:[#allocation71_spill] sm:$0xff] %v7655_v15 }
 0x4f6   :  { %v1247_v30 = vld [vmem:[#allocation5 + $0x21a8] sm:$0xff]  ;;  %4840 = vmatpush.msra.mxu1 %v927_v38 }
 0x4f7   :  { %v1587_v49 = vld [vmem:[#allocation5 + $0x2c48] sm:$0xff]  ;;  %4860 = vmatpush.msra.mxu2 %v1247_v30 }
 0x4f8   :  { %v587_v6 = vld [vmem:[#allocation5 + $0xd08] sm:$0xff]  ;;  %4879 = vmatpush.msra.mxu3 %v1587_v49 }
 0x4f9   :  { %v907_v16 = vld [vmem:[#allocation5 + $0x1708] sm:$0xff]  ;;  %4821 = vmatpush.msra.mxu0 %v587_v6 }
 0x4fa   :  { %v1227_v12 = vld [vmem:[#allocation5 + $0x2108] sm:$0xff]  ;;  %4841 = vmatpush.msra.mxu1 %v907_v16 }
 0x4fb   :  { %v1567_v5 = vld [vmem:[#allocation5 + $0x2ba8] sm:$0xff]  ;;  %4861 = vmatpush.msra.mxu2 %v1227_v12 }
 0x4fc   :  { %v567_v36 = vld [vmem:[#allocation5 + $0xc68] sm:$0xff]  ;;  %4880 = vmatpush.msra.mxu3 %v1567_v5 }
 0x4fd   :  { %v887_v61 = vld [vmem:[#allocation5 + $0x1668] sm:$0xff]  ;;  %4822 = vmatpush.msra.mxu0 %v567_v36 }
 0x4fe   :  { %v1207_v57 = vld [vmem:[#allocation5 + $0x2068] sm:$0xff]  ;;  %4842 = vmatpush.msra.mxu1 %v887_v61 }
 0x4ff   :  { %v1547_v34 = vld [vmem:[#allocation5 + $0x2b08] sm:$0xff]  ;;  %4862 = vmatpush.msra.mxu2 %v1207_v57  ;;  %v488_v57 = vld [vmem:[#allocation5 + $0x9f0] sm:$0xff] }
 0x500   :  { %v547_v56 = vld [vmem:[#allocation5 + $0xbc8] sm:$0xff]  ;;  %4881 = vmatpush.msra.mxu3 %v1547_v34 }
 0x501   :  { %v867_v17 = vld [vmem:[#allocation5 + $0x15c8] sm:$0xff]  ;;  %4823 = vmatpush.msra.mxu0 %v547_v56 }
 0x502   :  { %v1187_v18 = vld [vmem:[#allocation5 + $0x1fc8] sm:$0xff]  ;;  %4843 = vmatpush.msra.mxu1 %v867_v17 }
 0x503   :  { %v1527_v38 = vld [vmem:[#allocation5 + $0x2a68] sm:$0xff]  ;;  %4863 = vmatpush.msra.mxu2 %v1187_v18  ;;  %v468_v18 = vld [vmem:[#allocation5 + $0x950] sm:$0xff] }
 0x504   :  { %v527_v30 = vld [vmem:[#allocation5 + $0xb28] sm:$0xff]  ;;  %4882 = vmatpush.msra.mxu3 %v1527_v38  ;;  %v808_v38 = vld [vmem:[#allocation5 + $0x13f0] sm:$0xff] }
 0x505   :  { %v847_v49 = vld [vmem:[#allocation5 + $0x1528] sm:$0xff]  ;;  %4824 = vmatpush.msra.mxu0 %v527_v30 }
 0x506   :  { %v1167_v6 = vld [vmem:[#allocation5 + $0x1f28] sm:$0xff]  ;;  %4844 = vmatpush.msra.mxu1 %v847_v49 }
 0x507   :  { %v1507_v16 = vld [vmem:[#allocation5 + $0x29c8] sm:$0xff]  ;;  %4864 = vmatpush.msra.mxu2 %v1167_v6  ;;  %v448_v6 = vld [vmem:[#allocation5 + $0x8b0] sm:$0xff] }
 0x508   :  { %v507_v12 = vld [vmem:[#allocation5 + $0xa88] sm:$0xff]  ;;  %4883 = vmatpush.msra.mxu3 %v1507_v16  ;;  %v788_v16 = vld [vmem:[#allocation5 + $0x1350] sm:$0xff] }
 0x509   :  { %v827_v22 = vld [vmem:[#allocation5 + $0x1488] sm:$0xff]  ;;  %4825 = vmatpush.msra.mxu0 %v507_v12 }
 0x50a   :  { %v1147_v11 = vld [vmem:[#allocation5 + $0x1e88] sm:$0xff]  ;;  %4845 = vmatpush.msra.mxu1 %v827_v22  ;;  %4826 = vmatmul.f32.vlgmr.msra.gmra.mxu0 %v7621_v35 }
 0x50b   :  { %v1487_v5 = vld [vmem:[#allocation5 + $0x2928] sm:$0xff]  ;;  %4865 = vmatpush.msra.mxu2 %v1147_v11  ;;  %v428_v11 = vld [vmem:[#allocation5 + $0x810] sm:$0xff]  ;;  %4846 = vmatmul.f32.vlgmr.msra.gmra.mxu1 %v7624_v8 }
 0x50c   :  { %v2087_v36 = vld [vmem:[#allocation5 + $0x3be8] sm:$0xff]  ;;  %4884 = vmatpush.msra.mxu3 %v1487_v5  ;;  %v768_v5 = vld [vmem:[#allocation5 + $0x12b0] sm:$0xff] }
 0x50d   :  { %v2407_v61 = vld [vmem:[#allocation5 + $0x45e8] sm:$0xff]  ;;  %4890 = vmatpush.msrb.mxu0 %v2087_v36  ;;  %4930 = vmatpush.msrb.mxu2 %v488_v57  ;;  %v7658_v36 = vld [vmem:[#allocation2 + $0x18] sm:$0xff]  ;;  %v328_v8 = vld [vmem:[#allocation5 + $0x4f0] sm:$0xff] }
 0x50e   :  { %v1467_v34 = vld [vmem:[#allocation5 + $0x2888] sm:$0xff]  ;;  %4910 = vmatpush.msrb.mxu1 %v2407_v61  ;;  %4866 = vmatmul.f32.vlgmr.msra.gmra.mxu2 %v7658_v36 }
 0x50f   :  { %v2067_v56 = vld [vmem:[#allocation5 + $0x3b48] sm:$0xff]  ;;  %4885 = vmatpush.msra.mxu3 %v1467_v34  ;;  %4931 = vmatpush.msrb.mxu2 %v468_v18  ;;  %v408_v34 = vld [vmem:[#allocation5 + $0x770] sm:$0xff] }
 0x510   :  { %v2387_v17 = vld [vmem:[#allocation5 + $0x4548] sm:$0xff]  ;;  %4891 = vmatpush.msrb.mxu0 %v2067_v56  ;;  %v748_v56 = vld [vmem:[#allocation5 + $0x1210] sm:$0xff]  ;;  %4886 = vmatmul.f32.vlgmr.msra.gmra.mxu3 %v7646_v1 }
 0x511   :  { %v2047_v30 = vld [vmem:[#allocation5 + $0x3aa8] sm:$0xff]  ;;  %4911 = vmatpush.msrb.mxu1 %v2387_v17  ;;  %4950 = vmatpush.msrb.mxu3 %v808_v38  ;;  %v388_v38 = vld [vmem:[#allocation5 + $0x6d0] sm:$0xff] }
 0x512   :  { %v2367_v49 = vld [vmem:[#allocation5 + $0x44a8] sm:$0xff]  ;;  %4892 = vmatpush.msrb.mxu0 %v2047_v30  ;;  %4932 = vmatpush.msrb.mxu2 %v448_v6  ;;  %v728_v30 = vld [vmem:[#allocation5 + $0x1170] sm:$0xff] }
 0x513   :  { %v2027_v12 = vld [vmem:[#allocation5 + $0x3a08] sm:$0xff]  ;;  %4912 = vmatpush.msrb.mxu1 %v2367_v49  ;;  %4951 = vmatpush.msrb.mxu3 %v788_v16  ;;  %v368_v16 = vld [vmem:[#allocation5 + $0x630] sm:$0xff] }
 0x514   :  { %v2347_v22 = vld [vmem:[#allocation5 + $0x4408] sm:$0xff]  ;;  %4893 = vmatpush.msrb.mxu0 %v2027_v12  ;;  %4933 = vmatpush.msrb.mxu2 %v428_v11  ;;  %v708_v12 = vld [vmem:[#allocation5 + $0x10d0] sm:$0xff] }
 0x515   :  { %v2007_v61 = vld [vmem:[#allocation5 + $0x3968] sm:$0xff]  ;;  %4913 = vmatpush.msrb.mxu1 %v2347_v22  ;;  %4952 = vmatpush.msrb.mxu3 %v768_v5  ;;  %v348_v11 = vld [vmem:[#allocation5 + $0x590] sm:$0xff] }
 0x516   :  { %v2327_v57 = vld [vmem:[#allocation5 + $0x4368] sm:$0xff]  ;;  %4894 = vmatpush.msrb.mxu0 %v2007_v61  ;;  %4934 = vmatpush.msrb.mxu2 %v408_v34  ;;  %v688_v5 = vld [vmem:[#allocation5 + $0x1030] sm:$0xff] }
 0x517   :  { %v1987_v17 = vld [vmem:[#allocation5 + $0x38c8] sm:$0xff]  ;;  %4914 = vmatpush.msrb.mxu1 %v2327_v57  ;;  %4953 = vmatpush.msrb.mxu3 %v748_v56  ;;  %v668_v34 = vld [vmem:[#allocation5 + $0xf90] sm:$0xff] }
 0x518   :  { %v2307_v18 = vld [vmem:[#allocation5 + $0x42c8] sm:$0xff]  ;;  %4895 = vmatpush.msrb.mxu0 %v1987_v17  ;;  %4935 = vmatpush.msrb.mxu2 %v388_v38  ;;  %v648_v38 = vld [vmem:[#allocation5 + $0xef0] sm:$0xff] }
 0x519   :  { %v1967_v49 = vld [vmem:[#allocation5 + $0x3828] sm:$0xff]  ;;  %4915 = vmatpush.msrb.mxu1 %v2307_v18  ;;  %4954 = vmatpush.msrb.mxu3 %v728_v30  ;;  %v308_v18 = vld [vmem:[#allocation5 + $0x450] sm:$0xff] }
 0x51a   :  { %v2287_v6 = vld [vmem:[#allocation5 + $0x4228] sm:$0xff]  ;;  %4896 = vmatpush.msrb.mxu0 %v1967_v49  ;;  %4936 = vmatpush.msrb.mxu2 %v368_v16  ;;  %v628_v16 = vld [vmem:[#allocation5 + $0xe50] sm:$0xff] }
 0x51b   :  { %v1947_v35 = vld [vmem:[#allocation5 + $0x3788] sm:$0xff]  ;;  %4916 = vmatpush.msrb.mxu1 %v2287_v6  ;;  %4955 = vmatpush.msrb.mxu3 %v708_v12  ;;  %v288_v6 = vld [vmem:[#allocation5 + $0x3b0] sm:$0xff] }
 0x51c   :  { %v2267_v22 = vld [vmem:[#allocation5 + $0x4188] sm:$0xff]  ;;  %4897 = vmatpush.msrb.mxu0 %v1947_v35  ;;  %4937 = vmatpush.msrb.mxu2 %v348_v11  ;;  %v608_v11 = vld [vmem:[#allocation5 + $0xdb0] sm:$0xff] }
 0x51d   :  { %v1927_v61 = vld [vmem:[#allocation5 + $0x36e8] sm:$0xff]  ;;  %4917 = vmatpush.msrb.mxu1 %v2267_v22  ;;  %4956 = vmatpush.msrb.mxu3 %v688_v5  ;;  %v268_v22 = vld [vmem:[#allocation5 + $0x310] sm:$0xff] }
 0x51e   :  { %v2247_v57 = vld [vmem:[#allocation5 + $0x40e8] sm:$0xff]  ;;  %4898 = vmatpush.msrb.mxu0 %v1927_v61  ;;  %4938 = vmatpush.msrb.mxu2 %v328_v8  ;;  %v588_v8 = vld [vmem:[#allocation5 + $0xd10] sm:$0xff] }
 0x51f   :  { %v1907_v56 = vld [vmem:[#allocation5 + $0x3648] sm:$0xff]  ;;  %4918 = vmatpush.msrb.mxu1 %v2247_v57  ;;  %4957 = vmatpush.msrb.mxu3 %v668_v34  ;;  %v248_v57 = vld [vmem:[#allocation5 + $0x270] sm:$0xff] }
 0x520   :  { %v2227_v17 = vld [vmem:[#allocation5 + $0x4048] sm:$0xff]  ;;  %4899 = vmatpush.msrb.mxu0 %v1907_v56  ;;  %4939 = vmatpush.msrb.mxu2 %v308_v18  ;;  %v568_v18 = vld [vmem:[#allocation5 + $0xc70] sm:$0xff] }
 0x521   :  { %v1887_v30 = vld [vmem:[#allocation5 + $0x35a8] sm:$0xff]  ;;  %4919 = vmatpush.msrb.mxu1 %v2227_v17  ;;  %4958 = vmatpush.msrb.mxu3 %v648_v38  ;;  %v228_v17 = vld [vmem:[#allocation5 + $0x1d0] sm:$0xff] }
 0x522   :  { %v2207_v49 = vld [vmem:[#allocation5 + $0x3fa8] sm:$0xff]  ;;  %4900 = vmatpush.msrb.mxu0 %v1887_v30  ;;  %4940 = vmatpush.msrb.mxu2 %v288_v6  ;;  %v548_v6 = vld [vmem:[#allocation5 + $0xbd0] sm:$0xff] }
 0x523   :  { %v1867_v12 = vld [vmem:[#allocation5 + $0x3508] sm:$0xff]  ;;  %4920 = vmatpush.msrb.mxu1 %v2207_v49  ;;  %4959 = vmatpush.msrb.mxu3 %v628_v16  ;;  %v208_v49 = vld [vmem:[#allocation5 + $0x130] sm:$0xff] }
 0x524   :  { %v2187_v35 = vld [vmem:[#allocation5 + $0x3f08] sm:$0xff]  ;;  %4901 = vmatpush.msrb.mxu0 %v1867_v12  ;;  %4941 = vmatpush.msrb.mxu2 %v268_v22  ;;  %v528_v22 = vld [vmem:[#allocation5 + $0xb30] sm:$0xff] }
 0x525   :  { %v1847_v5 = vld [vmem:[#allocation5 + $0x3468] sm:$0xff]  ;;  %4921 = vmatpush.msrb.mxu1 %v2187_v35  ;;  %4960 = vmatpush.msrb.mxu3 %v608_v11  ;;  %v188_v35 = vld [vmem:[#allocation5 + $0x90] sm:$0xff] }
 0x526   :  { %v2167_v61 = vld [vmem:[#allocation5 + $0x3e68] sm:$0xff]  ;;  %4902 = vmatpush.msrb.mxu0 %v1847_v5  ;;  %4942 = vmatpush.msrb.mxu2 %v248_v57  ;;  %v1448_v11 = vld [vmem:[#allocation5 + $0x27f0] sm:$0xff] }
 0x527   :  { %v1827_v34 = vld [vmem:[#allocation5 + $0x33c8] sm:$0xff]  ;;  %4922 = vmatpush.msrb.mxu1 %v2167_v61  ;;  %4961 = vmatpush.msrb.mxu3 %v588_v8  ;;  %v1128_v5 = vld [vmem:[#allocation5 + $0x1df0] sm:$0xff] }
 0x528   :  { %v2147_v56 = vld [vmem:[#allocation5 + $0x3dc8] sm:$0xff]  ;;  %4903 = vmatpush.msrb.mxu0 %v1827_v34  ;;  %4943 = vmatpush.msrb.mxu2 %v228_v17  ;;  %v1768_v61 = vld [vmem:[#allocation5 + $0x31f0] sm:$0xff] }
 0x529   :  { %v1807_v38 = vld [vmem:[#allocation5 + $0x3328] sm:$0xff]  ;;  %4923 = vmatpush.msrb.mxu1 %v2147_v56  ;;  %4962 = vmatpush.msrb.mxu3 %v568_v18  ;;  %v508_v57 = vld [vmem:[#allocation5 + $0xa90] sm:$0xff] }
 0x52a   :  { %v2127_v30 = vld [vmem:[#allocation5 + $0x3d28] sm:$0xff]  ;;  %4904 = vmatpush.msrb.mxu0 %v1807_v38  ;;  %4944 = vmatpush.msrb.mxu2 %v208_v49  ;;  %v1108_v8 = vld [vmem:[#allocation5 + $0x1d50] sm:$0xff] }
 0x52b   :  { %v1787_v16 = vld [vmem:[#allocation5 + $0x3288] sm:$0xff]  ;;  %4924 = vmatpush.msrb.mxu1 %v2127_v30  ;;  %4963 = vmatpush.msrb.mxu3 %v548_v6  ;;  %v1428_v34 = vld [vmem:[#allocation5 + $0x2750] sm:$0xff] }
 0x52c   :  { %v2107_v12 = vld [vmem:[#allocation5 + $0x3c88] sm:$0xff]  ;;  %4905 = vmatpush.msrb.mxu0 %v1787_v16  ;;  %4945 = vmatpush.msrb.mxu2 %v188_v35  ;;  %v1748_v56 = vld [vmem:[#allocation5 + $0x3150] sm:$0xff] }
 0x52d   :  { %4925 = vmatpush.msrb.mxu1 %v2107_v12  ;;  %4964 = vmatpush.msrb.mxu3 %v528_v22  ;;  %v2088_v17 = vld [vmem:[#allocation5 + $0x3bf0] sm:$0xff] }
 0x52e   :  { %4906 = vmatmul.f32.vlgmr.msrb.gmra.mxu0 %v7649_v24  ;;  %5010 = vmatpush.msra.mxu2 %v1768_v61  ;;  %v1088_v18 = vld [vmem:[#allocation5 + $0x1cb0] sm:$0xff] }
 0x52f   :  { %4990 = vmatpush.msra.mxu1 %v1448_v11  ;;  %4970 = vmatpush.msra.mxu0 %v1128_v5  ;;  %v1408_v38 = vld [vmem:[#allocation5 + $0x26b0] sm:$0xff] }
 0x530   :  { %4965 = vmatpush.msrb.mxu3 %v508_v57  ;;  %4926 = vmatmul.f32.vlgmr.msrb.gmra.mxu1 %v7643_v37  ;;  %v1728_v30 = vld [vmem:[#allocation5 + $0x30b0] sm:$0xff] }
 0x531   :  { %4971 = vmatpush.msra.mxu0 %v1108_v8  ;;  %4991 = vmatpush.msra.mxu1 %v1428_v34  ;;  %v2068_v49 = vld [vmem:[#allocation5 + $0x3b50] sm:$0xff] }
 0x532   :  { %5011 = vmatpush.msra.mxu2 %v1748_v56  ;;  %5030 = vmatpush.msra.mxu3 %v2088_v17  ;;  %v1068_v6 = vld [vmem:[#allocation5 + $0x1c10] sm:$0xff] }
 0x533   :  { %v1388_v16 = vld [vmem:[#allocation5 + $0x2610] sm:$0xff]  ;;  %4972 = vmatpush.msra.mxu0 %v1088_v18  ;;  %4992 = vmatpush.msra.mxu1 %v1408_v38 }
 0x534   :  { %v1708_v12 = vld [vmem:[#allocation5 + $0x3010] sm:$0xff]  ;;  %5012 = vmatpush.msra.mxu2 %v1728_v30  ;;  %5031 = vmatpush.msra.mxu3 %v2068_v49 }
 0x535   :  { %v2048_v35 = vld [vmem:[#allocation5 + $0x3ab0] sm:$0xff]  ;;  %4973 = vmatpush.msra.mxu0 %v1068_v6  ;;  %4993 = vmatpush.msra.mxu1 %v1388_v16 }
 0x536   :  { %v1048_v22 = vld [vmem:[#allocation5 + $0x1b70] sm:$0xff]  ;;  %5013 = vmatpush.msra.mxu2 %v1708_v12  ;;  %5032 = vmatpush.msra.mxu3 %v2048_v35 }
 0x537   :  { %v1368_v11 = vld [vmem:[#allocation5 + $0x2570] sm:$0xff]  ;;  %4974 = vmatpush.msra.mxu0 %v1048_v22  ;;  %4946 = vmatmul.f32.vlgmr.msrb.gmra.mxu2 %v7638_v50 }
 0x538   :  { %v1688_v37 = vld [vmem:[#allocation5 + $0x2f70] sm:$0xff]  ;;  %4994 = vmatpush.msra.mxu1 %v1368_v11 }
 0x539   :  { %v2028_v5 = vld [vmem:[#allocation5 + $0x3a10] sm:$0xff]  ;;  %5014 = vmatpush.msra.mxu2 %v1688_v37 }
 0x53a   :  { %v1028_v61 = vld [vmem:[#allocation5 + $0x1ad0] sm:$0xff]  ;;  %5033 = vmatpush.msra.mxu3 %v2028_v5 }
 0x53b   :  { %v1348_v57 = vld [vmem:[#allocation5 + $0x24d0] sm:$0xff]  ;;  %4975 = vmatpush.msra.mxu0 %v1028_v61 }
 0x53c   :  { %v1668_v8 = vld [vmem:[#allocation5 + $0x2ed0] sm:$0xff]  ;;  %4995 = vmatpush.msra.mxu1 %v1348_v57 }
 0x53d   :  { %v2008_v34 = vld [vmem:[#allocation5 + $0x3970] sm:$0xff]  ;;  %5015 = vmatpush.msra.mxu2 %v1668_v8 }
 0x53e   :  { %v1008_v56 = vld [vmem:[#allocation5 + $0x1a30] sm:$0xff]  ;;  %5034 = vmatpush.msra.mxu3 %v2008_v34 }
 0x53f   :  { %v1328_v17 = vld [vmem:[#allocation5 + $0x2430] sm:$0xff]  ;;  %4976 = vmatpush.msra.mxu0 %v1008_v56 }
 0x540   :  { %v1648_v18 = vld [vmem:[#allocation5 + $0x2e30] sm:$0xff]  ;;  %4996 = vmatpush.msra.mxu1 %v1328_v17 }
 0x541   :  { %v1988_v38 = vld [vmem:[#allocation5 + $0x38d0] sm:$0xff]  ;;  %5016 = vmatpush.msra.mxu2 %v1648_v18 }
 0x542   :  { %v988_v30 = vld [vmem:[#allocation5 + $0x1990] sm:$0xff]  ;;  %5035 = vmatpush.msra.mxu3 %v1988_v38 }
 0x543   :  { %v1308_v49 = vld [vmem:[#allocation5 + $0x2390] sm:$0xff]  ;;  %4977 = vmatpush.msra.mxu0 %v988_v30 }
 0x544   :  { %v1628_v6 = vld [vmem:[#allocation5 + $0x2d90] sm:$0xff]  ;;  %4997 = vmatpush.msra.mxu1 %v1308_v49 }
 0x545   :  { %v1968_v16 = vld [vmem:[#allocation5 + $0x3830] sm:$0xff]  ;;  %5017 = vmatpush.msra.mxu2 %v1628_v6 }
 0x546   :  { %v968_v12 = vld [vmem:[#allocation5 + $0x18f0] sm:$0xff]  ;;  %5036 = vmatpush.msra.mxu3 %v1968_v16 }
 0x547   :  { %v1288_v35 = vld [vmem:[#allocation5 + $0x22f0] sm:$0xff]  ;;  %4978 = vmatpush.msra.mxu0 %v968_v12 }
 0x548   :  { %v1608_v22 = vld [vmem:[#allocation5 + $0x2cf0] sm:$0xff]  ;;  %4998 = vmatpush.msra.mxu1 %v1288_v35 }
 0x549   :  { %v1948_v11 = vld [vmem:[#allocation5 + $0x3790] sm:$0xff]  ;;  %5018 = vmatpush.msra.mxu2 %v1608_v22 }
 0x54a   :  { %v948_v37 = vld [vmem:[#allocation5 + $0x1850] sm:$0xff]  ;;  %5037 = vmatpush.msra.mxu3 %v1948_v11 }
 0x54b   :  { %v1268_v5 = vld [vmem:[#allocation5 + $0x2250] sm:$0xff]  ;;  %4979 = vmatpush.msra.mxu0 %v948_v37 }
 0x54c   :  { %v1588_v61 = vld [vmem:[#allocation5 + $0x2c50] sm:$0xff]  ;;  %4999 = vmatpush.msra.mxu1 %v1268_v5 }
 0x54d   :  { %v1928_v57 = vld [vmem:[#allocation5 + $0x36f0] sm:$0xff]  ;;  %5019 = vmatpush.msra.mxu2 %v1588_v61 }
 0x54e   :  { %v928_v8 = vld [vmem:[#allocation5 + $0x17b0] sm:$0xff]  ;;  %5038 = vmatpush.msra.mxu3 %v1928_v57 }
 0x54f   :  { %v1248_v34 = vld [vmem:[#allocation5 + $0x21b0] sm:$0xff]  ;;  %4980 = vmatpush.msra.mxu0 %v928_v8 }
 0x550   :  { %v1568_v56 = vld [vmem:[#allocation5 + $0x2bb0] sm:$0xff]  ;;  %5000 = vmatpush.msra.mxu1 %v1248_v34 }
 0x551   :  { %v1908_v17 = vld [vmem:[#allocation5 + $0x3650] sm:$0xff]  ;;  %5020 = vmatpush.msra.mxu2 %v1568_v56 }
 0x552   :  { %v908_v18 = vld [vmem:[#allocation5 + $0x1710] sm:$0xff]  ;;  %5039 = vmatpush.msra.mxu3 %v1908_v17 }
 0x553   :  { %v1228_v38 = vld [vmem:[#allocation5 + $0x2110] sm:$0xff]  ;;  %4981 = vmatpush.msra.mxu0 %v908_v18 }
 0x554   :  { %v1548_v30 = vld [vmem:[#allocation5 + $0x2b10] sm:$0xff]  ;;  %5001 = vmatpush.msra.mxu1 %v1228_v38 }
 0x555   :  { %v1888_v49 = vld [vmem:[#allocation5 + $0x35b0] sm:$0xff]  ;;  %5021 = vmatpush.msra.mxu2 %v1548_v30 }
 0x556   :  { %v888_v6 = vld [vmem:[#allocation5 + $0x1670] sm:$0xff]  ;;  %5040 = vmatpush.msra.mxu3 %v1888_v49  ;;  %v489_v49 = vld [vmem:[#allocation5 + $0x9f8] sm:$0xff] }
 0x557   :  { %v1208_v16 = vld [vmem:[#allocation5 + $0x2070] sm:$0xff]  ;;  %4982 = vmatpush.msra.mxu0 %v888_v6  ;;  %v809_v6 = vld [vmem:[#allocation5 + $0x13f8] sm:$0xff] }
 0x558   :  { %v1528_v12 = vld [vmem:[#allocation5 + $0x2a70] sm:$0xff]  ;;  %5002 = vmatpush.msra.mxu1 %v1208_v16 }
 0x559   :  { %v1868_v35 = vld [vmem:[#allocation5 + $0x3510] sm:$0xff]  ;;  %5022 = vmatpush.msra.mxu2 %v1528_v12 }
 0x55a   :  { %v868_v22 = vld [vmem:[#allocation5 + $0x15d0] sm:$0xff]  ;;  %5041 = vmatpush.msra.mxu3 %v1868_v35  ;;  %v469_v35 = vld [vmem:[#allocation5 + $0x958] sm:$0xff] }
 0x55b   :  { %v1188_v11 = vld [vmem:[#allocation5 + $0x1fd0] sm:$0xff]  ;;  %4983 = vmatpush.msra.mxu0 %v868_v22 }
 0x55c   :  { %v1508_v37 = vld [vmem:[#allocation5 + $0x29d0] sm:$0xff]  ;;  %5003 = vmatpush.msra.mxu1 %v1188_v11  ;;  %v789_v11 = vld [vmem:[#allocation5 + $0x1358] sm:$0xff] }
 0x55d   :  { %v1848_v5 = vld [vmem:[#allocation5 + $0x3470] sm:$0xff]  ;;  %5023 = vmatpush.msra.mxu2 %v1508_v37  ;;  %v1129_v37 = vld [vmem:[#allocation5 + $0x1df8] sm:$0xff] }
 0x55e   :  { %v848_v61 = vld [vmem:[#allocation5 + $0x1530] sm:$0xff]  ;;  %5042 = vmatpush.msra.mxu3 %v1848_v5  ;;  %v449_v5 = vld [vmem:[#allocation5 + $0x8b8] sm:$0xff] }
 0x55f   :  { %v1168_v57 = vld [vmem:[#allocation5 + $0x1f30] sm:$0xff]  ;;  %4984 = vmatpush.msra.mxu0 %v848_v61  ;;  %v769_v61 = vld [vmem:[#allocation5 + $0x12b8] sm:$0xff] }
 0x560   :  { %v1488_v8 = vld [vmem:[#allocation5 + $0x2930] sm:$0xff]  ;;  %5004 = vmatpush.msra.mxu1 %v1168_v57  ;;  %v1109_v57 = vld [vmem:[#allocation5 + $0x1d58] sm:$0xff] }
 0x561   :  { %v1828_v34 = vld [vmem:[#allocation5 + $0x33d0] sm:$0xff]  ;;  %5024 = vmatpush.msra.mxu2 %v1488_v8 }
 0x562   :  { %v828_v56 = vld [vmem:[#allocation5 + $0x1490] sm:$0xff]  ;;  %5043 = vmatpush.msra.mxu3 %v1828_v34  ;;  %v429_v34 = vld [vmem:[#allocation5 + $0x818] sm:$0xff] }
 0x563   :  { %v1148_v17 = vld [vmem:[#allocation5 + $0x1e90] sm:$0xff]  ;;  %4985 = vmatpush.msra.mxu0 %v828_v56  ;;  %v749_v56 = vld [vmem:[#allocation5 + $0x1218] sm:$0xff] }
 0x564   :  { %v1468_v18 = vld [vmem:[#allocation5 + $0x2890] sm:$0xff]  ;;  %5005 = vmatpush.msra.mxu1 %v1148_v17  ;;  %v1089_v17 = vld [vmem:[#allocation5 + $0x1cb8] sm:$0xff] }
 0x565   :  { %v1808_v38 = vld [vmem:[#allocation5 + $0x3330] sm:$0xff]  ;;  %5025 = vmatpush.msra.mxu2 %v1468_v18  ;;  %5006 = vmatmul.f32.vlgmr.msra.gmra.mxu1 %v7658_v36  ;;  %v649_v36 = vld [vmem:[#allocation5 + $0xef8] sm:$0xff] }
 0x566   :  { %v2408_v30 = vld [vmem:[#allocation5 + $0x45f0] sm:$0xff]  ;;  %5044 = vmatpush.msra.mxu3 %v1808_v38  ;;  %5070 = vmatpush.msrb.mxu1 %v489_v49  ;;  %v409_v38 = vld [vmem:[#allocation5 + $0x778] sm:$0xff] }
 0x567   :  { %v1788_v16 = vld [vmem:[#allocation5 + $0x3290] sm:$0xff]  ;;  %5050 = vmatpush.msrb.mxu0 %v2408_v30  ;;  %5090 = vmatpush.msrb.mxu2 %v809_v6  ;;  %v729_v30 = vld [vmem:[#allocation5 + $0x1178] sm:$0xff] }
 0x568   :  { %v2388_v12 = vld [vmem:[#allocation5 + $0x4550] sm:$0xff]  ;;  %5045 = vmatpush.msra.mxu3 %v1788_v16  ;;  %5071 = vmatpush.msrb.mxu1 %v469_v35  ;;  %v7671_v49 = vld [vmem:[#allocation2 + $0x10] sm:$0xff] }
 0x569   :  { %v7667_v22 = vld [vmem:[#allocation2 + $0x8] sm:$0xff]  ;;  %5051 = vmatpush.msrb.mxu0 %v2388_v12  ;;  %5091 = vmatpush.msrb.mxu2 %v789_v11  ;;  %v1069_v6 = vld [vmem:[#allocation5 + $0x1c18] sm:$0xff] }
 0x56a   :  { %4966 = vmatmul.f32.vlgmr.msrb.gmra.mxu3 %v7667_v22  ;;  %v2368_v50 = vld [vmem:[#allocation5 + $0x44b0] sm:$0xff]  ;;  %5072 = vmatpush.msrb.mxu1 %v449_v5  ;;  %v389_v12 = vld [vmem:[#allocation5 + $0x6d8] sm:$0xff] }
 0x56b   :  { %5110 = vmatpush.msrb.mxu3 %v1129_v37  ;;  %v2348_v8 = vld [vmem:[#allocation5 + $0x4410] sm:$0xff]  ;;  %5052 = vmatpush.msrb.mxu0 %v2368_v50  ;;  %v1049_v35 = vld [vmem:[#allocation5 + $0x1b78] sm:$0xff] }
 0x56c   :  { %5092 = vmatpush.msrb.mxu2 %v769_v61  ;;  %v2328_v18 = vld [vmem:[#allocation5 + $0x4370] sm:$0xff]  ;;  %5073 = vmatpush.msrb.mxu1 %v429_v34  ;;  %v369_v37 = vld [vmem:[#allocation5 + $0x638] sm:$0xff] }
 0x56d   :  { %5111 = vmatpush.msrb.mxu3 %v1109_v57  ;;  %5026 = vmatmul.f32.vlgmr.msra.gmra.mxu2 %v7646_v1  ;;  %v2308_v16 = vld [vmem:[#allocation5 + $0x42d0] sm:$0xff]  ;;  %v709_v1 = vld [vmem:[#allocation5 + $0x10d8] sm:$0xff] }
 0x56e   :  { %5053 = vmatpush.msrb.mxu0 %v2348_v8  ;;  %5093 = vmatpush.msrb.mxu2 %v749_v56  ;;  %v2288_v11 = vld [vmem:[#allocation5 + $0x4230] sm:$0xff]  ;;  %v689_v50 = vld [vmem:[#allocation5 + $0x1038] sm:$0xff] }
 0x56f   :  { %5112 = vmatpush.msrb.mxu3 %v1089_v17  ;;  %4986 = vmatmul.f32.vlgmr.msra.gmra.mxu0 %v7671_v49  ;;  %v1029_v5 = vld [vmem:[#allocation5 + $0x1ad8] sm:$0xff]  ;;  %v2268_v61 = vld [vmem:[#allocation5 + $0x4190] sm:$0xff] }
 0x570   :  { %5054 = vmatpush.msrb.mxu0 %v2328_v18  ;;  %5074 = vmatpush.msrb.mxu1 %v409_v38  ;;  %v669_v57 = vld [vmem:[#allocation5 + $0xf98] sm:$0xff]  ;;  %v2248_v34 = vld [vmem:[#allocation5 + $0x40f0] sm:$0xff] }
 0x571   :  { %5094 = vmatpush.msrb.mxu2 %v729_v30  ;;  %5113 = vmatpush.msrb.mxu3 %v1069_v6  ;;  %v1009_v8 = vld [vmem:[#allocation5 + $0x1a38] sm:$0xff]  ;;  %v2228_v18 = vld [vmem:[#allocation5 + $0x4050] sm:$0xff] }
 0x572   :  { %5046 = vmatmul.f32.vlgmr.msra.gmra.mxu3 %v7649_v24  ;;  %5055 = vmatpush.msrb.mxu0 %v2308_v16  ;;  %v349_v24 = vld [vmem:[#allocation5 + $0x598] sm:$0xff]  ;;  %v2208_v16 = vld [vmem:[#allocation5 + $0x3fb0] sm:$0xff] }
 0x573   :  { %5075 = vmatpush.msrb.mxu1 %v389_v12  ;;  %5095 = vmatpush.msrb.mxu2 %v709_v1  ;;  %v329_v56 = vld [vmem:[#allocation5 + $0x4f8] sm:$0xff] }
 0x574   :  { %5114 = vmatpush.msrb.mxu3 %v1049_v35  ;;  %5056 = vmatpush.msrb.mxu0 %v2288_v11  ;;  %v989_v17 = vld [vmem:[#allocation5 + $0x1998] sm:$0xff]  ;;  %v2188_v11 = vld [vmem:[#allocation5 + $0x3f10] sm:$0xff] }
 0x575   :  { %5076 = vmatpush.msrb.mxu1 %v369_v37  ;;  %5096 = vmatpush.msrb.mxu2 %v689_v50  ;;  %v309_v38 = vld [vmem:[#allocation5 + $0x458] sm:$0xff] }
 0x576   :  { %5115 = vmatpush.msrb.mxu3 %v1029_v5  ;;  %5057 = vmatpush.msrb.mxu0 %v2268_v61  ;;  %v629_v30 = vld [vmem:[#allocation5 + $0xe58] sm:$0xff]  ;;  %v2168_v61 = vld [vmem:[#allocation5 + $0x3e70] sm:$0xff] }
 0x577   :  { %5077 = vmatpush.msrb.mxu1 %v349_v24  ;;  %5097 = vmatpush.msrb.mxu2 %v669_v57  ;;  %v969_v6 = vld [vmem:[#allocation5 + $0x18f8] sm:$0xff] }
 0x578   :  { %5116 = vmatpush.msrb.mxu3 %v1009_v8  ;;  %5058 = vmatpush.msrb.mxu0 %v2248_v34  ;;  %v289_v12 = vld [vmem:[#allocation5 + $0x3b8] sm:$0xff]  ;;  %v2148_v34 = vld [vmem:[#allocation5 + $0x3dd0] sm:$0xff] }
 0x579   :  { %5078 = vmatpush.msrb.mxu1 %v329_v56  ;;  %5098 = vmatpush.msrb.mxu2 %v649_v36  ;;  %v609_v1 = vld [vmem:[#allocation5 + $0xdb8] sm:$0xff] }
 0x57a   :  { %5117 = vmatpush.msrb.mxu3 %v989_v17  ;;  %5059 = vmatpush.msrb.mxu0 %v2228_v18  ;;  %v949_v35 = vld [vmem:[#allocation5 + $0x1858] sm:$0xff]  ;;  %v2128_v18 = vld [vmem:[#allocation5 + $0x3d30] sm:$0xff] }
 0x57b   :  { %5079 = vmatpush.msrb.mxu1 %v309_v38  ;;  %5099 = vmatpush.msrb.mxu2 %v629_v30  ;;  %v269_v37 = vld [vmem:[#allocation5 + $0x318] sm:$0xff] }
 0x57c   :  { %5118 = vmatpush.msrb.mxu3 %v969_v6  ;;  %5060 = vmatpush.msrb.mxu0 %v2208_v16  ;;  %v589_v50 = vld [vmem:[#allocation5 + $0xd18] sm:$0xff]  ;;  %v2108_v16 = vld [vmem:[#allocation5 + $0x3c90] sm:$0xff] }
 0x57d   :  { %5080 = vmatpush.msrb.mxu1 %v289_v12  ;;  %v929_v5 = vld [vmem:[#allocation5 + $0x17b8] sm:$0xff]  ;;  %5100 = vmatpush.msrb.mxu2 %v609_v1 }
 0x57e   :  { %5119 = vmatpush.msrb.mxu3 %v949_v35  ;;  %v249_v24 = vld [vmem:[#allocation5 + $0x278] sm:$0xff]  ;;  %5061 = vmatpush.msrb.mxu0 %v2188_v11 }
 0x57f   :  { %5081 = vmatpush.msrb.mxu1 %v269_v37  ;;  %v569_v57 = vld [vmem:[#allocation5 + $0xc78] sm:$0xff]  ;;  %5101 = vmatpush.msrb.mxu2 %v589_v50 }
 0x580   :  { %v909_v8 = vld [vmem:[#allocation5 + $0x1718] sm:$0xff]  ;;  %5120 = vmatpush.msrb.mxu3 %v929_v5  ;;  %5062 = vmatpush.msrb.mxu0 %v2168_v61 }
 0x581   :  { %v229_v56 = vld [vmem:[#allocation5 + $0x1d8] sm:$0xff]  ;;  %5082 = vmatpush.msrb.mxu1 %v249_v24  ;;  %5102 = vmatpush.msrb.mxu2 %v569_v57 }
 0x582   :  { %v549_v36 = vld [vmem:[#allocation5 + $0xbd8] sm:$0xff]  ;;  %5121 = vmatpush.msrb.mxu3 %v909_v8  ;;  %5063 = vmatpush.msrb.mxu0 %v2148_v34 }
 0x583   :  { %v889_v17 = vld [vmem:[#allocation5 + $0x1678] sm:$0xff]  ;;  %5083 = vmatpush.msrb.mxu1 %v229_v56  ;;  %5103 = vmatpush.msrb.mxu2 %v549_v36 }
 0x584   :  { %v209_v38 = vld [vmem:[#allocation5 + $0x138] sm:$0xff]  ;;  %5122 = vmatpush.msrb.mxu3 %v889_v17  ;;  %5064 = vmatpush.msrb.mxu0 %v2128_v18 }
 0x585   :  { %v529_v30 = vld [vmem:[#allocation5 + $0xb38] sm:$0xff]  ;;  %5084 = vmatpush.msrb.mxu1 %v209_v38 }
 0x586   :  { %v869_v6 = vld [vmem:[#allocation5 + $0x15d8] sm:$0xff]  ;;  %5104 = vmatpush.msrb.mxu2 %v529_v30  ;;  %5065 = vmatpush.msrb.mxu0 %v2108_v16 }
 0x587   :  { %v189_v12 = vld [vmem:[#allocation5 + $0x98] sm:$0xff]  ;;  %5123 = vmatpush.msrb.mxu3 %v869_v6 }
 0x588   :  { %v509_v1 = vld [vmem:[#allocation5 + $0xa98] sm:$0xff]  ;;  %5085 = vmatpush.msrb.mxu1 %v189_v12 }
 0x589   :  { %v849_v35 = vld [vmem:[#allocation5 + $0x1538] sm:$0xff]  ;;  %5105 = vmatpush.msrb.mxu2 %v509_v1 }
 0x58a   :  { %v1769_v11 = vld [vmem:[#allocation5 + $0x31f8] sm:$0xff]  ;;  %5124 = vmatpush.msrb.mxu3 %v849_v35  ;;  %5106 = vmatmul.f32.vlgmr.msrb.gmra.mxu2 %v7667_v22 }
 0x58b   :  { %v1449_v37 = vld [vmem:[#allocation5 + $0x27f8] sm:$0xff]  ;;  %5150 = vmatpush.msra.mxu1 %v1769_v11 }
 0x58c   :  { %v2089_v50 = vld [vmem:[#allocation5 + $0x3bf8] sm:$0xff]  ;;  %5130 = vmatpush.msra.mxu0 %v1449_v37 }
 0x58d   :  { %v829_v5 = vld [vmem:[#allocation5 + $0x1498] sm:$0xff]  ;;  %5170 = vmatpush.msra.mxu2 %v2089_v50 }
 0x58e   :  { %v1749_v61 = vld [vmem:[#allocation5 + $0x3158] sm:$0xff]  ;;  %5125 = vmatpush.msrb.mxu3 %v829_v5 }
 0x58f   :  { %v7676_v24 = vld [vmem:[#allocation2 + $0x30] sm:$0xff]  ;;  %5151 = vmatpush.msra.mxu1 %v1749_v61  ;;  %v7679_v61 = vpop.f32.mrf.mxu1  ;;  %5126 = vmatmul.f32.vlgmr.msrb.gmra.mxu3 %v7671_v49 }
 0x590   :  { %5066 = vmatmul.f32.vlgmr.msrb.gmra.mxu0 %v7676_v24  ;;  %v1429_v57 = vld [vmem:[#allocation5 + $0x2758] sm:$0xff] }
 0x591   :  { %v2069_v8 = vld [vmem:[#allocation5 + $0x3b58] sm:$0xff]  ;;  %5131 = vmatpush.msra.mxu0 %v1429_v57 }
 0x592   :  { %v2409_v34 = vld [vmem:[#allocation5 + $0x45f8] sm:$0xff]  ;;  %5171 = vmatpush.msra.mxu2 %v2069_v8 }
 0x593   :  { %v1729_v56 = vld [vmem:[#allocation5 + $0x30b8] sm:$0xff]  ;;  %5190 = vmatpush.msra.mxu3 %v2409_v34 }
 0x594   :  { %v1409_v36 = vld [vmem:[#allocation5 + $0x26b8] sm:$0xff]  ;;  %5152 = vmatpush.msra.mxu1 %v1729_v56 }
 0x595   :  { %v2049_v17 = vld [vmem:[#allocation5 + $0x3ab8] sm:$0xff]  ;;  %5132 = vmatpush.msra.mxu0 %v1409_v36 }
 0x596   :  { %v2389_v18 = vld [vmem:[#allocation5 + $0x4558] sm:$0xff]  ;;  %5172 = vmatpush.msra.mxu2 %v2049_v17 }
 0x597   :  { %v1709_v38 = vld [vmem:[#allocation5 + $0x3018] sm:$0xff]  ;;  %5191 = vmatpush.msra.mxu3 %v2389_v18 }
 0x598   :  { %v1389_v30 = vld [vmem:[#allocation5 + $0x2618] sm:$0xff]  ;;  %5153 = vmatpush.msra.mxu1 %v1709_v38 }
 0x599   :  { %v2029_v6 = vld [vmem:[#allocation5 + $0x3a18] sm:$0xff]  ;;  %5133 = vmatpush.msra.mxu0 %v1389_v30  ;;  %v7681_v30 = vpop.f32.mrf.mxu2 }
 0x59a   :  { %v2369_v16 = vld [vmem:[#allocation5 + $0x44b8] sm:$0xff]  ;;  %5173 = vmatpush.msra.mxu2 %v2029_v6  ;;  %v4548_v49 = vadd.f32 %v7681_v30, %v7679_v61  ;;  %v3988_v61 = vadd.f32 %v7601_v59, %v7594_v3  ;;  %v5367_v30 = vld [vmem:[#allocation8 + $0x3c0] sm:$0xff] }
 0x59b   :  { %v1689_v12 = vld [vmem:[#allocation5 + $0x2f78] sm:$0xff]  ;;  %5192 = vmatpush.msra.mxu3 %v2369_v16  ;;  %v6918_v59 = vld [vmem:[#allocation2 + $0x18] sm:$0xff] }
 0x59c   :  { %v1369_v1 = vld [vmem:[#allocation5 + $0x2578] sm:$0xff]  ;;  %5154 = vmatpush.msra.mxu1 %v1689_v12 }
 0x59d   :  { %v2009_v35 = vld [vmem:[#allocation5 + $0x3978] sm:$0xff]  ;;  %5134 = vmatpush.msra.mxu0 %v1369_v1 }
 0x59e   :  { %v2349_v11 = vld [vmem:[#allocation5 + $0x4418] sm:$0xff]  ;;  %5174 = vmatpush.msra.mxu2 %v2009_v35  ;;  %v7683_v35 = vpop.f32.mrf.mxu0 }
 0x59f   :  { %v1669_v37 = vld [vmem:[#allocation5 + $0x2ed8] sm:$0xff]  ;;  %5193 = vmatpush.msra.mxu3 %v2349_v11 }
 0x5a0   :  { %v1349_v50 = vld [vmem:[#allocation5 + $0x24d8] sm:$0xff]  ;;  %5155 = vmatpush.msra.mxu1 %v1669_v37 }
 0x5a1   :  { %v1989_v5 = vld [vmem:[#allocation5 + $0x38d8] sm:$0xff]  ;;  %5135 = vmatpush.msra.mxu0 %v1349_v50 }
 0x5a2   :  { %v2329_v57 = vld [vmem:[#allocation5 + $0x4378] sm:$0xff]  ;;  %5175 = vmatpush.msra.mxu2 %v1989_v5 }
 0x5a3   :  { %v1649_v8 = vld [vmem:[#allocation5 + $0x2e38] sm:$0xff]  ;;  %5194 = vmatpush.msra.mxu3 %v2329_v57  ;;  %v7685_v57 = vpop.f32.mrf.mxu3 }
 0x5a4   :  { %v1329_v34 = vld [vmem:[#allocation5 + $0x2438] sm:$0xff]  ;;  %5156 = vmatpush.msra.mxu1 %v1649_v8 }
 0x5a5   :  { %v1969_v56 = vld [vmem:[#allocation5 + $0x3838] sm:$0xff]  ;;  %5136 = vmatpush.msra.mxu0 %v1329_v34 }
 0x5a6   :  { %v2309_v36 = vld [vmem:[#allocation5 + $0x42d8] sm:$0xff]  ;;  %5176 = vmatpush.msra.mxu2 %v1969_v56 }
 0x5a7   :  { %v1629_v17 = vld [vmem:[#allocation5 + $0x2d98] sm:$0xff]  ;;  %5195 = vmatpush.msra.mxu3 %v2309_v36 }
 0x5a8   :  { %v1309_v18 = vld [vmem:[#allocation5 + $0x2398] sm:$0xff]  ;;  %5157 = vmatpush.msra.mxu1 %v1629_v17  ;;  %v7687_v17 = vpop.f32.mrf.mxu1 }
 0x5a9   :  { %v1949_v38 = vld [vmem:[#allocation5 + $0x3798] sm:$0xff]  ;;  %5137 = vmatpush.msra.mxu0 %v1309_v18 }
 0x5aa   :  { %v2289_v6 = vld [vmem:[#allocation5 + $0x4238] sm:$0xff]  ;;  %5177 = vmatpush.msra.mxu2 %v1949_v38 }
 0x5ab   :  { %v1609_v16 = vld [vmem:[#allocation5 + $0x2cf8] sm:$0xff]  ;;  %5196 = vmatpush.msra.mxu3 %v2289_v6 }
 0x5ac   :  { %v1289_v12 = vld [vmem:[#allocation5 + $0x22f8] sm:$0xff]  ;;  %5158 = vmatpush.msra.mxu1 %v1609_v16 }
 0x5ad   :  { %v1929_v1 = vld [vmem:[#allocation5 + $0x36f8] sm:$0xff]  ;;  %5138 = vmatpush.msra.mxu0 %v1289_v12 }
 0x5ae   :  { %v2269_v11 = vld [vmem:[#allocation5 + $0x4198] sm:$0xff]  ;;  %5178 = vmatpush.msra.mxu2 %v1929_v1 }
 0x5af   :  { %v1589_v37 = vld [vmem:[#allocation5 + $0x2c58] sm:$0xff]  ;;  %5197 = vmatpush.msra.mxu3 %v2269_v11  ;;  %v7690_v11 = vpop.f32.mrf.mxu2 }
 0x5b0   :  { %v1269_v50 = vld [vmem:[#allocation5 + $0x2258] sm:$0xff]  ;;  %5159 = vmatpush.msra.mxu1 %v1589_v37  ;;  %v4667_v37 = vpop.f32.mrf.mxu0  ;;  %v4687_v15 = vpop.f32.mrf.mxu1 }
 0x5b1   :  { %v1909_v5 = vld [vmem:[#allocation5 + $0x3658] sm:$0xff]  ;;  %5139 = vmatpush.msra.mxu0 %v1269_v50 }
 0x5b2   :  { %v2249_v8 = vld [vmem:[#allocation5 + $0x40f8] sm:$0xff]  ;;  %5179 = vmatpush.msra.mxu2 %v1909_v5 }
 0x5b3   :  { %v1569_v34 = vld [vmem:[#allocation5 + $0x2bb8] sm:$0xff]  ;;  %5198 = vmatpush.msra.mxu3 %v2249_v8 }
 0x5b4   :  { %v1249_v56 = vld [vmem:[#allocation5 + $0x21b8] sm:$0xff]  ;;  %5160 = vmatpush.msra.mxu1 %v1569_v34 }
 0x5b5   :  { %v1889_v36 = vld [vmem:[#allocation5 + $0x35b8] sm:$0xff]  ;;  %5140 = vmatpush.msra.mxu0 %v1249_v56 }
 0x5b6   :  { %v2229_v18 = vld [vmem:[#allocation5 + $0x4058] sm:$0xff]  ;;  %5180 = vmatpush.msra.mxu2 %v1889_v36 }
 0x5b7   :  { %v1229_v38 = vld [vmem:[#allocation5 + $0x2118] sm:$0xff]  ;;  %5199 = vmatpush.msra.mxu3 %v2229_v18  ;;  %v7693_v18 = vpop.f32.mrf.mxu3  ;;  %v4707_v23 = vpop.f32.mrf.mxu2 }
 0x5b8   :  { %v1549_v6 = vld [vmem:[#allocation5 + $0x2b18] sm:$0xff]  ;;  %5141 = vmatpush.msra.mxu0 %v1229_v38  ;;  %7953 = vst [vmem:[#allocation72_spill] sm:$0xff] %v7693_v18  ;;  %v6917_v38 = vld [vmem:[#allocation2] sm:$0xff] }
 0x5b9   :  { %v1869_v16 = vld [vmem:[#allocation5 + $0x3518] sm:$0xff]  ;;  %5161 = vmatpush.msra.mxu1 %v1549_v6 }
 0x5ba   :  { %v2209_v12 = vld [vmem:[#allocation5 + $0x3fb8] sm:$0xff]  ;;  %5181 = vmatpush.msra.mxu2 %v1869_v16  ;;  %5086 = vmatmul.f32.vlgmr.msrb.gmra.mxu1 %v6917_v38  ;;  %v2448_v38 = vadd.f32 %v7418_v33, %v7422_v13  ;;  %v4568_v33 = vadd.f32 %v7685_v57, %v4548_v49  ;;  %v4747_v13 = vpop.f32.mrf.mxu0 }
 0x5bb   :  { %v1209_v1 = vld [vmem:[#allocation5 + $0x2078] sm:$0xff]  ;;  %5200 = vmatpush.msra.mxu3 %v2209_v12 }
 0x5bc   :  { %v1529_v50 = vld [vmem:[#allocation5 + $0x2a78] sm:$0xff]  ;;  %5142 = vmatpush.msra.mxu0 %v1209_v1 }
 0x5bd   :  { %v1849_v5 = vld [vmem:[#allocation5 + $0x3478] sm:$0xff]  ;;  %5162 = vmatpush.msra.mxu1 %v1529_v50 }
 0x5be   :  { %v2189_v8 = vld [vmem:[#allocation5 + $0x3f18] sm:$0xff]  ;;  %5182 = vmatpush.msra.mxu2 %v1849_v5  ;;  %v4688_v5 = vadd.f32 %v4687_v15, %v4667_v37  ;;  %v5495_v15 = vld [vmem:[#allocation8 + $0x7c0] sm:$0xff]  ;;  %v3848_v37 = vadd.f32 %v7580_v7, %v7578_v14 }
 0x5bf   :  { %v1189_v34 = vld [vmem:[#allocation5 + $0x1fd8] sm:$0xff]  ;;  %5201 = vmatpush.msra.mxu3 %v2189_v8  ;;  %v5359_v14 = vld [vmem:[#allocation8 + $0x380] sm:$0xff] }
 0x5c0   :  { %v1509_v56 = vld [vmem:[#allocation5 + $0x29d8] sm:$0xff]  ;;  %5143 = vmatpush.msra.mxu0 %v1189_v34  ;;  %v2588_v34 = vadd.f32 %v7438_v62, %v7426_v19  ;;  %v3288_v62 = vadd.f32 %v7511_v45, %v7507_v21  ;;  %v4708_v3 = vadd.f32 %v4707_v23, %v4688_v5  ;;  %v5487_v7 = vld [vmem:[#allocation8 + $0x780] sm:$0xff]  ;;  %v3868_v21 = vadd.f32 %v7584_v43, %v3848_v37 }
 0x5c1   :  { %v1829_v36 = vld [vmem:[#allocation5 + $0x33d8] sm:$0xff]  ;;  %5163 = vmatpush.msra.mxu1 %v1509_v56  ;;  %v5623_v56 = vld [vmem:[#allocation8 + $0xbc0] sm:$0xff]  ;;  %v4588_v45 = vadd.f32 %v7683_v35, %v4568_v33 }
 0x5c2   :  { %v2169_v22 = vld [vmem:[#allocation5 + $0x3e78] sm:$0xff]  ;;  %5183 = vmatpush.msra.mxu2 %v1829_v36  ;;  %v6919_v36 = vld [vmem:[#allocation2 + $0x28] sm:$0xff]  ;;  %v2608_v57 = vadd.f32 %v7434_v48, %v2588_v34  ;;  %v3308_v48 = vadd.f32 %v7521_v25, %v3288_v62  ;;  %v5343_v35 = vld [vmem:[#allocation8 + $0x300] sm:$0xff]  ;;  %v2728_v25 = vadd.f32 %v7444_v9, %v7440_v32 }
 0x5c3   :  { %v1169_v6 = vld [vmem:[#allocation5 + $0x1f38] sm:$0xff]  ;;  %5202 = vmatpush.msra.mxu3 %v2169_v22  ;;  %5164 = vmatpush.msra.mxu1 %v1489_v20  ;;  %v3148_v20 = vadd.f32 %v7505_v60, %v7495_v54  ;;  %v2468_v54 = vadd.f32 %v7412_v55, %v2448_v38  ;;  %v4727_v60 = vpop.f32.mrf.mxu3  ;;  %v4008_v22 = vadd.f32 %v7605_v51, %v3988_v61  ;;  %v6920_v55 = vld [vmem:[#allocation2 + $0x20] sm:$0xff]  ;;  %v4827_v61 = vpop.f32.mrf.mxu0 }
 0x5c4   :  { %v1809_v16 = vld [vmem:[#allocation5 + $0x3338] sm:$0xff]  ;;  %5144 = vmatpush.msra.mxu0 %v1169_v6  ;;  %v4767_v6 = vpop.f32.mrf.mxu1  ;;  %v3428_v51 = vadd.f32 %v7530_v46, %v7528_v29  ;;  %v4728_v49 = vadd.f32 %v4727_v60, %v4708_v3  ;;  %v5599_v5 = vld [vmem:[#allocation8 + $0xb00] sm:$0xff]  ;;  %v3888_v29 = vadd.f32 %v7582_v2, %v3868_v21 }
 0x5c5   :  { %v2149_v12 = vld [vmem:[#allocation5 + $0x3dd8] sm:$0xff]  ;;  %5184 = vmatpush.msra.mxu2 %v1809_v16  ;;  %v3168_v23 = vadd.f32 %v7501_v0, %v3148_v20  ;;  %v5351_v16 = vld [vmem:[#allocation8 + $0x340] sm:$0xff]  ;;  %v2488_v43 = vadd.f32 %v7420_v63, %v2468_v54  ;;  %v4787_v63 = vpop.f32.mrf.mxu2 }
 0x5c6   :  { %v1149_v1 = vld [vmem:[#allocation5 + $0x1e98] sm:$0xff]  ;;  %5203 = vmatpush.msra.mxu3 %v2149_v12  ;;  %v5479_v12 = vld [vmem:[#allocation8 + $0x740] sm:$0xff] }
 0x5c7   :  { %v1469_v50 = vld [vmem:[#allocation5 + $0x2898] sm:$0xff]  ;;  %5145 = vmatpush.msra.mxu0 %v1149_v1  ;;  %v5607_v0 = vld [vmem:[#allocation8 + $0xb40] sm:$0xff]  ;;  %v3188_v46 = vadd.f32 %v7499_v28, %v3168_v23  ;;  %v2508_v32 = vadd.f32 %v7430_v40, %v2488_v43 }
 0x5c8   :  { %v1789_v18 = vld [vmem:[#allocation5 + $0x3298] sm:$0xff]  ;;  %5165 = vmatpush.msra.mxu1 %v1469_v50  ;;  %5146 = vmatmul.f32.vlgmr.msra.gmra.mxu0 %v6918_v59  ;;  %v5471_v1 = vld [vmem:[#allocation8 + $0x700] sm:$0xff]  ;;  %v2628_v50 = vadd.f32 %v7432_v42, %v2608_v57  ;;  %v3328_v42 = vadd.f32 %v7516_v26, %v3308_v48 }
 0x5c9   :  { %v2129_v8 = vld [vmem:[#allocation5 + $0x3d38] sm:$0xff]  ;;  %5185 = vmatpush.msra.mxu2 %v1789_v18  ;;  %5887 = vmatpush.msrb.mxu0 %v5367_v30  ;;  %v5615_v18 = vld [vmem:[#allocation8 + $0xb80] sm:$0xff]  ;;  %v4748_v30 = vadd.f32 %v4747_v13, %v4728_v49  ;;  %v3208_v33 = vadd.f32 %v7503_v53, %v3188_v46  ;;  %v3908_v13 = vadd.f32 %v7589_v44, %v3888_v29 }
 0x5ca   :  { %5204 = vmatpush.msra.mxu3 %v2129_v8  ;;  %v2109_v19 = vld [vmem:[#allocation5 + $0x3c98] sm:$0xff]  ;;  %5186 = vmatmul.f32.vlgmr.msra.gmra.mxu2 %v6919_v36  ;;  %v4608_v8 = vadd.f32 %v7687_v17, %v4588_v45  ;;  %v5335_v38 = vld [vmem:[#allocation8 + $0x2c0] sm:$0xff]  ;;  %v2648_v17 = vadd.f32 %v7436_v41, %v2628_v50  ;;  %v3348_v41 = vadd.f32 %v7518_v39, %v3328_v42 }
 0x5cb   :  { %5907 = vmatpush.msrb.mxu1 %v5495_v15  ;;  %5927 = vmatpush.msrb.mxu2 %v5623_v56  ;;  %v5463_v34 = vld [vmem:[#allocation8 + $0x6c0] sm:$0xff]  ;;  %v4807_v9 = vpop.f32.mrf.mxu3  ;;  %v4768_v3 = vadd.f32 %v4767_v6, %v4748_v30  ;;  %v3228_v53 = vadd.f32 %v7513_v58, %v3208_v33  ;;  %v7958_v21 = vld [vmem:[#allocation72_spill] sm:$0xff]  ;;  %v7961_v43 = vld [vmem:[#allocation45_spill] sm:$0xff] }
 0x5cc   :  { %5205 = vmatpush.msra.mxu3 %v2109_v19  ;;  %5166 = vmatmul.f32.vlgmr.msra.gmra.mxu1 %v6920_v55  ;;  %v5591_v15 = vld [vmem:[#allocation8 + $0xac0] sm:$0xff]  ;;  %v4828_v37 = vadd.f32 %v4827_v61, %v4807_v9  ;;  %v4628_v40 = vadd.f32 %v7690_v11, %v4608_v8  ;;  %v4847_v56 = vpop.f32.mrf.mxu1  ;;  %v7960_v48 = vld [vmem:[#allocation48_spill] sm:$0xff] }
 0x5cd   :  { %5206 = vmatmul.f32.vlgmr.msra.gmra.mxu3 %v7676_v24  ;;  %5888 = vmatpush.msrb.mxu0 %v5359_v14  ;;  %v4028_v24 = vadd.f32 %v7610_v47, %v4008_v22  ;;  %v3448_v47 = vadd.f32 %v7534_v27, %v3428_v51  ;;  %v5327_v28 = vld [vmem:[#allocation8 + $0x280] sm:$0xff]  ;;  %v2748_v27 = vadd.f32 %v7454_v52, %v2728_v25  ;;  %v4867_v58 = vpop.f32.mrf.mxu2  ;;  %v7964_v8 = vld [vmem:[#allocation68_spill] sm:$0xff] }
 0x5ce   :  { %5908 = vmatpush.msrb.mxu1 %v5487_v7  ;;  %5928 = vmatpush.msrb.mxu2 %v5615_v18  ;;  %v5455_v2 = vld [vmem:[#allocation8 + $0x680] sm:$0xff]  ;;  %v2528_v52 = vadd.f32 %v7428_v31, %v2508_v32  ;;  %v4848_v57 = vadd.f32 %v4847_v56, %v4828_v37  ;;  %v7957_v18 = vld [vmem:[#allocation65_spill] sm:$0xff]  ;;  %v4648_v31 = vadd.f32 %v7958_v21, %v4628_v40  ;;  %v7965_v61 = vld [vmem:[#allocation24_spill] sm:$0xff] }
 0x5cf   :  { %5889 = vmatpush.msrb.mxu0 %v5351_v16  ;;  %v4048_v20 = vadd.f32 %v7612_v10, %v4028_v24  ;;  %v5583_v26 = vld [vmem:[#allocation8 + $0xa80] sm:$0xff]  ;;  %v3468_v10 = vadd.f32 %v7538_v4, %v3448_v47  ;;  %v7956_v4 = vld [vmem:[#allocation28_spill] sm:$0xff]  ;;  %v3928_v23 = vadd.f32 %v7957_v18, %v3908_v13  ;;  %v4788_v49 = vadd.f32 %v4787_v63, %v4768_v3  ;;  %v7968_v37 = vld [vmem:[#allocation49_spill] sm:$0xff] }
 0x5d0   :  { %5909 = vmatpush.msrb.mxu1 %v5479_v12  ;;  %5929 = vmatpush.msrb.mxu2 %v5607_v0  ;;  %v5319_v19 = vld [vmem:[#allocation8 + $0x240] sm:$0xff]  ;;  %v2768_v22 = vadd.f32 %v7956_v4, %v2748_v27  ;;  %v2548_v42 = vadd.f32 %v7965_v61, %v2528_v52  ;;  %v7756_v27 = vld [vmem:[#allocation7] sm:$0x1f] }
 0x5d1   :  { %5890 = vmatpush.msrb.mxu0 %v5343_v35  ;;  %v5447_v62 = vld [vmem:[#allocation8 + $0x640] sm:$0xff]  ;;  %v3488_v51 = vadd.f32 %v7960_v48, %v3468_v10  ;;  %v3248_v35 = vadd.f32 %v7961_v43, %v3228_v53 }
 0x5d2   :  { %5910 = vmatpush.msrb.mxu1 %v5471_v1  ;;  %5930 = vmatpush.msrb.mxu2 %v5599_v5  ;;  %v5575_v59 = vld [vmem:[#allocation8 + $0xa40] sm:$0xff] }
 0x5d3   :  { %5891 = vmatpush.msrb.mxu0 %v5335_v38  ;;  %v5311_v44 = vld [vmem:[#allocation8 + $0x200] sm:$0xff]  ;;  %v4887_v32 = vpop.f32.mrf.mxu3  ;;  %v5210_v40 = vmax.f32 %v2548_v42, %v3248_v35  ;;  %v7972_v35 = vld [vmem:[#allocation69_spill] sm:$0xff] }
 0x5d4   :  { %5911 = vmatpush.msrb.mxu1 %v5463_v34  ;;  %5931 = vmatpush.msrb.mxu2 %v5591_v15  ;;  %v5439_v36 = vld [vmem:[#allocation8 + $0x600] sm:$0xff]  ;;  %v4868_v34 = vadd.f32 %v4867_v58, %v4848_v57  ;;  %v4927_v21 = vpop.f32.mrf.mxu1  ;;  %v7971_v58 = vld [vmem:[#allocation33_spill] sm:$0xff] }
 0x5d5   :  { %5892 = vmatpush.msrb.mxu0 %v5327_v28  ;;  %v5751_v11 = vld [vmem:[#allocation8 + $0xfc0] sm:$0xff] }
 0x5d6   :  { %5912 = vmatpush.msrb.mxu1 %v5455_v2  ;;  %5932 = vmatpush.msrb.mxu2 %v5583_v26  ;;  %v7954_v54 = vld [vmem:[#allocation26_spill] sm:$0xff]  ;;  %v7955_v14 = vld [vmem:[#allocation67_spill] sm:$0xff]  ;;  %v3508_v26 = vadd.f32 %v7968_v37, %v3488_v51  ;;  %v4888_v10 = vadd.f32 %v4887_v32, %v4868_v34 }
 0x5d7   :  { %v2668_v60 = vadd.f32 %v7954_v54, %v2648_v17  ;;  %v4068_v7 = vadd.f32 %v7955_v14, %v4048_v20  ;;  %5893 = vmatpush.msrb.mxu0 %v5319_v19  ;;  %v5567_v39 = vld [vmem:[#allocation8 + $0xa00] sm:$0xff]  ;;  %5947 = vmatpush.msrb.mxu3 %v5751_v11  ;;  %v7967_v17 = vld [vmem:[#allocation25_spill] sm:$0xff]  ;;  %v4907_v54 = vpop.f32.mrf.mxu0  ;;  %v5480_v32 = vld [vmem:[#allocation8 + $0x748] sm:$0xff] }
 0x5d8   :  { %5913 = vmatpush.msrb.mxu1 %v5447_v62  ;;  %5933 = vmatpush.msrb.mxu2 %v5575_v59  ;;  %v5303_v45 = vld [vmem:[#allocation8 + $0x1c0] sm:$0xff]  ;;  %v7969_v59 = vld [vmem:[#allocation29_spill] sm:$0xff]  ;;  %v5464_v37 = vld [vmem:[#allocation8 + $0x6c8] sm:$0xff] }
 0x5d9   :  { %v5431_v6 = vld [vmem:[#allocation8 + $0x5c0] sm:$0xff]  ;;  %5894 = vmatpush.msrb.mxu0 %v5311_v44  ;;  %v4088_v38 = vadd.f32 %v7964_v8, %v4068_v7  ;;  %v2688_v20 = vadd.f32 %v7967_v17, %v2668_v60  ;;  %v5227_v44 = vperm.slane %v7756_v27, 0 }
 0x5da   :  { %v5743_v55 = vld [vmem:[#allocation8 + $0xf80] sm:$0xff]  ;;  %5914 = vmatpush.msrb.mxu1 %v5439_v36  ;;  %5934 = vmatpush.msrb.mxu2 %v5567_v39  ;;  %v5228_v39 = vperm.slane %v7756_v27, 1 }
 0x5db   :  { %v7959_v16 = vld [vmem:[#allocation46_spill] sm:$0xff]  ;;  %5948 = vmatpush.msrb.mxu3 %v5743_v55  ;;  %v7963_v46 = vld [vmem:[#allocation47_spill] sm:$0xff]  ;;  %5895 = vmatpush.msrb.mxu0 %v5303_v45  ;;  %v5216_v33 = vmax.f32 %v4088_v38, %v4788_v49 }
 0x5dc   :  { %v3368_v12 = vadd.f32 %v7959_v16, %v3348_v41  ;;  %v5559_v0 = vld [vmem:[#allocation8 + $0x9c0] sm:$0xff]  ;;  %5915 = vmatpush.msrb.mxu1 %v5431_v6  ;;  %v5496_v38 = vld [vmem:[#allocation8 + $0x7c8] sm:$0xff] }
 0x5dd   :  { %v7962_v1 = vld [vmem:[#allocation66_spill] sm:$0xff]  ;;  %v7966_v47 = vld [vmem:[#allocation27_spill] sm:$0xff]  ;;  %5935 = vmatpush.msrb.mxu2 %v5559_v0 }
 0x5de   :  { %v3948_v50 = vadd.f32 %v7962_v1, %v3928_v23  ;;  %v5295_v24 = vld [vmem:[#allocation8 + $0x180] sm:$0xff]  ;;  %v3388_v29 = vadd.f32 %v7963_v46, %v3368_v12  ;;  %v2788_v30 = vadd.f32 %v7966_v47, %v2768_v22  ;;  %v4908_v22 = vadd.f32 %v4907_v54, %v4888_v10  ;;  %v5488_v47 = vld [vmem:[#allocation8 + $0x788] sm:$0xff] }
 0x5df   :  { %v5423_v5 = vld [vmem:[#allocation8 + $0x580] sm:$0xff]  ;;  %5896 = vmatpush.msrb.mxu0 %v5295_v24  ;;  %v5440_v10 = vld [vmem:[#allocation8 + $0x608] sm:$0xff] }
 0x5e0   :  { %v5735_v25 = vld [vmem:[#allocation8 + $0xf40] sm:$0xff]  ;;  %v5215_v15 = vmax.f32 %v3948_v50, %v4648_v31  ;;  %5916 = vmatpush.msrb.mxu1 %v5423_v5  ;;  %v5211_v41 = vmax.f32 %v2688_v20, %v3388_v29  ;;  %v2808_v52 = vadd.f32 %v7969_v59, %v2788_v30  ;;  %v4928_v55 = vadd.f32 %v4927_v21, %v4908_v22  ;;  %v5360_v30 = vld [vmem:[#allocation8 + $0x388] sm:$0xff] }
 0x5e1   :  { %v5551_v63 = vld [vmem:[#allocation8 + $0x980] sm:$0xff]  ;;  %5949 = vmatpush.msrb.mxu3 %v5735_v25  ;;  %v5229_v50 = vperm.slane %v7756_v27, 2  ;;  %v5344_v20 = vld [vmem:[#allocation8 + $0x308] sm:$0xff] }
 0x5e2   :  { %v5287_v9 = vld [vmem:[#allocation8 + $0x140] sm:$0xff]  ;;  %5936 = vmatpush.msrb.mxu2 %v5551_v63  ;;  %v5220_v53 = vmax.f32 %v5210_v40, %v5215_v15  ;;  %v5221_v57 = vmax.f32 %v5211_v41, %v5216_v33  ;;  %v2828_v45 = vadd.f32 %v7971_v58, %v2808_v52  ;;  %v5217_v1 = vmax.f32 %v7972_v35, %v4928_v55  ;;  %v5368_v63 = vld [vmem:[#allocation8 + $0x3c8] sm:$0xff] }
 0x5e3   :  { %v5415_v28 = vld [vmem:[#allocation8 + $0x540] sm:$0xff]  ;;  %5897 = vmatpush.msrb.mxu0 %v5287_v9  ;;  %v5336_v33 = vld [vmem:[#allocation8 + $0x2c8] sm:$0xff] }
 0x5e4   :  { %v5727_v2 = vld [vmem:[#allocation8 + $0xf00] sm:$0xff]  ;;  %5917 = vmatpush.msrb.mxu1 %v5415_v28  ;;  %v5237_v16 = vadd.f32 %v5227_v44, %v5220_v53  ;;  %v5238_v0 = vadd.f32 %v5228_v39, %v5221_v57  ;;  %v5352_v28 = vld [vmem:[#allocation8 + $0x348] sm:$0xff] }
 0x5e5   :  { %v5543_v13 = vld [vmem:[#allocation8 + $0x940] sm:$0xff]  ;;  %5950 = vmatpush.msrb.mxu3 %v5727_v2  ;;  %v5472_v2 = vld [vmem:[#allocation8 + $0x708] sm:$0xff] }
 0x5e6   :  { %v5279_v56 = vld [vmem:[#allocation8 + $0x100] sm:$0xff]  ;;  %5937 = vmatpush.msrb.mxu2 %v5543_v13  ;;  %v7765_v8 = vmax.f32 %v5237_v16, 0.0  ;;  %v7767_v34 = vmax.f32 %v5238_v0, 0.0  ;;  %v5456_v13 = vld [vmem:[#allocation8 + $0x688] sm:$0xff] }
 0x5e7   :  { %v5407_v19 = vld [vmem:[#allocation8 + $0x500] sm:$0xff]  ;;  %5898 = vmatpush.msrb.mxu0 %v5279_v56  ;;  %v5328_v56 = vld [vmem:[#allocation8 + $0x288] sm:$0xff] }
 0x5e8   :  { %v5719_v62 = vld [vmem:[#allocation8 + $0xec0] sm:$0xff]  ;;  %5918 = vmatpush.msrb.mxu1 %v5407_v19  ;;  %v5448_v19 = vld [vmem:[#allocation8 + $0x648] sm:$0xff] }
 0x5e9   :  { %v5535_v3 = vld [vmem:[#allocation8 + $0x900] sm:$0xff]  ;;  %5951 = vmatpush.msrb.mxu3 %v5719_v62  ;;  %v5320_v41 = vld [vmem:[#allocation8 + $0x248] sm:$0xff] }
 0x5ea   :  { %v5271_v36 = vld [vmem:[#allocation8 + $0xc0] sm:$0xff]  ;;  %5938 = vmatpush.msrb.mxu2 %v5535_v3  ;;  %v5312_v59 = vld [vmem:[#allocation8 + $0x208] sm:$0xff] }
 0x5eb   :  { %v5399_v11 = vld [vmem:[#allocation8 + $0x4c0] sm:$0xff]  ;;  %5899 = vmatpush.msrb.mxu0 %v5271_v36  ;;  %v5624_v52 = vld [vmem:[#allocation8 + $0xbc8] sm:$0xff] }
 0x5ec   :  { %v5711_v60 = vld [vmem:[#allocation8 + $0xe80] sm:$0xff]  ;;  %5919 = vmatpush.msrb.mxu1 %v5399_v11  ;;  %v5432_v53 = vld [vmem:[#allocation8 + $0x5c8] sm:$0xff] }
 0x5ed   :  { %v7970_v14 = vld [vmem:[#allocation50_spill] sm:$0xff]  ;;  %5952 = vmatpush.msrb.mxu3 %v5711_v60  ;;  %v5304_v44 = vld [vmem:[#allocation8 + $0x1c8] sm:$0xff] }
 0x5ee   :  { %v3528_v7 = vadd.f32 %v7970_v14, %v3508_v26  ;;  %v5527_v4 = vld [vmem:[#allocation8 + $0x8c0] sm:$0xff]  ;;  %v5616_v36 = vld [vmem:[#allocation8 + $0xb88] sm:$0xff] }
 0x5ef   :  { %v5263_v18 = vld [vmem:[#allocation8 + $0x80] sm:$0xff]  ;;  %5939 = vmatpush.msrb.mxu2 %v5527_v4  ;;  %v5424_v11 = vld [vmem:[#allocation8 + $0x588] sm:$0xff] }
 0x5f0   :  { %v5391_v23 = vld [vmem:[#allocation8 + $0x480] sm:$0xff]  ;;  %v5212_v49 = vmax.f32 %v2828_v45, %v3528_v7  ;;  %5900 = vmatpush.msrb.mxu0 %v5263_v18  ;;  %v5296_v54 = vld [vmem:[#allocation8 + $0x188] sm:$0xff] }
 0x5f1   :  { %v5703_v31 = vld [vmem:[#allocation8 + $0xe40] sm:$0xff]  ;;  %5920 = vmatpush.msrb.mxu1 %v5391_v23  ;;  %v5608_v60 = vld [vmem:[#allocation8 + $0xb48] sm:$0xff] }
 0x5f2   :  { %v5519_v6 = vld [vmem:[#allocation8 + $0x880] sm:$0xff]  ;;  %5953 = vmatpush.msrb.mxu3 %v5703_v31  ;;  %v5222_v29 = vmax.f32 %v5212_v49, %v5217_v1  ;;  %v5416_v14 = vld [vmem:[#allocation8 + $0x548] sm:$0xff] }
 0x5f3   :  { %v5255_v12 = vld [vmem:[#allocation8 + $0x40] sm:$0xff]  ;;  %5940 = vmatpush.msrb.mxu2 %v5519_v6  ;;  %v5288_v7 = vld [vmem:[#allocation8 + $0x148] sm:$0xff] }
 0x5f4   :  { %v5383_v48 = vld [vmem:[#allocation8 + $0x440] sm:$0xff]  ;;  %5901 = vmatpush.msrb.mxu0 %v5255_v12  ;;  %v5239_v61 = vadd.f32 %v5229_v50, %v5222_v29  ;;  %v5600_v57 = vld [vmem:[#allocation8 + $0xb08] sm:$0xff]  ;;  %v5369_v50 = vld [vmem:[#allocation8 + $0x3d0] sm:$0xff] }
 0x5f5   :  { %v5695_v51 = vld [vmem:[#allocation8 + $0xe00] sm:$0xff]  ;;  %5921 = vmatpush.msrb.mxu1 %v5383_v48  ;;  %v5408_v4 = vld [vmem:[#allocation8 + $0x508] sm:$0xff] }
 0x5f6   :  { %v5511_v43 = vld [vmem:[#allocation8 + $0x840] sm:$0xff]  ;;  %5954 = vmatpush.msrb.mxu3 %v5695_v51  ;;  %v7771_v15 = vmax.f32 %v5239_v61, 0.0  ;;  %v5280_v22 = vld [vmem:[#allocation8 + $0x108] sm:$0xff] }
 0x5f7   :  { %v5247_v24 = vld [vmem:[#allocation8] sm:$0xff]  ;;  %5941 = vmatpush.msrb.mxu2 %v5511_v43  ;;  %v5592_v18 = vld [vmem:[#allocation8 + $0xac8] sm:$0xff] }
 0x5f8   :  { %v5375_v5 = vld [vmem:[#allocation8 + $0x400] sm:$0xff]  ;;  %5902 = vmatpush.msrb.mxu0 %v5247_v24  ;;  %v5400_v21 = vld [vmem:[#allocation8 + $0x4c8] sm:$0xff] }
 0x5f9   :  { %v5687_v25 = vld [vmem:[#allocation8 + $0xdc0] sm:$0xff]  ;;  %5922 = vmatpush.msrb.mxu1 %v5375_v5  ;;  %5903 = vmatmul.f32.vlgmr.msrb.gmra.mxu0 %v7765_v8  ;;  %v5272_v31 = vld [vmem:[#allocation8 + $0xc8] sm:$0xff] }
 0x5fa   :  { %v5503_v46 = vld [vmem:[#allocation8 + $0x800] sm:$0xff]  ;;  %5955 = vmatpush.msrb.mxu3 %v5687_v25  ;;  %5923 = vmatmul.f32.vlgmr.msrb.gmra.mxu1 %v7767_v34  ;;  %v5584_v58 = vld [vmem:[#allocation8 + $0xa88] sm:$0xff]  ;;  %v5361_v25 = vld [vmem:[#allocation8 + $0x390] sm:$0xff] }
 0x5fb   :  { %v5679_v42 = vld [vmem:[#allocation8 + $0xd80] sm:$0xff]  ;;  %5942 = vmatpush.msrb.mxu2 %v5503_v46  ;;  %5987 = vmatpush.msra.mxu1 %v5368_v63  ;;  %v5392_v6 = vld [vmem:[#allocation8 + $0x488] sm:$0xff]  ;;  %v5353_v63 = vld [vmem:[#allocation8 + $0x350] sm:$0xff] }
 0x5fc   :  { %5956 = vmatpush.msrb.mxu3 %v5679_v42  ;;  %v5671_v9 = vld [vmem:[#allocation8 + $0xd40] sm:$0xff]  ;;  %5943 = vmatmul.f32.vlgmr.msrb.gmra.mxu2 %v7771_v15  ;;  %v5264_v55 = vld [vmem:[#allocation8 + $0x88] sm:$0xff] }
 0x5fd   :  { %6007 = vmatpush.msra.mxu2 %v5496_v38  ;;  %5988 = vmatpush.msra.mxu1 %v5360_v30  ;;  %v5663_v17 = vld [vmem:[#allocation8 + $0xd00] sm:$0xff]  ;;  %v5576_v16 = vld [vmem:[#allocation8 + $0xa48] sm:$0xff]  ;;  %v5345_v30 = vld [vmem:[#allocation8 + $0x310] sm:$0xff] }
 0x5fe   :  { %5957 = vmatpush.msrb.mxu3 %v5671_v9  ;;  %v5655_v26 = vld [vmem:[#allocation8 + $0xcc0] sm:$0xff]  ;;  %v5384_v48 = vld [vmem:[#allocation8 + $0x448] sm:$0xff] }
 0x5ff   :  { %6008 = vmatpush.msra.mxu2 %v5488_v47  ;;  %5989 = vmatpush.msra.mxu1 %v5352_v28  ;;  %v5647_v40 = vld [vmem:[#allocation8 + $0xc80] sm:$0xff]  ;;  %v5256_v51 = vld [vmem:[#allocation8 + $0x48] sm:$0xff] }
 0x600   :  { %5958 = vmatpush.msrb.mxu3 %v5663_v17  ;;  %v5639_v62 = vld [vmem:[#allocation8 + $0xc40] sm:$0xff]  ;;  %v5568_v49 = vld [vmem:[#allocation8 + $0xa08] sm:$0xff] }
 0x601   :  { %6009 = vmatpush.msra.mxu2 %v5480_v32  ;;  %5990 = vmatpush.msra.mxu1 %v5344_v20  ;;  %v5631_v3 = vld [vmem:[#allocation8 + $0xc00] sm:$0xff]  ;;  %v5376_v43 = vld [vmem:[#allocation8 + $0x408] sm:$0xff] }
 0x602   :  { %5959 = vmatpush.msrb.mxu3 %v5655_v26  ;;  %v5879_v39 = vld [vmem:[#allocation8 + $0x13c0] sm:$0xff]  ;;  %v5248_v35 = vld [vmem:[#allocation8 + $0x8] sm:$0xff]  ;;  %v5337_v26 = vld [vmem:[#allocation8 + $0x2d0] sm:$0xff] }
 0x603   :  { %6010 = vmatpush.msra.mxu2 %v5472_v2  ;;  %5991 = vmatpush.msra.mxu1 %v5336_v33  ;;  %v5871_v23 = vld [vmem:[#allocation8 + $0x1380] sm:$0xff]  ;;  %v5880_v24 = vld [vmem:[#allocation8 + $0x13c8] sm:$0xff] }
 0x604   :  { %5960 = vmatpush.msrb.mxu3 %v5647_v40  ;;  %5967 = vmatpush.msra.mxu0 %v5879_v39  ;;  %v5863_v45 = vld [vmem:[#allocation8 + $0x1340] sm:$0xff]  ;;  %v5560_v5 = vld [vmem:[#allocation8 + $0x9c8] sm:$0xff] }
 0x605   :  { %6011 = vmatpush.msra.mxu2 %v5464_v37  ;;  %5992 = vmatpush.msra.mxu1 %v5328_v56  ;;  %v5855_v12 = vld [vmem:[#allocation8 + $0x1300] sm:$0xff]  ;;  %v5872_v46 = vld [vmem:[#allocation8 + $0x1388] sm:$0xff]  ;;  %v4967_v37 = vpop.f32.mrf.mxu3 }
 0x606   :  { %5961 = vmatpush.msrb.mxu3 %v5639_v62  ;;  %5968 = vmatpush.msra.mxu0 %v5871_v23  ;;  %v5847_v0 = vld [vmem:[#allocation8 + $0x12c0] sm:$0xff]  ;;  %v5552_v29 = vld [vmem:[#allocation8 + $0x988] sm:$0xff] }
 0x607   :  { %6012 = vmatpush.msra.mxu2 %v5456_v13  ;;  %5993 = vmatpush.msra.mxu1 %v5320_v41  ;;  %v5839_v1 = vld [vmem:[#allocation8 + $0x1280] sm:$0xff]  ;;  %v5864_v61 = vld [vmem:[#allocation8 + $0x1348] sm:$0xff]  ;;  %v4947_v41 = vpop.f32.mrf.mxu2 }
 0x608   :  { %5962 = vmatpush.msrb.mxu3 %v5631_v3  ;;  %5969 = vmatpush.msra.mxu0 %v5863_v45  ;;  %v5831_v38 = vld [vmem:[#allocation8 + $0x1240] sm:$0xff]  ;;  %v5544_v42 = vld [vmem:[#allocation8 + $0x948] sm:$0xff]  ;;  %v7977_v3 = vld [vmem:[#allocation53_spill] sm:$0xff]  ;;  %v5007_v45 = vpop.f32.mrf.mxu1 }
 0x609   :  { %6013 = vmatpush.msra.mxu2 %v5448_v19  ;;  %5994 = vmatpush.msra.mxu1 %v5312_v59  ;;  %v5823_v47 = vld [vmem:[#allocation8 + $0x1200] sm:$0xff]  ;;  %v7973_v32 = vld [vmem:[#allocation52_spill] sm:$0xff] }
 0x60a   :  { %6027 = vmatpush.msra.mxu3 %v5624_v52  ;;  %5970 = vmatpush.msra.mxu0 %v5855_v12  ;;  %v7974_v9 = vld [vmem:[#allocation51_spill] sm:$0xff]  ;;  %v7976_v13 = vld [vmem:[#allocation30_spill] sm:$0xff]  ;;  %v4968_v52 = vadd.f32 %v4967_v37, %v4947_v41 }
 0x60b   :  { %6014 = vmatpush.msra.mxu2 %v5440_v10  ;;  %5995 = vmatpush.msra.mxu1 %v5304_v44  ;;  %v3568_v28 = vadd.f32 %v7974_v9, %v7973_v32  ;;  %v5856_v2 = vld [vmem:[#allocation8 + $0x1308] sm:$0xff]  ;;  %v5815_v20 = vld [vmem:[#allocation8 + $0x11c0] sm:$0xff]  ;;  %v5329_v10 = vld [vmem:[#allocation8 + $0x290] sm:$0xff] }
 0x60c   :  { %6028 = vmatpush.msra.mxu3 %v5616_v36  ;;  %5971 = vmatpush.msra.mxu0 %v5847_v0  ;;  %v5536_v17 = vld [vmem:[#allocation8 + $0x908] sm:$0xff]  ;;  %v5807_v62 = vld [vmem:[#allocation8 + $0x1180] sm:$0xff] }
 0x60d   :  { %6015 = vmatpush.msra.mxu2 %v5432_v53  ;;  %5996 = vmatpush.msra.mxu1 %v5296_v54  ;;  %v7975_v33 = vld [vmem:[#allocation31_spill] sm:$0xff]  ;;  %v3588_v59 = vadd.f32 %v7977_v3, %v3568_v28  ;;  %v5321_v54 = vld [vmem:[#allocation8 + $0x250] sm:$0xff]  ;;  %v5047_v9 = vpop.f32.mrf.mxu3 }
 0x60e   :  { %6029 = vmatpush.msra.mxu3 %v5608_v60  ;;  %5972 = vmatpush.msra.mxu0 %v5839_v1  ;;  %v2868_v40 = vadd.f32 %v7976_v13, %v7975_v33  ;;  %v5848_v56 = vld [vmem:[#allocation8 + $0x12c8] sm:$0xff]  ;;  %v5799_v36 = vld [vmem:[#allocation8 + $0x1140] sm:$0xff]  ;;  %v5273_v28 = vld [vmem:[#allocation8 + $0xd0] sm:$0xff] }
 0x60f   :  { %6016 = vmatpush.msra.mxu2 %v5424_v11  ;;  %5997 = vmatpush.msra.mxu1 %v5288_v7  ;;  %v5528_v19 = vld [vmem:[#allocation8 + $0x8c8] sm:$0xff]  ;;  %v4987_v11 = vpop.f32.mrf.mxu0  ;;  %v5791_v39 = vld [vmem:[#allocation8 + $0x1100] sm:$0xff]  ;;  %v7985_v33 = vld [vmem:[#allocation57_spill] sm:$0xff] }
 0x610   :  { %6030 = vmatpush.msra.mxu3 %v5600_v57  ;;  %5973 = vmatpush.msra.mxu0 %v5831_v38  ;;  %v5840_v53 = vld [vmem:[#allocation8 + $0x1288] sm:$0xff]  ;;  %v4988_v23 = vadd.f32 %v4987_v11, %v4968_v52  ;;  %v5767_v1 = vld [vmem:[#allocation8 + $0x1040] sm:$0xff] }
 0x611   :  { %6017 = vmatpush.msra.mxu2 %v5416_v14  ;;  %5998 = vmatpush.msra.mxu1 %v5280_v22  ;;  %v5520_v44 = vld [vmem:[#allocation8 + $0x888] sm:$0xff]  ;;  %v7979_v22 = vld [vmem:[#allocation54_spill] sm:$0xff] }
 0x612   :  { %6031 = vmatpush.msra.mxu3 %v5592_v18  ;;  %5974 = vmatpush.msra.mxu0 %v5823_v47  ;;  %v7978_v60 = vld [vmem:[#allocation32_spill] sm:$0xff]  ;;  %v3608_v18 = vadd.f32 %v7979_v22, %v3588_v59  ;;  %v7987_v11 = vld [vmem:[#allocation70_spill] sm:$0xff] }
 0x613   :  { %6018 = vmatpush.msra.mxu2 %v5408_v4  ;;  %5999 = vmatpush.msra.mxu1 %v5272_v31  ;;  %v2888_v14 = vadd.f32 %v7978_v60, %v2868_v40  ;;  %v5832_v7 = vld [vmem:[#allocation8 + $0x1248] sm:$0xff]  ;;  %v5313_v4 = vld [vmem:[#allocation8 + $0x210] sm:$0xff]  ;;  %v5230_v60 = vperm.slane %v7756_v27, 3 }
 0x614   :  { %6032 = vmatpush.msra.mxu3 %v5584_v58  ;;  %5975 = vmatpush.msra.mxu0 %v5815_v20  ;;  %v5512_v57 = vld [vmem:[#allocation8 + $0x848] sm:$0xff]  ;;  %v5783_v58 = vld [vmem:[#allocation8 + $0x10c0] sm:$0xff]  ;;  %v5873_v22 = vld [vmem:[#allocation8 + $0x1390] sm:$0xff] }
 0x615   :  { %6019 = vmatpush.msra.mxu2 %v5400_v21  ;;  %6000 = vmatpush.msra.mxu1 %v5264_v55  ;;  %v5824_v21 = vld [vmem:[#allocation8 + $0x1208] sm:$0xff]  ;;  %v7980_v55 = vld [vmem:[#allocation37_spill] sm:$0xff] }
 0x616   :  { %6033 = vmatpush.msra.mxu3 %v5576_v16  ;;  %5976 = vmatpush.msra.mxu0 %v5807_v62  ;;  %v5504_v31 = vld [vmem:[#allocation8 + $0x808] sm:$0xff]  ;;  %v2908_v16 = vadd.f32 %v7980_v55, %v2888_v14  ;;  %v5257_v62 = vld [vmem:[#allocation8 + $0x50] sm:$0xff] }
 0x617   :  { %6020 = vmatpush.msra.mxu2 %v5392_v6  ;;  %6001 = vmatpush.msra.mxu1 %v5256_v51  ;;  %v5305_v6 = vld [vmem:[#allocation8 + $0x1d0] sm:$0xff]  ;;  %v5816_v12 = vld [vmem:[#allocation8 + $0x11c8] sm:$0xff]  ;;  %v5067_v41 = vpop.f32.mrf.mxu0 }
 0x618   :  { %6034 = vmatpush.msra.mxu3 %v5568_v49  ;;  %5977 = vmatpush.msra.mxu0 %v5799_v36  ;;  %v5297_v51 = vld [vmem:[#allocation8 + $0x190] sm:$0xff]  ;;  %v5752_v38 = vld [vmem:[#allocation8 + $0xfc8] sm:$0xff] }
 0x619   :  { %6021 = vmatpush.msra.mxu2 %v5384_v48  ;;  %6002 = vmatpush.msra.mxu1 %v5248_v35  ;;  %v5775_v48 = vld [vmem:[#allocation8 + $0x1080] sm:$0xff]  ;;  %v7981_v49 = vld [vmem:[#allocation56_spill] sm:$0xff] }
 0x61a   :  { %6003 = vmatmul.f32.vlgmr.msra.gmra.mxu1 %v7765_v8  ;;  %6035 = vmatpush.msra.mxu3 %v5560_v5  ;;  %v3628_v0 = vadd.f32 %v7981_v49, %v3608_v18  ;;  %v5808_v35 = vld [vmem:[#allocation8 + $0x1188] sm:$0xff]  ;;  %v5745_v18 = vld [vmem:[#allocation8 + $0xf90] sm:$0xff] }
 0x61b   :  { %6022 = vmatpush.msra.mxu2 %v5376_v43  ;;  %6067 = vmatpush.msrb.mxu1 %v5880_v24  ;;  %v5008_v43 = vadd.f32 %v5007_v45, %v4988_v23  ;;  %v5289_v24 = vld [vmem:[#allocation8 + $0x150] sm:$0xff]  ;;  %v7982_v5 = vld [vmem:[#allocation35_spill] sm:$0xff] }
 0x61c   :  { %6023 = vmatmul.f32.vlgmr.msra.gmra.mxu2 %v7767_v34  ;;  %6036 = vmatpush.msra.mxu3 %v5552_v29  ;;  %v5759_v29 = vld [vmem:[#allocation8 + $0x1000] sm:$0xff]  ;;  %v5744_v32 = vld [vmem:[#allocation8 + $0xf88] sm:$0xff]  ;;  %v5497_v45 = vld [vmem:[#allocation8 + $0x7d0] sm:$0xff] }
 0x61d   :  { %6087 = vmatpush.msrb.mxu2 %v5369_v50  ;;  %6068 = vmatpush.msrb.mxu1 %v5872_v46  ;;  %v5027_v50 = vpop.f32.mrf.mxu2  ;;  %v5800_v46 = vld [vmem:[#allocation8 + $0x1148] sm:$0xff]  ;;  %v5857_v55 = vld [vmem:[#allocation8 + $0x1310] sm:$0xff] }
 0x61e   :  { %6037 = vmatpush.msra.mxu3 %v5544_v42  ;;  %5978 = vmatpush.msra.mxu0 %v5791_v39  ;;  %v5028_v47 = vadd.f32 %v5027_v50, %v5008_v43  ;;  %v5784_v20 = vld [vmem:[#allocation8 + $0x10c8] sm:$0xff]  ;;  %v5721_v43 = vld [vmem:[#allocation8 + $0xed0] sm:$0xff] }
 0x61f   :  { %6088 = vmatpush.msrb.mxu2 %v5361_v25  ;;  %6069 = vmatpush.msrb.mxu1 %v5864_v61  ;;  %v2928_v25 = vadd.f32 %v7982_v5, %v2908_v16  ;;  %v7983_v61 = vld [vmem:[#allocation55_spill] sm:$0xff]  ;;  %v5473_v50 = vld [vmem:[#allocation8 + $0x710] sm:$0xff] }
 0x620   :  { %6038 = vmatpush.msra.mxu3 %v5536_v17  ;;  %5979 = vmatpush.msra.mxu0 %v5783_v58  ;;  %v3648_v42 = vadd.f32 %v7983_v61, %v3628_v0  ;;  %v5736_v37 = vld [vmem:[#allocation8 + $0xf48] sm:$0xff]  ;;  %v5048_v40 = vadd.f32 %v5047_v9, %v5028_v47  ;;  %v5481_v0 = vld [vmem:[#allocation8 + $0x750] sm:$0xff] }
 0x621   :  { %6089 = vmatpush.msrb.mxu2 %v5353_v63  ;;  %6070 = vmatpush.msrb.mxu1 %v5856_v2  ;;  %v5281_v63 = vld [vmem:[#allocation8 + $0x110] sm:$0xff]  ;;  %v7984_v2 = vld [vmem:[#allocation34_spill] sm:$0xff]  ;;  %v5768_v52 = vld [vmem:[#allocation8 + $0x1048] sm:$0xff] }
 0x622   :  { %6039 = vmatpush.msra.mxu3 %v5528_v19  ;;  %5980 = vmatpush.msra.mxu0 %v5775_v48  ;;  %v2948_v17 = vadd.f32 %v7984_v2, %v2928_v25  ;;  %v3668_v13 = vadd.f32 %v7985_v33, %v3648_v42  ;;  %v5728_v19 = vld [vmem:[#allocation8 + $0xf08] sm:$0xff]  ;;  %v5068_v59 = vadd.f32 %v5067_v41, %v5048_v40  ;;  %v5729_v48 = vld [vmem:[#allocation8 + $0xf10] sm:$0xff]  ;;  %v7990_v33 = vld [vmem:[#allocation58_spill] sm:$0xff] }
 0x623   :  { %6090 = vmatpush.msrb.mxu2 %v5345_v30  ;;  %6071 = vmatpush.msrb.mxu1 %v5848_v56  ;;  %v5792_v30 = vld [vmem:[#allocation8 + $0x1108] sm:$0xff]  ;;  %v5833_v5 = vld [vmem:[#allocation8 + $0x1250] sm:$0xff] }
 0x624   :  { %6040 = vmatpush.msra.mxu3 %v5520_v44  ;;  %5981 = vmatpush.msra.mxu0 %v5767_v1  ;;  %v5776_v56 = vld [vmem:[#allocation8 + $0x1088] sm:$0xff]  ;;  %v5249_v44 = vld [vmem:[#allocation8 + $0x10] sm:$0xff] }
 0x625   :  { %6091 = vmatpush.msrb.mxu2 %v5337_v26  ;;  %6072 = vmatpush.msrb.mxu1 %v5840_v53  ;;  %v5265_v26 = vld [vmem:[#allocation8 + $0x90] sm:$0xff]  ;;  %v5720_v53 = vld [vmem:[#allocation8 + $0xec8] sm:$0xff] }
 0x626   :  { %6041 = vmatpush.msra.mxu3 %v5512_v57  ;;  %5982 = vmatpush.msra.mxu0 %v5759_v29  ;;  %v5760_v14 = vld [vmem:[#allocation8 + $0x1008] sm:$0xff]  ;;  %v5753_v57 = vld [vmem:[#allocation8 + $0xfd0] sm:$0xff] }
 0x627   :  { %6092 = vmatpush.msrb.mxu2 %v5329_v10  ;;  %6073 = vmatpush.msrb.mxu1 %v5832_v7  ;;  %v7986_v10 = vld [vmem:[#allocation36_spill] sm:$0xff] }
 0x628   :  { %6042 = vmatpush.msra.mxu3 %v5504_v31  ;;  %6047 = vmatpush.msrb.mxu0 %v5752_v38  ;;  %v2968_v3 = vadd.f32 %v7986_v10, %v2948_v17  ;;  %v5881_v7 = vld [vmem:[#allocation8 + $0x13d0] sm:$0xff]  ;;  %v5696_v16 = vld [vmem:[#allocation8 + $0xe08] sm:$0xff] }
 0x629   :  { %6093 = vmatpush.msrb.mxu2 %v5321_v54  ;;  %6074 = vmatpush.msrb.mxu1 %v5824_v21  ;;  %v5218_v54 = vmax.f32 %v7987_v11, %v5068_v59  ;;  %v5704_v21 = vld [vmem:[#allocation8 + $0xe48] sm:$0xff]  ;;  %v5865_v31 = vld [vmem:[#allocation8 + $0x1350] sm:$0xff] }
 0x62a   :  { %6048 = vmatpush.msrb.mxu0 %v5744_v32  ;;  %v5213_v36 = vmax.f32 %v2968_v3, %v3668_v13  ;;  %v5688_v49 = vld [vmem:[#allocation8 + $0xdc8] sm:$0xff]  ;;  %v5465_v25 = vld [vmem:[#allocation8 + $0x6d0] sm:$0xff] }
 0x62b   :  { %6094 = vmatpush.msrb.mxu2 %v5313_v4  ;;  %6075 = vmatpush.msrb.mxu1 %v5816_v12  ;;  %v5712_v4 = vld [vmem:[#allocation8 + $0xe88] sm:$0xff]  ;;  %v5489_v12 = vld [vmem:[#allocation8 + $0x790] sm:$0xff] }
 0x62c   :  { %6049 = vmatpush.msrb.mxu0 %v5736_v37  ;;  %v5223_v39 = vmax.f32 %v5213_v36, %v5218_v54  ;;  %v5680_v1 = vld [vmem:[#allocation8 + $0xd88] sm:$0xff]  ;;  %v5825_v29 = vld [vmem:[#allocation8 + $0x1210] sm:$0xff] }
 0x62d   :  { %6095 = vmatpush.msrb.mxu2 %v5305_v6  ;;  %6076 = vmatpush.msrb.mxu1 %v5808_v35  ;;  %v5737_v6 = vld [vmem:[#allocation8 + $0xf50] sm:$0xff]  ;;  %v5672_v38 = vld [vmem:[#allocation8 + $0xd48] sm:$0xff] }
 0x62e   :  { %6050 = vmatpush.msrb.mxu0 %v5728_v19  ;;  %v5240_v23 = vadd.f32 %v5230_v60, %v5223_v39  ;;  %v5841_v35 = vld [vmem:[#allocation8 + $0x1290] sm:$0xff]  ;;  %v5664_v47 = vld [vmem:[#allocation8 + $0xd08] sm:$0xff] }
 0x62f   :  { %6096 = vmatpush.msrb.mxu2 %v5297_v51  ;;  %6077 = vmatpush.msrb.mxu1 %v5800_v46  ;;  %v5849_v51 = vld [vmem:[#allocation8 + $0x12d0] sm:$0xff]  ;;  %v7989_v37 = vld [vmem:[#allocation39_spill] sm:$0xff] }
 0x630   :  { %6051 = vmatpush.msrb.mxu0 %v5720_v53  ;;  %v7793_v58 = vmax.f32 %v5240_v23, 0.0  ;;  %v5705_v46 = vld [vmem:[#allocation8 + $0xe50] sm:$0xff]  ;;  %v5648_v19 = vld [vmem:[#allocation8 + $0xc88] sm:$0xff] }
 0x631   :  { %6097 = vmatpush.msrb.mxu2 %v5289_v24  ;;  %6078 = vmatpush.msrb.mxu1 %v5792_v30  ;;  %v5713_v24 = vld [vmem:[#allocation8 + $0xe90] sm:$0xff]  ;;  %v5640_v3 = vld [vmem:[#allocation8 + $0xc48] sm:$0xff] }
 0x632   :  { %6052 = vmatpush.msrb.mxu0 %v5712_v4  ;;  %5963 = vmatmul.f32.vlgmr.msrb.gmra.mxu3 %v7793_v58  ;;  %v5697_v61 = vld [vmem:[#allocation8 + $0xe10] sm:$0xff]  ;;  %v7993_v11 = vld [vmem:[#allocation59_spill] sm:$0xff] }
 0x633   :  { %6098 = vmatpush.msrb.mxu2 %v5281_v63  ;;  %6079 = vmatpush.msrb.mxu1 %v5784_v20  ;;  %v5457_v63 = vld [vmem:[#allocation8 + $0x690] sm:$0xff] }
 0x634   :  { %6053 = vmatpush.msrb.mxu0 %v5704_v21  ;;  %6107 = vmatpush.msrb.mxu3 %v5497_v45  ;;  %v5817_v42 = vld [vmem:[#allocation8 + $0x11d0] sm:$0xff] }
 0x635   :  { %6099 = vmatpush.msrb.mxu2 %v5273_v28  ;;  %6080 = vmatpush.msrb.mxu1 %v5776_v56  ;;  %v5449_v30 = vld [vmem:[#allocation8 + $0x650] sm:$0xff]  ;;  %v5656_v28 = vld [vmem:[#allocation8 + $0xcc8] sm:$0xff] }
 0x636   :  { %6054 = vmatpush.msrb.mxu0 %v5696_v16  ;;  %6108 = vmatpush.msrb.mxu3 %v5489_v12  ;;  %v5689_v32 = vld [vmem:[#allocation8 + $0xdd0] sm:$0xff] }
 0x637   :  { %6100 = vmatpush.msrb.mxu2 %v5265_v26  ;;  %6081 = vmatpush.msrb.mxu1 %v5768_v52  ;;  %v5809_v9 = vld [vmem:[#allocation8 + $0x1190] sm:$0xff]  ;;  %v5087_v59 = vpop.f32.mrf.mxu1 }
 0x638   :  { %6055 = vmatpush.msrb.mxu0 %v5688_v49  ;;  %6109 = vmatpush.msrb.mxu3 %v5481_v0  ;;  %v5441_v2 = vld [vmem:[#allocation8 + $0x610] sm:$0xff] }
 0x639   :  { %6101 = vmatpush.msrb.mxu2 %v5257_v62  ;;  %6082 = vmatpush.msrb.mxu1 %v5760_v14  ;;  %v5681_v17 = vld [vmem:[#allocation8 + $0xd90] sm:$0xff]  ;;  %v5107_v14 = vpop.f32.mrf.mxu2 }
 0x63a   :  { %6056 = vmatpush.msrb.mxu0 %v5680_v1  ;;  %6110 = vmatpush.msrb.mxu3 %v5473_v50  ;;  %v7988_v20 = vld [vmem:[#allocation41_spill] sm:$0xff]  ;;  %v7991_v13 = vld [vmem:[#allocation60_spill] sm:$0xff] }
 0x63b   :  { %6102 = vmatpush.msrb.mxu2 %v5249_v44  ;;  %6147 = vmatpush.msra.mxu1 %v5753_v57  ;;  %v3008_v26 = vadd.f32 %v7989_v37, %v7988_v20  ;;  %v3708_v40 = vadd.f32 %v7991_v13, %v7990_v33  ;;  %v5801_v56 = vld [vmem:[#allocation8 + $0x1150] sm:$0xff]  ;;  %v7992_v44 = vld [vmem:[#allocation38_spill] sm:$0xff]  ;;  %v5108_v57 = vadd.f32 %v5107_v14, %v5087_v59 }
 0x63c   :  { %6103 = vmatmul.f32.vlgmr.msrb.gmra.mxu2 %v7765_v8  ;;  %6043 = vmatmul.f32.vlgmr.msra.gmra.mxu3 %v7771_v15  ;;  %v5433_v62 = vld [vmem:[#allocation8 + $0x5d0] sm:$0xff]  ;;  %v5370_v37 = vld [vmem:[#allocation8 + $0x3d8] sm:$0xff] }
 0x63d   :  { %6167 = vmatpush.msra.mxu2 %v5881_v7  ;;  %6148 = vmatpush.msra.mxu1 %v5745_v18  ;;  %v5673_v41 = vld [vmem:[#allocation8 + $0xd50] sm:$0xff]  ;;  %v3028_v36 = vadd.f32 %v7992_v44, %v3008_v26  ;;  %v3728_v54 = vadd.f32 %v7993_v11, %v3708_v40  ;;  %v5632_v7 = vld [vmem:[#allocation8 + $0xc08] sm:$0xff]  ;;  %v5127_v18 = vpop.f32.mrf.mxu3  ;;  %v5722_v13 = vld [vmem:[#allocation8 + $0xed8] sm:$0xff]  ;;  %v5231_v44 = vperm.slane %v7756_v27, 4 }
 0x63e   :  { %6111 = vmatpush.msrb.mxu3 %v5465_v25  ;;  %6057 = vmatpush.msrb.mxu0 %v5672_v38  ;;  %v5793_v10 = vld [vmem:[#allocation8 + $0x1110] sm:$0xff]  ;;  %v5128_v12 = vadd.f32 %v5127_v18, %v5108_v57  ;;  %v8000_v26 = vld [vmem:[#allocation63_spill] sm:$0xff]  ;;  %v5346_v11 = vld [vmem:[#allocation8 + $0x318] sm:$0xff] }
 0x63f   :  { %6168 = vmatpush.msra.mxu2 %v5873_v22  ;;  %6149 = vmatpush.msra.mxu1 %v5737_v6  ;;  %v5425_v52 = vld [vmem:[#allocation8 + $0x590] sm:$0xff]  ;;  %v5338_v14 = vld [vmem:[#allocation8 + $0x2d8] sm:$0xff] }
 0x640   :  { %6112 = vmatpush.msrb.mxu3 %v5457_v63  ;;  %6058 = vmatpush.msrb.mxu0 %v5664_v47  ;;  %v5665_v53 = vld [vmem:[#allocation8 + $0xd10] sm:$0xff]  ;;  %v5690_v57 = vld [vmem:[#allocation8 + $0xdd8] sm:$0xff] }
 0x641   :  { %6169 = vmatpush.msra.mxu2 %v5865_v31  ;;  %6150 = vmatpush.msra.mxu1 %v5729_v48  ;;  %v5785_v60 = vld [vmem:[#allocation8 + $0x10d0] sm:$0xff]  ;;  %v5626_v18 = vld [vmem:[#allocation8 + $0xbd8] sm:$0xff] }
 0x642   :  { %6113 = vmatpush.msrb.mxu3 %v5449_v30  ;;  %6059 = vmatpush.msrb.mxu0 %v5656_v28  ;;  %v5417_v39 = vld [vmem:[#allocation8 + $0x550] sm:$0xff]  ;;  %v5738_v30 = vld [vmem:[#allocation8 + $0xf58] sm:$0xff] }
 0x643   :  { %6170 = vmatpush.msra.mxu2 %v5857_v55  ;;  %6151 = vmatpush.msra.mxu1 %v5721_v43  ;;  %v5657_v4 = vld [vmem:[#allocation8 + $0xcd0] sm:$0xff]  ;;  %v5754_v43 = vld [vmem:[#allocation8 + $0xfd8] sm:$0xff] }
 0x644   :  { %6114 = vmatpush.msrb.mxu3 %v5441_v2  ;;  %6060 = vmatpush.msrb.mxu0 %v5648_v19  ;;  %v5777_v22 = vld [vmem:[#allocation8 + $0x1090] sm:$0xff]  ;;  %v8001_v19 = vld [vmem:[#allocation42_spill] sm:$0xff] }
 0x645   :  { %6171 = vmatpush.msra.mxu2 %v5849_v51  ;;  %6152 = vmatpush.msra.mxu1 %v5713_v24  ;;  %v5409_v23 = vld [vmem:[#allocation8 + $0x510] sm:$0xff]  ;;  %v5147_v0 = vpop.f32.mrf.mxu0 }
 0x646   :  { %6115 = vmatpush.msrb.mxu3 %v5433_v62  ;;  %6061 = vmatpush.msrb.mxu0 %v5640_v3  ;;  %v5649_v21 = vld [vmem:[#allocation8 + $0xc90] sm:$0xff]  ;;  %v5354_v3 = vld [vmem:[#allocation8 + $0x358] sm:$0xff] }
 0x647   :  { %6172 = vmatpush.msra.mxu2 %v5841_v35  ;;  %6153 = vmatpush.msra.mxu1 %v5705_v46  ;;  %v7994_v31 = vld [vmem:[#allocation40_spill] sm:$0xff]  ;;  %v7995_v6 = vld [vmem:[#allocation61_spill] sm:$0xff]  ;;  %v5148_v35 = vadd.f32 %v5147_v0, %v5128_v12 }
 0x648   :  { %6116 = vmatpush.msrb.mxu3 %v5425_v52  ;;  %6062 = vmatpush.msrb.mxu0 %v5632_v7  ;;  %v3048_v45 = vadd.f32 %v7994_v31, %v3028_v36  ;;  %v3748_v55 = vadd.f32 %v7995_v6, %v3728_v54  ;;  %v5769_v16 = vld [vmem:[#allocation8 + $0x1050] sm:$0xff]  ;;  %v8002_v52 = vld [vmem:[#allocation71_spill] sm:$0xff]  ;;  %v5706_v36 = vld [vmem:[#allocation8 + $0xe58] sm:$0xff] }
 0x649   :  { %6173 = vmatpush.msra.mxu2 %v5833_v5  ;;  %6154 = vmatpush.msra.mxu1 %v5697_v61  ;;  %v5401_v48 = vld [vmem:[#allocation8 + $0x4d0] sm:$0xff]  ;;  %v7997_v5 = vld [vmem:[#allocation62_spill] sm:$0xff]  ;;  %v5167_v38 = vpop.f32.mrf.mxu1 }
 0x64a   :  { %6117 = vmatpush.msrb.mxu3 %v5417_v39  ;;  %v5641_v51 = vld [vmem:[#allocation8 + $0xc50] sm:$0xff]  ;;  %v3768_v25 = vadd.f32 %v7997_v5, %v3748_v55  ;;  %v5168_v47 = vadd.f32 %v5167_v38, %v5148_v35  ;;  %v5618_v31 = vld [vmem:[#allocation8 + $0xb98] sm:$0xff]  ;;  %v5627_v38 = vld [vmem:[#allocation8 + $0xbe0] sm:$0xff] }
 0x64b   :  { %6174 = vmatpush.msra.mxu2 %v5825_v29  ;;  %6155 = vmatpush.msra.mxu1 %v5689_v32  ;;  %v5761_v49 = vld [vmem:[#allocation8 + $0x1010] sm:$0xff]  ;;  %v5746_v29 = vld [vmem:[#allocation8 + $0xf98] sm:$0xff] }
 0x64c   :  { %6118 = vmatpush.msrb.mxu3 %v5409_v23  ;;  %v5393_v1 = vld [vmem:[#allocation8 + $0x490] sm:$0xff]  ;;  %v5674_v23 = vld [vmem:[#allocation8 + $0xd58] sm:$0xff] }
 0x64d   :  { %6175 = vmatpush.msra.mxu2 %v5817_v42  ;;  %6156 = vmatpush.msra.mxu1 %v5681_v17  ;;  %v7996_v50 = vld [vmem:[#allocation44_spill] sm:$0xff]  ;;  %v5187_v2 = vpop.f32.mrf.mxu2  ;;  %v5730_v17 = vld [vmem:[#allocation8 + $0xf18] sm:$0xff] }
 0x64e   :  { %v3068_v24 = vadd.f32 %v7996_v50, %v3048_v45  ;;  %6119 = vmatpush.msrb.mxu3 %v5401_v48  ;;  %v5633_v46 = vld [vmem:[#allocation8 + $0xc10] sm:$0xff]  ;;  %v5188_v20 = vadd.f32 %v5187_v2, %v5168_v47  ;;  %v5666_v6 = vld [vmem:[#allocation8 + $0xd18] sm:$0xff]  ;;  %v5619_v47 = vld [vmem:[#allocation8 + $0xba0] sm:$0xff] }
 0x64f   :  { %6176 = vmatpush.msra.mxu2 %v5809_v9  ;;  %6157 = vmatpush.msra.mxu1 %v5673_v41  ;;  %v5385_v63 = vld [vmem:[#allocation8 + $0x450] sm:$0xff]  ;;  %v7999_v9 = vld [vmem:[#allocation43_spill] sm:$0xff]  ;;  %v5322_v55 = vld [vmem:[#allocation8 + $0x258] sm:$0xff] }
 0x650   :  { %v7998_v61 = vld [vmem:[#allocation64_spill] sm:$0xff]  ;;  %6120 = vmatpush.msrb.mxu3 %v5393_v1  ;;  %v3088_v28 = vadd.f32 %v7999_v9, %v3068_v24  ;;  %v5207_v40 = vpop.f32.mrf.mxu3  ;;  %v5658_v48 = vld [vmem:[#allocation8 + $0xcd8] sm:$0xff] }
 0x651   :  { %6177 = vmatpush.msra.mxu2 %v5801_v56  ;;  %6158 = vmatpush.msra.mxu1 %v5665_v53  ;;  %v3788_v42 = vadd.f32 %v7998_v61, %v3768_v25  ;;  %v5377_v32 = vld [vmem:[#allocation8 + $0x410] sm:$0xff]  ;;  %v5362_v56 = vld [vmem:[#allocation8 + $0x398] sm:$0xff]  ;;  %v5208_v41 = vadd.f32 %v5207_v40, %v5188_v20  ;;  %v5595_v40 = vld [vmem:[#allocation8 + $0xae0] sm:$0xff] }
 0x652   :  { %6121 = vmatpush.msrb.mxu3 %v5385_v63  ;;  %v3108_v62 = vadd.f32 %v8001_v19, %v3088_v28  ;;  %v5617_v27 = vld [vmem:[#allocation8 + $0xb90] sm:$0xff]  ;;  %v5650_v0 = vld [vmem:[#allocation8 + $0xc98] sm:$0xff]  ;;  %v5611_v28 = vld [vmem:[#allocation8 + $0xb60] sm:$0xff] }
 0x653   :  { %6178 = vmatpush.msra.mxu2 %v5793_v10  ;;  %6159 = vmatpush.msra.mxu1 %v5657_v4  ;;  %v3808_v33 = vadd.f32 %v8000_v26, %v3788_v42  ;;  %v5714_v10 = vld [vmem:[#allocation8 + $0xe98] sm:$0xff]  ;;  %v5219_v53 = vmax.f32 %v8002_v52, %v5208_v41  ;;  %v5625_v4 = vld [vmem:[#allocation8 + $0xbd0] sm:$0xff]  ;;  %v5587_v41 = vld [vmem:[#allocation8 + $0xaa0] sm:$0xff] }
 0x654   :  { %6122 = vmatpush.msrb.mxu3 %v5377_v32  ;;  %v5609_v45 = vld [vmem:[#allocation8 + $0xb50] sm:$0xff]  ;;  %v5306_v35 = vld [vmem:[#allocation8 + $0x1d8] sm:$0xff]  ;;  %v5579_v52 = vld [vmem:[#allocation8 + $0xa60] sm:$0xff] }
 0x655   :  { %6179 = vmatpush.msra.mxu2 %v5785_v60  ;;  %6160 = vmatpush.msra.mxu1 %v5649_v21  ;;  %v5214_v59 = vmax.f32 %v3108_v62, %v3808_v33  ;;  %v5698_v60 = vld [vmem:[#allocation8 + $0xe18] sm:$0xff]  ;;  %v5601_v12 = vld [vmem:[#allocation8 + $0xb10] sm:$0xff] }
 0x656   :  { %6123 = vmatmul.f32.vlgmr.msrb.gmra.mxu3 %v7767_v34  ;;  %v5330_v21 = vld [vmem:[#allocation8 + $0x298] sm:$0xff]  ;;  %v5585_v24 = vld [vmem:[#allocation8 + $0xa90] sm:$0xff] }
 0x657   :  { %6180 = vmatpush.msra.mxu2 %v5777_v22  ;;  %6161 = vmatpush.msra.mxu1 %v5641_v51  ;;  %v5224_v54 = vmax.f32 %v5214_v59, %v5219_v53  ;;  %v5682_v22 = vld [vmem:[#allocation8 + $0xd98] sm:$0xff]  ;;  %v5569_v42 = vld [vmem:[#allocation8 + $0xa10] sm:$0xff] }
 0x658   :  { %6187 = vmatpush.msra.mxu3 %v5370_v37  ;;  %v5314_v51 = vld [vmem:[#allocation8 + $0x218] sm:$0xff]  ;;  %v5561_v9 = vld [vmem:[#allocation8 + $0x9d0] sm:$0xff]  ;;  %v5603_v37 = vld [vmem:[#allocation8 + $0xb20] sm:$0xff] }
 0x659   :  { %6181 = vmatpush.msra.mxu2 %v5769_v16  ;;  %6162 = vmatpush.msra.mxu1 %v5633_v46  ;;  %v5241_v7 = vadd.f32 %v5231_v44, %v5224_v54  ;;  %v5610_v16 = vld [vmem:[#allocation8 + $0xb58] sm:$0xff]  ;;  %v5553_v20 = vld [vmem:[#allocation8 + $0x990] sm:$0xff] }
 0x65a   :  { %6188 = vmatpush.msra.mxu3 %v5362_v56  ;;  %v5594_v1 = vld [vmem:[#allocation8 + $0xad8] sm:$0xff]  ;;  %v5537_v62 = vld [vmem:[#allocation8 + $0x910] sm:$0xff] }
 0x65b   :  { %6182 = vmatpush.msra.mxu2 %v5761_v49  ;;  %v7814_v39 = vmax.f32 %v5241_v7, 0.0  ;;  %v5602_v49 = vld [vmem:[#allocation8 + $0xb18] sm:$0xff]  ;;  %v5529_v53 = vld [vmem:[#allocation8 + $0x8d0] sm:$0xff]  ;;  %v5563_v7 = vld [vmem:[#allocation8 + $0x9e0] sm:$0xff] }
 0x65c   :  { %6189 = vmatpush.msra.mxu3 %v5354_v3  ;;  %v5642_v50 = vld [vmem:[#allocation8 + $0xc58] sm:$0xff]  ;;  %v5521_v54 = vld [vmem:[#allocation8 + $0x890] sm:$0xff] }
 0x65d   :  { %6247 = vmatpush.msrb.mxu2 %v5754_v43  ;;  %5983 = vmatmul.f32.vlgmr.msra.gmra.mxu0 %v7814_v39  ;;  %v5593_v43 = vld [vmem:[#allocation8 + $0xad0] sm:$0xff]  ;;  %v5298_v5 = vld [vmem:[#allocation8 + $0x198] sm:$0xff] }
 0x65e   :  { %6190 = vmatpush.msra.mxu3 %v5346_v11  ;;  %6083 = vmatmul.f32.vlgmr.msrb.gmra.mxu1 %v7814_v39  ;;  %v5586_v25 = vld [vmem:[#allocation8 + $0xa98] sm:$0xff]  ;;  %v5571_v11 = vld [vmem:[#allocation8 + $0xa20] sm:$0xff] }
 0x65f   :  { %6248 = vmatpush.msrb.mxu2 %v5746_v29  ;;  %6127 = vmatpush.msra.mxu0 %v5625_v4  ;;  %v5634_v46 = vld [vmem:[#allocation8 + $0xc18] sm:$0xff]  ;;  %v5577_v29 = vld [vmem:[#allocation8 + $0xa50] sm:$0xff] }
 0x660   :  { %6191 = vmatpush.msra.mxu3 %v5338_v14  ;;  %6227 = vmatpush.msrb.mxu1 %v5626_v18  ;;  %v5290_v63 = vld [vmem:[#allocation8 + $0x158] sm:$0xff]  ;;  %v5555_v18 = vld [vmem:[#allocation8 + $0x9a0] sm:$0xff] }
 0x661   :  { %6249 = vmatpush.msrb.mxu2 %v5738_v30  ;;  %6128 = vmatpush.msra.mxu0 %v5617_v27  ;;  %v5578_v61 = vld [vmem:[#allocation8 + $0xa58] sm:$0xff]  ;;  %v5505_v27 = vld [vmem:[#allocation8 + $0x810] sm:$0xff] }
 0x662   :  { %6183 = vmatmul.f32.vlgmr.msra.gmra.mxu2 %v7814_v39  ;;  %6192 = vmatpush.msra.mxu3 %v5330_v21  ;;  %v5282_v30 = vld [vmem:[#allocation8 + $0x118] sm:$0xff] }
 0x663   :  { %6250 = vmatpush.msrb.mxu2 %v5730_v17  ;;  %6228 = vmatpush.msrb.mxu1 %v5618_v31  ;;  %v5570_v32 = vld [vmem:[#allocation8 + $0xa18] sm:$0xff] }
 0x664   :  { %6129 = vmatpush.msra.mxu0 %v5609_v45  ;;  %6193 = vmatpush.msra.mxu3 %v5322_v55  ;;  %v5274_v2 = vld [vmem:[#allocation8 + $0xd8] sm:$0xff]  ;;  %v5499_v45 = vld [vmem:[#allocation8 + $0x7e0] sm:$0xff] }
 0x665   :  { %6251 = vmatpush.msrb.mxu2 %v5722_v13  ;;  %6229 = vmatpush.msrb.mxu1 %v5610_v16  ;;  %v5562_v17 = vld [vmem:[#allocation8 + $0x9d8] sm:$0xff]  ;;  %v5545_v13 = vld [vmem:[#allocation8 + $0x950] sm:$0xff] }
 0x666   :  { %6130 = vmatpush.msra.mxu0 %v5601_v12  ;;  %6194 = vmatpush.msra.mxu3 %v5314_v51  ;;  %v5266_v26 = vld [vmem:[#allocation8 + $0x98] sm:$0xff]  ;;  %v5491_v12 = vld [vmem:[#allocation8 + $0x7a0] sm:$0xff] }
 0x667   :  { %6252 = vmatpush.msrb.mxu2 %v5714_v10  ;;  %6230 = vmatpush.msrb.mxu1 %v5602_v49  ;;  %v5554_v33 = vld [vmem:[#allocation8 + $0x998] sm:$0xff] }
 0x668   :  { %6063 = vmatmul.f32.vlgmr.msrb.gmra.mxu0 %v7793_v58  ;;  %6163 = vmatmul.f32.vlgmr.msra.gmra.mxu1 %v7793_v58  ;;  %v5258_v56 = vld [vmem:[#allocation8 + $0x58] sm:$0xff] }
 0x669   :  { %6253 = vmatpush.msrb.mxu2 %v5706_v36  ;;  %6131 = vmatpush.msra.mxu0 %v5593_v43  ;;  %v5546_v19 = vld [vmem:[#allocation8 + $0x958] sm:$0xff]  ;;  %v5531_v43 = vld [vmem:[#allocation8 + $0x8e0] sm:$0xff] }
 0x66a   :  { %6195 = vmatpush.msra.mxu3 %v5306_v35  ;;  %6231 = vmatpush.msrb.mxu1 %v5594_v1  ;;  %v5250_v10 = vld [vmem:[#allocation8 + $0x18] sm:$0xff] }
 0x66b   :  { %6254 = vmatpush.msrb.mxu2 %v5698_v60  ;;  %6132 = vmatpush.msra.mxu0 %v5585_v24  ;;  %v5538_v3 = vld [vmem:[#allocation8 + $0x918] sm:$0xff]  ;;  %v5523_v24 = vld [vmem:[#allocation8 + $0x8a0] sm:$0xff] }
 0x66c   :  { %6196 = vmatpush.msra.mxu3 %v5298_v5  ;;  %6232 = vmatpush.msrb.mxu1 %v5586_v25  ;;  %v5882_v59 = vld [vmem:[#allocation8 + $0x13d8] sm:$0xff] }
 0x66d   :  { %6255 = vmatpush.msrb.mxu2 %v5690_v57  ;;  %6133 = vmatpush.msra.mxu0 %v5577_v29  ;;  %v5530_v44 = vld [vmem:[#allocation8 + $0x8d8] sm:$0xff]  ;;  %v5513_v57 = vld [vmem:[#allocation8 + $0x850] sm:$0xff]  ;;  %v5515_v29 = vld [vmem:[#allocation8 + $0x860] sm:$0xff] }
 0x66e   :  { %6197 = vmatpush.msra.mxu3 %v5290_v63  ;;  %6233 = vmatpush.msrb.mxu1 %v5578_v61  ;;  %v5874_v36 = vld [vmem:[#allocation8 + $0x1398] sm:$0xff]  ;;  %v5459_v61 = vld [vmem:[#allocation8 + $0x6a0] sm:$0xff] }
 0x66f   :  { %6256 = vmatpush.msrb.mxu2 %v5682_v22  ;;  %6134 = vmatpush.msra.mxu0 %v5569_v42  ;;  %v5522_v60 = vld [vmem:[#allocation8 + $0x898] sm:$0xff]  ;;  %v5507_v42 = vld [vmem:[#allocation8 + $0x820] sm:$0xff] }
 0x670   :  { %6198 = vmatpush.msra.mxu3 %v5282_v30  ;;  %6234 = vmatpush.msrb.mxu1 %v5570_v32  ;;  %v5866_v14 = vld [vmem:[#allocation8 + $0x1358] sm:$0xff]  ;;  %v5500_v30 = vld [vmem:[#allocation8 + $0x7e8] sm:$0xff] }
 0x671   :  { %6257 = vmatpush.msrb.mxu2 %v5674_v23  ;;  %6135 = vmatpush.msra.mxu0 %v5561_v9  ;;  %v5514_v4 = vld [vmem:[#allocation8 + $0x858] sm:$0xff]  ;;  %v5451_v9 = vld [vmem:[#allocation8 + $0x660] sm:$0xff] }
 0x672   :  { %6199 = vmatpush.msra.mxu3 %v5274_v2  ;;  %6235 = vmatpush.msrb.mxu1 %v5562_v17  ;;  %v5858_v22 = vld [vmem:[#allocation8 + $0x1318] sm:$0xff]  ;;  %v5492_v2 = vld [vmem:[#allocation8 + $0x7a8] sm:$0xff] }
 0x673   :  { %6258 = vmatpush.msrb.mxu2 %v5666_v6  ;;  %6136 = vmatpush.msra.mxu0 %v5553_v20  ;;  %v5506_v23 = vld [vmem:[#allocation8 + $0x818] sm:$0xff]  ;;  %v5547_v6 = vld [vmem:[#allocation8 + $0x960] sm:$0xff] }
 0x674   :  { %6200 = vmatpush.msra.mxu3 %v5266_v26  ;;  %6236 = vmatpush.msrb.mxu1 %v5554_v33  ;;  %v5498_v21 = vld [vmem:[#allocation8 + $0x7d8] sm:$0xff]  ;;  %v5443_v20 = vld [vmem:[#allocation8 + $0x620] sm:$0xff]  ;;  %v5484_v26 = vld [vmem:[#allocation8 + $0x768] sm:$0xff] }
 0x675   :  { %6259 = vmatpush.msrb.mxu2 %v5658_v48  ;;  %6137 = vmatpush.msra.mxu0 %v5545_v13  ;;  %v5850_v31 = vld [vmem:[#allocation8 + $0x12d8] sm:$0xff]  ;;  %v5539_v48 = vld [vmem:[#allocation8 + $0x920] sm:$0xff] }
 0x676   :  { %6201 = vmatpush.msra.mxu3 %v5258_v56  ;;  %6237 = vmatpush.msrb.mxu1 %v5546_v19  ;;  %v5490_v55 = vld [vmem:[#allocation8 + $0x798] sm:$0xff]  ;;  %v5435_v13 = vld [vmem:[#allocation8 + $0x5e0] sm:$0xff]  ;;  %v5476_v56 = vld [vmem:[#allocation8 + $0x728] sm:$0xff] }
 0x677   :  { %6260 = vmatpush.msrb.mxu2 %v5650_v0  ;;  %6138 = vmatpush.msra.mxu0 %v5537_v62  ;;  %v5842_v16 = vld [vmem:[#allocation8 + $0x1298] sm:$0xff]  ;;  %v5483_v0 = vld [vmem:[#allocation8 + $0x760] sm:$0xff] }
 0x678   :  { %6202 = vmatpush.msra.mxu3 %v5250_v10  ;;  %6238 = vmatpush.msrb.mxu1 %v5538_v3  ;;  %v5482_v51 = vld [vmem:[#allocation8 + $0x758] sm:$0xff]  ;;  %v5427_v62 = vld [vmem:[#allocation8 + $0x5a0] sm:$0xff]  ;;  %v5468_v10 = vld [vmem:[#allocation8 + $0x6e8] sm:$0xff] }
 0x679   :  { %6261 = vmatpush.msrb.mxu2 %v5642_v50  ;;  %6203 = vmatmul.f32.vlgmr.msra.gmra.mxu3 %v7765_v8  ;;  %v5834_v49 = vld [vmem:[#allocation8 + $0x1258] sm:$0xff]  ;;  %v5475_v50 = vld [vmem:[#allocation8 + $0x720] sm:$0xff] }
 0x67a   :  { %6267 = vmatpush.msrb.mxu3 %v5882_v59  ;;  %6139 = vmatpush.msra.mxu0 %v5529_v53  ;;  %v5474_v35 = vld [vmem:[#allocation8 + $0x718] sm:$0xff]  ;;  %v5419_v59 = vld [vmem:[#allocation8 + $0x560] sm:$0xff]  ;;  %v5460_v53 = vld [vmem:[#allocation8 + $0x6a8] sm:$0xff] }
 0x67b   :  { %6262 = vmatpush.msrb.mxu2 %v5634_v46  ;;  %6239 = vmatpush.msrb.mxu1 %v5530_v44  ;;  %v5826_v1 = vld [vmem:[#allocation8 + $0x1218] sm:$0xff]  ;;  %v5467_v46 = vld [vmem:[#allocation8 + $0x6e0] sm:$0xff] }
 0x67c   :  { %6263 = vmatmul.f32.vlgmr.msrb.gmra.mxu2 %v7793_v58  ;;  %6268 = vmatpush.msrb.mxu3 %v5874_v36  ;;  %v5466_v5 = vld [vmem:[#allocation8 + $0x6d8] sm:$0xff]  ;;  %v5411_v36 = vld [vmem:[#allocation8 + $0x520] sm:$0xff] }
 0x67d   :  { %6327 = vmatpush.msra.mxu2 %v5627_v38  ;;  %6140 = vmatpush.msra.mxu0 %v5521_v54  ;;  %v5818_v25 = vld [vmem:[#allocation8 + $0x11d8] sm:$0xff]  ;;  %v5452_v54 = vld [vmem:[#allocation8 + $0x668] sm:$0xff] }
 0x67e   :  { %6240 = vmatpush.msrb.mxu1 %v5522_v60  ;;  %6269 = vmatpush.msrb.mxu3 %v5866_v14  ;;  %v5458_v38 = vld [vmem:[#allocation8 + $0x698] sm:$0xff]  ;;  %v5403_v14 = vld [vmem:[#allocation8 + $0x4e0] sm:$0xff] }
 0x67f   :  { %6328 = vmatpush.msra.mxu2 %v5619_v47  ;;  %6141 = vmatpush.msra.mxu0 %v5513_v57  ;;  %v5810_v63 = vld [vmem:[#allocation8 + $0x1198] sm:$0xff]  ;;  %v5444_v57 = vld [vmem:[#allocation8 + $0x628] sm:$0xff] }
 0x680   :  { %6241 = vmatpush.msrb.mxu1 %v5514_v4  ;;  %6270 = vmatpush.msrb.mxu3 %v5858_v22  ;;  %v5450_v47 = vld [vmem:[#allocation8 + $0x658] sm:$0xff]  ;;  %v5395_v22 = vld [vmem:[#allocation8 + $0x4a0] sm:$0xff] }
 0x681   :  { %6329 = vmatpush.msra.mxu2 %v5611_v28  ;;  %6142 = vmatpush.msra.mxu0 %v5505_v27  ;;  %v5802_v32 = vld [vmem:[#allocation8 + $0x1158] sm:$0xff]  ;;  %v5436_v27 = vld [vmem:[#allocation8 + $0x5e8] sm:$0xff] }
 0x682   :  { %6242 = vmatpush.msrb.mxu1 %v5506_v23  ;;  %6143 = vmatmul.f32.vlgmr.msra.gmra.mxu0 %v7771_v15  ;;  %v5442_v28 = vld [vmem:[#allocation8 + $0x618] sm:$0xff] }
 0x683   :  { %6330 = vmatpush.msra.mxu2 %v5603_v37  ;;  %6243 = vmatmul.f32.vlgmr.msrb.gmra.mxu1 %v7771_v15  ;;  %v5794_v17 = vld [vmem:[#allocation8 + $0x1118] sm:$0xff] }
 0x684   :  { %6207 = vmatpush.msrb.mxu0 %v5498_v21  ;;  %6271 = vmatpush.msrb.mxu3 %v5850_v31  ;;  %v5434_v37 = vld [vmem:[#allocation8 + $0x5d8] sm:$0xff]  ;;  %v5387_v21 = vld [vmem:[#allocation8 + $0x460] sm:$0xff] }
 0x685   :  { %6331 = vmatpush.msra.mxu2 %v5595_v40  ;;  %6307 = vmatpush.msra.mxu1 %v5499_v45  ;;  %v5786_v33 = vld [vmem:[#allocation8 + $0x10d8] sm:$0xff]  ;;  %v5731_v31 = vld [vmem:[#allocation8 + $0xf20] sm:$0xff]  ;;  %v5428_v45 = vld [vmem:[#allocation8 + $0x5a8] sm:$0xff] }
 0x686   :  { %6208 = vmatpush.msrb.mxu0 %v5490_v55  ;;  %6272 = vmatpush.msrb.mxu3 %v5842_v16  ;;  %v5426_v40 = vld [vmem:[#allocation8 + $0x598] sm:$0xff]  ;;  %v5379_v55 = vld [vmem:[#allocation8 + $0x420] sm:$0xff] }
 0x687   :  { %6332 = vmatpush.msra.mxu2 %v5587_v41  ;;  %6308 = vmatpush.msra.mxu1 %v5491_v12  ;;  %v5778_v19 = vld [vmem:[#allocation8 + $0x1098] sm:$0xff]  ;;  %v5371_v16 = vld [vmem:[#allocation8 + $0x3e0] sm:$0xff] }
 0x688   :  { %6209 = vmatpush.msrb.mxu0 %v5482_v51  ;;  %6273 = vmatpush.msrb.mxu3 %v5834_v49  ;;  %v5418_v41 = vld [vmem:[#allocation8 + $0x558] sm:$0xff]  ;;  %v5723_v12 = vld [vmem:[#allocation8 + $0xee0] sm:$0xff]  ;;  %v5420_v51 = vld [vmem:[#allocation8 + $0x568] sm:$0xff] }
 0x689   :  { %6333 = vmatpush.msra.mxu2 %v5579_v52  ;;  %6309 = vmatpush.msra.mxu1 %v5483_v0  ;;  %v5770_v3 = vld [vmem:[#allocation8 + $0x1058] sm:$0xff]  ;;  %v5363_v49 = vld [vmem:[#allocation8 + $0x3a0] sm:$0xff] }
 0x68a   :  { %6210 = vmatpush.msrb.mxu0 %v5474_v35  ;;  %6274 = vmatpush.msrb.mxu3 %v5826_v1  ;;  %v5410_v52 = vld [vmem:[#allocation8 + $0x518] sm:$0xff]  ;;  %v5715_v0 = vld [vmem:[#allocation8 + $0xea0] sm:$0xff]  ;;  %v5412_v35 = vld [vmem:[#allocation8 + $0x528] sm:$0xff] }
 0x68b   :  { %6334 = vmatpush.msra.mxu2 %v5571_v11  ;;  %6310 = vmatpush.msra.mxu1 %v5475_v50  ;;  %v5762_v44 = vld [vmem:[#allocation8 + $0x1018] sm:$0xff]  ;;  %v5755_v11 = vld [vmem:[#allocation8 + $0xfe0] sm:$0xff] }
 0x68c   :  { %6211 = vmatpush.msrb.mxu0 %v5466_v5  ;;  %6275 = vmatpush.msrb.mxu3 %v5818_v25  ;;  %v5402_v60 = vld [vmem:[#allocation8 + $0x4d8] sm:$0xff]  ;;  %v5355_v1 = vld [vmem:[#allocation8 + $0x360] sm:$0xff]  ;;  %v5404_v5 = vld [vmem:[#allocation8 + $0x4e8] sm:$0xff] }
 0x68d   :  { %6335 = vmatpush.msra.mxu2 %v5563_v7  ;;  %6311 = vmatpush.msra.mxu1 %v5467_v46  ;;  %v5747_v7 = vld [vmem:[#allocation8 + $0xfa0] sm:$0xff]  ;;  %v5394_v4 = vld [vmem:[#allocation8 + $0x498] sm:$0xff] }
 0x68e   :  { %6212 = vmatpush.msrb.mxu0 %v5458_v38  ;;  %6276 = vmatpush.msrb.mxu3 %v5810_v63  ;;  %v5386_v23 = vld [vmem:[#allocation8 + $0x458] sm:$0xff]  ;;  %v5707_v50 = vld [vmem:[#allocation8 + $0xe60] sm:$0xff]  ;;  %v5396_v38 = vld [vmem:[#allocation8 + $0x4a8] sm:$0xff] }
 0x68f   :  { %6336 = vmatpush.msra.mxu2 %v5555_v18  ;;  %6312 = vmatpush.msra.mxu1 %v5459_v61  ;;  %v5739_v18 = vld [vmem:[#allocation8 + $0xf60] sm:$0xff] }
 0x690   :  { %6213 = vmatpush.msrb.mxu0 %v5450_v47  ;;  %6277 = vmatpush.msrb.mxu3 %v5802_v32  ;;  %v5347_v25 = vld [vmem:[#allocation8 + $0x320] sm:$0xff]  ;;  %v5388_v47 = vld [vmem:[#allocation8 + $0x468] sm:$0xff] }
 0x691   :  { %6337 = vmatpush.msra.mxu2 %v5547_v6  ;;  %6313 = vmatpush.msra.mxu1 %v5451_v9  ;;  %v5378_v6 = vld [vmem:[#allocation8 + $0x418] sm:$0xff]  ;;  %v5699_v46 = vld [vmem:[#allocation8 + $0xe20] sm:$0xff]  ;;  %v5332_v9 = vld [vmem:[#allocation8 + $0x2a8] sm:$0xff] }
 0x692   :  { %6214 = vmatpush.msrb.mxu0 %v5442_v28  ;;  %6278 = vmatpush.msrb.mxu3 %v5794_v17  ;;  %v5339_v63 = vld [vmem:[#allocation8 + $0x2e0] sm:$0xff]  ;;  %v5380_v28 = vld [vmem:[#allocation8 + $0x428] sm:$0xff]  ;;  %v5373_v17 = vld [vmem:[#allocation8 + $0x3f0] sm:$0xff] }
 0x693   :  { %6338 = vmatpush.msra.mxu2 %v5539_v48  ;;  %6314 = vmatpush.msra.mxu1 %v5443_v20  ;;  %v5372_v48 = vld [vmem:[#allocation8 + $0x3e8] sm:$0xff]  ;;  %v5691_v61 = vld [vmem:[#allocation8 + $0xde0] sm:$0xff] }
 0x694   :  { %6215 = vmatpush.msrb.mxu0 %v5434_v37  ;;  %6279 = vmatpush.msrb.mxu3 %v5786_v33  ;;  %v5683_v32 = vld [vmem:[#allocation8 + $0xda0] sm:$0xff]  ;;  %v5324_v37 = vld [vmem:[#allocation8 + $0x268] sm:$0xff]  ;;  %v5365_v33 = vld [vmem:[#allocation8 + $0x3b0] sm:$0xff] }
 0x695   :  { %6339 = vmatpush.msra.mxu2 %v5531_v43  ;;  %6315 = vmatpush.msra.mxu1 %v5435_v13  ;;  %v5364_v43 = vld [vmem:[#allocation8 + $0x3a8] sm:$0xff]  ;;  %v5675_v20 = vld [vmem:[#allocation8 + $0xd60] sm:$0xff] }
 0x696   :  { %6216 = vmatpush.msrb.mxu0 %v5426_v40  ;;  %6280 = vmatpush.msrb.mxu3 %v5778_v19  ;;  %v5667_v13 = vld [vmem:[#allocation8 + $0xd20] sm:$0xff]  ;;  %v7830_v40 = vpop.f32.mrf.mxu2 }
 0x697   :  { %6340 = vmatpush.msra.mxu2 %v5523_v24  ;;  %6316 = vmatpush.msra.mxu1 %v5427_v62  ;;  %v5356_v24 = vld [vmem:[#allocation8 + $0x368] sm:$0xff]  ;;  %v5307_v19 = vld [vmem:[#allocation8 + $0x1e0] sm:$0xff]  ;;  %v5357_v62 = vld [vmem:[#allocation8 + $0x370] sm:$0xff] }
 0x698   :  { %6217 = vmatpush.msrb.mxu0 %v5418_v41  ;;  %6281 = vmatpush.msrb.mxu3 %v5770_v3  ;;  %v5659_v41 = vld [vmem:[#allocation8 + $0xce0] sm:$0xff]  ;;  %v5308_v3 = vld [vmem:[#allocation8 + $0x1e8] sm:$0xff] }
 0x699   :  { %6341 = vmatpush.msra.mxu2 %v5515_v29  ;;  %6317 = vmatpush.msra.mxu1 %v5419_v59  ;;  %v5348_v29 = vld [vmem:[#allocation8 + $0x328] sm:$0xff]  ;;  %v5299_v59 = vld [vmem:[#allocation8 + $0x1a0] sm:$0xff] }
 0x69a   :  { %6218 = vmatpush.msrb.mxu0 %v5410_v52  ;;  %6282 = vmatpush.msrb.mxu3 %v5762_v44  ;;  %v5349_v52 = vld [vmem:[#allocation8 + $0x330] sm:$0xff]  ;;  %v5300_v44 = vld [vmem:[#allocation8 + $0x1a8] sm:$0xff] }
 0x69b   :  { %6342 = vmatpush.msra.mxu2 %v5507_v42  ;;  %6318 = vmatpush.msra.mxu1 %v5411_v36  ;;  %v5340_v42 = vld [vmem:[#allocation8 + $0x2e8] sm:$0xff]  ;;  %v5291_v36 = vld [vmem:[#allocation8 + $0x160] sm:$0xff] }
 0x69c   :  { %6343 = vmatmul.f32.vlgmr.msra.gmra.mxu2 %v7771_v15  ;;  %6283 = vmatmul.f32.vlgmr.msrb.gmra.mxu3 %v7814_v39 }
 0x69d   :  { %6407 = vmatpush.msrb.mxu2 %v5500_v30  ;;  %6347 = vmatpush.msra.mxu3 %v5755_v11  ;;  %v5331_v30 = vld [vmem:[#allocation8 + $0x2a0] sm:$0xff] }
 0x69e   :  { %6219 = vmatpush.msrb.mxu0 %v5402_v60  ;;  %6319 = vmatpush.msra.mxu1 %v5403_v14  ;;  %v5643_v60 = vld [vmem:[#allocation8 + $0xc60] sm:$0xff]  ;;  %v5292_v14 = vld [vmem:[#allocation8 + $0x168] sm:$0xff] }
 0x69f   :  { %6408 = vmatpush.msrb.mxu2 %v5492_v2  ;;  %6348 = vmatpush.msra.mxu3 %v5747_v7  ;;  %v5323_v2 = vld [vmem:[#allocation8 + $0x260] sm:$0xff] }
 0x6a0   :  { %6220 = vmatpush.msrb.mxu0 %v5394_v4  ;;  %6320 = vmatpush.msra.mxu1 %v5395_v22  ;;  %v5283_v7 = vld [vmem:[#allocation8 + $0x120] sm:$0xff]  ;;  %v6024_v22 = vpop.f32.mrf.mxu2 }
 0x6a1   :  { %6409 = vmatpush.msrb.mxu2 %v5484_v26  ;;  %6349 = vmatpush.msra.mxu3 %v5739_v18  ;;  %v5315_v26 = vld [vmem:[#allocation8 + $0x220] sm:$0xff]  ;;  %v5284_v18 = vld [vmem:[#allocation8 + $0x128] sm:$0xff] }
 0x6a2   :  { %6221 = vmatpush.msrb.mxu0 %v5386_v23  ;;  %6321 = vmatpush.msra.mxu1 %v5387_v21  ;;  %v5635_v4 = vld [vmem:[#allocation8 + $0xc20] sm:$0xff]  ;;  %v5325_v23 = vld [vmem:[#allocation8 + $0x270] sm:$0xff] }
 0x6a3   :  { %6410 = vmatpush.msrb.mxu2 %v5476_v56  ;;  %6350 = vmatpush.msra.mxu3 %v5731_v31  ;;  %v5316_v56 = vld [vmem:[#allocation8 + $0x228] sm:$0xff]  ;;  %v5275_v31 = vld [vmem:[#allocation8 + $0xe0] sm:$0xff] }
 0x6a4   :  { %6222 = vmatpush.msrb.mxu0 %v5378_v6  ;;  %6322 = vmatpush.msra.mxu1 %v5379_v55  ;;  %v5620_v55 = vld [vmem:[#allocation8 + $0xba8] sm:$0xff] }
 0x6a5   :  { %6411 = vmatpush.msrb.mxu2 %v5468_v10  ;;  %6223 = vmatmul.f32.vlgmr.msrb.gmra.mxu0 %v7767_v34  ;;  %v7832_v10 = vpop.f32.mrf.mxu1 }
 0x6a6   :  { %6323 = vmatmul.f32.vlgmr.msra.gmra.mxu1 %v7767_v34  ;;  %6287 = vmatpush.msra.mxu0 %v5371_v16  ;;  %v5317_v16 = vld [vmem:[#allocation8 + $0x230] sm:$0xff] }
 0x6a7   :  { %6412 = vmatpush.msrb.mxu2 %v5460_v53  ;;  %6351 = vmatpush.msra.mxu3 %v5723_v12  ;;  %v5651_v53 = vld [vmem:[#allocation8 + $0xca0] sm:$0xff] }
 0x6a8   :  { %6387 = vmatpush.msrb.mxu1 %v5372_v48  ;;  %6288 = vmatpush.msra.mxu0 %v5363_v49  ;;  %v5267_v12 = vld [vmem:[#allocation8 + $0xa0] sm:$0xff]  ;;  %v5268_v48 = vld [vmem:[#allocation8 + $0xa8] sm:$0xff] }
 0x6a9   :  { %6413 = vmatpush.msrb.mxu2 %v5452_v54  ;;  %6352 = vmatpush.msra.mxu3 %v5715_v0  ;;  %v5341_v54 = vld [vmem:[#allocation8 + $0x2f0] sm:$0xff]  ;;  %v5612_v49 = vld [vmem:[#allocation8 + $0xb68] sm:$0xff] }
 0x6aa   :  { %6388 = vmatpush.msrb.mxu1 %v5364_v43  ;;  %6289 = vmatpush.msra.mxu0 %v5355_v1  ;;  %v5309_v0 = vld [vmem:[#allocation8 + $0x1f0] sm:$0xff]  ;;  %v5260_v1 = vld [vmem:[#allocation8 + $0x68] sm:$0xff] }
 0x6ab   :  { %6414 = vmatpush.msrb.mxu2 %v5444_v57  ;;  %6353 = vmatpush.msra.mxu3 %v5707_v50  ;;  %v5333_v57 = vld [vmem:[#allocation8 + $0x2b0] sm:$0xff]  ;;  %v5604_v50 = vld [vmem:[#allocation8 + $0xb28] sm:$0xff] }
 0x6ac   :  { %6389 = vmatpush.msrb.mxu1 %v5356_v24  ;;  %6290 = vmatpush.msra.mxu0 %v5347_v25  ;;  %v5301_v24 = vld [vmem:[#allocation8 + $0x1b0] sm:$0xff]  ;;  %v5252_v25 = vld [vmem:[#allocation8 + $0x28] sm:$0xff] }
 0x6ad   :  { %6415 = vmatpush.msrb.mxu2 %v5436_v27  ;;  %6354 = vmatpush.msra.mxu3 %v5699_v46  ;;  %v5628_v27 = vld [vmem:[#allocation8 + $0xbe8] sm:$0xff]  ;;  %v6004_v21 = vpop.f32.mrf.mxu1  ;;  %v5883_v46 = vld [vmem:[#allocation8 + $0x13e0] sm:$0xff] }
 0x6ae   :  { %6390 = vmatpush.msrb.mxu1 %v5348_v29  ;;  %6291 = vmatpush.msra.mxu0 %v5339_v63  ;;  %v6025_v6 = vadd.f32 %v6024_v22, %v6004_v21  ;;  %v5596_v29 = vld [vmem:[#allocation8 + $0xae8] sm:$0xff]  ;;  %v5293_v63 = vld [vmem:[#allocation8 + $0x170] sm:$0xff] }
 0x6af   :  { %6416 = vmatpush.msrb.mxu2 %v5428_v45  ;;  %6355 = vmatpush.msra.mxu3 %v5691_v61  ;;  %v5276_v45 = vld [vmem:[#allocation8 + $0xe8] sm:$0xff]  ;;  %v5875_v61 = vld [vmem:[#allocation8 + $0x13a0] sm:$0xff]  ;;  %v5869_v22 = vld [vmem:[#allocation8 + $0x1370] sm:$0xff] }
 0x6b0   :  { %6391 = vmatpush.msrb.mxu1 %v5340_v42  ;;  %6292 = vmatpush.msra.mxu0 %v5331_v30  ;;  %v5588_v42 = vld [vmem:[#allocation8 + $0xaa8] sm:$0xff]  ;;  %v5285_v30 = vld [vmem:[#allocation8 + $0x130] sm:$0xff] }
 0x6b1   :  { %6417 = vmatpush.msrb.mxu2 %v5420_v51  ;;  %6356 = vmatpush.msra.mxu3 %v5683_v32  ;;  %v5867_v32 = vld [vmem:[#allocation8 + $0x1360] sm:$0xff]  ;;  %v5861_v21 = vld [vmem:[#allocation8 + $0x1330] sm:$0xff] }
 0x6b2   :  { %6392 = vmatpush.msrb.mxu1 %v5332_v9  ;;  %6293 = vmatpush.msra.mxu0 %v5323_v2  ;;  %v5580_v9 = vld [vmem:[#allocation8 + $0xa68] sm:$0xff]  ;;  %v5277_v2 = vld [vmem:[#allocation8 + $0xf0] sm:$0xff] }
 0x6b3   :  { %6418 = vmatpush.msrb.mxu2 %v5412_v35  ;;  %6357 = vmatpush.msra.mxu3 %v5675_v20  ;;  %v5259_v35 = vld [vmem:[#allocation8 + $0x60] sm:$0xff]  ;;  %v5572_v20 = vld [vmem:[#allocation8 + $0xa28] sm:$0xff] }
 0x6b4   :  { %6393 = vmatpush.msrb.mxu1 %v5324_v37  ;;  %6294 = vmatpush.msra.mxu0 %v5315_v26  ;;  %v5860_v37 = vld [vmem:[#allocation8 + $0x1328] sm:$0xff]  ;;  %v5269_v26 = vld [vmem:[#allocation8 + $0xb0] sm:$0xff] }
 0x6b5   :  { %6419 = vmatpush.msrb.mxu2 %v5404_v5  ;;  %6358 = vmatpush.msra.mxu3 %v5667_v13  ;;  %v7834_v11 = vpop.f32.mrf.mxu3  ;;  %v5251_v5 = vld [vmem:[#allocation8 + $0x20] sm:$0xff]  ;;  %v5564_v13 = vld [vmem:[#allocation8 + $0x9e8] sm:$0xff] }
 0x6b6   :  { %6394 = vmatpush.msrb.mxu1 %v5316_v56  ;;  %6295 = vmatpush.msra.mxu0 %v5307_v19  ;;  %v5852_v56 = vld [vmem:[#allocation8 + $0x12e8] sm:$0xff]  ;;  %v5261_v19 = vld [vmem:[#allocation8 + $0x70] sm:$0xff] }
 0x6b7   :  { %6420 = vmatpush.msrb.mxu2 %v5396_v38  ;;  %6359 = vmatpush.msra.mxu3 %v5659_v41  ;;  %v5884_v38 = vld [vmem:[#allocation8 + $0x13e8] sm:$0xff] }
 0x6b8   :  { %6395 = vmatpush.msrb.mxu1 %v5308_v3  ;;  %6296 = vmatpush.msra.mxu0 %v5299_v59  ;;  %v5556_v41 = vld [vmem:[#allocation8 + $0x9a8] sm:$0xff]  ;;  %v5253_v59 = vld [vmem:[#allocation8 + $0x30] sm:$0xff] }
 0x6b9   :  { %6421 = vmatpush.msrb.mxu2 %v5388_v47  ;;  %6360 = vmatpush.msra.mxu3 %v5651_v53  ;;  %v5876_v47 = vld [vmem:[#allocation8 + $0x13a8] sm:$0xff]  ;;  %v5885_v53 = vld [vmem:[#allocation8 + $0x13f0] sm:$0xff] }
 0x6ba   :  { %6396 = vmatpush.msrb.mxu1 %v5300_v44  ;;  %6297 = vmatpush.msra.mxu0 %v5291_v36  ;;  %v5844_v3 = vld [vmem:[#allocation8 + $0x12a8] sm:$0xff] }
 0x6bb   :  { %6422 = vmatpush.msrb.mxu2 %v5380_v28  ;;  %6361 = vmatpush.msra.mxu3 %v5643_v60  ;;  %v5868_v28 = vld [vmem:[#allocation8 + $0x1368] sm:$0xff]  ;;  %v7841_v60 = vpop.f32.mrf.mxu0 }
 0x6bc   :  { %6423 = vmatmul.f32.vlgmr.msrb.gmra.mxu2 %v7767_v34  ;;  %6397 = vmatpush.msrb.mxu1 %v5292_v14  ;;  %v5548_v44 = vld [vmem:[#allocation8 + $0x968] sm:$0xff]  ;;  %v5877_v14 = vld [vmem:[#allocation8 + $0x13b0] sm:$0xff] }
 0x6bd   :  { %6487 = vmatpush.msra.mxu2 %v5373_v17  ;;  %6298 = vmatpush.msra.mxu0 %v5283_v7  ;;  %v5859_v17 = vld [vmem:[#allocation8 + $0x1320] sm:$0xff]  ;;  %v5836_v36 = vld [vmem:[#allocation8 + $0x1268] sm:$0xff] }
 0x6be   :  { %6362 = vmatpush.msra.mxu3 %v5635_v4  ;;  %6398 = vmatpush.msrb.mxu1 %v5284_v18  ;;  %v5540_v7 = vld [vmem:[#allocation8 + $0x928] sm:$0xff]  ;;  %v5819_v4 = vld [vmem:[#allocation8 + $0x11e0] sm:$0xff] }
 0x6bf   :  { %6488 = vmatpush.msra.mxu2 %v5365_v33  ;;  %6363 = vmatmul.f32.vlgmr.msra.gmra.mxu3 %v7793_v58  ;;  %v6044_v51 = vpop.f32.mrf.mxu3  ;;  %v5851_v33 = vld [vmem:[#allocation8 + $0x12e0] sm:$0xff]  ;;  %v5532_v18 = vld [vmem:[#allocation8 + $0x8e8] sm:$0xff] }
 0x6c0   :  { %6427 = vmatpush.msrb.mxu3 %v5628_v27  ;;  %6299 = vmatpush.msra.mxu0 %v5275_v31  ;;  %v7837_v43 = vadd.f32 %v6044_v51, %v6025_v6  ;;  %v5820_v27 = vld [vmem:[#allocation8 + $0x11e8] sm:$0xff]  ;;  %v5803_v6 = vld [vmem:[#allocation8 + $0x1160] sm:$0xff]  ;;  %v5845_v51 = vld [vmem:[#allocation8 + $0x12b0] sm:$0xff] }
 0x6c1   :  { %6489 = vmatpush.msra.mxu2 %v5357_v62  ;;  %6399 = vmatpush.msrb.mxu1 %v5276_v45  ;;  %v5843_v62 = vld [vmem:[#allocation8 + $0x12a0] sm:$0xff]  ;;  %v5524_v31 = vld [vmem:[#allocation8 + $0x8a8] sm:$0xff] }
 0x6c2   :  { %6428 = vmatpush.msrb.mxu3 %v5620_v55  ;;  %6300 = vmatpush.msra.mxu0 %v5267_v12  ;;  %v5812_v45 = vld [vmem:[#allocation8 + $0x11a8] sm:$0xff]  ;;  %v5853_v55 = vld [vmem:[#allocation8 + $0x12f0] sm:$0xff] }
 0x6c3   :  { %6490 = vmatpush.msra.mxu2 %v5349_v52  ;;  %6400 = vmatpush.msrb.mxu1 %v5268_v48  ;;  %v5835_v52 = vld [vmem:[#allocation8 + $0x1260] sm:$0xff]  ;;  %v5804_v12 = vld [vmem:[#allocation8 + $0x1168] sm:$0xff] }
 0x6c4   :  { %6429 = vmatpush.msrb.mxu3 %v5612_v49  ;;  %6301 = vmatpush.msra.mxu0 %v5259_v35  ;;  %v5795_v48 = vld [vmem:[#allocation8 + $0x1120] sm:$0xff]  ;;  %v5508_v49 = vld [vmem:[#allocation8 + $0x828] sm:$0xff] }
 0x6c5   :  { %6491 = vmatpush.msra.mxu2 %v5341_v54  ;;  %6401 = vmatpush.msrb.mxu1 %v5260_v1  ;;  %v5827_v54 = vld [vmem:[#allocation8 + $0x1220] sm:$0xff]  ;;  %v5796_v35 = vld [vmem:[#allocation8 + $0x1128] sm:$0xff]  ;;  %v5501_v1 = vld [vmem:[#allocation8 + $0x7f0] sm:$0xff] }
 0x6c6   :  { %6430 = vmatpush.msrb.mxu3 %v5604_v50  ;;  %6302 = vmatpush.msra.mxu0 %v5251_v5  ;;  %v5837_v50 = vld [vmem:[#allocation8 + $0x1270] sm:$0xff]  ;;  %v5788_v5 = vld [vmem:[#allocation8 + $0x10e8] sm:$0xff] }
 0x6c7   :  { %6492 = vmatpush.msra.mxu2 %v5333_v57  ;;  %6402 = vmatpush.msrb.mxu1 %v5252_v25  ;;  %v5828_v57 = vld [vmem:[#allocation8 + $0x1228] sm:$0xff]  ;;  %v5493_v25 = vld [vmem:[#allocation8 + $0x7b0] sm:$0xff] }
 0x6c8   :  { %6303 = vmatmul.f32.vlgmr.msra.gmra.mxu0 %v7765_v8  ;;  %6403 = vmatmul.f32.vlgmr.msrb.gmra.mxu1 %v7765_v8 }
 0x6c9   :  { %6493 = vmatpush.msra.mxu2 %v5325_v23  ;;  %6367 = vmatpush.msrb.mxu0 %v5883_v46  ;;  %v5811_v23 = vld [vmem:[#allocation8 + $0x11a0] sm:$0xff]  ;;  %v5829_v46 = vld [vmem:[#allocation8 + $0x1230] sm:$0xff] }
 0x6ca   :  { %6431 = vmatpush.msrb.mxu3 %v5596_v29  ;;  %6467 = vmatpush.msra.mxu1 %v5884_v38  ;;  %v5779_v29 = vld [vmem:[#allocation8 + $0x10a0] sm:$0xff]  ;;  %v5780_v38 = vld [vmem:[#allocation8 + $0x10a8] sm:$0xff] }
 0x6cb   :  { %6494 = vmatpush.msra.mxu2 %v5317_v16  ;;  %6368 = vmatpush.msrb.mxu0 %v5875_v61  ;;  %v5516_v16 = vld [vmem:[#allocation8 + $0x868] sm:$0xff]  ;;  %v5821_v61 = vld [vmem:[#allocation8 + $0x11f0] sm:$0xff] }
 0x6cc   :  { %6432 = vmatpush.msrb.mxu3 %v5588_v42  ;;  %6468 = vmatpush.msra.mxu1 %v5876_v47  ;;  %v5771_v42 = vld [vmem:[#allocation8 + $0x1060] sm:$0xff]  ;;  %v5772_v47 = vld [vmem:[#allocation8 + $0x1068] sm:$0xff] }
 0x6cd   :  { %6495 = vmatpush.msra.mxu2 %v5309_v0  ;;  %6369 = vmatpush.msrb.mxu0 %v5867_v32  ;;  %v5813_v32 = vld [vmem:[#allocation8 + $0x11b0] sm:$0xff] }
 0x6ce   :  { %6433 = vmatpush.msrb.mxu3 %v5580_v9  ;;  %6469 = vmatpush.msra.mxu1 %v5868_v28  ;;  %v5763_v9 = vld [vmem:[#allocation8 + $0x1020] sm:$0xff]  ;;  %v5764_v28 = vld [vmem:[#allocation8 + $0x1028] sm:$0xff] }
 0x6cf   :  { %6496 = vmatpush.msra.mxu2 %v5301_v24  ;;  %6370 = vmatpush.msrb.mxu0 %v5859_v17  ;;  %v5787_v24 = vld [vmem:[#allocation8 + $0x10e0] sm:$0xff] }
 0x6d0   :  { %6434 = vmatpush.msrb.mxu3 %v5572_v20  ;;  %6470 = vmatpush.msra.mxu1 %v5860_v37  ;;  %v5756_v20 = vld [vmem:[#allocation8 + $0xfe8] sm:$0xff]  ;;  %v5469_v37 = vld [vmem:[#allocation8 + $0x6f0] sm:$0xff] }
 0x6d1   :  { %6497 = vmatpush.msra.mxu2 %v5293_v63  ;;  %6371 = vmatpush.msrb.mxu0 %v5851_v33  ;;  %v5485_v63 = vld [vmem:[#allocation8 + $0x770] sm:$0xff] }
 0x6d2   :  { %6435 = vmatpush.msrb.mxu3 %v5564_v13  ;;  %6471 = vmatpush.msra.mxu1 %v5852_v56  ;;  %v5757_v33 = vld [vmem:[#allocation8 + $0xff0] sm:$0xff] }
 0x6d3   :  { %6498 = vmatpush.msra.mxu2 %v5285_v30  ;;  %6372 = vmatpush.msrb.mxu0 %v5843_v62  ;;  %v5477_v30 = vld [vmem:[#allocation8 + $0x730] sm:$0xff] }
 0x6d4   :  { %6436 = vmatpush.msrb.mxu3 %v5556_v41  ;;  %6472 = vmatpush.msra.mxu1 %v5844_v3  ;;  %v5805_v13 = vld [vmem:[#allocation8 + $0x1170] sm:$0xff]  ;;  %v5740_v3 = vld [vmem:[#allocation8 + $0xf68] sm:$0xff] }
 0x6d5   :  { %6499 = vmatpush.msra.mxu2 %v5277_v2  ;;  %6373 = vmatpush.msrb.mxu0 %v5835_v52  ;;  %v5461_v62 = vld [vmem:[#allocation8 + $0x6b0] sm:$0xff] }
 0x6d6   :  { %6437 = vmatpush.msrb.mxu3 %v5548_v44  ;;  %6473 = vmatpush.msra.mxu1 %v5836_v36  ;;  %v5797_v41 = vld [vmem:[#allocation8 + $0x1130] sm:$0xff]  ;;  %v5732_v44 = vld [vmem:[#allocation8 + $0xf28] sm:$0xff] }
 0x6d7   :  { %6500 = vmatpush.msra.mxu2 %v5269_v26  ;;  %6374 = vmatpush.msrb.mxu0 %v5827_v54  ;;  %v5741_v52 = vld [vmem:[#allocation8 + $0xf70] sm:$0xff] }
 0x6d8   :  { %6438 = vmatpush.msrb.mxu3 %v5540_v7  ;;  %6474 = vmatpush.msra.mxu1 %v5828_v57  ;;  %v5445_v36 = vld [vmem:[#allocation8 + $0x630] sm:$0xff]  ;;  %v5724_v7 = vld [vmem:[#allocation8 + $0xee8] sm:$0xff] }
 0x6d9   :  { %6501 = vmatpush.msra.mxu2 %v5261_v19  ;;  %6375 = vmatpush.msrb.mxu0 %v5819_v4  ;;  %v5748_v19 = vld [vmem:[#allocation8 + $0xfa8] sm:$0xff]  ;;  %v5733_v54 = vld [vmem:[#allocation8 + $0xf30] sm:$0xff] }
 0x6da   :  { %6439 = vmatpush.msrb.mxu3 %v5532_v18  ;;  %6475 = vmatpush.msra.mxu1 %v5820_v27  ;;  %v7844_v0 = vpop.f32.mrf.mxu0  ;;  %v5437_v57 = vld [vmem:[#allocation8 + $0x5f0] sm:$0xff]  ;;  %v5716_v18 = vld [vmem:[#allocation8 + $0xea8] sm:$0xff] }
 0x6db   :  { %6502 = vmatpush.msra.mxu2 %v5253_v59  ;;  %6376 = vmatpush.msrb.mxu0 %v5811_v23  ;;  %v6084_v26 = vpop.f32.mrf.mxu1  ;;  %v5453_v59 = vld [vmem:[#allocation8 + $0x670] sm:$0xff] }
 0x6dc   :  { %6503 = vmatmul.f32.vlgmr.msra.gmra.mxu2 %v7765_v8  ;;  %6440 = vmatpush.msrb.mxu3 %v5524_v31  ;;  %v5725_v4 = vld [vmem:[#allocation8 + $0xef0] sm:$0xff]  ;;  %v5708_v31 = vld [vmem:[#allocation8 + $0xe68] sm:$0xff] }
 0x6dd   :  { %6567 = vmatpush.msrb.mxu2 %v5885_v53  ;;  %6476 = vmatpush.msra.mxu1 %v5812_v45  ;;  %v5789_v53 = vld [vmem:[#allocation8 + $0x10f0] sm:$0xff]  ;;  %v5758_v45 = vld [vmem:[#allocation8 + $0xff8] sm:$0xff] }
 0x6de   :  { %6377 = vmatpush.msrb.mxu0 %v5803_v6  ;;  %6441 = vmatpush.msrb.mxu3 %v5516_v16  ;;  %v5429_v27 = vld [vmem:[#allocation8 + $0x5b0] sm:$0xff]  ;;  %v5700_v16 = vld [vmem:[#allocation8 + $0xe28] sm:$0xff] }
 0x6df   :  { %6568 = vmatpush.msrb.mxu2 %v5877_v14  ;;  %6477 = vmatpush.msra.mxu1 %v5804_v12  ;;  %v5781_v14 = vld [vmem:[#allocation8 + $0x10b0] sm:$0xff]  ;;  %v5750_v12 = vld [vmem:[#allocation8 + $0xfb8] sm:$0xff] }
 0x6e0   :  { %6378 = vmatpush.msrb.mxu0 %v5795_v48  ;;  %6442 = vmatpush.msrb.mxu3 %v5508_v49  ;;  %v5717_v23 = vld [vmem:[#allocation8 + $0xeb0] sm:$0xff]  ;;  %v5692_v49 = vld [vmem:[#allocation8 + $0xde8] sm:$0xff] }
 0x6e1   :  { %6569 = vmatpush.msrb.mxu2 %v5869_v22  ;;  %6478 = vmatpush.msra.mxu1 %v5796_v35  ;;  %v5773_v22 = vld [vmem:[#allocation8 + $0x1070] sm:$0xff]  ;;  %v5742_v35 = vld [vmem:[#allocation8 + $0xf78] sm:$0xff] }
 0x6e2   :  { %6443 = vmatmul.f32.vlgmr.msrb.gmra.mxu3 %v7771_v15  ;;  %6379 = vmatpush.msrb.mxu0 %v5787_v24  ;;  %v5421_v6 = vld [vmem:[#allocation8 + $0x570] sm:$0xff]  ;;  %v5684_v24 = vld [vmem:[#allocation8 + $0xda8] sm:$0xff] }
 0x6e3   :  { %6570 = vmatpush.msrb.mxu2 %v5861_v21  ;;  %6507 = vmatpush.msra.mxu3 %v5501_v1  ;;  %v5765_v21 = vld [vmem:[#allocation8 + $0x1030] sm:$0xff] }
 0x6e4   :  { %6479 = vmatpush.msra.mxu1 %v5788_v5  ;;  %6380 = vmatpush.msrb.mxu0 %v5779_v29  ;;  %v5413_v48 = vld [vmem:[#allocation8 + $0x530] sm:$0xff]  ;;  %v5734_v5 = vld [vmem:[#allocation8 + $0xf38] sm:$0xff]  ;;  %v5676_v29 = vld [vmem:[#allocation8 + $0xd68] sm:$0xff] }
 0x6e5   :  { %6571 = vmatpush.msrb.mxu2 %v5853_v55  ;;  %6508 = vmatpush.msra.mxu3 %v5493_v25  ;;  %v6064_v2 = vpop.f32.mrf.mxu0  ;;  %v5709_v55 = vld [vmem:[#allocation8 + $0xe70] sm:$0xff] }
 0x6e6   :  { %6480 = vmatpush.msra.mxu1 %v5780_v38  ;;  %6381 = vmatpush.msrb.mxu0 %v5771_v42  ;;  %v6065_v17 = vadd.f32 %v6064_v2, %v7837_v43  ;;  %v5749_v43 = vld [vmem:[#allocation8 + $0xfb0] sm:$0xff]  ;;  %v5726_v38 = vld [vmem:[#allocation8 + $0xef8] sm:$0xff]  ;;  %v5668_v42 = vld [vmem:[#allocation8 + $0xd28] sm:$0xff] }
 0x6e7   :  { %6572 = vmatpush.msrb.mxu2 %v5845_v51  ;;  %6509 = vmatpush.msra.mxu3 %v5485_v63  ;;  %v5701_v51 = vld [vmem:[#allocation8 + $0xe30] sm:$0xff]  ;;  %v5660_v2 = vld [vmem:[#allocation8 + $0xce8] sm:$0xff] }
 0x6e8   :  { %6481 = vmatpush.msra.mxu1 %v5772_v47  ;;  %6382 = vmatpush.msrb.mxu0 %v5763_v9  ;;  %v7848_v56 = vadd.f32 %v6084_v26, %v6065_v17  ;;  %v5405_v1 = vld [vmem:[#allocation8 + $0x4f0] sm:$0xff]  ;;  %v5718_v47 = vld [vmem:[#allocation8 + $0xeb8] sm:$0xff]  ;;  %v5652_v26 = vld [vmem:[#allocation8 + $0xca8] sm:$0xff] }
 0x6e9   :  { %6573 = vmatpush.msrb.mxu2 %v5837_v50  ;;  %6510 = vmatpush.msra.mxu3 %v5477_v30  ;;  %v5693_v50 = vld [vmem:[#allocation8 + $0xdf0] sm:$0xff]  ;;  %v5374_v9 = vld [vmem:[#allocation8 + $0x3f8] sm:$0xff] }
 0x6ea   :  { %6482 = vmatpush.msra.mxu1 %v5764_v28  ;;  %6383 = vmatmul.f32.vlgmr.msrb.gmra.mxu0 %v7814_v39  ;;  %v5397_v25 = vld [vmem:[#allocation8 + $0x4b0] sm:$0xff]  ;;  %v5710_v28 = vld [vmem:[#allocation8 + $0xe78] sm:$0xff] }
 0x6eb   :  { %6574 = vmatpush.msrb.mxu2 %v5829_v46  ;;  %6483 = vmatmul.f32.vlgmr.msra.gmra.mxu1 %v7814_v39  ;;  %v5685_v46 = vld [vmem:[#allocation8 + $0xdb0] sm:$0xff] }
 0x6ec   :  { %6447 = vmatpush.msra.mxu0 %v5756_v20  ;;  %6511 = vmatpush.msra.mxu3 %v5469_v37  ;;  %v5389_v63 = vld [vmem:[#allocation8 + $0x470] sm:$0xff]  ;;  %v5366_v20 = vld [vmem:[#allocation8 + $0x3b8] sm:$0xff] }
 0x6ed   :  { %6575 = vmatpush.msrb.mxu2 %v5821_v61  ;;  %6547 = vmatpush.msrb.mxu1 %v5757_v33  ;;  %v5677_v61 = vld [vmem:[#allocation8 + $0xd70] sm:$0xff]  ;;  %v5702_v37 = vld [vmem:[#allocation8 + $0xe38] sm:$0xff] }
 0x6ee   :  { %6448 = vmatpush.msra.mxu0 %v5748_v19  ;;  %6512 = vmatpush.msra.mxu3 %v5461_v62  ;;  %v5381_v30 = vld [vmem:[#allocation8 + $0x430] sm:$0xff]  ;;  %v5694_v19 = vld [vmem:[#allocation8 + $0xdf8] sm:$0xff]  ;;  %v5644_v62 = vld [vmem:[#allocation8 + $0xc68] sm:$0xff] }
 0x6ef   :  { %6576 = vmatpush.msrb.mxu2 %v5813_v32  ;;  %6548 = vmatpush.msrb.mxu1 %v5749_v43  ;;  %v5669_v32 = vld [vmem:[#allocation8 + $0xd30] sm:$0xff] }
 0x6f0   :  { %6449 = vmatpush.msra.mxu0 %v5740_v3  ;;  %6513 = vmatpush.msra.mxu3 %v5453_v59  ;;  %v5661_v17 = vld [vmem:[#allocation8 + $0xcf0] sm:$0xff]  ;;  %v5686_v3 = vld [vmem:[#allocation8 + $0xdb8] sm:$0xff]  ;;  %v5636_v59 = vld [vmem:[#allocation8 + $0xc28] sm:$0xff] }
 0x6f1   :  { %6577 = vmatpush.msrb.mxu2 %v5805_v13  ;;  %6549 = vmatpush.msrb.mxu1 %v5741_v52  ;;  %v5653_v33 = vld [vmem:[#allocation8 + $0xcb0] sm:$0xff]  ;;  %v5358_v13 = vld [vmem:[#allocation8 + $0x378] sm:$0xff] }
 0x6f2   :  { %6450 = vmatpush.msra.mxu0 %v5732_v44  ;;  %6514 = vmatpush.msra.mxu3 %v5445_v36  ;;  %v5645_v43 = vld [vmem:[#allocation8 + $0xc70] sm:$0xff]  ;;  %v5342_v44 = vld [vmem:[#allocation8 + $0x2f8] sm:$0xff] }
 0x6f3   :  { %6578 = vmatpush.msrb.mxu2 %v5797_v41  ;;  %6550 = vmatpush.msrb.mxu1 %v5733_v54  ;;  %v5350_v41 = vld [vmem:[#allocation8 + $0x338] sm:$0xff]  ;;  %v5637_v52 = vld [vmem:[#allocation8 + $0xc30] sm:$0xff] }
 0x6f4   :  { %6451 = vmatpush.msra.mxu0 %v5724_v7  ;;  %6515 = vmatpush.msra.mxu3 %v5437_v57  ;;  %v5630_v36 = vld [vmem:[#allocation8 + $0xbf8] sm:$0xff] }
 0x6f5   :  { %6579 = vmatpush.msrb.mxu2 %v5789_v53  ;;  %6551 = vmatpush.msrb.mxu1 %v5725_v4  ;;  %v5629_v53 = vld [vmem:[#allocation8 + $0xbf0] sm:$0xff]  ;;  %v5678_v54 = vld [vmem:[#allocation8 + $0xd78] sm:$0xff] }
 0x6f6   :  { %6452 = vmatpush.msra.mxu0 %v5716_v18  ;;  %6516 = vmatpush.msra.mxu3 %v5429_v27  ;;  %v5334_v7 = vld [vmem:[#allocation8 + $0x2b8] sm:$0xff] }
 0x6f7   :  { %6580 = vmatpush.msrb.mxu2 %v5781_v14  ;;  %6552 = vmatpush.msrb.mxu1 %v5717_v23  ;;  %v5621_v14 = vld [vmem:[#allocation8 + $0xbb0] sm:$0xff]  ;;  %v5622_v57 = vld [vmem:[#allocation8 + $0xbb8] sm:$0xff] }
 0x6f8   :  { %6453 = vmatpush.msra.mxu0 %v5708_v31  ;;  %6517 = vmatpush.msra.mxu3 %v5421_v6  ;;  %v5670_v4 = vld [vmem:[#allocation8 + $0xd38] sm:$0xff] }
 0x6f9   :  { %6581 = vmatpush.msrb.mxu2 %v5773_v22  ;;  %6553 = vmatpush.msrb.mxu1 %v5709_v55  ;;  %v5613_v22 = vld [vmem:[#allocation8 + $0xb70] sm:$0xff]  ;;  %v5326_v18 = vld [vmem:[#allocation8 + $0x278] sm:$0xff] }
 0x6fa   :  { %6454 = vmatpush.msra.mxu0 %v5700_v16  ;;  %6518 = vmatpush.msra.mxu3 %v5413_v48  ;;  %v5614_v27 = vld [vmem:[#allocation8 + $0xb78] sm:$0xff]  ;;  %v5597_v55 = vld [vmem:[#allocation8 + $0xaf0] sm:$0xff] }
 0x6fb   :  { %6582 = vmatpush.msrb.mxu2 %v5765_v21  ;;  %6554 = vmatpush.msrb.mxu1 %v5701_v51  ;;  %v5662_v23 = vld [vmem:[#allocation8 + $0xcf8] sm:$0xff]  ;;  %v5605_v21 = vld [vmem:[#allocation8 + $0xb30] sm:$0xff] }
 0x6fc   :  { %6583 = vmatmul.f32.vlgmr.msrb.gmra.mxu2 %v7814_v39  ;;  %6455 = vmatpush.msra.mxu0 %v5692_v49  ;;  %v5318_v31 = vld [vmem:[#allocation8 + $0x238] sm:$0xff]  ;;  %v5589_v51 = vld [vmem:[#allocation8 + $0xab0] sm:$0xff] }
 0x6fd   :  { %6647 = vmatpush.msra.mxu2 %v5758_v45  ;;  %6519 = vmatpush.msra.mxu3 %v5405_v1  ;;  %v5606_v45 = vld [vmem:[#allocation8 + $0xb38] sm:$0xff] }
 0x6fe   :  { %6555 = vmatpush.msrb.mxu1 %v5693_v50  ;;  %6456 = vmatpush.msra.mxu0 %v5684_v24  ;;  %v5654_v6 = vld [vmem:[#allocation8 + $0xcb8] sm:$0xff]  ;;  %v5581_v50 = vld [vmem:[#allocation8 + $0xa70] sm:$0xff]  ;;  %v7856_v24 = vpop.f32.mrf.mxu2 }
 0x6ff   :  { %6648 = vmatpush.msra.mxu2 %v5750_v12  ;;  %6520 = vmatpush.msra.mxu3 %v5397_v25  ;;  %v5310_v16 = vld [vmem:[#allocation8 + $0x1f8] sm:$0xff] }
 0x700   :  { %6556 = vmatpush.msrb.mxu1 %v5685_v46  ;;  %6457 = vmatpush.msra.mxu0 %v5676_v29  ;;  %v5598_v12 = vld [vmem:[#allocation8 + $0xaf8] sm:$0xff]  ;;  %v5573_v46 = vld [vmem:[#allocation8 + $0xa30] sm:$0xff]  ;;  %v7858_v29 = vpop.f32.mrf.mxu3 }
 0x701   :  { %6649 = vmatpush.msra.mxu2 %v5742_v35  ;;  %6521 = vmatpush.msra.mxu3 %v5389_v63  ;;  %v5646_v48 = vld [vmem:[#allocation8 + $0xc78] sm:$0xff] }
 0x702   :  { %6557 = vmatpush.msrb.mxu1 %v5677_v61  ;;  %6458 = vmatpush.msra.mxu0 %v5668_v42  ;;  %v5302_v49 = vld [vmem:[#allocation8 + $0x1b8] sm:$0xff]  ;;  %v5565_v61 = vld [vmem:[#allocation8 + $0x9f0] sm:$0xff]  ;;  %v7861_v42 = vpop.f32.mrf.mxu0 }
 0x703   :  { %6650 = vmatpush.msra.mxu2 %v5734_v5  ;;  %6522 = vmatpush.msra.mxu3 %v5381_v30  ;;  %v5590_v35 = vld [vmem:[#allocation8 + $0xab8] sm:$0xff] }
 0x704   :  { %6558 = vmatpush.msrb.mxu1 %v5669_v32  ;;  %6523 = vmatmul.f32.vlgmr.msra.gmra.mxu3 %v7767_v34  ;;  %v5638_v1 = vld [vmem:[#allocation8 + $0xc38] sm:$0xff]  ;;  %v5557_v32 = vld [vmem:[#allocation8 + $0x9b0] sm:$0xff] }
 0x705   :  { %6651 = vmatpush.msra.mxu2 %v5726_v38  ;;  %6587 = vmatpush.msrb.mxu3 %v5374_v9  ;;  %v5294_v5 = vld [vmem:[#allocation8 + $0x178] sm:$0xff]  ;;  %v7863_v9 = vpop.f32.mrf.mxu1 }
 0x706   :  { %6459 = vmatpush.msra.mxu0 %v5660_v2  ;;  %6559 = vmatpush.msrb.mxu1 %v5661_v17  ;;  %v5582_v25 = vld [vmem:[#allocation8 + $0xa78] sm:$0xff]  ;;  %v7865_v17 = vpop.f32.mrf.mxu2 }
 0x707   :  { %6652 = vmatpush.msra.mxu2 %v5718_v47  ;;  %6588 = vmatpush.msrb.mxu3 %v5366_v20  ;;  %v5286_v38 = vld [vmem:[#allocation8 + $0x138] sm:$0xff] }
 0x708   :  { %6460 = vmatpush.msra.mxu0 %v5652_v26  ;;  %6560 = vmatpush.msrb.mxu1 %v5653_v33  ;;  %v5574_v63 = vld [vmem:[#allocation8 + $0xa38] sm:$0xff]  ;;  %v5541_v26 = vld [vmem:[#allocation8 + $0x930] sm:$0xff]  ;;  %v6204_v33 = vpop.f32.mrf.mxu3 }
 0x709   :  { %6653 = vmatpush.msra.mxu2 %v5710_v28  ;;  %6589 = vmatpush.msrb.mxu3 %v5358_v13  ;;  %v5278_v47 = vld [vmem:[#allocation8 + $0xf8] sm:$0xff] }
 0x70a   :  { %6461 = vmatpush.msra.mxu0 %v5644_v62  ;;  %6561 = vmatpush.msrb.mxu1 %v5645_v43  ;;  %v5566_v30 = vld [vmem:[#allocation8 + $0x9f8] sm:$0xff]  ;;  %v5533_v62 = vld [vmem:[#allocation8 + $0x8f0] sm:$0xff] }
 0x70b   :  { %6654 = vmatpush.msra.mxu2 %v5702_v37  ;;  %6590 = vmatpush.msrb.mxu3 %v5350_v41  ;;  %v5270_v28 = vld [vmem:[#allocation8 + $0xb8] sm:$0xff] }
 0x70c   :  { %6462 = vmatpush.msra.mxu0 %v5636_v59  ;;  %6562 = vmatpush.msrb.mxu1 %v5637_v52  ;;  %v5558_v2 = vld [vmem:[#allocation8 + $0x9b8] sm:$0xff]  ;;  %v5525_v59 = vld [vmem:[#allocation8 + $0x8b0] sm:$0xff] }
 0x70d   :  { %6655 = vmatpush.msra.mxu2 %v5694_v19  ;;  %6463 = vmatmul.f32.vlgmr.msra.gmra.mxu0 %v7793_v58  ;;  %v5262_v20 = vld [vmem:[#allocation8 + $0x78] sm:$0xff] }
 0x70e   :  { %6563 = vmatmul.f32.vlgmr.msrb.gmra.mxu1 %v7793_v58  ;;  %6527 = vmatpush.msrb.mxu0 %v5629_v53  ;;  %v5550_v37 = vld [vmem:[#allocation8 + $0x978] sm:$0xff]  ;;  %v6244_v53 = vpop.f32.mrf.mxu1 }
 0x70f   :  { %6656 = vmatpush.msra.mxu2 %v5686_v3  ;;  %6591 = vmatpush.msrb.mxu3 %v5342_v44  ;;  %v5254_v13 = vld [vmem:[#allocation8 + $0x38] sm:$0xff] }
 0x710   :  { %6627 = vmatpush.msra.mxu1 %v5630_v36  ;;  %6528 = vmatpush.msrb.mxu0 %v5621_v14  ;;  %v5542_v19 = vld [vmem:[#allocation8 + $0x938] sm:$0xff] }
 0x711   :  { %6657 = vmatpush.msra.mxu2 %v5678_v54  ;;  %6592 = vmatpush.msrb.mxu3 %v5334_v7  ;;  %v5886_v43 = vld [vmem:[#allocation8 + $0x13f8] sm:$0xff]  ;;  %v5517_v54 = vld [vmem:[#allocation8 + $0x870] sm:$0xff]  ;;  %v6264_v7 = vpop.f32.mrf.mxu2 }
 0x712   :  { %6628 = vmatpush.msra.mxu1 %v5622_v57  ;;  %6529 = vmatpush.msrb.mxu0 %v5613_v22  ;;  %v5534_v41 = vld [vmem:[#allocation8 + $0x8f8] sm:$0xff]  ;;  %v5509_v22 = vld [vmem:[#allocation8 + $0x830] sm:$0xff] }
 0x713   :  { %6658 = vmatpush.msra.mxu2 %v5670_v4  ;;  %6593 = vmatpush.msrb.mxu3 %v5326_v18  ;;  %v5878_v44 = vld [vmem:[#allocation8 + $0x13b8] sm:$0xff] }
 0x714   :  { %6629 = vmatpush.msra.mxu1 %v5614_v27  ;;  %6530 = vmatpush.msrb.mxu0 %v5605_v21  ;;  %v5526_v36 = vld [vmem:[#allocation8 + $0x8b8] sm:$0xff] }
 0x715   :  { %6659 = vmatpush.msra.mxu2 %v5662_v23  ;;  %6594 = vmatpush.msrb.mxu3 %v5318_v31  ;;  %v5870_v57 = vld [vmem:[#allocation8 + $0x1378] sm:$0xff] }
 0x716   :  { %6630 = vmatpush.msra.mxu1 %v5606_v45  ;;  %6531 = vmatpush.msrb.mxu0 %v5597_v55  ;;  %v5518_v4 = vld [vmem:[#allocation8 + $0x878] sm:$0xff] }
 0x717   :  { %6660 = vmatpush.msra.mxu2 %v5654_v6  ;;  %6595 = vmatpush.msrb.mxu3 %v5310_v16  ;;  %v5862_v27 = vld [vmem:[#allocation8 + $0x1338] sm:$0xff] }
 0x718   :  { %6631 = vmatpush.msra.mxu1 %v5598_v12  ;;  %6532 = vmatpush.msrb.mxu0 %v5589_v51  ;;  %v5510_v21 = vld [vmem:[#allocation8 + $0x838] sm:$0xff] }
 0x719   :  { %6661 = vmatpush.msra.mxu2 %v5646_v48  ;;  %6596 = vmatpush.msrb.mxu3 %v5302_v49  ;;  %v5502_v31 = vld [vmem:[#allocation8 + $0x7f8] sm:$0xff] }
 0x71a   :  { %6632 = vmatpush.msra.mxu1 %v5590_v35  ;;  %6533 = vmatpush.msrb.mxu0 %v5581_v50  ;;  %v5854_v45 = vld [vmem:[#allocation8 + $0x12f8] sm:$0xff] }
 0x71b   :  { %6662 = vmatpush.msra.mxu2 %v5638_v1  ;;  %6597 = vmatpush.msrb.mxu3 %v5294_v5  ;;  %v5494_v55 = vld [vmem:[#allocation8 + $0x7b8] sm:$0xff] }
 0x71c   :  { %6663 = vmatmul.f32.vlgmr.msra.gmra.mxu2 %v7793_v58  ;;  %6633 = vmatpush.msra.mxu1 %v5582_v25  ;;  %v5549_v58 = vld [vmem:[#allocation8 + $0x970] sm:$0xff]  ;;  %v5846_v16 = vld [vmem:[#allocation8 + $0x12b8] sm:$0xff] }
 0x71d   :  { %6534 = vmatpush.msrb.mxu0 %v5573_v46  ;;  %6598 = vmatpush.msrb.mxu3 %v5286_v38  ;;  %v5486_v12 = vld [vmem:[#allocation8 + $0x778] sm:$0xff] }
 0x71e   :  { %6634 = vmatpush.msra.mxu1 %v5574_v63  ;;  %v5838_v48 = vld [vmem:[#allocation8 + $0x1278] sm:$0xff] }
 0x71f   :  { %6535 = vmatpush.msrb.mxu0 %v5565_v61  ;;  %6599 = vmatpush.msrb.mxu3 %v5278_v47  ;;  %v6284_v23 = vpop.f32.mrf.mxu3  ;;  %v5478_v51 = vld [vmem:[#allocation8 + $0x738] sm:$0xff] }
 0x720   :  { %6635 = vmatpush.msra.mxu1 %v5566_v30  ;;  %v5830_v49 = vld [vmem:[#allocation8 + $0x1238] sm:$0xff] }
 0x721   :  { %6536 = vmatpush.msrb.mxu0 %v5557_v32  ;;  %6600 = vmatpush.msrb.mxu3 %v5270_v28  ;;  %v5470_v35 = vld [vmem:[#allocation8 + $0x6f8] sm:$0xff] }
 0x722   :  { %6636 = vmatpush.msra.mxu1 %v5558_v2  ;;  %v6224_v3 = vpop.f32.mrf.mxu0  ;;  %v5822_v1 = vld [vmem:[#allocation8 + $0x11f8] sm:$0xff] }
 0x723   :  { %6537 = vmatpush.msrb.mxu0 %v5549_v58  ;;  %6601 = vmatpush.msrb.mxu3 %v5262_v20  ;;  %v6225_v52 = vadd.f32 %v6224_v3, %v6204_v33  ;;  %v5462_v50 = vld [vmem:[#allocation8 + $0x6b8] sm:$0xff] }
 0x724   :  { %6637 = vmatpush.msra.mxu1 %v5550_v37  ;;  %v5814_v5 = vld [vmem:[#allocation8 + $0x11b8] sm:$0xff] }
 0x725   :  { %6538 = vmatpush.msrb.mxu0 %v5541_v26  ;;  %6602 = vmatpush.msrb.mxu3 %v5254_v13  ;;  %v6245_v14 = vadd.f32 %v6244_v53, %v6225_v52  ;;  %v5806_v25 = vld [vmem:[#allocation8 + $0x1178] sm:$0xff] }
 0x726   :  { %6638 = vmatpush.msra.mxu1 %v5542_v19  ;;  %6603 = vmatmul.f32.vlgmr.msrb.gmra.mxu3 %v7765_v8  ;;  %v5446_v46 = vld [vmem:[#allocation8 + $0x638] sm:$0xff] }
 0x727   :  { %6539 = vmatpush.msrb.mxu0 %v5533_v62  ;;  %6667 = vmatpush.msra.mxu3 %v5886_v43  ;;  %v6265_v18 = vadd.f32 %v6264_v7, %v6245_v14  ;;  %v5798_v38 = vld [vmem:[#allocation8 + $0x1138] sm:$0xff]  ;;  %v6716_v62 = vld [vmem:[#allocation11 + $0x68] sm:$0xff]  ;;  %v6715_v43 = vld [vmem:[#allocation11 + $0x60] sm:$0xff]  ;;  %v6324_v14 = vpop.f32.mrf.mxu1 }
 0x728   :  { %6639 = vmatpush.msra.mxu1 %v5534_v41  ;;  %v5438_v63 = vld [vmem:[#allocation8 + $0x5f8] sm:$0xff] }
 0x729   :  { %6540 = vmatpush.msrb.mxu0 %v5525_v59  ;;  %6668 = vmatpush.msra.mxu3 %v5878_v44  ;;  %v7868_v8 = vadd.f32 %v6284_v23, %v6265_v18  ;;  %v5790_v61 = vld [vmem:[#allocation8 + $0x10f8] sm:$0xff]  ;;  %v6711_v59 = vld [vmem:[#allocation11 + $0x40] sm:$0xff] }
 0x72a   :  { %6640 = vmatpush.msra.mxu1 %v5526_v36  ;;  %v5430_v47 = vld [vmem:[#allocation8 + $0x5b8] sm:$0xff]  ;;  %v6707_v44 = vld [vmem:[#allocation11 + $0x20] sm:$0xff] }
 0x72b   :  { %6541 = vmatpush.msrb.mxu0 %v5517_v54  ;;  %6669 = vmatpush.msra.mxu3 %v5870_v57  ;;  %v6688_v6 = vmax.f32 %v7848_v56, %v7868_v8  ;;  %v5782_v30 = vld [vmem:[#allocation8 + $0x10b8] sm:$0xff]  ;;  %v6344_v57 = vpop.f32.mrf.mxu2  ;;  %v6703_v18 = vld [vmem:[#allocation11] sm:$0xff] }
 0x72c   :  { %6641 = vmatpush.msra.mxu1 %v5518_v4  ;;  %v5422_v32 = vld [vmem:[#allocation8 + $0x578] sm:$0xff] }
 0x72d   :  { %6542 = vmatpush.msrb.mxu0 %v5509_v22  ;;  %6670 = vmatpush.msra.mxu3 %v5862_v27  ;;  %v5774_v28 = vld [vmem:[#allocation8 + $0x1078] sm:$0xff]  ;;  %v6704_v22 = vld [vmem:[#allocation11 + $0x8] sm:$0xff] }
 0x72e   :  { %6642 = vmatpush.msra.mxu1 %v5510_v21  ;;  %6543 = vmatmul.f32.vlgmr.msrb.gmra.mxu0 %v7771_v15  ;;  %v5414_v2 = vld [vmem:[#allocation8 + $0x538] sm:$0xff] }
 0x72f   :  { %6643 = vmatmul.f32.vlgmr.msra.gmra.mxu1 %v7771_v15  ;;  %6607 = vmatpush.msra.mxu0 %v5502_v31  ;;  %v5454_v15 = vld [vmem:[#allocation8 + $0x678] sm:$0xff]  ;;  %v6732_v31 = vld [vmem:[#allocation11 + $0xe8] sm:$0xff] }
 0x730   :  { %6671 = vmatpush.msra.mxu3 %v5854_v45  ;;  %v5766_v58 = vld [vmem:[#allocation8 + $0x1038] sm:$0xff] }
 0x731   :  { %6608 = vmatpush.msra.mxu0 %v5494_v55  ;;  %v5406_v20 = vld [vmem:[#allocation8 + $0x4f8] sm:$0xff]  ;;  %v6731_v55 = vld [vmem:[#allocation11 + $0xe0] sm:$0xff] }
 0x732   :  { %6672 = vmatpush.msra.mxu3 %v5846_v16  ;;  %v5398_v37 = vld [vmem:[#allocation8 + $0x4b8] sm:$0xff] }
 0x733   :  { %6609 = vmatpush.msra.mxu0 %v5486_v12  ;;  %v5390_v26 = vld [vmem:[#allocation8 + $0x478] sm:$0xff] }
 0x734   :  { %6673 = vmatpush.msra.mxu3 %v5838_v48  ;;  %v5382_v33 = vld [vmem:[#allocation8 + $0x438] sm:$0xff] }
 0x735   :  { %6610 = vmatpush.msra.mxu0 %v5478_v51  ;;  %v6718_v13 = vld [vmem:[#allocation11 + $0x78] sm:$0xff]  ;;  %v6717_v19 = vld [vmem:[#allocation11 + $0x70] sm:$0xff] }
 0x736   :  { %6674 = vmatpush.msra.mxu3 %v5830_v49  ;;  %v6714_v41 = vld [vmem:[#allocation11 + $0x58] sm:$0xff]  ;;  %v6713_v3 = vld [vmem:[#allocation11 + $0x50] sm:$0xff] }
 0x737   :  { %6611 = vmatpush.msra.mxu0 %v5470_v35  ;;  %v6710_v52 = vld [vmem:[#allocation11 + $0x38] sm:$0xff]  ;;  %v6709_v53 = vld [vmem:[#allocation11 + $0x30] sm:$0xff]  ;;  %v6125_v35 = vadd.f32 %v7858_v29, %v7856_v24 }
 0x738   :  { %6675 = vmatpush.msra.mxu3 %v5822_v1  ;;  %v6706_v54 = vld [vmem:[#allocation11 + $0x18] sm:$0xff]  ;;  %v6705_v7 = vld [vmem:[#allocation11 + $0x10] sm:$0xff] }
 0x739   :  { %6612 = vmatpush.msra.mxu0 %v5462_v50  ;;  %v6734_v27 = vld [vmem:[#allocation11 + $0xf8] sm:$0xff]  ;;  %v6733_v23 = vld [vmem:[#allocation11 + $0xf0] sm:$0xff]  ;;  %v6145_v50 = vadd.f32 %v7861_v42, %v6125_v35 }
 0x73a   :  { %6676 = vmatpush.msra.mxu3 %v5814_v5  ;;  %6759 = vmatpush.msrb.mxu1 %v6734_v27  ;;  %v6730_v48 = vld [vmem:[#allocation11 + $0xd8] sm:$0xff]  ;;  %v6729_v51 = vld [vmem:[#allocation11 + $0xd0] sm:$0xff] }
 0x73b   :  { %6613 = vmatpush.msra.mxu0 %v5454_v15  ;;  %v6791_v35 = vld [vmem:[#allocation14 + $0x58] sm:$0xff]  ;;  %v6786_v8 = vld [vmem:[#allocation14 + $0x30] sm:$0xff] }
 0x73c   :  { %6677 = vmatpush.msra.mxu3 %v5806_v25  ;;  %6760 = vmatpush.msrb.mxu1 %v6733_v23  ;;  %v6787_v56 = vld [vmem:[#allocation14 + $0x38] sm:$0xff] }
 0x73d   :  { %6614 = vmatpush.msra.mxu0 %v5446_v46  ;;  %v6728_v46 = vld [vmem:[#allocation11 + $0xc8] sm:$0xff] }
 0x73e   :  { %6678 = vmatpush.msra.mxu3 %v5798_v38  ;;  %6761 = vmatpush.msrb.mxu1 %v6732_v31  ;;  %v5925_v38 = vadd.f32 %v7832_v10, %v7841_v60  ;;  %v6725_v10 = vld [vmem:[#allocation11 + $0xb0] sm:$0xff] }
 0x73f   :  { %6615 = vmatpush.msra.mxu0 %v5438_v63  ;;  %v6424_v16 = vpop.f32.mrf.mxu2  ;;  %v6165_v63 = vadd.f32 %v7863_v9, %v6145_v50  ;;  %v6693_v9 = vld [vmem:[#allocation10] sm:$0x3]  ;;  %v6789_v50 = vld [vmem:[#allocation14 + $0x48] sm:$0xff] }
 0x740   :  { %6679 = vmatpush.msra.mxu3 %v5790_v61  ;;  %6762 = vmatpush.msrb.mxu1 %v6731_v55  ;;  %v5945_v24 = vadd.f32 %v7830_v40, %v5925_v38  ;;  %v6696_v31 = vperm.slane %v6693_v9, 1  ;;  %v6781_v38 = vld [vmem:[#allocation14 + $0x8] sm:$0xff] }
 0x741   :  { %6616 = vmatpush.msra.mxu0 %v5430_v47 }
 0x742   :  { %6680 = vmatpush.msra.mxu3 %v5782_v30  ;;  %v6364_v4 = vpop.f32.mrf.mxu3  ;;  %6763 = vmatpush.msrb.mxu1 %v6730_v48  ;;  %v6727_v30 = vld [vmem:[#allocation11 + $0xc0] sm:$0xff] }
 0x743   :  { %6617 = vmatpush.msra.mxu0 %v5422_v32 }
 0x744   :  { %6681 = vmatpush.msra.mxu3 %v5774_v28  ;;  %6764 = vmatpush.msrb.mxu1 %v6729_v51  ;;  %v6726_v28 = vld [vmem:[#allocation11 + $0xb8] sm:$0xff] }
 0x745   :  { %6618 = vmatpush.msra.mxu0 %v5414_v2  ;;  %v6304_v36 = vpop.f32.mrf.mxu0  ;;  %v7876_v45 = vpop.f32.mrf.mxu1  ;;  %v5965_v2 = vadd.f32 %v7834_v11, %v5945_v24 }
 0x746   :  { %6682 = vmatpush.msra.mxu3 %v5766_v58  ;;  %v6325_v5 = vadd.f32 %v6324_v14, %v6304_v36  ;;  %6765 = vmatpush.msrb.mxu1 %v6728_v46  ;;  %v6185_v58 = vadd.f32 %v7865_v17, %v6165_v63  ;;  %v6782_v46 = vld [vmem:[#allocation14 + $0x10] sm:$0xff]  ;;  %v6780_v63 = vld [vmem:[#allocation14] sm:$0xff] }
 0x747   :  { %6683 = vmatmul.f32.vlgmr.msra.gmra.mxu3 %v7814_v39  ;;  %6619 = vmatpush.msra.mxu0 %v5406_v20  ;;  %v6712_v39 = vld [vmem:[#allocation11 + $0x48] sm:$0xff] }
 0x748   :  { %v6345_v61 = vadd.f32 %v6344_v57, %v6325_v5  ;;  %6766 = vmatpush.msrb.mxu1 %v6727_v30  ;;  %v6788_v5 = vld [vmem:[#allocation14 + $0x40] sm:$0xff] }
 0x749   :  { %6620 = vmatpush.msra.mxu0 %v5398_v37 }
 0x74a   :  { %6767 = vmatpush.msrb.mxu1 %v6726_v28  ;;  %v6365_v20 = vadd.f32 %v6364_v4, %v6345_v61  ;;  %v6868_v61 = vld [vmem:[#allocation13] ss:$0 sm:$0xff]  ;;  %v6869_v28 = vld [vmem:[#allocation16] ss:$0 sm:$0xff] }
 0x74b   :  { %6621 = vmatpush.msra.mxu0 %v5390_v26  ;;  %v5985_v26 = vadd.f32 %v7844_v0, %v5965_v2 }
 0x74c   :  { %6768 = vmatpush.msrb.mxu1 %v6725_v10 }
 0x74d   :  { %6622 = vmatpush.msra.mxu0 %v5382_v33  ;;  %v6687_v40 = vmax.f32 %v5985_v26, %v6185_v58 }
 0x74e   :  { %6623 = vmatmul.f32.vlgmr.msra.gmra.mxu0 %v7767_v34  ;;  %v6708_v34 = vld [vmem:[#allocation11 + $0x28] sm:$0xff] }
 0x74f   :  { %6739 = vmatpush.msrb.mxu0 %v6718_v13 }
 0x751   :  { %6740 = vmatpush.msrb.mxu0 %v6717_v19  ;;  %v6724_v19 = vld [vmem:[#allocation11 + $0xa8] sm:$0xff] }
 0x752   :  { %6769 = vmatpush.msrb.mxu1 %v6724_v19 }
 0x753   :  { %6741 = vmatpush.msrb.mxu0 %v6716_v62 }
 0x755   :  { %6742 = vmatpush.msrb.mxu0 %v6715_v43  ;;  %v6695_v43 = vperm.slane %v6693_v9, 0 }
 0x757   :  { %6743 = vmatpush.msrb.mxu0 %v6714_v41  ;;  %v6723_v41 = vld [vmem:[#allocation11 + $0xa0] sm:$0xff] }
 0x758   :  { %6770 = vmatpush.msrb.mxu1 %v6723_v41 }
 0x759   :  { %6744 = vmatpush.msrb.mxu0 %v6713_v3  ;;  %v6722_v3 = vld [vmem:[#allocation11 + $0x98] sm:$0xff] }
 0x75a   :  { %6771 = vmatpush.msrb.mxu1 %v6722_v3 }
 0x75b   :  { %6745 = vmatpush.msrb.mxu0 %v6712_v39  ;;  %v6721_v39 = vld [vmem:[#allocation11 + $0x90] sm:$0xff] }
 0x75c   :  { %6772 = vmatpush.msrb.mxu1 %v6721_v39 }
 0x75d   :  { %6746 = vmatpush.msrb.mxu0 %v6711_v59  ;;  %v6720_v59 = vld [vmem:[#allocation11 + $0x88] sm:$0xff] }
 0x75e   :  { %6773 = vmatpush.msrb.mxu1 %v6720_v59 }
 0x75f   :  { %6747 = vmatpush.msrb.mxu0 %v6710_v52  ;;  %v6504_v15 = vpop.f32.mrf.mxu2 }
 0x761   :  { %6748 = vmatpush.msrb.mxu0 %v6709_v53  ;;  %v6719_v53 = vld [vmem:[#allocation11 + $0x80] sm:$0xff] }
 0x762   :  { %6774 = vmatpush.msrb.mxu1 %v6719_v53 }
 0x763   :  { %6749 = vmatpush.msrb.mxu0 %v6708_v34  ;;  %v6425_v34 = vadd.f32 %v6424_v16, %v7876_v45  ;;  %v6795_v45 = vld [vmem:[#allocation14 + $0x78] sm:$0xff]  ;;  %v6794_v16 = vld [vmem:[#allocation14 + $0x70] sm:$0xff] }
 0x764   :  { %6800 = vmatpush.msrb.mxu2 %v6795_v45 }
 0x765   :  { %6750 = vmatpush.msrb.mxu0 %v6707_v44  ;;  %v6444_v12 = vpop.f32.mrf.mxu3 }
 0x766   :  { %v6445_v36 = vadd.f32 %v6444_v12, %v6425_v34  ;;  %v6793_v12 = vld [vmem:[#allocation14 + $0x68] sm:$0xff]  ;;  %6801 = vmatpush.msrb.mxu2 %v6794_v16 }
 0x767   :  { %6751 = vmatpush.msrb.mxu0 %v6706_v54  ;;  %v6384_v21 = vpop.f32.mrf.mxu0 }
 0x768   :  { %v6484_v1 = vpop.f32.mrf.mxu1  ;;  %v6385_v33 = vadd.f32 %v6384_v21, %v6365_v20  ;;  %6802 = vmatpush.msrb.mxu2 %v6793_v12 }
 0x769   :  { %6752 = vmatpush.msrb.mxu0 %v6705_v7 }
 0x76b   :  { %6753 = vmatpush.msrb.mxu0 %v6704_v22 }
 0x76d   :  { %6754 = vmatpush.msrb.mxu0 %v6703_v18 }
 0x77f   :  { %v6584_v60 = vpop.f32.mrf.mxu2 }
 0x787   :  { %v6524_v25 = vpop.f32.mrf.mxu3 }
 0x788   :  { %v6525_v47 = vadd.f32 %v6524_v25, %v6504_v15  ;;  %v6784_v15 = vld [vmem:[#allocation14 + $0x20] sm:$0xff]  ;;  %v6783_v25 = vld [vmem:[#allocation14 + $0x18] sm:$0xff] }
 0x78a   :  { %v6464_v49 = vpop.f32.mrf.mxu0 }
 0x78b   :  { %v6564_v42 = vpop.f32.mrf.mxu1  ;;  %v6465_v7 = vadd.f32 %v6464_v49, %v6445_v36  ;;  %v6792_v49 = vld [vmem:[#allocation14 + $0x60] sm:$0xff] }
 0x78c   :  { %6803 = vmatpush.msrb.mxu2 %v6792_v49 }
 0x78d   :  { %v6485_v27 = vadd.f32 %v6484_v1, %v6465_v7  ;;  %v6790_v1 = vld [vmem:[#allocation14 + $0x50] sm:$0xff] }
 0x78e   :  { %6804 = vmatpush.msrb.mxu2 %v6791_v35 }
 0x790   :  { %6805 = vmatpush.msrb.mxu2 %v6790_v1 }
 0x792   :  { %6806 = vmatpush.msrb.mxu2 %v6789_v50 }
 0x794   :  { %6807 = vmatpush.msrb.mxu2 %v6788_v5 }
 0x796   :  { %6808 = vmatpush.msrb.mxu2 %v6787_v56 }
 0x798   :  { %6809 = vmatpush.msrb.mxu2 %v6786_v8 }
 0x79f   :  { %v6664_v4 = vpop.f32.mrf.mxu2 }
 0x7a9   :  { %v6604_v0 = vpop.f32.mrf.mxu3 }
 0x7ab   :  { %v6544_v32 = vpop.f32.mrf.mxu0 }
 0x7ac   :  { %v6545_v29 = vadd.f32 %v6544_v32, %v6525_v47  ;;  %v6644_v14 = vpop.f32.mrf.mxu1 }
 0x7ae   :  { %v6565_v37 = vadd.f32 %v6564_v42, %v6545_v29 }
 0x7b0   :  { %v6585_v13 = vadd.f32 %v6584_v60, %v6565_v37 }
 0x7b2   :  { %v6689_v62 = vmax.f32 %v6385_v33, %v6585_v13 }
 0x7b4   :  { %v6691_v11 = vmax.f32 %v6687_v40, %v6689_v62 }
 0x7b6   :  { %v6699_v17 = vadd.f32 %v6695_v43, %v6691_v11 }
 0x7b8   :  { %v6701_v52 = vmax.f32 %v6699_v17, 0.0 }
 0x7ba   :  { %6755 = vmatmul.f32.vlgmr.msrb.gmra.mxu0 %v6701_v52 }
 0x7ca   :  { %v6684_v18 = vpop.f32.mrf.mxu3 }
 0x7cb   :  { %v6624_v44 = vpop.f32.mrf.mxu0 }
 0x7cc   :  { %v6625_v54 = vadd.f32 %v6624_v44, %v6604_v0 }
 0x7ce   :  { %v6645_v57 = vadd.f32 %v6644_v14, %v6625_v54 }
 0x7d0   :  { %v6665_v22 = vadd.f32 %v6664_v4, %v6645_v57 }
 0x7d2   :  { %v6685_v23 = vadd.f32 %v6684_v18, %v6665_v22 }
 0x7d4   :  { %v6690_v21 = vmax.f32 %v6485_v27, %v6685_v23 }
 0x7d6   :  { %v6692_v55 = vmax.f32 %v6688_v6, %v6690_v21  ;;  %v6785_v6 = vld [vmem:[#allocation14 + $0x28] sm:$0xff] }
 0x7d7   :  { %6810 = vmatpush.msrb.mxu2 %v6785_v6 }
 0x7d8   :  { %v6700_v48 = vadd.f32 %v6696_v31, %v6692_v55 }
 0x7d9   :  { %6811 = vmatpush.msrb.mxu2 %v6784_v15 }
 0x7da   :  { %v6702_v51 = vmax.f32 %v6700_v48, 0.0 }
 0x7db   :  { %6812 = vmatpush.msrb.mxu2 %v6783_v25 }
 0x7dc   :  { %6775 = vmatmul.f32.vlgmr.msrb.gmra.mxu1 %v6702_v51 }
 0x7dd   :  { %6813 = vmatpush.msrb.mxu2 %v6782_v46 }
 0x7df   :  { %6814 = vmatpush.msrb.mxu2 %v6781_v38 }
 0x7e1   :  { %6815 = vmatpush.msrb.mxu2 %v6780_v63 }
 0x837   :  { %v6756_v47 = vpop.f32.mrf.mxu0 }
 0x838   :  { %v6757_v30 = vadd.f32 %v6868_v61, %v6756_v47 }
 0x859   :  { %v6776_v32 = vpop.f32.mrf.mxu1 }
 0x85a   :  { %v6777_v24 = vadd.f32 %v6776_v32, %v6757_v30 }
 0x85c   :  { %v6779_v29 = vmax.f32 %v6777_v24, 0.0 }
 0x85e   :  { %6816 = vmatmul.f32.vlgmr.msrb.gmra.mxu2 %v6779_v29 }
 0x8e1   :  { %v6817_v42 = vpop.f32.mrf.mxu2 }
 0x8e2   :  { %v6818_v2 = vadd.f32 %v6869_v28, %v6817_v42 }
 0x8e4   :  { %6820 = vmax.xlane.f32.xlu0 %v6818_v2 }
 0x957   :  { %v6821_v58 = vpop.xlane.xlu0 %6820 }
 0x958   :  { %v6822_v20 = vsub.f32 %v6818_v2, %v6821_v58 }
 0x95a   :  { %v6823_v37 = vmul.f32 1.442695, %v6822_v20 }
 0x95c   :  { %6870 = vpow2.f32 %v6823_v37 }
 0x962   :  { %v6871_v10 = vpop.eup %6870 }
 0x963   :  { %6825 = vadd.xlane.f32.xlu0 %v6871_v10 }
 0x9d6   :  { %v6826_v60 = vpop.xlane.xlu0 %6825 }
 0x9d7   :  { %6872 = vlog2.f32 %v6826_v60 }
 0x9dd   :  { %v6873_v9 = vpop.eup %6872 }
 0x9de   :  { %v6828_v26 = vmul.f32 0.6931472, %v6873_v9 }
 0x9e0   :  { %v6829_v33 = vsub.f32 %v6822_v20, %v6828_v26 }
 0x9e2   :  { %6830 = vst [vmem:[#allocation17] sm:$0xff] %v6829_v33 }
 0x9e3   :  { %6841 = dma.vmem_to_hbm [thread:$0]  %s6837_s8, 128, %s6839_s11, [#allocation4]  }
 0x9e4   :  { %7171 = dma.done.wait [#allocation4], 128  }
 0x9e5   :  { %7172 = vsyncadd [#allocation4], 4294967168 }
 0x9e6   :  { %6846 = vsyncpa [#allocation3], 1 }
 0x9e7   :  { %6847 = vsyncpa [#allocation6], 1 }
 0x9e8   :  { %6848 = vsyncpa [#allocation9], 1 }
 0x9e9   :  { %6849 = vsyncpa [#allocation12], 1 }
 0x9ea   :  { %6850 = vsyncpa [#allocation15], 1 }
 0x9eb   :  { %6851 = vsyncpa [#allocation4], 1 }

</bundles_post_ra>
